<compile_context>
chip_gen: v6e
topology: v6e:2x2x1
jax: 0.10.0
libtpu: 0.0.40
codegen_flags: <defaults>
</compile_context>

<pallas_src>
import functools

import jax
import jax.numpy as jnp
from jax.experimental import pallas as pl
from jax.experimental.pallas import tpu as pltpu


_VMEM_LIMIT_BYTES = 32 * 1024 * 1024  # per-step budget: safe on v5e/v6e/v7x
_BN_EPS = 1e-5


def _compiler_params():
    return pltpu.CompilerParams(
        dimension_semantics=("parallel",),
        vmem_limit_bytes=_VMEM_LIMIT_BYTES,
    )


# ---------------------------- Pallas kernels ----------------------------

def _conv_bn_relu_pool_kernel(x_ref, w_ref, s_ref, b_ref, o_ref, hpool_ref,
                              *, rows, wo, cout):
    """Fused im2col-conv matmul + BN (folded) + ReLU + 2x2 max-pool for one row tile.

    x_ref     : [rows*wo, K] bf16 patch rows covering `rows` conv-output H-rows.
    w_ref     : [K, cout] bf16 (resident across the grid).
    s_ref/b_ref: [1, cout] f32 folded BatchNorm scale / bias.
    o_ref     : [(rows//2)*(wo//2), cout] pooled output rows.
    hpool_ref : VMEM scratch [(rows//2)*wo, cout] f32 (H-pooled intermediate).
    Requires: rows even, wo % 8 == 0 (reshapes below only regroup whole (8,128) tiles).
    """
    y = jnp.dot(x_ref[...], w_ref[...], preferred_element_type=jnp.float32)
    y = jnp.maximum(y * s_ref[...] + b_ref[...], 0.0)                 # [rows*wo, cout] f32
    # H-direction pool: paired H rows are `wo` rows apart -> 8-aligned regroup + max.
    y = y.reshape(rows // 2, 2, wo, cout)
    hpool_ref[...] = jnp.max(y, axis=1).reshape((rows // 2) * wo, cout)
    # W-direction pool: paired W positions are adjacent rows -> strided loads.
    half = (rows // 2) * (wo // 2)
    even = hpool_ref[pl.ds(0, half, stride=2), :]
    odd = hpool_ref[pl.ds(1, half, stride=2), :]
    o_ref[...] = jnp.maximum(even, odd).astype(o_ref.dtype)


def _fc_stack_kernel(x_ref, w1_ref, s1_ref, b1_ref, w2_ref, s2_ref, b2_ref,
                     w3_ref, s3_ref, b3_ref, o_ref):
    """fc1+BN+ReLU -> fc2+BN+ReLU -> fc3+ReLU, all weights resident, lane-dense pads."""
    h = jnp.dot(x_ref[...], w1_ref[...], preferred_element_type=jnp.float32)
    h = jnp.maximum(h * s1_ref[...] + b1_ref[...], 0.0)
    h = jnp.dot(h.astype(jnp.bfloat16), w2_ref[...], preferred_element_type=jnp.float32)
    h = jnp.maximum(h * s2_ref[...] + b2_ref[...], 0.0)
    h = jnp.dot(h.astype(jnp.bfloat16), w3_ref[...], preferred_element_type=jnp.float32)
    o_ref[...] = jnp.maximum(h * s3_ref[...] + b3_ref[...], 0.0)


# ---------------------------- Pallas wrappers ----------------------------

def _round_up(x, m):
    return (x + m - 1) // m * m


def _pick_conv_rows(nh, wo, target_rows=4096):
    """Largest even divisor R of nh with R*wo <= target and 8-aligned blocks."""
    best = None
    for r in range(2, nh + 1, 2):
        if nh % r or r * wo > target_rows:
            continue
        if (r * wo) % 8 or ((r // 2) * (wo // 2)) % 8:
            continue
        best = r
    return best if best is not None else nh   # fallback: single full-extent block


def conv_bn_relu_pool(patches, w, scale, bias, *, n, ho, wo, cout, target_rows=4096):
    """relu((patches @ w) * scale + bias) followed by 2x2/2 max-pool.

    patches: [n*ho*wo, K] bf16 im2col rows in (n, h, w) order.
    Returns [n, ho//2, wo//2, cout] bf16.
    """
    assert ho % 2 == 0 and wo % 2 == 0 and wo % 8 == 0, (ho, wo)
    k = patches.shape[1]
    nh = n * ho
    r = _pick_conv_rows(nh, wo, target_rows)
    blk_out = (r // 2) * (wo // 2)
    out_rows = (nh // 2) * (wo // 2)
    out = pl.pallas_call(
        functools.partial(_conv_bn_relu_pool_kernel, rows=r, wo=wo, cout=cout),
        out_shape=jax.ShapeDtypeStruct((out_rows, cout), jnp.bfloat16),
        grid=(nh // r,),
        in_specs=[
            pl.BlockSpec((r * wo, k), lambda i: (i, 0)),
            pl.BlockSpec((k, cout), lambda i: (0, 0)),     # weights resident
            pl.BlockSpec((1, cout), lambda i: (0, 0)),
            pl.BlockSpec((1, cout), lambda i: (0, 0)),
        ],
        out_specs=pl.BlockSpec((blk_out, cout), lambda i: (i, 0)),
        scratch_shapes=[pltpu.VMEM(((r // 2) * wo, cout), jnp.float32)],
        compiler_params=_compiler_params(),
    )(patches, w, scale, bias)
    return out.reshape(n, ho // 2, wo // 2, cout)


def fc_stack(x_flat, fc1, fc2, fc3, *, tile_m=256):
    """Fused fc1+BN+ReLU -> fc2+BN+ReLU -> fc3+ReLU.  x_flat: [N, 1152] bf16."""
    n = x_flat.shape[0]
    w1, s1, b1 = fc1
    w2, s2, b2 = fc2
    w3, s3, b3 = fc3
    if n > tile_m:
        mp, tm = _round_up(n, tile_m), tile_m
    else:
        mp = _round_up(n, 16)
        tm = mp
    if mp != n:
        x_flat = jnp.pad(x_flat, ((0, mp - n), (0, 0)))
    d_out = w3.shape[1]
    out = pl.pallas_call(
        _fc_stack_kernel,
        out_shape=jax.ShapeDtypeStruct((mp, d_out), jnp.float32),
        grid=(mp // tm,),
        in_specs=[
            pl.BlockSpec((tm, w1.shape[0]), lambda i: (i, 0)),
            pl.BlockSpec(w1.shape, lambda i: (0, 0)),
            pl.BlockSpec((1, w1.shape[1]), lambda i: (0, 0)),
            pl.BlockSpec((1, w1.shape[1]), lambda i: (0, 0)),
            pl.BlockSpec(w2.shape, lambda i: (0, 0)),
            pl.BlockSpec((1, w2.shape[1]), lambda i: (0, 0)),
            pl.BlockSpec((1, w2.shape[1]), lambda i: (0, 0)),
            pl.BlockSpec(w3.shape, lambda i: (0, 0)),
            pl.BlockSpec((1, w3.shape[1]), lambda i: (0, 0)),
            pl.BlockSpec((1, w3.shape[1]), lambda i: (0, 0)),
        ],
        out_specs=pl.BlockSpec((tm, d_out), lambda i: (i, 0)),
        compiler_params=_compiler_params(),
    )(x_flat, w1, s1, b1, w2, s2, b2, w3, s3, b3)
    return out[:n]


# ---------------------------- JAX glue ----------------------------

def im2col(x_nhwc, k, pad):
    """x:[N,H,W,C] -> ([N*Ho*Wo, k*k*C], (N, Ho, Wo)); patch feature order (kh, kw, Cin)."""
    n, h, w, c = x_nhwc.shape
    if pad:
        x_nhwc = jnp.pad(x_nhwc, ((0, 0), (pad, pad), (pad, pad), (0, 0)))
    ho = h + 2 * pad - k + 1
    wo = w + 2 * pad - k + 1
    cols = [x_nhwc[:, di:di + ho, dj:dj + wo, :] for di in range(k) for dj in range(k)]
    patches = jnp.concatenate(cols, axis=-1)
    return patches.reshape(n * ho * wo, k * k * c), (n, ho, wo)


def _xavier_uniform(key, shape, fan_in, fan_out):
    limit = (6.0 / (fan_in + fan_out)) ** 0.5
    return jax.random.uniform(key, shape, jnp.float32, -limit, limit)


def init_params(key):
    ks = jax.random.split(key, 12)
    bn_scale = 1.0 / (1.0 + _BN_EPS) ** 0.5   # eval BN: mean=0, var=1, gamma=1, beta=0

    def conv_layer(kw, kb, cin, cout, k=3):
        # weight stored as [k*k*cin, cout] matching im2col (kh, kw, cin) ordering.
        w = _xavier_uniform(kw, (k, k, cin, cout), cin * k * k, cout * k * k)
        w = w.reshape(k * k * cin, cout).astype(jnp.bfloat16)
        b = jax.random.uniform(kb, (cout,), jnp.float32, -0.05, 0.05)
        scale = jnp.full((1, cout), bn_scale, jnp.float32)
        bias = (b * bn_scale).reshape(1, cout)   # (b - running_mean)*scale + beta
        return w, scale, bias

    def fc_layer(kw, kb, fin, fout, fin_pad, fout_pad, bn=True):
        # Lane-dense padded weights: zero rows/cols so the padding is numerically inert.
        w = _xavier_uniform(kw, (fin, fout), fin, fout)
        b = jax.random.uniform(kb, (fout,), jnp.float32, -0.05, 0.05)
        sc = bn_scale if bn else 1.0
        w_pad = jnp.zeros((fin_pad, fout_pad), jnp.float32).at[:fin, :fout].set(w)
        s_pad = jnp.full((1, fout_pad), sc, jnp.float32)
        b_pad = jnp.zeros((1, fout_pad), jnp.float32).at[0, :fout].set(b * sc)
        return w_pad.astype(jnp.bfloat16), s_pad, b_pad

    p = {}
    p["conv1"] = conv_layer(ks[0], ks[1], 3, 36)
    p["conv2"] = conv_layer(ks[2], ks[3], 36, 64)
    p["conv3"] = conv_layer(ks[4], ks[5], 64, 128)
    p["fc1"] = fc_layer(ks[6], ks[7], 128 * 3 * 3, 540, 1152, 640)
    p["fc2"] = fc_layer(ks[8], ks[9], 540, 276, 640, 384)
    p["fc3"] = fc_layer(ks[10], ks[11], 276, 84, 384, 128, bn=False)
    return p


def conv_net_forward(x_nchw, params):
    x = jnp.transpose(x_nchw, (0, 2, 3, 1)).astype(jnp.bfloat16)   # NCHW -> NHWC, bf16

    # block 1: conv1(3->36,k3,p1) + BN + ReLU + 2x2 pool   (dropout1 = identity in eval)
    w, s, b = params["conv1"]
    patches, (n, ho, wo) = im2col(x, 3, 1)
    y = conv_bn_relu_pool(patches, w, s, b, n=n, ho=ho, wo=wo, cout=36)    # [N,16,16,36]

    # block 2: conv2(36->64,k3,p1) + BN + ReLU + 2x2 pool  (dropout2 = identity in eval)
    w, s, b = params["conv2"]
    patches, (n, ho, wo) = im2col(y, 3, 1)
    y = conv_bn_relu_pool(patches, w, s, b, n=n, ho=ho, wo=wo, cout=64)    # [N,8,8,64]

    # block 3: conv3(64->128,k3,p0) + BN + ReLU + 2x2 pool.
    # Zero-pad W (8->10) so the conv output width is 8 (8-aligned for the fused pool
    # kernel); the last pooled column comes from the padding and is sliced off.
    w, s, b = params["conv3"]
    y = jnp.pad(y, ((0, 0), (0, 0), (0, 2), (0, 0)))
    patches, (n, ho, wo) = im2col(y, 3, 0)                                  # Ho=6, Wo=8
    y = conv_bn_relu_pool(patches, w, s, b, n=n, ho=ho, wo=wo, cout=128)    # [N,3,4,128]
    y = y[:, :, :3, :]                                                      # [N,3,3,128]

    # flatten in PyTorch NCHW (C,H,W) order; dropout3/dropout4 = identity in eval.
    flat = jnp.transpose(y, (0, 3, 1, 2)).reshape(n, 128 * 3 * 3)

    out = fc_stack(flat, params["fc1"], params["fc2"], params["fc3"])       # [N,128] f32
    return out[:, :84]                                                      # drop lane pad


# ---------------------------- pure-JAX reference (for sanity check) ----------------------------

def _reference_forward(x_nchw, params):
    x = jnp.transpose(x_nchw, (0, 2, 3, 1)).astype(jnp.bfloat16)

    def conv_block(x, p, pad):
        w, s, b = p
        patches, (n, ho, wo) = im2col(x, 3, pad)
        y = jnp.dot(patches, w, preferred_element_type=jnp.float32)
        y = jnp.maximum(y * s + b, 0.0).reshape(n, ho, wo, -1)
        y = y.reshape(n, ho // 2, 2, wo // 2, 2, y.shape[-1]).max(axis=(2, 4))
        return y.astype(jnp.bfloat16)

    y = conv_block(x, params["conv1"], 1)
    y = conv_block(y, params["conv2"], 1)
    y = conv_block(y, params["conv3"], 0)
    n = y.shape[0]
    flat = jnp.transpose(y, (0, 3, 1, 2)).reshape(n, 128 * 3 * 3)

    def fc(h, p):
        w, s, b = p
        y = jnp.dot(h.astype(jnp.bfloat16), w, preferred_element_type=jnp.float32)
        return jnp.maximum(y * s + b, 0.0)

    h = fc(flat, params["fc1"])
    h = fc(h, params["fc2"])
    h = fc(h, params["fc3"])
    return h[:, :84]


if __name__ == "__main__":
    key = jax.random.PRNGKey(0)
    kx, kp = jax.random.split(key)
    # CIFAR-10-shaped input: the flatten (128*3*3) requires 32x32 spatial, 3 channels.
    x = jax.random.normal(kx, (2, 3, 32, 32), jnp.float32)
    params = init_params(kp)

    out = jax.block_until_ready(jax.jit(conv_net_forward)(x, params))
    assert out.shape == (2, 84), out.shape
    assert bool(jnp.all(jnp.isfinite(out)))

    ref = jax.block_until_ready(jax.jit(_reference_forward)(x, params))
    assert bool(jnp.allclose(out, ref, rtol=1e-1, atol=1e-1)), (
        float(jnp.max(jnp.abs(out - ref))))

    print("KERNEL_OK")
</pallas_src>

<mosaic_0001>
module attributes {stable_mosaic.version = 11 : i64} {
  func.func @_conv_bn_relu_pool_kernel(%arg0: i32, %arg1: memref<2048x27xbf16, #tpu.memory_space<vmem>>, %arg2: memref<27x36xbf16, #tpu.memory_space<vmem>>, %arg3: memref<1x36xf32, #tpu.memory_space<vmem>>, %arg4: memref<1x36xf32, #tpu.memory_space<vmem>>, %arg5: memref<512x36xbf16, #tpu.memory_space<vmem>>, %arg6: memref<1024x36xf32, #tpu.memory_space<vmem>>) attributes {dimension_semantics = [#tpu.dimension_semantics<parallel>], iteration_bounds = array<i64: 1>, scalar_prefetch = 0 : i64, scratch_operands = 1 : i64, tpu.core_type = #tpu.core_type<tc>, window_params = [{transform_indices = @transform_0, window_bounds = array<i64: 2048, 27>}, {pipeline_mode = #tpu.pipeline_mode<synchronous>, transform_indices = @transform_1, window_bounds = array<i64: 27, 36>}, {pipeline_mode = #tpu.pipeline_mode<synchronous>, transform_indices = @transform_2, window_bounds = array<i64: 1, 36>}, {pipeline_mode = #tpu.pipeline_mode<synchronous>, transform_indices = @transform_3, window_bounds = array<i64: 1, 36>}, {transform_indices = @transform_4, window_bounds = array<i64: 512, 36>}]} {
    %c0 = arith.constant 0 : index
    %c0_0 = arith.constant 0 : index
    %0 = vector.load %arg1[%c0, %c0_0] : memref<2048x27xbf16, #tpu.memory_space<vmem>>, vector<2048x27xbf16>
    %c0_1 = arith.constant 0 : index
    %c0_2 = arith.constant 0 : index
    %1 = vector.load %arg2[%c0_1, %c0_2] : memref<27x36xbf16, #tpu.memory_space<vmem>>, vector<27x36xbf16>
    %cst = arith.constant dense<0.000000e+00> : vector<2048x36xf32>
    %2 = tpu.matmul %0, %1, %cst {dimension_numbers = #tpu.dot_dimension_numbers<[1], [0], [0], [1], [0, 0, 1, 1], [], []>} : vector<2048x27xbf16>, vector<27x36xbf16>, vector<2048x36xf32> -> vector<2048x36xf32>
    %c0_3 = arith.constant 0 : index
    %c0_4 = arith.constant 0 : index
    %3 = vector.load %arg3[%c0_3, %c0_4] : memref<1x36xf32, #tpu.memory_space<vmem>>, vector<1x36xf32>
    %4 = vector.broadcast %3 : vector<1x36xf32> to vector<2048x36xf32>
    %5 = arith.mulf %2, %4 : vector<2048x36xf32>
    %c0_5 = arith.constant 0 : index
    %c0_6 = arith.constant 0 : index
    %6 = vector.load %arg4[%c0_5, %c0_6] : memref<1x36xf32, #tpu.memory_space<vmem>>, vector<1x36xf32>
    %7 = vector.broadcast %6 : vector<1x36xf32> to vector<2048x36xf32>
    %8 = arith.addf %5, %7 : vector<2048x36xf32>
    %cst_7 = arith.constant 0.000000e+00 : f32
    %9 = vector.broadcast %cst_7 : f32 to vector<2048x36xf32>
    %10 = arith.maximumf %8, %9 : vector<2048x36xf32>
    %11 = vector.shape_cast %10 : vector<2048x36xf32> to vector<32x2x32x36xf32>
    %cst_8 = arith.constant dense<0xFF800000> : vector<32x32x36xf32>
    %12 = vector.multi_reduction <maximumf>, %11, %cst_8 [1] : vector<32x2x32x36xf32> to vector<32x32x36xf32>
    %13 = vector.shape_cast %12 : vector<32x32x36xf32> to vector<1024x36xf32>
    %c0_9 = arith.constant 0 : index
    %c0_10 = arith.constant 0 : index
    %14 = vector.load %arg6[%c0_9, %c0_10] : memref<1024x36xf32, #tpu.memory_space<vmem>>, vector<1024x36xf32>
    tpu.vector_store %arg6[%c0_9, %c0_10], %13 {strides = array<i32>} : memref<1024x36xf32, #tpu.memory_space<vmem>>, vector<1024x36xf32>,
    %c0_11 = arith.constant 0 : index
    %c0_12 = arith.constant 0 : index
    %15 = tpu.strided_load %arg6[%c0_11, %c0_12] {strides = array<i32: 2, 1>} : memref<1024x36xf32, #tpu.memory_space<vmem>>, vector<512x36xf32>
    %c1 = arith.constant 1 : index
    %c0_13 = arith.constant 0 : index
    %16 = tpu.strided_load %arg6[%c1, %c0_13] {strides = array<i32: 2, 1>} : memref<1024x36xf32, #tpu.memory_space<vmem>>, vector<512x36xf32>
    %17 = arith.maximumf %15, %16 : vector<512x36xf32>
    %18 = arith.truncf %17 : vector<512x36xf32> to vector<512x36xbf16>
    %c0_14 = arith.constant 0 : index
    %c0_15 = arith.constant 0 : index
    %19 = vector.load %arg5[%c0_14, %c0_15] : memref<512x36xbf16, #tpu.memory_space<vmem>>, vector<512x36xbf16>
    tpu.vector_store %arg5[%c0_14, %c0_15], %18 {strides = array<i32>} : memref<512x36xbf16, #tpu.memory_space<vmem>>, vector<512x36xbf16>,
    return
  }
  func.func @transform_0(%arg0: i32) -> (i32, i32) {
    %c0_i32 = arith.constant 0 : i32
    %c0_i32_0 = arith.constant 0 : i32
    return %arg0, %c0_i32 : i32, i32
  }
  func.func @transform_1(%arg0: i32) -> (i32, i32) {
    %c0_i32 = arith.constant 0 : i32
    %c0_i32_0 = arith.constant 0 : i32
    %c0_i32_1 = arith.constant 0 : i32
    return %c0_i32, %c0_i32_0 : i32, i32
  }
  func.func @transform_2(%arg0: i32) -> (i32, i32) {
    %c0_i32 = arith.constant 0 : i32
    %c0_i32_0 = arith.constant 0 : i32
    %c0_i32_1 = arith.constant 0 : i32
    return %c0_i32, %c0_i32_0 : i32, i32
  }
  func.func @transform_3(%arg0: i32) -> (i32, i32) {
    %c0_i32 = arith.constant 0 : i32
    %c0_i32_0 = arith.constant 0 : i32
    %c0_i32_1 = arith.constant 0 : i32
    return %c0_i32, %c0_i32_0 : i32, i32
  }
  func.func @transform_4(%arg0: i32) -> (i32, i32) {
    %c0_i32 = arith.constant 0 : i32
    %c0_i32_0 = arith.constant 0 : i32
    return %arg0, %c0_i32 : i32, i32
  }
}

module attributes {stable_mosaic.version = 11 : i64} {
  func.func @_conv_bn_relu_pool_kernel(%arg0: i32, %arg1: memref<512x324xbf16, #tpu.memory_space<vmem>>, %arg2: memref<324x64xbf16, #tpu.memory_space<vmem>>, %arg3: memref<1x64xf32, #tpu.memory_space<vmem>>, %arg4: memref<1x64xf32, #tpu.memory_space<vmem>>, %arg5: memref<128x64xbf16, #tpu.memory_space<vmem>>, %arg6: memref<256x64xf32, #tpu.memory_space<vmem>>) attributes {dimension_semantics = [#tpu.dimension_semantics<parallel>], iteration_bounds = array<i64: 1>, scalar_prefetch = 0 : i64, scratch_operands = 1 : i64, tpu.core_type = #tpu.core_type<tc>, window_params = [{transform_indices = @transform_0, window_bounds = array<i64: 512, 324>}, {pipeline_mode = #tpu.pipeline_mode<synchronous>, transform_indices = @transform_1, window_bounds = array<i64: 324, 64>}, {pipeline_mode = #tpu.pipeline_mode<synchronous>, transform_indices = @transform_2, window_bounds = array<i64: 1, 64>}, {pipeline_mode = #tpu.pipeline_mode<synchronous>, transform_indices = @transform_3, window_bounds = array<i64: 1, 64>}, {transform_indices = @transform_4, window_bounds = array<i64: 128, 64>}]} {
    %c0 = arith.constant 0 : index
    %c0_0 = arith.constant 0 : index
    %0 = vector.load %arg1[%c0, %c0_0] : memref<512x324xbf16, #tpu.memory_space<vmem>>, vector<512x324xbf16>
    %c0_1 = arith.constant 0 : index
    %c0_2 = arith.constant 0 : index
    %1 = vector.load %arg2[%c0_1, %c0_2] : memref<324x64xbf16, #tpu.memory_space<vmem>>, vector<324x64xbf16>
    %cst = arith.constant dense<0.000000e+00> : vector<512x64xf32>
    %2 = tpu.matmul %0, %1, %cst {dimension_numbers = #tpu.dot_dimension_numbers<[1], [0], [0], [1], [0, 0, 1, 1], [], []>} : vector<512x324xbf16>, vector<324x64xbf16>, vector<512x64xf32> -> vector<512x64xf32>
    %c0_3 = arith.constant 0 : index
    %c0_4 = arith.constant 0 : index
    %3 = vector.load %arg3[%c0_3, %c0_4] : memref<1x64xf32, #tpu.memory_space<vmem>>, vector<1x64xf32>
    %4 = vector.broadcast %3 : vector<1x64xf32> to vector<512x64xf32>
    %5 = arith.mulf %2, %4 : vector<512x64xf32>
    %c0_5 = arith.constant 0 : index
    %c0_6 = arith.constant 0 : index
    %6 = vector.load %arg4[%c0_5, %c0_6] : memref<1x64xf32, #tpu.memory_space<vmem>>, vector<1x64xf32>
    %7 = vector.broadcast %6 : vector<1x64xf32> to vector<512x64xf32>
    %8 = arith.addf %5, %7 : vector<512x64xf32>
    %cst_7 = arith.constant 0.000000e+00 : f32
    %9 = vector.broadcast %cst_7 : f32 to vector<512x64xf32>
    %10 = arith.maximumf %8, %9 : vector<512x64xf32>
    %11 = vector.shape_cast %10 : vector<512x64xf32> to vector<16x2x16x64xf32>
    %cst_8 = arith.constant dense<0xFF800000> : vector<16x16x64xf32>
    %12 = vector.multi_reduction <maximumf>, %11, %cst_8 [1] : vector<16x2x16x64xf32> to vector<16x16x64xf32>
    %13 = vector.shape_cast %12 : vector<16x16x64xf32> to vector<256x64xf32>
    %c0_9 = arith.constant 0 : index
    %c0_10 = arith.constant 0 : index
    %14 = vector.load %arg6[%c0_9, %c0_10] : memref<256x64xf32, #tpu.memory_space<vmem>>, vector<256x64xf32>
    tpu.vector_store %arg6[%c0_9, %c0_10], %13 {strides = array<i32>} : memref<256x64xf32, #tpu.memory_space<vmem>>, vector<256x64xf32>,
    %c0_11 = arith.constant 0 : index
    %c0_12 = arith.constant 0 : index
    %15 = tpu.strided_load %arg6[%c0_11, %c0_12] {strides = array<i32: 2, 1>} : memref<256x64xf32, #tpu.memory_space<vmem>>, vector<128x64xf32>
    %c1 = arith.constant 1 : index
    %c0_13 = arith.constant 0 : index
    %16 = tpu.strided_load %arg6[%c1, %c0_13] {strides = array<i32: 2, 1>} : memref<256x64xf32, #tpu.memory_space<vmem>>, vector<128x64xf32>
    %17 = arith.maximumf %15, %16 : vector<128x64xf32>
    %18 = arith.truncf %17 : vector<128x64xf32> to vector<128x64xbf16>
    %c0_14 = arith.constant 0 : index
    %c0_15 = arith.constant 0 : index
    %19 = vector.load %arg5[%c0_14, %c0_15] : memref<128x64xbf16, #tpu.memory_space<vmem>>, vector<128x64xbf16>
    tpu.vector_store %arg5[%c0_14, %c0_15], %18 {strides = array<i32>} : memref<128x64xbf16, #tpu.memory_space<vmem>>, vector<128x64xbf16>,
    return
  }
  func.func @transform_0(%arg0: i32) -> (i32, i32) {
    %c0_i32 = arith.constant 0 : i32
    %c0_i32_0 = arith.constant 0 : i32
    return %arg0, %c0_i32 : i32, i32
  }
  func.func @transform_1(%arg0: i32) -> (i32, i32) {
    %c0_i32 = arith.constant 0 : i32
    %c0_i32_0 = arith.constant 0 : i32
    %c0_i32_1 = arith.constant 0 : i32
    return %c0_i32, %c0_i32_0 : i32, i32
  }
  func.func @transform_2(%arg0: i32) -> (i32, i32) {
    %c0_i32 = arith.constant 0 : i32
    %c0_i32_0 = arith.constant 0 : i32
    %c0_i32_1 = arith.constant 0 : i32
    return %c0_i32, %c0_i32_0 : i32, i32
  }
  func.func @transform_3(%arg0: i32) -> (i32, i32) {
    %c0_i32 = arith.constant 0 : i32
    %c0_i32_0 = arith.constant 0 : i32
    %c0_i32_1 = arith.constant 0 : i32
    return %c0_i32, %c0_i32_0 : i32, i32
  }
  func.func @transform_4(%arg0: i32) -> (i32, i32) {
    %c0_i32 = arith.constant 0 : i32
    %c0_i32_0 = arith.constant 0 : i32
    return %arg0, %c0_i32 : i32, i32
  }
}

module attributes {stable_mosaic.version = 11 : i64} {
  func.func @_conv_bn_relu_pool_kernel(%arg0: i32, %arg1: memref<96x576xbf16, #tpu.memory_space<vmem>>, %arg2: memref<576x128xbf16, #tpu.memory_space<vmem>>, %arg3: memref<1x128xf32, #tpu.memory_space<vmem>>, %arg4: memref<1x128xf32, #tpu.memory_space<vmem>>, %arg5: memref<24x128xbf16, #tpu.memory_space<vmem>>, %arg6: memref<48x128xf32, #tpu.memory_space<vmem>>) attributes {dimension_semantics = [#tpu.dimension_semantics<parallel>], iteration_bounds = array<i64: 1>, scalar_prefetch = 0 : i64, scratch_operands = 1 : i64, tpu.core_type = #tpu.core_type<tc>, window_params = [{transform_indices = @transform_0, window_bounds = array<i64: 96, 576>}, {pipeline_mode = #tpu.pipeline_mode<synchronous>, transform_indices = @transform_1, window_bounds = array<i64: 576, 128>}, {pipeline_mode = #tpu.pipeline_mode<synchronous>, transform_indices = @transform_2, window_bounds = array<i64: 1, 128>}, {pipeline_mode = #tpu.pipeline_mode<synchronous>, transform_indices = @transform_3, window_bounds = array<i64: 1, 128>}, {transform_indices = @transform_4, window_bounds = array<i64: 24, 128>}]} {
    %c0 = arith.constant 0 : index
    %c0_0 = arith.constant 0 : index
    %0 = vector.load %arg1[%c0, %c0_0] : memref<96x576xbf16, #tpu.memory_space<vmem>>, vector<96x576xbf16>
    %c0_1 = arith.constant 0 : index
    %c0_2 = arith.constant 0 : index
    %1 = vector.load %arg2[%c0_1, %c0_2] : memref<576x128xbf16, #tpu.memory_space<vmem>>, vector<576x128xbf16>
    %cst = arith.constant dense<0.000000e+00> : vector<96x128xf32>
    %2 = tpu.matmul %0, %1, %cst {dimension_numbers = #tpu.dot_dimension_numbers<[1], [0], [0], [1], [0, 0, 1, 1], [], []>} : vector<96x576xbf16>, vector<576x128xbf16>, vector<96x128xf32> -> vector<96x128xf32>
    %c0_3 = arith.constant 0 : index
    %c0_4 = arith.constant 0 : index
    %3 = vector.load %arg3[%c0_3, %c0_4] : memref<1x128xf32, #tpu.memory_space<vmem>>, vector<1x128xf32>
    %4 = vector.broadcast %3 : vector<1x128xf32> to vector<96x128xf32>
    %5 = arith.mulf %2, %4 : vector<96x128xf32>
    %c0_5 = arith.constant 0 : index
    %c0_6 = arith.constant 0 : index
    %6 = vector.load %arg4[%c0_5, %c0_6] : memref<1x128xf32, #tpu.memory_space<vmem>>, vector<1x128xf32>
    %7 = vector.broadcast %6 : vector<1x128xf32> to vector<96x128xf32>
    %8 = arith.addf %5, %7 : vector<96x128xf32>
    %cst_7 = arith.constant 0.000000e+00 : f32
    %9 = vector.broadcast %cst_7 : f32 to vector<96x128xf32>
    %10 = arith.maximumf %8, %9 : vector<96x128xf32>
    %11 = vector.shape_cast %10 : vector<96x128xf32> to vector<6x2x8x128xf32>
    %cst_8 = arith.constant dense<0xFF800000> : vector<6x8x128xf32>
    %12 = vector.multi_reduction <maximumf>, %11, %cst_8 [1] : vector<6x2x8x128xf32> to vector<6x8x128xf32>
    %13 = vector.shape_cast %12 : vector<6x8x128xf32> to vector<48x128xf32>
    %c0_9 = arith.constant 0 : index
    %c0_10 = arith.constant 0 : index
    %14 = vector.load %arg6[%c0_9, %c0_10] : memref<48x128xf32, #tpu.memory_space<vmem>>, vector<48x128xf32>
    tpu.vector_store %arg6[%c0_9, %c0_10], %13 {strides = array<i32>} : memref<48x128xf32, #tpu.memory_space<vmem>>, vector<48x128xf32>,
    %c0_11 = arith.constant 0 : index
    %c0_12 = arith.constant 0 : index
    %15 = tpu.strided_load %arg6[%c0_11, %c0_12] {strides = array<i32: 2, 1>} : memref<48x128xf32, #tpu.memory_space<vmem>>, vector<24x128xf32>
    %c1 = arith.constant 1 : index
    %c0_13 = arith.constant 0 : index
    %16 = tpu.strided_load %arg6[%c1, %c0_13] {strides = array<i32: 2, 1>} : memref<48x128xf32, #tpu.memory_space<vmem>>, vector<24x128xf32>
    %17 = arith.maximumf %15, %16 : vector<24x128xf32>
    %18 = arith.truncf %17 : vector<24x128xf32> to vector<24x128xbf16>
    %c0_14 = arith.constant 0 : index
    %c0_15 = arith.constant 0 : index
    %19 = vector.load %arg5[%c0_14, %c0_15] : memref<24x128xbf16, #tpu.memory_space<vmem>>, vector<24x128xbf16>
    tpu.vector_store %arg5[%c0_14, %c0_15], %18 {strides = array<i32>} : memref<24x128xbf16, #tpu.memory_space<vmem>>, vector<24x128xbf16>,
    return
  }
  func.func @transform_0(%arg0: i32) -> (i32, i32) {
    %c0_i32 = arith.constant 0 : i32
    %c0_i32_0 = arith.constant 0 : i32
    return %arg0, %c0_i32 : i32, i32
  }
  func.func @transform_1(%arg0: i32) -> (i32, i32) {
    %c0_i32 = arith.constant 0 : i32
    %c0_i32_0 = arith.constant 0 : i32
    %c0_i32_1 = arith.constant 0 : i32
    return %c0_i32, %c0_i32_0 : i32, i32
  }
  func.func @transform_2(%arg0: i32) -> (i32, i32) {
    %c0_i32 = arith.constant 0 : i32
    %c0_i32_0 = arith.constant 0 : i32
    %c0_i32_1 = arith.constant 0 : i32
    return %c0_i32, %c0_i32_0 : i32, i32
  }
  func.func @transform_3(%arg0: i32) -> (i32, i32) {
    %c0_i32 = arith.constant 0 : i32
    %c0_i32_0 = arith.constant 0 : i32
    %c0_i32_1 = arith.constant 0 : i32
    return %c0_i32, %c0_i32_0 : i32, i32
  }
  func.func @transform_4(%arg0: i32) -> (i32, i32) {
    %c0_i32 = arith.constant 0 : i32
    %c0_i32_0 = arith.constant 0 : i32
    return %arg0, %c0_i32 : i32, i32
  }
}

module attributes {stable_mosaic.version = 11 : i64} {
  func.func @_fc_stack_kernel(%arg0: i32, %arg1: memref<16x1152xbf16, #tpu.memory_space<vmem>>, %arg2: memref<1152x640xbf16, #tpu.memory_space<vmem>>, %arg3: memref<1x640xf32, #tpu.memory_space<vmem>>, %arg4: memref<1x640xf32, #tpu.memory_space<vmem>>, %arg5: memref<640x384xbf16, #tpu.memory_space<vmem>>, %arg6: memref<1x384xf32, #tpu.memory_space<vmem>>, %arg7: memref<1x384xf32, #tpu.memory_space<vmem>>, %arg8: memref<384x128xbf16, #tpu.memory_space<vmem>>, %arg9: memref<1x128xf32, #tpu.memory_space<vmem>>, %arg10: memref<1x128xf32, #tpu.memory_space<vmem>>, %arg11: memref<16x128xf32, #tpu.memory_space<vmem>>) attributes {dimension_semantics = [#tpu.dimension_semantics<parallel>], iteration_bounds = array<i64: 1>, scalar_prefetch = 0 : i64, scratch_operands = 0 : i64, tpu.core_type = #tpu.core_type<tc>, window_params = [{transform_indices = @transform_0, window_bounds = array<i64: 16, 1152>}, {pipeline_mode = #tpu.pipeline_mode<synchronous>, transform_indices = @transform_1, window_bounds = array<i64: 1152, 640>}, {pipeline_mode = #tpu.pipeline_mode<synchronous>, transform_indices = @transform_2, window_bounds = array<i64: 1, 640>}, {pipeline_mode = #tpu.pipeline_mode<synchronous>, transform_indices = @transform_3, window_bounds = array<i64: 1, 640>}, {pipeline_mode = #tpu.pipeline_mode<synchronous>, transform_indices = @transform_4, window_bounds = array<i64: 640, 384>}, {pipeline_mode = #tpu.pipeline_mode<synchronous>, transform_indices = @transform_5, window_bounds = array<i64: 1, 384>}, {pipeline_mode = #tpu.pipeline_mode<synchronous>, transform_indices = @transform_6, window_bounds = array<i64: 1, 384>}, {pipeline_mode = #tpu.pipeline_mode<synchronous>, transform_indices = @transform_7, window_bounds = array<i64: 384, 128>}, {pipeline_mode = #tpu.pipeline_mode<synchronous>, transform_indices = @transform_8, window_bounds = array<i64: 1, 128>}, {pipeline_mode = #tpu.pipeline_mode<synchronous>, transform_indices = @transform_9, window_bounds = array<i64: 1, 128>}, {transform_indices = @transform_10, window_bounds = array<i64: 16, 128>}]} {
    %c0 = arith.constant 0 : index
    %c0_0 = arith.constant 0 : index
    %0 = vector.load %arg1[%c0, %c0_0] : memref<16x1152xbf16, #tpu.memory_space<vmem>>, vector<16x1152xbf16>
    %c0_1 = arith.constant 0 : index
    %c0_2 = arith.constant 0 : index
    %1 = vector.load %arg2[%c0_1, %c0_2] : memref<1152x640xbf16, #tpu.memory_space<vmem>>, vector<1152x640xbf16>
    %cst = arith.constant dense<0.000000e+00> : vector<16x640xf32>
    %2 = tpu.matmul %0, %1, %cst {dimension_numbers = #tpu.dot_dimension_numbers<[1], [0], [0], [1], [0, 0, 1, 1], [], []>} : vector<16x1152xbf16>, vector<1152x640xbf16>, vector<16x640xf32> -> vector<16x640xf32>
    %c0_3 = arith.constant 0 : index
    %c0_4 = arith.constant 0 : index
    %3 = vector.load %arg3[%c0_3, %c0_4] : memref<1x640xf32, #tpu.memory_space<vmem>>, vector<1x640xf32>
    %4 = vector.broadcast %3 : vector<1x640xf32> to vector<16x640xf32>
    %5 = arith.mulf %2, %4 : vector<16x640xf32>
    %c0_5 = arith.constant 0 : index
    %c0_6 = arith.constant 0 : index
    %6 = vector.load %arg4[%c0_5, %c0_6] : memref<1x640xf32, #tpu.memory_space<vmem>>, vector<1x640xf32>
    %7 = vector.broadcast %6 : vector<1x640xf32> to vector<16x640xf32>
    %8 = arith.addf %5, %7 : vector<16x640xf32>
    %cst_7 = arith.constant 0.000000e+00 : f32
    %9 = vector.broadcast %cst_7 : f32 to vector<16x640xf32>
    %10 = arith.maximumf %8, %9 : vector<16x640xf32>
    %11 = arith.truncf %10 : vector<16x640xf32> to vector<16x640xbf16>
    %c0_8 = arith.constant 0 : index
    %c0_9 = arith.constant 0 : index
    %12 = vector.load %arg5[%c0_8, %c0_9] : memref<640x384xbf16, #tpu.memory_space<vmem>>, vector<640x384xbf16>
    %cst_10 = arith.constant dense<0.000000e+00> : vector<16x384xf32>
    %13 = tpu.matmul %11, %12, %cst_10 {dimension_numbers = #tpu.dot_dimension_numbers<[1], [0], [0], [1], [0, 0, 1, 1], [], []>} : vector<16x640xbf16>, vector<640x384xbf16>, vector<16x384xf32> -> vector<16x384xf32>
    %c0_11 = arith.constant 0 : index
    %c0_12 = arith.constant 0 : index
    %14 = vector.load %arg6[%c0_11, %c0_12] : memref<1x384xf32, #tpu.memory_space<vmem>>, vector<1x384xf32>
    %15 = vector.broadcast %14 : vector<1x384xf32> to vector<16x384xf32>
    %16 = arith.mulf %13, %15 : vector<16x384xf32>
    %c0_13 = arith.constant 0 : index
    %c0_14 = arith.constant 0 : index
    %17 = vector.load %arg7[%c0_13, %c0_14] : memref<1x384xf32, #tpu.memory_space<vmem>>, vector<1x384xf32>
    %18 = vector.broadcast %17 : vector<1x384xf32> to vector<16x384xf32>
    %19 = arith.addf %16, %18 : vector<16x384xf32>
    %cst_15 = arith.constant 0.000000e+00 : f32
    %20 = vector.broadcast %cst_15 : f32 to vector<16x384xf32>
    %21 = arith.maximumf %19, %20 : vector<16x384xf32>
    %22 = arith.truncf %21 : vector<16x384xf32> to vector<16x384xbf16>
    %c0_16 = arith.constant 0 : index
    %c0_17 = arith.constant 0 : index
    %23 = vector.load %arg8[%c0_16, %c0_17] : memref<384x128xbf16, #tpu.memory_space<vmem>>, vector<384x128xbf16>
    %cst_18 = arith.constant dense<0.000000e+00> : vector<16x128xf32>
    %24 = tpu.matmul %22, %23, %cst_18 {dimension_numbers = #tpu.dot_dimension_numbers<[1], [0], [0], [1], [0, 0, 1, 1], [], []>} : vector<16x384xbf16>, vector<384x128xbf16>, vector<16x128xf32> -> vector<16x128xf32>
    %c0_19 = arith.constant 0 : index
    %c0_20 = arith.constant 0 : index
    %25 = vector.load %arg9[%c0_19, %c0_20] : memref<1x128xf32, #tpu.memory_space<vmem>>, vector<1x128xf32>
    %26 = vector.broadcast %25 : vector<1x128xf32> to vector<16x128xf32>
    %27 = arith.mulf %24, %26 : vector<16x128xf32>
    %c0_21 = arith.constant 0 : index
    %c0_22 = arith.constant 0 : index
    %28 = vector.load %arg10[%c0_21, %c0_22] : memref<1x128xf32, #tpu.memory_space<vmem>>, vector<1x128xf32>
    %29 = vector.broadcast %28 : vector<1x128xf32> to vector<16x128xf32>
    %30 = arith.addf %27, %29 : vector<16x128xf32>
    %cst_23 = arith.constant 0.000000e+00 : f32
    %31 = vector.broadcast %cst_23 : f32 to vector<16x128xf32>
    %32 = arith.maximumf %30, %31 : vector<16x128xf32>
    %c0_24 = arith.constant 0 : index
    %c0_25 = arith.constant 0 : index
    %33 = vector.load %arg11[%c0_24, %c0_25] : memref<16x128xf32, #tpu.memory_space<vmem>>, vector<16x128xf32>
    tpu.vector_store %arg11[%c0_24, %c0_25], %32 {strides = array<i32>} : memref<16x128xf32, #tpu.memory_space<vmem>>, vector<16x128xf32>,
    return
  }
  func.func @transform_0(%arg0: i32) -> (i32, i32) {
    %c0_i32 = arith.constant 0 : i32
    %c0_i32_0 = arith.constant 0 : i32
    return %arg0, %c0_i32 : i32, i32
  }
  func.func @transform_1(%arg0: i32) -> (i32, i32) {
    %c0_i32 = arith.constant 0 : i32
    %c0_i32_0 = arith.constant 0 : i32
    %c0_i32_1 = arith.constant 0 : i32
    return %c0_i32, %c0_i32_0 : i32, i32
  }
  func.func @transform_2(%arg0: i32) -> (i32, i32) {
    %c0_i32 = arith.constant 0 : i32
    %c0_i32_0 = arith.constant 0 : i32
    %c0_i32_1 = arith.constant 0 : i32
    return %c0_i32, %c0_i32_0 : i32, i32
  }
  func.func @transform_3(%arg0: i32) -> (i32, i32) {
    %c0_i32 = arith.constant 0 : i32
    %c0_i32_0 = arith.constant 0 : i32
    %c0_i32_1 = arith.constant 0 : i32
    return %c0_i32, %c0_i32_0 : i32, i32
  }
  func.func @transform_4(%arg0: i32) -> (i32, i32) {
    %c0_i32 = arith.constant 0 : i32
    %c0_i32_0 = arith.constant 0 : i32
    %c0_i32_1 = arith.constant 0 : i32
    return %c0_i32, %c0_i32_0 : i32, i32
  }
  func.func @transform_5(%arg0: i32) -> (i32, i32) {
    %c0_i32 = arith.constant 0 : i32
    %c0_i32_0 = arith.constant 0 : i32
    %c0_i32_1 = arith.constant 0 : i32
    return %c0_i32, %c0_i32_0 : i32, i32
  }
  func.func @transform_6(%arg0: i32) -> (i32, i32) {
    %c0_i32 = arith.constant 0 : i32
    %c0_i32_0 = arith.constant 0 : i32
    %c0_i32_1 = arith.constant 0 : i32
    return %c0_i32, %c0_i32_0 : i32, i32
  }
  func.func @transform_7(%arg0: i32) -> (i32, i32) {
    %c0_i32 = arith.constant 0 : i32
    %c0_i32_0 = arith.constant 0 : i32
    %c0_i32_1 = arith.constant 0 : i32
    return %c0_i32, %c0_i32_0 : i32, i32
  }
  func.func @transform_8(%arg0: i32) -> (i32, i32) {
    %c0_i32 = arith.constant 0 : i32
    %c0_i32_0 = arith.constant 0 : i32
    %c0_i32_1 = arith.constant 0 : i32
    return %c0_i32, %c0_i32_0 : i32, i32
  }
  func.func @transform_9(%arg0: i32) -> (i32, i32) {
    %c0_i32 = arith.constant 0 : i32
    %c0_i32_0 = arith.constant 0 : i32
    %c0_i32_1 = arith.constant 0 : i32
    return %c0_i32, %c0_i32_0 : i32, i32
  }
  func.func @transform_10(%arg0: i32) -> (i32, i32) {
    %c0_i32 = arith.constant 0 : i32
    %c0_i32_0 = arith.constant 0 : i32
    return %arg0, %c0_i32 : i32, i32
  }
}

</mosaic_0001>

<bundles_post_ra>
// kernel: conv_net_forward.4
= control target key start
LH: loop header
LB: loop body
LE: loop exit
PB: predicated region body
PF: predicated region fallthrough
CT: control target
= control target key end

     0   :  { %vm1314_vm0 = vcmask 1044480   ;;  %vm1315_vm1 = vcmask 1045504   ;;  %v5236_v1 = vmov 65535   ;;  %vm929_vm2 = vcmask 220160   ;;  %s7917_s1 = inlined_call_operand.vmem [shape: bf16[27,36], index: 1, kind: input, shape index: {}]   ;;  %s7918_s0 = inlined_call_operand.vmem [shape: bf16[2048,27], index: 0, kind: input, shape index: {}]   ;;  %s7919_s2 = inlined_call_operand.vmem [shape: f32[1,36], index: 2, kind: input, shape index: {}]   ;;  %s7920_s3 = inlined_call_operand.vmem [shape: f32[1,36], index: 3, kind: input, shape index: {}]   ;;  %s7921_s4 = inlined_call_operand.vmem [shape: bf16[512,36], index: 4, kind: output, shape index: {}]  }
   0x1   :  { %v5100_v0 = vld [vmem:[%s7917_s1 + $0x8] sm:$0x3f]   ;;  %v1316_v2 = vsel %vm1314_vm0, 4294967295, %v5236_v1  ;;  %v5102_v4 = vld [vmem:[%s7918_s0] sm:$0xff]   ;;  %v5106_v10 = vld [vmem:[%s7918_s0 + $0x10] sm:$0xff]   ;;  %vm3160_vm3 = vcmask 293888  }
   0x2   :  { %v1317_v3 = vsel %vm1315_vm1, %v1316_v2, 0  ;;  %v5101_v6 = vld [vmem:[%s7917_s1] sm:$0xff]   ;;  %4839 = vmatprep.mubr.msk.bf16.mxu0 %vm929_vm2, %v5102_v4  ;;  %v5104_v8 = vld [vmem:[%s7918_s0 + $0x8] sm:$0xff]   ;;  %v5107_v11 = vld [vmem:[%s7918_s0 + $0x210] sm:$0xff]   ;;  %vm4248_vm4 = vcmask 289792  }
   0x3   :  { %v1319_v5 = vand.u32 %v5100_v0, %v1317_v3  ;;  %v5103_v7 = vld [vmem:[%s7918_s0 + $0x200] sm:$0xff]   ;;  %v5105_v9 = vld [vmem:[%s7918_s0 + $0x208] sm:$0xff]   ;;  %v5108_v12 = vld [vmem:[%s7918_s0 + $0x18] sm:$0xff]  }
   0x4   :  { %4967 = vmatprep.mubr.msk.bf16.mxu1 %vm929_vm2, %v5103_v7  ;;  %v5109_v13 = vld [vmem:[%s7918_s0 + $0x218] sm:$0xff]   ;;  %v5110_v14 = vld [vmem:[%s7918_s0 + $0x20] sm:$0xff]   ;;  %v5112_v16 = vld [vmem:[%s7918_s0 + $0x28] sm:$0xff]  }
   0x5   :  { %4835 = vmatprep.subr.bf16.mxu0 %v1319_v5  ;;  %5095 = vmatprep.subr.bf16.mxu1 %v1319_v5  ;;  %v5111_v15 = vld [vmem:[%s7918_s0 + $0x220] sm:$0xff]   ;;  %v5113_v17 = vld [vmem:[%s7918_s0 + $0x228] sm:$0xff]   ;;  %v5114_v18 = vld [vmem:[%s7918_s0 + $0x30] sm:$0xff]  }
   0x6   :  { %4836 = vmatpush3.bf16.msra.mxu0 %v1319_v5  ;;  %5097 = vmatpush3.bf16.msra.mxu1 %v1319_v5  ;;  %v5115_v19 = vld [vmem:[%s7918_s0 + $0x230] sm:$0xff]   ;;  %v5116_v20 = vld [vmem:[%s7918_s0 + $0x38] sm:$0xff]   ;;  %v5118_v22 = vld [vmem:[%s7918_s0 + $0x40] sm:$0xff]  }
   0x7   :  { %4837 = vmatprep.subr.bf16.mxu0 %v5101_v6  ;;  %5096 = vmatprep.subr.bf16.mxu1 %v5101_v6  ;;  %v5117_v21 = vld [vmem:[%s7918_s0 + $0x238] sm:$0xff]   ;;  %v5119_v23 = vld [vmem:[%s7918_s0 + $0x240] sm:$0xff]   ;;  %v5120_v24 = vld [vmem:[%s7918_s0 + $0x48] sm:$0xff]  }
   0x8   :  { %v5121_v25 = vld [vmem:[%s7918_s0 + $0x248] sm:$0xff]   ;;  %v5122_v26 = vld [vmem:[%s7918_s0 + $0x50] sm:$0xff]   ;;  %v5124_v28 = vld [vmem:[%s7918_s0 + $0x58] sm:$0xff]  }
   0x9   :  { %v5123_v27 = vld [vmem:[%s7918_s0 + $0x250] sm:$0xff]   ;;  %v5125_v29 = vld [vmem:[%s7918_s0 + $0x258] sm:$0xff]   ;;  %v5126_v30 = vld [vmem:[%s7918_s0 + $0x60] sm:$0xff]  }
   0xa   :  { %4838 = vmatpush3.bf16.msra.mxu0 %v5101_v6  ;;  %5098 = vmatpush3.bf16.msra.mxu1 %v5101_v6  ;;  %v5127_v31 = vld [vmem:[%s7918_s0 + $0x260] sm:$0xff]   ;;  %v5128_v32 = vld [vmem:[%s7918_s0 + $0x68] sm:$0xff]   ;;  %v5130_v34 = vld [vmem:[%s7918_s0 + $0x70] sm:$0xff]  }
   0xb   :  { %v5129_v33 = vld [vmem:[%s7918_s0 + $0x268] sm:$0xff]   ;;  %v5131_v35 = vld [vmem:[%s7918_s0 + $0x270] sm:$0xff]   ;;  %v5132_v36 = vld [vmem:[%s7918_s0 + $0x78] sm:$0xff]  }
   0xc   :  { %v5133_v37 = vld [vmem:[%s7918_s0 + $0x278] sm:$0xff]   ;;  %v5134_v38 = vld [vmem:[%s7918_s0 + $0x80] sm:$0xff]   ;;  %v5136_v40 = vld [vmem:[%s7918_s0 + $0x88] sm:$0xff]  }
   0xd   :  { %4840 = vmatmul.mubr.msk.bf16.vlgmr.msra.gmra.mxu0 %vm929_vm2, %v5104_v8  ;;  %4968 = vmatmul.mubr.msk.bf16.vlgmr.msra.gmra.mxu1 %vm929_vm2, %v5105_v9  ;;  %v5135_v39 = vld [vmem:[%s7918_s0 + $0x280] sm:$0xff]   ;;  %v5137_v41 = vld [vmem:[%s7918_s0 + $0x288] sm:$0xff]   ;;  %v5138_v42 = vld [vmem:[%s7918_s0 + $0x90] sm:$0xff]  }
   0xe   :  { %4843 = vmatprep.mubr.msk.bf16.mxu0 %vm929_vm2, %v5106_v10  ;;  %4971 = vmatprep.mubr.msk.bf16.mxu1 %vm929_vm2, %v5107_v11  ;;  %v5139_v43 = vld [vmem:[%s7918_s0 + $0x290] sm:$0xff]   ;;  %v5140_v44 = vld [vmem:[%s7918_s0 + $0x98] sm:$0xff]   ;;  %v5142_v46 = vld [vmem:[%s7918_s0 + $0xa0] sm:$0xff]  }
   0xf   :  { %v5141_v45 = vld [vmem:[%s7918_s0 + $0x298] sm:$0xff]   ;;  %v5143_v47 = vld [vmem:[%s7918_s0 + $0x2a0] sm:$0xff]   ;;  %v5144_v48 = vld [vmem:[%s7918_s0 + $0xa8] sm:$0xff]  }
  0x10   :  { %v5145_v49 = vld [vmem:[%s7918_s0 + $0x2a8] sm:$0xff]   ;;  %v5146_v50 = vld [vmem:[%s7918_s0 + $0xb0] sm:$0xff]   ;;  %v5148_v52 = vld [vmem:[%s7918_s0 + $0xb8] sm:$0xff]  }
  0x11   :  { %v5147_v51 = vld [vmem:[%s7918_s0 + $0x2b0] sm:$0xff]   ;;  %v5149_v53 = vld [vmem:[%s7918_s0 + $0x2b8] sm:$0xff]   ;;  %v5150_v54 = vld [vmem:[%s7918_s0 + $0xc0] sm:$0xff]  }
  0x12   :  { %v5151_v55 = vld [vmem:[%s7918_s0 + $0x2c0] sm:$0xff]   ;;  %v5152_v56 = vld [vmem:[%s7918_s0 + $0xc8] sm:$0xff]   ;;  %v5154_v58 = vld [vmem:[%s7918_s0 + $0xd0] sm:$0xff]  }
  0x13   :  { %v5153_v57 = vld [vmem:[%s7918_s0 + $0x2c8] sm:$0xff]   ;;  %v5155_v59 = vld [vmem:[%s7918_s0 + $0x2d0] sm:$0xff]   ;;  %v5156_v60 = vld [vmem:[%s7918_s0 + $0xd8] sm:$0xff]  }
  0x14   :  { %v5157_v61 = vld [vmem:[%s7918_s0 + $0x2d8] sm:$0xff]   ;;  %v5158_v62 = vld [vmem:[%s7918_s0 + $0xe0] sm:$0xff]   ;;  %v5160_v0 = vld [vmem:[%s7918_s0 + $0xe8] sm:$0xff]  }
  0x15   :  { %4844 = vmatmul.mubr.msk.bf16.gmra.mxu0 %vm929_vm2, %v5108_v12  ;;  %4972 = vmatmul.mubr.msk.bf16.gmra.mxu1 %vm929_vm2, %v5109_v13  ;;  %v5159_v63 = vld [vmem:[%s7918_s0 + $0x2e0] sm:$0xff]   ;;  %v5161_v1 = vld [vmem:[%s7918_s0 + $0x2e8] sm:$0xff]   ;;  %v5162_v2 = vld [vmem:[%s7918_s0 + $0xf0] sm:$0xff]  }
  0x16   :  { %4847 = vmatprep.mubr.msk.bf16.mxu0 %vm929_vm2, %v5110_v14  ;;  %4975 = vmatprep.mubr.msk.bf16.mxu1 %vm929_vm2, %v5111_v15  ;;  %v5163_v3 = vld [vmem:[%s7918_s0 + $0x2f0] sm:$0xff]   ;;  %v5164_v4 = vld [vmem:[%s7918_s0 + $0xf8] sm:$0xff]   ;;  %v5166_v6 = vld [vmem:[%s7918_s0 + $0x100] sm:$0xff]  }
  0x17   :  { %v5165_v5 = vld [vmem:[%s7918_s0 + $0x2f8] sm:$0xff]   ;;  %v5167_v7 = vld [vmem:[%s7918_s0 + $0x300] sm:$0xff]   ;;  %v5168_v8 = vld [vmem:[%s7918_s0 + $0x108] sm:$0xff]  }
  0x18   :  { %v5169_v9 = vld [vmem:[%s7918_s0 + $0x308] sm:$0xff]   ;;  %v5170_v10 = vld [vmem:[%s7918_s0 + $0x110] sm:$0xff]   ;;  %v5172_v12 = vld [vmem:[%s7918_s0 + $0x118] sm:$0xff]  }
  0x19   :  { %v5171_v11 = vld [vmem:[%s7918_s0 + $0x310] sm:$0xff]   ;;  %v5173_v13 = vld [vmem:[%s7918_s0 + $0x318] sm:$0xff]   ;;  %v5174_v14 = vld [vmem:[%s7918_s0 + $0x120] sm:$0xff]  }
  0x1a   :  { %v5175_v15 = vld [vmem:[%s7918_s0 + $0x320] sm:$0xff]  }
  0x1d   :  { %4848 = vmatmul.mubr.msk.bf16.gmra.mxu0 %vm929_vm2, %v5112_v16  ;;  %4976 = vmatmul.mubr.msk.bf16.gmra.mxu1 %vm929_vm2, %v5113_v17  ;;  %v5176_v16 = vld [vmem:[%s7918_s0 + $0x128] sm:$0xff]  }
  0x1e   :  { %4851 = vmatprep.mubr.msk.bf16.mxu0 %vm929_vm2, %v5114_v18  ;;  %4979 = vmatprep.mubr.msk.bf16.mxu1 %vm929_vm2, %v5115_v19  ;;  %v5177_v17 = vld [vmem:[%s7918_s0 + $0x328] sm:$0xff]   ;;  %v5178_v18 = vld [vmem:[%s7918_s0 + $0x130] sm:$0xff]  }
  0x1f   :  { %v5179_v19 = vld [vmem:[%s7918_s0 + $0x330] sm:$0xff]  }
  0x25   :  { %4852 = vmatmul.mubr.msk.bf16.gmra.mxu0 %vm929_vm2, %v5116_v20  ;;  %4980 = vmatmul.mubr.msk.bf16.gmra.mxu1 %vm929_vm2, %v5117_v21  ;;  %v5180_v20 = vld [vmem:[%s7918_s0 + $0x138] sm:$0xff]  }
  0x26   :  { %4855 = vmatprep.mubr.msk.bf16.mxu0 %vm929_vm2, %v5118_v22  ;;  %4983 = vmatprep.mubr.msk.bf16.mxu1 %vm929_vm2, %v5119_v23  ;;  %v5181_v21 = vld [vmem:[%s7918_s0 + $0x338] sm:$0xff]   ;;  %v5182_v22 = vld [vmem:[%s7918_s0 + $0x140] sm:$0xff]  }
  0x27   :  { %v5183_v23 = vld [vmem:[%s7918_s0 + $0x340] sm:$0xff]  }
  0x2d   :  { %4856 = vmatmul.mubr.msk.bf16.gmra.mxu0 %vm929_vm2, %v5120_v24  ;;  %4984 = vmatmul.mubr.msk.bf16.gmra.mxu1 %vm929_vm2, %v5121_v25  ;;  %v5184_v24 = vld [vmem:[%s7918_s0 + $0x148] sm:$0xff]  }
  0x2e   :  { %4859 = vmatprep.mubr.msk.bf16.mxu0 %vm929_vm2, %v5122_v26  ;;  %4987 = vmatprep.mubr.msk.bf16.mxu1 %vm929_vm2, %v5123_v27  ;;  %v5185_v25 = vld [vmem:[%s7918_s0 + $0x348] sm:$0xff]   ;;  %v5186_v26 = vld [vmem:[%s7918_s0 + $0x150] sm:$0xff]  }
  0x2f   :  { %v5187_v27 = vld [vmem:[%s7918_s0 + $0x350] sm:$0xff]  }
  0x35   :  { %4860 = vmatmul.mubr.msk.bf16.gmra.mxu0 %vm929_vm2, %v5124_v28  ;;  %4988 = vmatmul.mubr.msk.bf16.gmra.mxu1 %vm929_vm2, %v5125_v29  ;;  %v5188_v28 = vld [vmem:[%s7918_s0 + $0x158] sm:$0xff]  }
  0x36   :  { %4863 = vmatprep.mubr.msk.bf16.mxu0 %vm929_vm2, %v5126_v30  ;;  %4991 = vmatprep.mubr.msk.bf16.mxu1 %vm929_vm2, %v5127_v31  ;;  %v5189_v29 = vld [vmem:[%s7918_s0 + $0x358] sm:$0xff]   ;;  %v5190_v30 = vld [vmem:[%s7918_s0 + $0x160] sm:$0xff]  }
  0x37   :  { %v5191_v31 = vld [vmem:[%s7918_s0 + $0x360] sm:$0xff]  }
  0x3d   :  { %4864 = vmatmul.mubr.msk.bf16.gmra.mxu0 %vm929_vm2, %v5128_v32  ;;  %4992 = vmatmul.mubr.msk.bf16.gmra.mxu1 %vm929_vm2, %v5129_v33  ;;  %v5192_v32 = vld [vmem:[%s7918_s0 + $0x168] sm:$0xff]  }
  0x3e   :  { %4867 = vmatprep.mubr.msk.bf16.mxu0 %vm929_vm2, %v5130_v34  ;;  %4995 = vmatprep.mubr.msk.bf16.mxu1 %vm929_vm2, %v5131_v35  ;;  %v5193_v33 = vld [vmem:[%s7918_s0 + $0x368] sm:$0xff]   ;;  %v5194_v34 = vld [vmem:[%s7918_s0 + $0x170] sm:$0xff]  }
  0x3f   :  { %v5195_v35 = vld [vmem:[%s7918_s0 + $0x370] sm:$0xff]  }
  0x45   :  { %4868 = vmatmul.mubr.msk.bf16.gmra.mxu0 %vm929_vm2, %v5132_v36  ;;  %4996 = vmatmul.mubr.msk.bf16.gmra.mxu1 %vm929_vm2, %v5133_v37  ;;  %v5196_v36 = vld [vmem:[%s7918_s0 + $0x178] sm:$0xff]  }
  0x46   :  { %4871 = vmatprep.mubr.msk.bf16.mxu0 %vm929_vm2, %v5134_v38  ;;  %4999 = vmatprep.mubr.msk.bf16.mxu1 %vm929_vm2, %v5135_v39  ;;  %v5197_v37 = vld [vmem:[%s7918_s0 + $0x378] sm:$0xff]   ;;  %v5198_v38 = vld [vmem:[%s7918_s0 + $0x180] sm:$0xff]  }
  0x47   :  { %v5199_v39 = vld [vmem:[%s7918_s0 + $0x380] sm:$0xff]  }
  0x4d   :  { %4872 = vmatmul.mubr.msk.bf16.gmra.mxu0 %vm929_vm2, %v5136_v40  ;;  %5000 = vmatmul.mubr.msk.bf16.gmra.mxu1 %vm929_vm2, %v5137_v41  ;;  %v5200_v40 = vld [vmem:[%s7918_s0 + $0x188] sm:$0xff]  }
  0x4e   :  { %4875 = vmatprep.mubr.msk.bf16.mxu0 %vm929_vm2, %v5138_v42  ;;  %5003 = vmatprep.mubr.msk.bf16.mxu1 %vm929_vm2, %v5139_v43  ;;  %v5201_v41 = vld [vmem:[%s7918_s0 + $0x388] sm:$0xff]   ;;  %v5202_v42 = vld [vmem:[%s7918_s0 + $0x190] sm:$0xff]  }
  0x4f   :  { %v5203_v43 = vld [vmem:[%s7918_s0 + $0x390] sm:$0xff]  }
  0x55   :  { %4876 = vmatmul.mubr.msk.bf16.gmra.mxu0 %vm929_vm2, %v5140_v44  ;;  %5004 = vmatmul.mubr.msk.bf16.gmra.mxu1 %vm929_vm2, %v5141_v45  ;;  %v5675_v44 = vld [vmem:[%s7919_s2] ss:$0 sm:$0xff] }
  0x56   :  { %4879 = vmatprep.mubr.msk.bf16.mxu0 %vm929_vm2, %v5142_v46  ;;  %5007 = vmatprep.mubr.msk.bf16.mxu1 %vm929_vm2, %v5143_v47  ;;  %v5680_v46 = vld [vmem:[%s7920_s3] ss:$0 sm:$0xff] }
  0x5d   :  { %4880 = vmatmul.mubr.msk.bf16.gmra.mxu0 %vm929_vm2, %v5144_v48  ;;  %5008 = vmatmul.mubr.msk.bf16.gmra.mxu1 %vm929_vm2, %v5145_v49 }
  0x5e   :  { %4883 = vmatprep.mubr.msk.bf16.mxu0 %vm929_vm2, %v5146_v50  ;;  %5011 = vmatprep.mubr.msk.bf16.mxu1 %vm929_vm2, %v5147_v51 }
  0x65   :  { %4884 = vmatmul.mubr.msk.bf16.gmra.mxu0 %vm929_vm2, %v5148_v52  ;;  %5012 = vmatmul.mubr.msk.bf16.gmra.mxu1 %vm929_vm2, %v5149_v53 }
  0x66   :  { %4887 = vmatprep.mubr.msk.bf16.mxu0 %vm929_vm2, %v5150_v54  ;;  %5015 = vmatprep.mubr.msk.bf16.mxu1 %vm929_vm2, %v5151_v55 }
  0x6d   :  { %4888 = vmatmul.mubr.msk.bf16.gmra.mxu0 %vm929_vm2, %v5152_v56  ;;  %5016 = vmatmul.mubr.msk.bf16.gmra.mxu1 %vm929_vm2, %v5153_v57 }
  0x6e   :  { %4891 = vmatprep.mubr.msk.bf16.mxu0 %vm929_vm2, %v5154_v58  ;;  %5019 = vmatprep.mubr.msk.bf16.mxu1 %vm929_vm2, %v5155_v59  ;;  %v5204_v58 = vld [vmem:[%s7918_s0 + $0x198] sm:$0xff]  }
  0x75   :  { %4892 = vmatmul.mubr.msk.bf16.gmra.mxu0 %vm929_vm2, %v5156_v60  ;;  %5020 = vmatmul.mubr.msk.bf16.gmra.mxu1 %vm929_vm2, %v5157_v61 }
  0x76   :  { %4895 = vmatprep.mubr.msk.bf16.mxu0 %vm929_vm2, %v5158_v62  ;;  %5023 = vmatprep.mubr.msk.bf16.mxu1 %vm929_vm2, %v5159_v63  ;;  %v5205_v63 = vld [vmem:[%s7918_s0 + $0x398] sm:$0xff]  }
  0x7d   :  { %4896 = vmatmul.mubr.msk.bf16.gmra.mxu0 %vm929_vm2, %v5160_v0  ;;  %5024 = vmatmul.mubr.msk.bf16.gmra.mxu1 %vm929_vm2, %v5161_v1  ;;  %v5206_v0 = vld [vmem:[%s7918_s0 + $0x1a0] sm:$0xff]  }
  0x7e   :  { %4899 = vmatprep.mubr.msk.bf16.mxu0 %vm929_vm2, %v5162_v2  ;;  %5027 = vmatprep.mubr.msk.bf16.mxu1 %vm929_vm2, %v5163_v3 }
  0x85   :  { %4900 = vmatmul.mubr.msk.bf16.gmra.mxu0 %vm929_vm2, %v5164_v4  ;;  %5028 = vmatmul.mubr.msk.bf16.gmra.mxu1 %vm929_vm2, %v5165_v5  ;;  %v5207_v5 = vld [vmem:[%s7918_s0 + $0x3a0] sm:$0xff]  }
  0x86   :  { %4903 = vmatprep.mubr.msk.bf16.mxu0 %vm929_vm2, %v5166_v6  ;;  %5031 = vmatprep.mubr.msk.bf16.mxu1 %vm929_vm2, %v5167_v7 }
  0x8d   :  { %4904 = vmatmul.mubr.msk.bf16.gmra.mxu0 %vm929_vm2, %v5168_v8  ;;  %5032 = vmatmul.mubr.msk.bf16.gmra.mxu1 %vm929_vm2, %v5169_v9 }
  0x8e   :  { %4907 = vmatprep.mubr.msk.bf16.mxu0 %vm929_vm2, %v5170_v10  ;;  %5035 = vmatprep.mubr.msk.bf16.mxu1 %vm929_vm2, %v5171_v11 }
  0x95   :  { %4908 = vmatmul.mubr.msk.bf16.gmra.mxu0 %vm929_vm2, %v5172_v12  ;;  %5036 = vmatmul.mubr.msk.bf16.gmra.mxu1 %vm929_vm2, %v5173_v13 }
  0x96   :  { %4911 = vmatprep.mubr.msk.bf16.mxu0 %vm929_vm2, %v5174_v14  ;;  %5039 = vmatprep.mubr.msk.bf16.mxu1 %vm929_vm2, %v5175_v15 }
  0x9d   :  { %4912 = vmatmul.mubr.msk.bf16.gmra.mxu0 %vm929_vm2, %v5176_v16  ;;  %5040 = vmatmul.mubr.msk.bf16.gmra.mxu1 %vm929_vm2, %v5177_v17 }
  0x9e   :  { %4915 = vmatprep.mubr.msk.bf16.mxu0 %vm929_vm2, %v5178_v18  ;;  %5043 = vmatprep.mubr.msk.bf16.mxu1 %vm929_vm2, %v5179_v19 }
  0xa5   :  { %4916 = vmatmul.mubr.msk.bf16.gmra.mxu0 %vm929_vm2, %v5180_v20  ;;  %5044 = vmatmul.mubr.msk.bf16.gmra.mxu1 %vm929_vm2, %v5181_v21 }
  0xa6   :  { %4919 = vmatprep.mubr.msk.bf16.mxu0 %vm929_vm2, %v5182_v22  ;;  %5047 = vmatprep.mubr.msk.bf16.mxu1 %vm929_vm2, %v5183_v23 }
  0xad   :  { %4920 = vmatmul.mubr.msk.bf16.gmra.mxu0 %vm929_vm2, %v5184_v24  ;;  %5048 = vmatmul.mubr.msk.bf16.gmra.mxu1 %vm929_vm2, %v5185_v25 }
  0xae   :  { %4923 = vmatprep.mubr.msk.bf16.mxu0 %vm929_vm2, %v5186_v26  ;;  %5051 = vmatprep.mubr.msk.bf16.mxu1 %vm929_vm2, %v5187_v27 }
  0xb5   :  { %4924 = vmatmul.mubr.msk.bf16.gmra.mxu0 %vm929_vm2, %v5188_v28  ;;  %5052 = vmatmul.mubr.msk.bf16.gmra.mxu1 %vm929_vm2, %v5189_v29 }
  0xb6   :  { %4927 = vmatprep.mubr.msk.bf16.mxu0 %vm929_vm2, %v5190_v30  ;;  %5055 = vmatprep.mubr.msk.bf16.mxu1 %vm929_vm2, %v5191_v31 }
  0xbd   :  { %4928 = vmatmul.mubr.msk.bf16.gmra.mxu0 %vm929_vm2, %v5192_v32  ;;  %5056 = vmatmul.mubr.msk.bf16.gmra.mxu1 %vm929_vm2, %v5193_v33 }
  0xbe   :  { %4931 = vmatprep.mubr.msk.bf16.mxu0 %vm929_vm2, %v5194_v34  ;;  %5059 = vmatprep.mubr.msk.bf16.mxu1 %vm929_vm2, %v5195_v35 }
  0xc5   :  { %4932 = vmatmul.mubr.msk.bf16.gmra.mxu0 %vm929_vm2, %v5196_v36  ;;  %5060 = vmatmul.mubr.msk.bf16.gmra.mxu1 %vm929_vm2, %v5197_v37  ;;  %v5208_v36 = vld [vmem:[%s7918_s0 + $0x1a8] sm:$0xff]  }
  0xc6   :  { %4935 = vmatprep.mubr.msk.bf16.mxu0 %vm929_vm2, %v5198_v38  ;;  %5063 = vmatprep.mubr.msk.bf16.mxu1 %vm929_vm2, %v5199_v39 }
  0xcd   :  { %v4841_v45 = vpop.f32.mrf.mxu0  ;;  %4936 = vmatmul.mubr.msk.bf16.gmra.mxu0 %vm929_vm2, %v5200_v40  ;;  %v4969_v47 = vpop.f32.mrf.mxu1  ;;  %5064 = vmatmul.mubr.msk.bf16.gmra.mxu1 %vm929_vm2, %v5201_v41  ;;  %v5209_v41 = vld [vmem:[%s7918_s0 + $0x3a8] sm:$0xff]  }
  0xce   :  { %v2387_v48 = vmul.f32 %v4841_v45, %v5675_v44  ;;  %v2515_v49 = vmul.f32 %v4969_v47, %v5675_v44  ;;  %4939 = vmatprep.mubr.msk.bf16.mxu0 %vm929_vm2, %v5202_v42  ;;  %5067 = vmatprep.mubr.msk.bf16.mxu1 %vm929_vm2, %v5203_v43  ;;  %v5210_v42 = vld [vmem:[%s7918_s0 + $0x1b0] sm:$0xff]  }
  0xcf   :  { %v1355_v50 = vpop.f32.mrf.mxu0  ;;  %v1867_v51 = vpop.f32.mrf.mxu1 }
  0xd0   :  { %v2650_v52 = vadd.f32 %v5680_v46, %v2387_v48  ;;  %v2778_v53 = vadd.f32 %v5680_v46, %v2515_v49  ;;  %v2385_v54 = vmul.f32 %v5675_v44, %v1355_v50  ;;  %v2513_v55 = vmul.f32 %v5675_v44, %v1867_v51  ;;  %v5211_v51 = vld [vmem:[%s7918_s0 + $0x3b0] sm:$0xff]  }
  0xd1   :  { %v4842_v56 = vpop.f32.mrf.mxu0  ;;  %v4970_v57 = vpop.f32.mrf.mxu1 }
  0xd2   :  { %v2906_v59 = vmax.f32 %v2650_v52, 0.0  ;;  %v3034_v60 = vmax.f32 %v2778_v53, 0.0  ;;  %v2648_v61 = vadd.f32 %v5680_v46, %v2385_v54  ;;  %v2776_v62 = vadd.f32 %v5680_v46, %v2513_v55 }
  0xd3   :  { %v2388_v1 = vmul.f32 %v4842_v56, %v5675_v44  ;;  %v2516_v2 = vmul.f32 %v4970_v57, %v5675_v44  ;;  %v1358_v3 = vpop.f32.mrf.mxu0  ;;  %v1870_v4 = vpop.f32.mrf.mxu1 }
  0xd4   :  { %v5709_v6 = vsel %vm3160_vm3, %v2906_v59, -inf  ;;  %v5712_v7 = vsel %vm3160_vm3, %v3034_v60, -inf  ;;  %v2904_v8 = vmax.f32 %v2648_v61, 0.0  ;;  %v3032_v9 = vmax.f32 %v2776_v62, 0.0 }
  0xd5   :  { %v2651_v10 = vadd.f32 %v5680_v46, %v2388_v1  ;;  %v2779_v11 = vadd.f32 %v5680_v46, %v2516_v2  ;;  %v2386_v12 = vmul.f32 %v5675_v44, %v1358_v3  ;;  %v2514_v13 = vmul.f32 %v5675_v44, %v1870_v4  ;;  %v4845_v14 = vpop.f32.mrf.mxu0  ;;  %4940 = vmatmul.mubr.msk.bf16.gmra.mxu0 %vm929_vm2, %v5204_v58  ;;  %v4973_v15 = vpop.f32.mrf.mxu1 }
  0xd6   :  { %v5720_v16 = vsel %vm3160_vm3, %v2904_v8, -inf  ;;  %v5723_v17 = vsel %vm3160_vm3, %v3032_v9, -inf  ;;  %v2391_v18 = vmul.f32 %v4845_v14, %v5675_v44  ;;  %v2519_v19 = vmul.f32 %v4973_v15, %v5675_v44  ;;  %5068 = vmatmul.mubr.msk.bf16.gmra.mxu1 %vm929_vm2, %v5205_v63  ;;  %4943 = vmatprep.mubr.msk.bf16.mxu0 %vm929_vm2, %v5206_v0 }
  0xd7   :  { %v2907_v20 = vmax.f32 %v2651_v10, 0.0  ;;  %v3035_v21 = vmax.f32 %v2779_v11, 0.0  ;;  %v2649_v22 = vadd.f32 %v5680_v46, %v2386_v12  ;;  %v2777_v23 = vadd.f32 %v5680_v46, %v2514_v13  ;;  %v1371_v24 = vpop.f32.mrf.mxu0  ;;  %v1883_v25 = vpop.f32.mrf.mxu1  ;;  %5071 = vmatprep.mubr.msk.bf16.mxu1 %vm929_vm2, %v5207_v5 }
  0xd8   :  { %v2654_v26 = vadd.f32 %v5680_v46, %v2391_v18  ;;  %v2782_v27 = vadd.f32 %v5680_v46, %v2519_v19  ;;  %v2389_v28 = vmul.f32 %v5675_v44, %v1371_v24  ;;  %v2517_v29 = vmul.f32 %v5675_v44, %v1883_v25  ;;  %v5212_v18 = vld [vmem:[%s7918_s0 + $0x1b8] sm:$0xff]   ;;  %v5214_v24 = vld [vmem:[%s7918_s0 + $0x1c0] sm:$0xff]  }
  0xd9   :  { %v5737_v30 = vsel %vm3160_vm3, %v2907_v20, -inf  ;;  %v5740_v31 = vsel %vm3160_vm3, %v3035_v21, -inf  ;;  %v2905_v32 = vmax.f32 %v2649_v22, 0.0  ;;  %v3033_v33 = vmax.f32 %v2777_v23, 0.0  ;;  %v4846_v34 = vpop.f32.mrf.mxu0  ;;  %v4974_v35 = vpop.f32.mrf.mxu1  ;;  %v5213_v23 = vld [vmem:[%s7918_s0 + $0x3b8] sm:$0xff]  }
  0xda   :  { %v2910_v37 = vmax.f32 %v2654_v26, 0.0  ;;  %v3038_v38 = vmax.f32 %v2782_v27, 0.0  ;;  %v2652_v39 = vadd.f32 %v5680_v46, %v2389_v28  ;;  %v2780_v40 = vadd.f32 %v5680_v46, %v2517_v29 }
  0xdb   :  { %v5754_v43 = vsel %vm3160_vm3, %v2905_v32, -inf  ;;  %v5757_v45 = vsel %vm3160_vm3, %v3033_v33, -inf  ;;  %v2392_v47 = vmul.f32 %v4846_v34, %v5675_v44  ;;  %v2520_v48 = vmul.f32 %v4974_v35, %v5675_v44  ;;  %v1374_v49 = vpop.f32.mrf.mxu0  ;;  %v1886_v50 = vpop.f32.mrf.mxu1 }
  0xdc   :  { %v3168_v52 = vsel %vm3160_vm3, %v2910_v37, -inf  ;;  %v3360_v53 = vsel %vm3160_vm3, %v3038_v38, -inf  ;;  %v2908_v54 = vmax.f32 %v2652_v39, 0.0  ;;  %v3036_v55 = vmax.f32 %v2780_v40, 0.0 }
  0xdd   :  { %v3169_v56 = vmax.f32 %v5709_v6, %v3168_v52  ;;  %v3361_v57 = vmax.f32 %v5712_v7, %v3360_v53  ;;  %v2655_v58 = vadd.f32 %v5680_v46, %v2392_v47  ;;  %v2783_v59 = vadd.f32 %v5680_v46, %v2520_v48  ;;  %v4849_v60 = vpop.f32.mrf.mxu0  ;;  %4944 = vmatmul.mubr.msk.bf16.gmra.mxu0 %vm929_vm2, %v5208_v36  ;;  %v4977_v61 = vpop.f32.mrf.mxu1 }
  0xde   :  { %v3162_v62 = vsel %vm3160_vm3, %v2908_v54, -inf  ;;  %v3354_v63 = vsel %vm3160_vm3, %v3036_v55, -inf  ;;  %v2390_v0 = vmul.f32 %v5675_v44, %v1374_v49  ;;  %v2518_v1 = vmul.f32 %v5675_v44, %v1886_v50  ;;  %5072 = vmatmul.mubr.msk.bf16.gmra.mxu1 %vm929_vm2, %v5209_v41  ;;  %4947 = vmatprep.mubr.msk.bf16.mxu0 %vm929_vm2, %v5210_v42 }
  0xdf   :  { %3547 = vst.msk [vmem:[#allocation2 + $0x10] sm:$0xff] %vm3160_vm3, %v3169_v56  ;;  %3611 = vst.msk [vmem:[#allocation2 + $0x210] sm:$0xff] %vm3160_vm3, %v3361_v57  ;;  %v3163_v2 = vmax.f32 %v5720_v16, %v3162_v62  ;;  %v3355_v3 = vmax.f32 %v5723_v17, %v3354_v63  ;;  %v2911_v4 = vmax.f32 %v2655_v58, 0.0  ;;  %v3039_v5 = vmax.f32 %v2783_v59, 0.0  ;;  %v1387_v6 = vpop.f32.mrf.mxu0  ;;  %v1899_v7 = vpop.f32.mrf.mxu1  ;;  %5075 = vmatprep.mubr.msk.bf16.mxu1 %vm929_vm2, %v5211_v51 }
  0xe0   :  { %v2653_v8 = vadd.f32 %v5680_v46, %v2390_v0  ;;  %v2781_v9 = vadd.f32 %v5680_v46, %v2518_v1  ;;  %v2395_v10 = vmul.f32 %v4849_v60, %v5675_v44  ;;  %v2523_v11 = vmul.f32 %v4977_v61, %v5675_v44  ;;  %v5216_v0 = vld [vmem:[%s7918_s0 + $0x1c8] sm:$0xff]  }
  0xe1   :  { %3545 = vst.msk [vmem:[#allocation2] sm:$0xff] %vm3160_vm3, %v3163_v2  ;;  %3609 = vst.msk [vmem:[#allocation2 + $0x200] sm:$0xff] %vm3160_vm3, %v3355_v3  ;;  %v3171_v12 = vsel %vm3160_vm3, %v2911_v4, -inf  ;;  %v3363_v13 = vsel %vm3160_vm3, %v3039_v5, -inf  ;;  %v2393_v14 = vmul.f32 %v5675_v44, %v1387_v6  ;;  %v2521_v15 = vmul.f32 %v5675_v44, %v1899_v7  ;;  %v4850_v16 = vpop.f32.mrf.mxu0  ;;  %v4978_v17 = vpop.f32.mrf.mxu1  ;;  %v5217_v5 = vld [vmem:[%s7918_s0 + $0x3c8] sm:$0xff]   ;;  %v5218_v6 = vld [vmem:[%s7918_s0 + $0x1d0] sm:$0xff]  }
  0xe2   :  { %v3172_v19 = vmax.f32 %v5737_v30, %v3171_v12  ;;  %v3364_v20 = vmax.f32 %v5740_v31, %v3363_v13  ;;  %v2909_v21 = vmax.f32 %v2653_v8, 0.0  ;;  %v3037_v22 = vmax.f32 %v2781_v9, 0.0  ;;  %v5215_v31 = vld [vmem:[%s7918_s0 + $0x3c0] sm:$0xff]   ;;  %v5219_v7 = vld [vmem:[%s7918_s0 + $0x3d0] sm:$0xff]  }
  0xe3   :  { %v2658_v25 = vadd.f32 %v5680_v46, %v2395_v10  ;;  %v2786_v26 = vadd.f32 %v5680_v46, %v2523_v11  ;;  %v2656_v27 = vadd.f32 %v5680_v46, %v2393_v14  ;;  %v2784_v28 = vadd.f32 %v5680_v46, %v2521_v15  ;;  %v1390_v29 = vpop.f32.mrf.mxu0  ;;  %v1902_v30 = vpop.f32.mrf.mxu1 }
  0xe4   :  { %3548 = vst.msk [vmem:[#allocation2 + $0x18] sm:$0xff] %vm3160_vm3, %v3172_v19  ;;  %3612 = vst.msk [vmem:[#allocation2 + $0x218] sm:$0xff] %vm3160_vm3, %v3364_v20  ;;  %v3165_v32 = vsel %vm3160_vm3, %v2909_v21, -inf  ;;  %v3357_v33 = vsel %vm3160_vm3, %v3037_v22, -inf  ;;  %v2396_v34 = vmul.f32 %v4850_v16, %v5675_v44  ;;  %v2524_v35 = vmul.f32 %v4978_v17, %v5675_v44 }
  0xe5   :  { %v3166_v36 = vmax.f32 %v5754_v43, %v3165_v32  ;;  %v3358_v37 = vmax.f32 %v5757_v45, %v3357_v33  ;;  %v2914_v38 = vmax.f32 %v2658_v25, 0.0  ;;  %v3042_v39 = vmax.f32 %v2786_v26, 0.0  ;;  %v4853_v40 = vpop.f32.mrf.mxu0  ;;  %4948 = vmatmul.mubr.msk.bf16.gmra.mxu0 %vm929_vm2, %v5212_v18  ;;  %v4981_v41 = vpop.f32.mrf.mxu1 }
  0xe6   :  { %v2912_v42 = vmax.f32 %v2656_v27, 0.0  ;;  %v3040_v47 = vmax.f32 %v2784_v28, 0.0  ;;  %v2659_v48 = vadd.f32 %v5680_v46, %v2396_v34  ;;  %v2787_v49 = vadd.f32 %v5680_v46, %v2524_v35  ;;  %5076 = vmatmul.mubr.msk.bf16.gmra.mxu1 %vm929_vm2, %v5213_v23  ;;  %4951 = vmatprep.mubr.msk.bf16.mxu0 %vm929_vm2, %v5214_v24 }
  0xe7   :  { %3546 = vst.msk [vmem:[#allocation2 + $0x8] sm:$0xff] %vm3160_vm3, %v3166_v36  ;;  %3610 = vst.msk [vmem:[#allocation2 + $0x208] sm:$0xff] %vm3160_vm3, %v3358_v37  ;;  %v5826_v43 = vsel %vm3160_vm3, %v2914_v38, -inf  ;;  %v5829_v45 = vsel %vm3160_vm3, %v3042_v39, -inf  ;;  %v2394_v50 = vmul.f32 %v5675_v44, %v1390_v29  ;;  %v2522_v51 = vmul.f32 %v5675_v44, %v1902_v30  ;;  %v1403_v52 = vpop.f32.mrf.mxu0  ;;  %v1915_v53 = vpop.f32.mrf.mxu1  ;;  %5079 = vmatprep.mubr.msk.bf16.mxu1 %vm929_vm2, %v5215_v31 }
  0xe8   :  { %v5835_v54 = vsel %vm3160_vm3, %v2912_v42, -inf  ;;  %v5838_v55 = vsel %vm3160_vm3, %v3040_v47, -inf  ;;  %v2915_v56 = vmax.f32 %v2659_v48, 0.0  ;;  %v3043_v57 = vmax.f32 %v2787_v49, 0.0 }
  0xe9   :  { %v2657_v58 = vadd.f32 %v5680_v46, %v2394_v50  ;;  %v2785_v59 = vadd.f32 %v5680_v46, %v2522_v51  ;;  %v2399_v60 = vmul.f32 %v4853_v40, %v5675_v44  ;;  %v2527_v61 = vmul.f32 %v4981_v41, %v5675_v44  ;;  %v4854_v62 = vpop.f32.mrf.mxu0  ;;  %v4982_v63 = vpop.f32.mrf.mxu1 }
  0xea   :  { %v5848_v1 = vsel %vm3160_vm3, %v2915_v56, -inf  ;;  %v5851_v2 = vsel %vm3160_vm3, %v3043_v57, -inf  ;;  %v2397_v3 = vmul.f32 %v5675_v44, %v1403_v52  ;;  %v2525_v4 = vmul.f32 %v5675_v44, %v1915_v53 }
  0xeb   :  { %v3675_v8 = vld [vmem:[#allocation2 + $0x10] ss:$2 sm:$0xff]  ;;  %v3803_v9 = vld [vmem:[#allocation2 + $0x11] ss:$2 sm:$0xff]  ;;  %v2662_v11 = vadd.f32 %v5680_v46, %v2399_v60  ;;  %v2790_v12 = vadd.f32 %v5680_v46, %v2527_v61  ;;  %v2400_v13 = vmul.f32 %v4854_v62, %v5675_v44  ;;  %v2528_v14 = vmul.f32 %v4982_v63, %v5675_v44  ;;  %v1406_v15 = vpop.f32.mrf.mxu0  ;;  %v1918_v16 = vpop.f32.mrf.mxu1 }
  0xec   :  { %v3739_v10 = vld [vmem:[#allocation2 + $0x210] ss:$2 sm:$0xff]  ;;  %v3929_v17 = vmax.f32 %v3675_v8, %v3803_v9  ;;  %v3867_v18 = vld [vmem:[#allocation2 + $0x211] ss:$2 sm:$0xff]  ;;  %v2913_v19 = vmax.f32 %v2657_v58, 0.0  ;;  %v3041_v20 = vmax.f32 %v2785_v59, 0.0  ;;  %v2660_v21 = vadd.f32 %v5680_v46, %v2397_v3 }
  0xed   :  { %v3961_v22 = vmax.f32 %v3739_v10, %v3867_v18  ;;  %v2918_v23 = vmax.f32 %v2662_v11, 0.0  ;;  %v3046_v24 = vmax.f32 %v2790_v12, 0.0  ;;  %v2788_v25 = vadd.f32 %v5680_v46, %v2525_v4  ;;  %v4857_v26 = vpop.f32.mrf.mxu0  ;;  %4952 = vmatmul.mubr.msk.bf16.gmra.mxu0 %vm929_vm2, %v5216_v0  ;;  %v4985_v27 = vpop.f32.mrf.mxu1  ;;  %v5220_v58 = vld [vmem:[%s7918_s0 + $0x1d8] sm:$0xff]  }
  0xee   :  { %v4642_v28 = vpack.c.bf16 %v3929_v17, %v3929_v17  ;;  %v3673_v29 = vld [vmem:[#allocation2] ss:$2 sm:$0xff]  ;;  %v3801_v30 = vld [vmem:[#allocation2 + $0x1] ss:$2 sm:$0xff]  ;;  %v2663_v32 = vadd.f32 %v5680_v46, %v2400_v13  ;;  %v2791_v33 = vadd.f32 %v5680_v46, %v2528_v14  ;;  %v2398_v34 = vmul.f32 %v5675_v44, %v1406_v15  ;;  %5080 = vmatmul.mubr.msk.bf16.gmra.mxu1 %vm929_vm2, %v5217_v5  ;;  %v5221_v63 = vld [vmem:[%s7918_s0 + $0x3d8] sm:$0xff]  }
  0xef   :  { %v3737_v31 = vld [vmem:[#allocation2 + $0x200] ss:$2 sm:$0xff]  ;;  %v4674_v35 = vpack.c.bf16 %v3961_v22, %v3961_v22  ;;  %v3928_v36 = vmax.f32 %v3673_v29, %v3801_v30  ;;  %v3865_v37 = vld [vmem:[#allocation2 + $0x201] ss:$2 sm:$0xff]  ;;  %v5876_v38 = vsel %vm3160_vm3, %v2913_v19, -inf  ;;  %v5879_v39 = vsel %vm3160_vm3, %v3041_v20, -inf  ;;  %v1419_v40 = vpop.f32.mrf.mxu0  ;;  %v1931_v41 = vpop.f32.mrf.mxu1  ;;  %4955 = vmatprep.mubr.msk.bf16.mxu0 %vm929_vm2, %v5218_v6  ;;  %5083 = vmatprep.mubr.msk.bf16.mxu1 %vm929_vm2, %v5219_v7 }
  0xf0   :  { %4250 = vst.msk [vmem:[%s7921_s4 + $0x4] sm:$0xf] %vm4248_vm4, %v4642_v28  ;;  %v3960_v42 = vmax.f32 %v3737_v31, %v3865_v37  ;;  %v3180_v47 = vsel %vm3160_vm3, %v2918_v23, -inf  ;;  %v3372_v48 = vsel %vm3160_vm3, %v3046_v24, -inf  ;;  %v2916_v49 = vmax.f32 %v2660_v21, 0.0  ;;  %v5222_v6 = vld [vmem:[%s7918_s0 + $0x1e0] sm:$0xff]  }
  0xf1   :  { %4282 = vst.msk [vmem:[%s7921_s4 + $0x84] sm:$0xf] %vm4248_vm4, %v4674_v35  ;;  %v4641_v50 = vpack.c.bf16 %v3928_v36, %v3928_v36  ;;  %v3181_v51 = vmax.f32 %v5826_v43, %v3180_v47  ;;  %v3373_v52 = vmax.f32 %v5829_v45, %v3372_v48  ;;  %v3044_v53 = vmax.f32 %v2788_v25, 0.0  ;;  %v4858_v56 = vpop.f32.mrf.mxu0  ;;  %v4986_v57 = vpop.f32.mrf.mxu1  ;;  %v5223_v7 = vld [vmem:[%s7918_s0 + $0x3e0] sm:$0xff]  }
  0xf2   :  { %v4673_v59 = vpack.c.bf16 %v3960_v42, %v3960_v42  ;;  %v3174_v60 = vsel %vm3160_vm3, %v2916_v49, -inf  ;;  %v2919_v61 = vmax.f32 %v2663_v32, 0.0  ;;  %v3047_v62 = vmax.f32 %v2791_v33, 0.0 }
  0xf3   :  { %4249 = vst.msk [vmem:[%s7921_s4] sm:$0xf] %vm4248_vm4, %v4641_v50  ;;  %v3175_v43 = vmax.f32 %v5835_v54, %v3174_v60  ;;  %v3366_v45 = vsel %vm3160_vm3, %v3044_v53, -inf  ;;  %v2661_v0 = vadd.f32 %v5680_v46, %v2398_v34  ;;  %v2526_v3 = vmul.f32 %v5675_v44, %v1918_v16  ;;  %v1422_v4 = vpop.f32.mrf.mxu0  ;;  %v1934_v5 = vpop.f32.mrf.mxu1  ;;  %v5224_v34 = vld [vmem:[%s7918_s0 + $0x1e8] sm:$0xff]  }
  0xf4   :  { %3551 = vst.msk [vmem:[#allocation2 + $0x30] sm:$0xff] %vm3160_vm3, %v3181_v51  ;;  %3615 = vst.msk [vmem:[#allocation2 + $0x230] sm:$0xff] %vm3160_vm3, %v3373_v52  ;;  %v3367_v54 = vmax.f32 %v5838_v55, %v3366_v45  ;;  %v3183_v8 = vsel %vm3160_vm3, %v2919_v61, -inf  ;;  %v3375_v9 = vsel %vm3160_vm3, %v3047_v62, -inf  ;;  %v2403_v10 = vmul.f32 %v4857_v26, %v5675_v44  ;;  %v5227_v51 = vld [vmem:[%s7918_s0 + $0x3f0] sm:$0xff]  }
  0xf5   :  { %4281 = vst.msk [vmem:[%s7921_s4 + $0x80] sm:$0xf] %vm4248_vm4, %v4673_v59  ;;  %v3184_v11 = vmax.f32 %v5848_v1, %v3183_v8  ;;  %v3376_v12 = vmax.f32 %v5851_v2, %v3375_v9  ;;  %v2917_v13 = vmax.f32 %v2661_v0, 0.0  ;;  %v2789_v14 = vadd.f32 %v5680_v46, %v2526_v3  ;;  %v4861_v15 = vpop.f32.mrf.mxu0  ;;  %4956 = vmatmul.mubr.msk.bf16.gmra.mxu0 %vm929_vm2, %v5220_v58  ;;  %v4989_v16 = vpop.f32.mrf.mxu1 }
  0xf6   :  { %3549 = vst.msk [vmem:[#allocation2 + $0x20] sm:$0xff] %vm3160_vm3, %v3175_v43  ;;  %3613 = vst.msk [vmem:[#allocation2 + $0x220] sm:$0xff] %vm3160_vm3, %v3367_v54  ;;  %v2666_v55 = vadd.f32 %v5680_v46, %v2403_v10  ;;  %v2531_v17 = vmul.f32 %v4985_v27, %v5675_v44  ;;  %v2401_v18 = vmul.f32 %v5675_v44, %v1419_v40  ;;  %5084 = vmatmul.mubr.msk.bf16.gmra.mxu1 %vm929_vm2, %v5221_v63  ;;  %v5225_v40 = vld [vmem:[%s7918_s0 + $0x3e8] sm:$0xff]  }
  0xf7   :  { %v2529_v19 = vmul.f32 %v5675_v44, %v1931_v41  ;;  %3552 = vst.msk [vmem:[#allocation2 + $0x38] sm:$0xff] %vm3160_vm3, %v3184_v11  ;;  %3616 = vst.msk [vmem:[#allocation2 + $0x238] sm:$0xff] %vm3160_vm3, %v3376_v12  ;;  %v3177_v1 = vsel %vm3160_vm3, %v2917_v13, -inf  ;;  %v3045_v2 = vmax.f32 %v2789_v14, 0.0  ;;  %v2404_v20 = vmul.f32 %v4858_v56, %v5675_v44  ;;  %v1435_v22 = vpop.f32.mrf.mxu0  ;;  %v1947_v23 = vpop.f32.mrf.mxu1  ;;  %4959 = vmatprep.mubr.msk.bf16.mxu0 %vm929_vm2, %v5222_v6 }
  0xf8   :  { %v2532_v21 = vmul.f32 %v4986_v57, %v5675_v44  ;;  %5087 = vmatprep.mubr.msk.bf16.mxu1 %vm929_vm2, %v5223_v7  ;;  %v3178_v24 = vmax.f32 %v5876_v38, %v3177_v1  ;;  %v2922_v25 = vmax.f32 %v2666_v55, 0.0  ;;  %v2794_v26 = vadd.f32 %v5680_v46, %v2531_v17 }
  0xf9   :  { %v2664_v27 = vadd.f32 %v5680_v46, %v2401_v18  ;;  %v3369_v28 = vsel %vm3160_vm3, %v3045_v2, -inf  ;;  %v2792_v29 = vadd.f32 %v5680_v46, %v2529_v19  ;;  %v2667_v30 = vadd.f32 %v5680_v46, %v2404_v20  ;;  %v4862_v32 = vpop.f32.mrf.mxu0  ;;  %v5951_v33 = vpop.f32.mrf.mxu1 }
  0xfa   :  { %v2795_v31 = vadd.f32 %v5680_v46, %v2532_v21  ;;  %3550 = vst.msk [vmem:[#allocation2 + $0x28] sm:$0xff] %vm3160_vm3, %v3178_v24  ;;  %v3370_v35 = vmax.f32 %v5879_v39, %v3369_v28  ;;  %v5959_v36 = vsel %vm3160_vm3, %v2922_v25, -inf  ;;  %v3050_v37 = vmax.f32 %v2794_v26, 0.0  ;;  %v5226_v39 = vld [vmem:[%s7918_s0 + $0x1f0] sm:$0xff]  }
  0xfb   :  { %v2920_v38 = vmax.f32 %v2664_v27, 0.0  ;;  %v3048_v41 = vmax.f32 %v2792_v29, 0.0  ;;  %v2923_v42 = vmax.f32 %v2667_v30, 0.0  ;;  %v2402_v48 = vmul.f32 %v5675_v44, %v1422_v4  ;;  %v5965_v49 = vpop.f32.mrf.mxu0  ;;  %v5967_v50 = vpop.f32.mrf.mxu1  ;;  %v5229_v27 = vld [vmem:[%s7918_s0 + $0x3f8] sm:$0xff]  }
  0xfc   :  { %v3051_v47 = vmax.f32 %v2795_v31, 0.0  ;;  %3614 = vst.msk [vmem:[#allocation2 + $0x228] sm:$0xff] %vm3160_vm3, %v3370_v35  ;;  %v5977_v52 = vsel %vm3160_vm3, %v3050_v37, -inf  ;;  %v2530_v56 = vmul.f32 %v5675_v44, %v1934_v5  ;;  %v2407_v57 = vmul.f32 %v4861_v15, %v5675_v44 }
  0xfd   :  { %v5980_v53 = vsel %vm3160_vm3, %v2920_v38, -inf  ;;  %v5985_v58 = vsel %vm3160_vm3, %v3048_v41, -inf  ;;  %v5988_v59 = vsel %vm3160_vm3, %v2923_v42, -inf  ;;  %v2665_v61 = vadd.f32 %v5680_v46, %v2402_v48  ;;  %v5994_v62 = vpop.f32.mrf.mxu0  ;;  %4960 = vmatmul.mubr.msk.bf16.gmra.mxu0 %vm929_vm2, %v5224_v34  ;;  %v5997_v63 = vpop.f32.mrf.mxu1 }
  0xfe   :  { %v5991_v60 = vsel %vm3160_vm3, %v3051_v47, -inf  ;;  %v3679_v43 = vld [vmem:[#allocation2 + $0x30] ss:$2 sm:$0xff]  ;;  %v3807_v45 = vld [vmem:[#allocation2 + $0x31] ss:$2 sm:$0xff]  ;;  %v2793_v3 = vadd.f32 %v5680_v46, %v2530_v56  ;;  %v2670_v4 = vadd.f32 %v5680_v46, %v2407_v57  ;;  %v2535_v5 = vmul.f32 %v4989_v16, %v5675_v44  ;;  %5088 = vmatmul.mubr.msk.bf16.gmra.mxu1 %vm929_vm2, %v5225_v40  ;;  %4963 = vmatprep.mubr.msk.bf16.mxu0 %vm929_vm2, %v5226_v39 }
  0xff   :  { %v3743_v0 = vld [vmem:[#allocation2 + $0x230] ss:$2 sm:$0xff]  ;;  %v2405_v6 = vmul.f32 %v5675_v44, %v1435_v22  ;;  %v3931_v7 = vmax.f32 %v3679_v43, %v3807_v45  ;;  %v3871_v54 = vld [vmem:[#allocation2 + $0x231] ss:$2 sm:$0xff]  ;;  %v2921_v8 = vmax.f32 %v2665_v61, 0.0  ;;  %v2533_v9 = vmul.f32 %v5675_v44, %v1947_v23  ;;  %v6006_v11 = vpop.f32.mrf.mxu0  ;;  %v6008_v12 = vpop.f32.mrf.mxu1  ;;  %5091 = vmatprep.mubr.msk.bf16.mxu1 %vm929_vm2, %v5227_v51 }
 0x100   :  { %v2408_v10 = vmul.f32 %v4862_v32, %v5675_v44  ;;  %v3963_v13 = vmax.f32 %v3743_v0, %v3871_v54  ;;  %v3049_v14 = vmax.f32 %v2793_v3, 0.0  ;;  %v2926_v15 = vmax.f32 %v2670_v4, 0.0  ;;  %v5228_v22 = vld [vmem:[%s7918_s0 + $0x1f8] sm:$0xff]  }
 0x101   :  { %v2798_v16 = vadd.f32 %v5680_v46, %v2535_v5  ;;  %v4644_v55 = vpack.c.bf16 %v3931_v7, %v3931_v7  ;;  %v3677_v17 = vld [vmem:[#allocation2 + $0x20] ss:$2 sm:$0xff]  ;;  %v3805_v18 = vld [vmem:[#allocation2 + $0x21] ss:$2 sm:$0xff]  ;;  %v6014_v19 = vsel %vm3160_vm3, %v2921_v8, -inf  ;;  %v2668_v1 = vadd.f32 %v5680_v46, %v2405_v6  ;;  %v4866_v20 = vpop.f32.mrf.mxu0  ;;  %v6018_v21 = vpop.f32.mrf.mxu1 }
 0x102   :  { %v2796_v2 = vadd.f32 %v5680_v46, %v2533_v9  ;;  %v4676_v23 = vpack.c.bf16 %v3963_v13, %v3963_v13  ;;  %v3930_v24 = vmax.f32 %v3677_v17, %v3805_v18  ;;  %v6024_v25 = vsel %vm3160_vm3, %v3049_v14, -inf }
 0x103   :  { %v3192_v26 = vsel %vm3160_vm3, %v2926_v15, -inf  ;;  %4252 = vst.msk [vmem:[%s7921_s4 + $0xc] sm:$0xf] %vm4248_vm4, %v4644_v55  ;;  %v3741_v28 = vld [vmem:[#allocation2 + $0x220] ss:$2 sm:$0xff]  ;;  %v3054_v31 = vmax.f32 %v2798_v16, 0.0  ;;  %v2671_v34 = vadd.f32 %v5680_v46, %v2408_v10  ;;  %v6036_v35 = vpop.f32.mrf.mxu0  ;;  %v6038_v37 = vpop.f32.mrf.mxu1  ;;  %v2536_v42 = vmul.f32 %v5951_v33, %v5675_v44 }
 0x104   :  { %v3869_v29 = vld [vmem:[#allocation2 + $0x221] ss:$2 sm:$0xff]  ;;  %v3193_v30 = vmax.f32 %v5959_v36, %v3192_v26  ;;  %v2924_v32 = vmax.f32 %v2668_v1, 0.0  ;;  %4284 = vst.msk [vmem:[%s7921_s4 + $0x8c] sm:$0xf] %vm4248_vm4, %v4676_v23  ;;  %v4643_v38 = vpack.c.bf16 %v3930_v24, %v3930_v24  ;;  %v3052_v41 = vmax.f32 %v2796_v2, 0.0 }
 0x105   :  { %v3962_v40 = vmax.f32 %v3741_v28, %v3869_v29  ;;  %v3384_v36 = vsel %vm3160_vm3, %v3054_v31, -inf  ;;  %v2927_v48 = vmax.f32 %v2671_v34, 0.0  ;;  %v2406_v39 = vmul.f32 %v5675_v44, %v5965_v49  ;;  %v6051_v51 = vpop.f32.mrf.mxu0  ;;  %4964 = vmatmul.mubr.msk.bf16.gmra.mxu0 %vm929_vm2, %v5228_v22  ;;  %v6054_v56 = vpop.f32.mrf.mxu1 }
 0x106   :  { %3555 = vst.msk [vmem:[#allocation2 + $0x50] sm:$0xff] %vm3160_vm3, %v3193_v30  ;;  %v3186_v47 = vsel %vm3160_vm3, %v2924_v32, -inf  ;;  %v3385_v57 = vmax.f32 %v5977_v52, %v3384_v36  ;;  %v3378_v43 = vsel %vm3160_vm3, %v3052_v41, -inf  ;;  %5092 = vmatmul.mubr.msk.bf16.gmra.mxu1 %vm929_vm2, %v5229_v27  ;;  %v2799_v0 = vadd.f32 %v5680_v46, %v2536_v42 }
 0x107   :  { %4251 = vst.msk [vmem:[%s7921_s4 + $0x8] sm:$0xf] %vm4248_vm4, %v4643_v38  ;;  %v4675_v33 = vpack.c.bf16 %v3962_v40, %v3962_v40  ;;  %v3187_v61 = vmax.f32 %v5980_v53, %v3186_v47  ;;  %v3379_v49 = vmax.f32 %v5985_v58, %v3378_v43  ;;  %v3195_v45 = vsel %vm3160_vm3, %v2927_v48, -inf  ;;  %v1467_v4 = vpop.f32.mrf.mxu0  ;;  %v1979_v5 = vpop.f32.mrf.mxu1 }
 0x108   :  { %v2669_v3 = vadd.f32 %v5680_v46, %v2406_v39  ;;  %3619 = vst.msk [vmem:[#allocation2 + $0x250] sm:$0xff] %vm3160_vm3, %v3385_v57  ;;  %v3196_v52 = vmax.f32 %v5988_v59, %v3195_v45  ;;  %v2534_v53 = vmul.f32 %v5675_v44, %v5967_v50  ;;  %v2411_v58 = vmul.f32 %v5994_v62, %v5675_v44 }
 0x109   :  { %4283 = vst.msk [vmem:[%s7921_s4 + $0x88] sm:$0xf] %vm4248_vm4, %v4675_v33  ;;  %v2539_v6 = vmul.f32 %v5997_v63, %v5675_v44  ;;  %v3055_v7 = vmax.f32 %v2799_v0, 0.0  ;;  %v2409_v8 = vmul.f32 %v5675_v44, %v6006_v11  ;;  %v2537_v9 = vmul.f32 %v5675_v44, %v6008_v12  ;;  %v6086_v59 = vpop.f32.mrf.mxu0  ;;  %v6088_v10 = vpop.f32.mrf.mxu1 }
 0x10a   :  { %3553 = vst.msk [vmem:[#allocation2 + $0x40] sm:$0xff] %vm3160_vm3, %v3187_v61  ;;  %3617 = vst.msk [vmem:[#allocation2 + $0x240] sm:$0xff] %vm3160_vm3, %v3379_v49  ;;  %v2925_v54 = vmax.f32 %v2669_v3, 0.0  ;;  %v2797_v50 = vadd.f32 %v5680_v46, %v2534_v53  ;;  %v2674_v62 = vadd.f32 %v5680_v46, %v2411_v58  ;;  %v2412_v13 = vmul.f32 %v4866_v20, %v5675_v44 }
 0x10b   :  { %3556 = vst.msk [vmem:[#allocation2 + $0x58] sm:$0xff] %vm3160_vm3, %v3196_v52  ;;  %v2802_v63 = vadd.f32 %v5680_v46, %v2539_v6  ;;  %v3387_v14 = vsel %vm3160_vm3, %v3055_v7, -inf  ;;  %v2672_v12 = vadd.f32 %v5680_v46, %v2409_v8  ;;  %v2800_v15 = vadd.f32 %v5680_v46, %v2537_v9  ;;  %v1470_v16 = vpop.f32.mrf.mxu0  ;;  %v1982_v55 = vpop.f32.mrf.mxu1 }
 0x10c   :  { %v3189_v11 = vsel %vm3160_vm3, %v2925_v54, -inf  ;;  %v3388_v17 = vmax.f32 %v5991_v60, %v3387_v14  ;;  %v3053_v1 = vmax.f32 %v2797_v50, 0.0  ;;  %v2930_v2 = vmax.f32 %v2674_v62, 0.0 }
 0x10d   :  { %v3190_v18 = vmax.f32 %v6014_v19, %v3189_v11  ;;  %v3058_v22 = vmax.f32 %v2802_v63, 0.0  ;;  %v2928_v23 = vmax.f32 %v2672_v12, 0.0  ;;  %v3056_v24 = vmax.f32 %v2800_v15, 0.0  ;;  %v6102_v26 = vpop.f32.mrf.mxu0  ;;  %v6104_v27 = vpop.f32.mrf.mxu1 }
 0x10e   :  { %v2675_v20 = vadd.f32 %v5680_v46, %v2412_v13  ;;  %3620 = vst.msk [vmem:[#allocation2 + $0x258] sm:$0xff] %vm3160_vm3, %v3388_v17  ;;  %v3381_v28 = vsel %vm3160_vm3, %v3053_v1, -inf  ;;  %v6110_v60 = vsel %vm3160_vm3, %v2930_v2, -inf  ;;  %v2540_v19 = vmul.f32 %v6018_v21, %v5675_v44 }
 0x10f   :  { %3554 = vst.msk [vmem:[#allocation2 + $0x48] sm:$0xff] %vm3160_vm3, %v3190_v18  ;;  %v2410_v29 = vmul.f32 %v5675_v44, %v6036_v35  ;;  %v3382_v30 = vmax.f32 %v6024_v25, %v3381_v28  ;;  %v6118_v31 = vsel %vm3160_vm3, %v3058_v22, -inf  ;;  %v6121_v32 = vsel %vm3160_vm3, %v2928_v23, -inf  ;;  %v6126_v38 = vpop.f32.mrf.mxu0  ;;  %v6128_v40 = vpop.f32.mrf.mxu1 }
 0x110   :  { %v6124_v34 = vsel %vm3160_vm3, %v3056_v24, -inf  ;;  %v2931_v41 = vmax.f32 %v2675_v20, 0.0  ;;  %v2803_v21 = vadd.f32 %v5680_v46, %v2540_v19  ;;  %v2538_v25 = vmul.f32 %v5675_v44, %v6038_v37 }
 0x111   :  { %v2673_v35 = vadd.f32 %v5680_v46, %v2410_v29  ;;  %3618 = vst.msk [vmem:[#allocation2 + $0x248] sm:$0xff] %vm3160_vm3, %v3382_v30  ;;  %v2415_v47 = vmul.f32 %v6051_v51, %v5675_v44  ;;  %v2543_v48 = vmul.f32 %v6054_v56, %v5675_v44  ;;  %v2413_v39 = vmul.f32 %v5675_v44, %v1467_v4  ;;  %v6141_v57 = vpop.f32.mrf.mxu0  ;;  %v6143_v61 = vpop.f32.mrf.mxu1 }
 0x112   :  { %v3683_v42 = vld [vmem:[#allocation2 + $0x50] ss:$2 sm:$0xff]  ;;  %v3811_v36 = vld [vmem:[#allocation2 + $0x51] ss:$2 sm:$0xff]  ;;  %v2541_v33 = vmul.f32 %v5675_v44, %v1979_v5  ;;  %v6146_v37 = vsel %vm3160_vm3, %v2931_v41, -inf  ;;  %v3059_v49 = vmax.f32 %v2803_v21, 0.0  ;;  %v2801_v0 = vadd.f32 %v5680_v46, %v2538_v25 }
 0x113   :  { %v3933_v43 = vmax.f32 %v3683_v42, %v3811_v36  ;;  %v2929_v45 = vmax.f32 %v2673_v35, 0.0  ;;  %v2678_v51 = vadd.f32 %v5680_v46, %v2415_v47  ;;  %v2806_v56 = vadd.f32 %v5680_v46, %v2543_v48  ;;  %v6152_v4 = vpop.f32.mrf.mxu0  ;;  %v6154_v5 = vpop.f32.mrf.mxu1 }
 0x114   :  { %v2676_v3 = vadd.f32 %v5680_v46, %v2413_v39  ;;  %v6157_v53 = vsel %vm3160_vm3, %v3059_v49, -inf  ;;  %v2804_v6 = vadd.f32 %v5680_v46, %v2541_v33  ;;  %v2416_v9 = vmul.f32 %v6086_v59, %v5675_v44 }
 0x115   :  { %v4646_v52 = vpack.c.bf16 %v3933_v43, %v3933_v43  ;;  %v6160_v58 = vsel %vm3160_vm3, %v2929_v45, -inf  ;;  %v3747_v7 = vld [vmem:[#allocation2 + $0x250] ss:$2 sm:$0xff]  ;;  %v3875_v54 = vld [vmem:[#allocation2 + $0x251] ss:$2 sm:$0xff]  ;;  %v2544_v50 = vmul.f32 %v6088_v10, %v5675_v44  ;;  %v2414_v62 = vmul.f32 %v5675_v44, %v1470_v16  ;;  %v6169_v13 = vpop.f32.mrf.mxu0  ;;  %v6171_v14 = vpop.f32.mrf.mxu1 }
 0x116   :  { %v3681_v8 = vld [vmem:[#allocation2 + $0x40] ss:$2 sm:$0xff]  ;;  %v2542_v63 = vmul.f32 %v5675_v44, %v1982_v55  ;;  %v3965_v11 = vmax.f32 %v3747_v7, %v3875_v54  ;;  %v3809_v12 = vld [vmem:[#allocation2 + $0x41] ss:$2 sm:$0xff]  ;;  %v3057_v15 = vmax.f32 %v2801_v0, 0.0  ;;  %v2934_v59 = vmax.f32 %v2678_v51, 0.0 }
 0x117   :  { %4254 = vst.msk [vmem:[%s7921_s4 + $0x14] sm:$0xf] %vm4248_vm4, %v4646_v52  ;;  %v3062_v17 = vmax.f32 %v2806_v56, 0.0  ;;  %v3932_v18 = vmax.f32 %v3681_v8, %v3809_v12  ;;  %v2932_v10 = vmax.f32 %v2676_v3, 0.0  ;;  %v3060_v1 = vmax.f32 %v2804_v6, 0.0  ;;  %v6178_v55 = vpop.f32.mrf.mxu0  ;;  %v6180_v2 = vpop.f32.mrf.mxu1 }
 0x118   :  { %v2679_v16 = vadd.f32 %v5680_v46, %v2416_v9  ;;  %v4678_v22 = vpack.c.bf16 %v3965_v11, %v3965_v11  ;;  %v3745_v23 = vld [vmem:[#allocation2 + $0x240] ss:$2 sm:$0xff]  ;;  %v3873_v24 = vld [vmem:[#allocation2 + $0x241] ss:$2 sm:$0xff]  ;;  %v6183_v20 = vsel %vm3160_vm3, %v3057_v15, -inf  ;;  %v3204_v28 = vsel %vm3160_vm3, %v2934_v59, -inf }
 0x119   :  { %v2807_v19 = vadd.f32 %v5680_v46, %v2544_v50  ;;  %v4645_v29 = vpack.c.bf16 %v3932_v18, %v3932_v18  ;;  %v3964_v30 = vmax.f32 %v3745_v23, %v3873_v24  ;;  %v3205_v41 = vmax.f32 %v6110_v60, %v3204_v28  ;;  %v6189_v35 = vpop.f32.mrf.mxu0  ;;  %v6191_v25 = vpop.f32.mrf.mxu1 }
 0x11a   :  { %v3396_v21 = vsel %vm3160_vm3, %v3062_v17, -inf  ;;  %4286 = vst.msk [vmem:[%s7921_s4 + $0x94] sm:$0xf] %vm4248_vm4, %v4678_v22  ;;  %v3198_v36 = vsel %vm3160_vm3, %v2932_v10, -inf  ;;  %v3390_v47 = vsel %vm3160_vm3, %v3060_v1, -inf  ;;  %v2935_v48 = vmax.f32 %v2679_v16, 0.0 }
 0x11b   :  { %v3397_v42 = vmax.f32 %v6118_v31, %v3396_v21  ;;  %4253 = vst.msk [vmem:[%s7921_s4 + $0x10] sm:$0xf] %vm4248_vm4, %v4645_v29  ;;  %v4677_v60 = vpack.c.bf16 %v3964_v30, %v3964_v30  ;;  %v3199_v39 = vmax.f32 %v6121_v32, %v3198_v36  ;;  %v3391_v33 = vmax.f32 %v6124_v34, %v3390_v47  ;;  %v6207_v49 = vpop.f32.mrf.mxu0  ;;  %v6209_v31 = vpop.f32.mrf.mxu1 }
 0x11c   :  { %3559 = vst.msk [vmem:[#allocation2 + $0x70] sm:$0xff] %vm3160_vm3, %v3205_v41  ;;  %v3063_v43 = vmax.f32 %v2807_v19, 0.0  ;;  %v3207_v45 = vsel %vm3160_vm3, %v2935_v48, -inf  ;;  %v2677_v0 = vadd.f32 %v5680_v46, %v2414_v62  ;;  %v2805_v51 = vadd.f32 %v5680_v46, %v2542_v63  ;;  %v6230_v46 = vld [vmem:[%s7919_s2] ss:$0 sm:$0xff] }
 0x11d   :  { %3623 = vst.msk [vmem:[#allocation2 + $0x270] sm:$0xff] %vm3160_vm3, %v3397_v42  ;;  %v2419_v56 = vmul.f32 %v6102_v26, %v5675_v44  ;;  %3557 = vst.msk [vmem:[#allocation2 + $0x60] sm:$0xff] %vm3160_vm3, %v3199_v39  ;;  %v3208_v32 = vmax.f32 %v6146_v37, %v3207_v45  ;;  %v2547_v3 = vmul.f32 %v6104_v27, %v5675_v44  ;;  %v6234_v52 = vpop.f32.mrf.mxu0  ;;  %v6236_v6 = vpop.f32.mrf.mxu1  ;;  %v6242_v44 = vld [vmem:[%s7920_s3] ss:$0 sm:$0xff] }
 0x11e   :  { %4285 = vst.msk [vmem:[%s7921_s4 + $0x90] sm:$0xf] %vm4248_vm4, %v4677_v60  ;;  %v3399_v34 = vsel %vm3160_vm3, %v3063_v43, -inf  ;;  %v2417_v26 = vmul.f32 %v6230_v46, %v6126_v38  ;;  %v2933_v37 = vmax.f32 %v2677_v0, 0.0  ;;  %v3061_v54 = vmax.f32 %v2805_v51, 0.0 }
 0x11f   :  { %3621 = vst.msk [vmem:[#allocation2 + $0x260] sm:$0xff] %vm3160_vm3, %v3391_v33  ;;  %v3400_v7 = vmax.f32 %v6157_v53, %v3399_v34  ;;  %v2682_v27 = vadd.f32 %v6242_v44, %v2419_v56  ;;  %3560 = vst.msk [vmem:[#allocation2 + $0x78] sm:$0xff] %vm3160_vm3, %v3208_v32  ;;  %v2810_v8 = vadd.f32 %v6242_v44, %v2547_v3  ;;  %v6252_v50 = vpop.f32.mrf.mxu0  ;;  %v6254_v62 = vpop.f32.mrf.mxu1 }
 0x120   :  { %v2680_v38 = vadd.f32 %v6242_v44, %v2417_v26  ;;  %v2545_v9 = vmul.f32 %v6230_v46, %v6128_v40  ;;  %v2420_v53 = vmul.f32 %v6230_v46, %v6141_v57  ;;  %v3201_v63 = vsel %vm3160_vm3, %v2933_v37, -inf }
 0x121   :  { %3624 = vst.msk [vmem:[#allocation2 + $0x278] sm:$0xff] %vm3160_vm3, %v3400_v7  ;;  %v3393_v11 = vsel %vm3160_vm3, %v3061_v54, -inf  ;;  %v2938_v12 = vmax.f32 %v2682_v27, 0.0  ;;  %v2548_v15 = vmul.f32 %v6230_v46, %v6143_v61  ;;  %v3202_v59 = vmax.f32 %v6160_v58, %v3201_v63  ;;  %v6263_v18 = vpop.f32.mrf.mxu0  ;;  %v6265_v10 = vpop.f32.mrf.mxu1 }
 0x122   :  { %v3394_v40 = vmax.f32 %v6183_v20, %v3393_v11  ;;  %v3066_v17 = vmax.f32 %v2810_v8, 0.0  ;;  %v2936_v57 = vmax.f32 %v2680_v38, 0.0  ;;  %v2808_v16 = vadd.f32 %v6242_v44, %v2545_v9 }
 0x123   :  { %v6268_v1 = vsel %vm3160_vm3, %v2938_v12, -inf  ;;  %v2683_v22 = vadd.f32 %v6242_v44, %v2420_v53  ;;  %v2811_v23 = vadd.f32 %v6242_v44, %v2548_v15  ;;  %3558 = vst.msk [vmem:[#allocation2 + $0x68] sm:$0xff] %vm3160_vm3, %v3202_v59  ;;  %v2418_v24 = vmul.f32 %v6230_v46, %v6152_v4  ;;  %v6285_v28 = vpop.f32.mrf.mxu0  ;;  %v6287_v19 = vpop.f32.mrf.mxu1 }
 0x124   :  { %3622 = vst.msk [vmem:[#allocation2 + $0x268] sm:$0xff] %vm3160_vm3, %v3394_v40  ;;  %v6276_v61 = vsel %vm3160_vm3, %v3066_v17, -inf  ;;  %v6279_v58 = vsel %vm3160_vm3, %v2936_v57, -inf  ;;  %v2546_v20 = vmul.f32 %v6230_v46, %v6154_v5  ;;  %v3064_v29 = vmax.f32 %v2808_v16, 0.0 }
 0x125   :  { %v2939_v30 = vmax.f32 %v2683_v22, 0.0  ;;  %v3067_v41 = vmax.f32 %v2811_v23, 0.0  ;;  %v2423_v21 = vmul.f32 %v6230_v46, %v6169_v13  ;;  %v2681_v42 = vadd.f32 %v6242_v44, %v2418_v24  ;;  %v6297_v47 = vpop.f32.mrf.mxu0  ;;  %v6299_v48 = vpop.f32.mrf.mxu1 }
 0x126   :  { %v2809_v36 = vadd.f32 %v6242_v44, %v2546_v20  ;;  %v2551_v4 = vmul.f32 %v6230_v46, %v6171_v14  ;;  %v2421_v5 = vmul.f32 %v6230_v46, %v6178_v55  ;;  %v3687_v60 = vld [vmem:[#allocation2 + $0x70] ss:$2 sm:$0xff]  ;;  %v3815_v39 = vld [vmem:[#allocation2 + $0x71] ss:$2 sm:$0xff]  ;;  %v6302_v33 = vsel %vm3160_vm3, %v3064_v29, -inf }
 0x127   :  { %v6305_v13 = vsel %vm3160_vm3, %v2939_v30, -inf  ;;  %v2686_v43 = vadd.f32 %v6242_v44, %v2423_v21  ;;  %v2549_v14 = vmul.f32 %v6230_v46, %v6180_v2  ;;  %v3935_v45 = vmax.f32 %v3687_v60, %v3815_v39  ;;  %v6314_v34 = vpop.f32.mrf.mxu0  ;;  %v6316_v3 = vpop.f32.mrf.mxu1 }
 0x128   :  { %v3751_v0 = vld [vmem:[#allocation2 + $0x270] ss:$2 sm:$0xff]  ;;  %v3879_v55 = vld [vmem:[#allocation2 + $0x271] ss:$2 sm:$0xff]  ;;  %v6311_v51 = vsel %vm3160_vm3, %v3067_v41, -inf  ;;  %v2937_v56 = vmax.f32 %v2681_v42, 0.0  ;;  %v2814_v32 = vadd.f32 %v6242_v44, %v2551_v4  ;;  %v2684_v54 = vadd.f32 %v6242_v44, %v2421_v5 }
 0x129   :  { %v3967_v26 = vmax.f32 %v3751_v0, %v3879_v55  ;;  %v3065_v7 = vmax.f32 %v2809_v36, 0.0  ;;  %v2942_v37 = vmax.f32 %v2686_v43, 0.0  ;;  %v4648_v27 = vpack.c.bf16 %v3935_v45, %v3935_v45  ;;  %v6323_v9 = vpop.f32.mrf.mxu0  ;;  %v6325_v53 = vpop.f32.mrf.mxu1 }
 0x12a   :  { %v6320_v2 = vsel %vm3160_vm3, %v2937_v56, -inf  ;;  %v3070_v8 = vmax.f32 %v2814_v32, 0.0  ;;  %v2812_v38 = vadd.f32 %v6242_v44, %v2549_v14  ;;  %v3685_v11 = vld [vmem:[#allocation2 + $0x60] ss:$2 sm:$0xff]  ;;  %v3813_v12 = vld [vmem:[#allocation2 + $0x61] ss:$2 sm:$0xff]  ;;  %v2424_v59 = vmul.f32 %v6230_v46, %v6189_v35 }
 0x12b   :  { %v4680_v63 = vpack.c.bf16 %v3967_v26, %v3967_v26  ;;  %v3749_v15 = vld [vmem:[#allocation2 + $0x260] ss:$2 sm:$0xff]  ;;  %v2552_v40 = vmul.f32 %v6230_v46, %v6191_v25  ;;  %v2422_v17 = vmul.f32 %v6230_v46, %v6207_v49  ;;  %4256 = vst.msk [vmem:[%s7921_s4 + $0x1c] sm:$0xf] %vm4248_vm4, %v4648_v27  ;;  %v3934_v57 = vmax.f32 %v3685_v11, %v3813_v12  ;;  %v3877_v16 = vld [vmem:[#allocation2 + $0x261] ss:$2 sm:$0xff]  ;;  %v6342_v24 = vpop.f32.mrf.mxu0  ;;  %v6344_v25 = vpop.f32.mrf.mxu1 }
 0x12c   :  { %v6338_v22 = vsel %vm3160_vm3, %v3065_v7, -inf  ;;  %v3216_v23 = vsel %vm3160_vm3, %v2942_v37, -inf  ;;  %v3408_v35 = vsel %vm3160_vm3, %v3070_v8, -inf  ;;  %v3966_v49 = vmax.f32 %v3749_v15, %v3877_v16 }
 0x12d   :  { %4288 = vst.msk [vmem:[%s7921_s4 + $0x9c] sm:$0xf] %vm4248_vm4, %v4680_v63  ;;  %v3217_v20 = vmax.f32 %v6268_v1, %v3216_v23  ;;  %v3409_v29 = vmax.f32 %v6276_v61, %v3408_v35  ;;  %v2940_v30 = vmax.f32 %v2684_v54, 0.0  ;;  %v4647_v41 = vpack.c.bf16 %v3934_v57, %v3934_v57  ;;  %v6354_v4 = vpop.f32.mrf.mxu0  ;;  %v6356_v5 = vpop.f32.mrf.mxu1 }
 0x12e   :  { %v3068_v21 = vmax.f32 %v2812_v38, 0.0  ;;  %v2687_v42 = vadd.f32 %v6242_v44, %v2424_v59  ;;  %v2815_v36 = vadd.f32 %v6242_v44, %v2552_v40  ;;  %v4679_v60 = vpack.c.bf16 %v3966_v49, %v3966_v49 }
 0x12f   :  { %3563 = vst.msk [vmem:[#allocation2 + $0x90] sm:$0xff] %vm3160_vm3, %v3217_v20  ;;  %3627 = vst.msk [vmem:[#allocation2 + $0x290] sm:$0xff] %vm3160_vm3, %v3409_v29  ;;  %v3210_v1 = vsel %vm3160_vm3, %v2940_v30, -inf  ;;  %v2685_v61 = vadd.f32 %v6242_v44, %v2422_v17  ;;  %v2550_v39 = vmul.f32 %v6230_v46, %v6209_v31  ;;  %v6370_v55 = vpop.f32.mrf.mxu0  ;;  %v6372_v56 = vpop.f32.mrf.mxu1  ;;  %v2555_v54 = vmul.f32 %v6230_v46, %v6236_v6 }
 0x130   :  { %4255 = vst.msk [vmem:[%s7921_s4 + $0x18] sm:$0xf] %vm4248_vm4, %v4647_v41  ;;  %v3211_v43 = vmax.f32 %v6279_v58, %v3210_v1  ;;  %v3402_v14 = vsel %vm3160_vm3, %v3068_v21, -inf  ;;  %v2943_v45 = vmax.f32 %v2687_v42, 0.0  ;;  %v3071_v0 = vmax.f32 %v2815_v36, 0.0 }
 0x131   :  { %4287 = vst.msk [vmem:[%s7921_s4 + $0x98] sm:$0xf] %vm4248_vm4, %v4679_v60  ;;  %v3403_v31 = vmax.f32 %v6302_v33, %v3402_v14  ;;  %v2941_v32 = vmax.f32 %v2685_v61, 0.0  ;;  %v2813_v26 = vadd.f32 %v6242_v44, %v2550_v39  ;;  %v2427_v58 = vmul.f32 %v6230_v46, %v6234_v52  ;;  %v6389_v8 = vpop.f32.mrf.mxu0  ;;  %v6391_v33 = vpop.f32.mrf.mxu1 }
 0x132   :  { %3561 = vst.msk [vmem:[#allocation2 + $0x80] sm:$0xff] %vm3160_vm3, %v3211_v43  ;;  %v3219_v7 = vsel %vm3160_vm3, %v2943_v45, -inf  ;;  %v3411_v37 = vsel %vm3160_vm3, %v3071_v0, -inf  ;;  %v2425_v27 = vmul.f32 %v6230_v46, %v6252_v50  ;;  %v2818_v15 = vadd.f32 %v6242_v44, %v2555_v54 }
 0x133   :  { %3625 = vst.msk [vmem:[#allocation2 + $0x280] sm:$0xff] %vm3160_vm3, %v3403_v31  ;;  %v3220_v52 = vmax.f32 %v6305_v13, %v3219_v7  ;;  %v3412_v38 = vmax.f32 %v6311_v51, %v3411_v37  ;;  %v3213_v63 = vsel %vm3160_vm3, %v2941_v32, -inf  ;;  %v3069_v11 = vmax.f32 %v2813_v26, 0.0  ;;  %v6401_v59 = vpop.f32.mrf.mxu0  ;;  %v6403_v40 = vpop.f32.mrf.mxu1 }
 0x134   :  { %v3214_v12 = vmax.f32 %v6320_v2, %v3213_v63  ;;  %v2690_v6 = vadd.f32 %v6242_v44, %v2427_v58  ;;  %v2688_v50 = vadd.f32 %v6242_v44, %v2425_v27  ;;  %v2553_v51 = vmul.f32 %v6230_v46, %v6254_v62 }
 0x135   :  { %3564 = vst.msk [vmem:[#allocation2 + $0x98] sm:$0xff] %vm3160_vm3, %v3220_v52  ;;  %3628 = vst.msk [vmem:[#allocation2 + $0x298] sm:$0xff] %vm3160_vm3, %v3412_v38  ;;  %v3405_v13 = vsel %vm3160_vm3, %v3069_v11, -inf  ;;  %v2428_v2 = vmul.f32 %v6230_v46, %v6263_v18  ;;  %v2556_v17 = vmul.f32 %v6230_v46, %v6265_v10  ;;  %v3074_v23 = vmax.f32 %v2818_v15, 0.0  ;;  %v6416_v49 = vpop.f32.mrf.mxu0  ;;  %v6418_v20 = vpop.f32.mrf.mxu1 }
 0x136   :  { %3562 = vst.msk [vmem:[#allocation2 + $0x88] sm:$0xff] %vm3160_vm3, %v3214_v12  ;;  %v3406_v57 = vmax.f32 %v6338_v22, %v3405_v13  ;;  %v2946_v16 = vmax.f32 %v2690_v6, 0.0  ;;  %v2944_v35 = vmax.f32 %v2688_v50, 0.0  ;;  %v2816_v29 = vadd.f32 %v6242_v44, %v2553_v51 }
 0x137   :  { %v2691_v62 = vadd.f32 %v6242_v44, %v2428_v2  ;;  %v2819_v18 = vadd.f32 %v6242_v44, %v2556_v17  ;;  %v2426_v10 = vmul.f32 %v6230_v46, %v6285_v28  ;;  %v6430_v30 = vsel %vm3160_vm3, %v3074_v23, -inf  ;;  %v6437_v42 = vpop.f32.mrf.mxu0  ;;  %v6439_v36 = vpop.f32.mrf.mxu1 }
 0x138   :  { %3626 = vst.msk [vmem:[#allocation2 + $0x288] sm:$0xff] %vm3160_vm3, %v3406_v57  ;;  %v6427_v22 = vsel %vm3160_vm3, %v2946_v16, -inf  ;;  %v6433_v41 = vsel %vm3160_vm3, %v2944_v35, -inf  ;;  %v2554_v21 = vmul.f32 %v6230_v46, %v6287_v19  ;;  %v3072_v60 = vmax.f32 %v2816_v29, 0.0 }
 0x139   :  { %v2947_v28 = vmax.f32 %v2691_v62, 0.0  ;;  %v3075_v1 = vmax.f32 %v2819_v18, 0.0  ;;  %v2689_v61 = vadd.f32 %v6242_v44, %v2426_v10  ;;  %v2431_v43 = vmul.f32 %v6230_v46, %v6297_v47  ;;  %v6449_v45 = vpop.f32.mrf.mxu0  ;;  %v6451_v0 = vpop.f32.mrf.mxu1 }
 0x13a   :  { %v2817_v39 = vadd.f32 %v6242_v44, %v2554_v21  ;;  %v2559_v14 = vmul.f32 %v6230_v46, %v6299_v48  ;;  %v2429_v19 = vmul.f32 %v6230_v46, %v6314_v34  ;;  %v6454_v31 = vsel %vm3160_vm3, %v3072_v60, -inf }
 0x13b   :  { %v6457_v32 = vsel %vm3160_vm3, %v2947_v28, -inf  ;;  %v6460_v26 = vsel %vm3160_vm3, %v3075_v1, -inf  ;;  %v2945_v47 = vmax.f32 %v2689_v61, 0.0  ;;  %v2694_v37 = vadd.f32 %v6242_v44, %v2431_v43  ;;  %v6467_v52 = vpop.f32.mrf.mxu0  ;;  %v6469_v38 = vpop.f32.mrf.mxu1 }
 0x13c   :  { %v3691_v58 = vld [vmem:[#allocation2 + $0x90] ss:$2 sm:$0xff]  ;;  %v3819_v7 = vld [vmem:[#allocation2 + $0x91] ss:$2 sm:$0xff]  ;;  %v2822_v34 = vadd.f32 %v6242_v44, %v2559_v14  ;;  %v2692_v54 = vadd.f32 %v6242_v44, %v2429_v19  ;;  %v2557_v27 = vmul.f32 %v6230_v46, %v6316_v3  ;;  %v2432_v15 = vmul.f32 %v6230_v46, %v6323_v9 }
 0x13d   :  { %v3755_v48 = vld [vmem:[#allocation2 + $0x290] ss:$2 sm:$0xff]  ;;  %v3937_v63 = vmax.f32 %v3691_v58, %v3819_v7  ;;  %v3883_v11 = vld [vmem:[#allocation2 + $0x291] ss:$2 sm:$0xff]  ;;  %v3689_v12 = vld [vmem:[#allocation2 + $0x80] ss:$2 sm:$0xff]  ;;  %v2560_v50 = vmul.f32 %v6230_v46, %v6325_v53  ;;  %v2430_v13 = vmul.f32 %v6230_v46, %v6342_v24  ;;  %v6480_v57 = vpop.f32.mrf.mxu0  ;;  %v6482_v16 = vpop.f32.mrf.mxu1 }
 0x13e   :  { %v3817_v6 = vld [vmem:[#allocation2 + $0x81] ss:$2 sm:$0xff]  ;;  %v3969_v51 = vmax.f32 %v3755_v48, %v3883_v11  ;;  %v6478_v3 = vsel %vm3160_vm3, %v2945_v47, -inf  ;;  %v3073_v17 = vmax.f32 %v2817_v39, 0.0  ;;  %v2950_v9 = vmax.f32 %v2694_v37, 0.0 }
 0x13f   :  { %v3936_v2 = vmax.f32 %v3689_v12, %v3817_v6  ;;  %v4650_v23 = vpack.c.bf16 %v3937_v63, %v3937_v63  ;;  %v3753_v35 = vld [vmem:[#allocation2 + $0x280] ss:$2 sm:$0xff]  ;;  %v3881_v29 = vld [vmem:[#allocation2 + $0x281] ss:$2 sm:$0xff]  ;;  %v3078_v62 = vmax.f32 %v2822_v34, 0.0  ;;  %v2820_v53 = vadd.f32 %v6242_v44, %v2557_v27  ;;  %v6488_v60 = vpop.f32.mrf.mxu0  ;;  %v6490_v28 = vpop.f32.mrf.mxu1 }
 0x140   :  { %v4682_v18 = vpack.c.bf16 %v3969_v51, %v3969_v51  ;;  %v3968_v24 = vmax.f32 %v3753_v35, %v3881_v29  ;;  %v6486_v21 = vsel %vm3160_vm3, %v3073_v17, -inf  ;;  %v3228_v1 = vsel %vm3160_vm3, %v2950_v9, -inf }
 0x141   :  { %v4649_v10 = vpack.c.bf16 %v3936_v2, %v3936_v2  ;;  %4258 = vst.msk [vmem:[%s7921_s4 + $0x24] sm:$0xf] %vm4248_vm4, %v4650_v23  ;;  %v3420_v61 = vsel %vm3160_vm3, %v3078_v62, -inf  ;;  %v2948_v39 = vmax.f32 %v2692_v54, 0.0  ;;  %v3076_v43 = vmax.f32 %v2820_v53, 0.0  ;;  %v6509_v7 = vpop.f32.mrf.mxu0  ;;  %v6511_v48 = vpop.f32.mrf.mxu1 }
 0x142   :  { %4290 = vst.msk [vmem:[%s7921_s4 + $0xa4] sm:$0xf] %vm4248_vm4, %v4682_v18  ;;  %v4681_v14 = vpack.c.bf16 %v3968_v24, %v3968_v24  ;;  %v3229_v19 = vmax.f32 %v6427_v22, %v3228_v1  ;;  %v3421_v47 = vmax.f32 %v6430_v30, %v3420_v61  ;;  %v2695_v58 = vadd.f32 %v6242_v44, %v2432_v15 }
 0x143   :  { %4257 = vst.msk [vmem:[%s7921_s4 + $0x20] sm:$0xf] %vm4248_vm4, %v4649_v10  ;;  %v3222_v37 = vsel %vm3160_vm3, %v2948_v39, -inf  ;;  %v3414_v34 = vsel %vm3160_vm3, %v3076_v43, -inf  ;;  %v2823_v54 = vadd.f32 %v6242_v44, %v2560_v50  ;;  %v2693_v27 = vadd.f32 %v6242_v44, %v2430_v13  ;;  %v6527_v12 = vpop.f32.mrf.mxu0  ;;  %v6529_v6 = vpop.f32.mrf.mxu1 }
 0x144   :  { %4289 = vst.msk [vmem:[%s7921_s4 + $0xa0] sm:$0xf] %vm4248_vm4, %v4681_v14  ;;  %v3223_v22 = vmax.f32 %v6433_v41, %v3222_v37  ;;  %v3415_v30 = vmax.f32 %v6454_v31, %v3414_v34  ;;  %v2951_v63 = vmax.f32 %v2695_v58, 0.0  ;;  %v2558_v11 = vmul.f32 %v6230_v46, %v6344_v25 }
 0x145   :  { %3567 = vst.msk [vmem:[#allocation2 + $0xb0] sm:$0xff] %vm3160_vm3, %v3229_v19  ;;  %3631 = vst.msk [vmem:[#allocation2 + $0x2b0] sm:$0xff] %vm3160_vm3, %v3421_v47  ;;  %v3079_v15 = vmax.f32 %v2823_v54, 0.0  ;;  %v2949_v50 = vmax.f32 %v2693_v27, 0.0  ;;  %v2435_v13 = vmul.f32 %v6230_v46, %v6354_v4  ;;  %v2563_v51 = vmul.f32 %v6230_v46, %v6356_v5  ;;  %v6543_v17 = vpop.f32.mrf.mxu0  ;;  %v6545_v4 = vpop.f32.mrf.mxu1 }
 0x146   :  { %3565 = vst.msk [vmem:[#allocation2 + $0xa0] sm:$0xff] %vm3160_vm3, %v3223_v22  ;;  %3629 = vst.msk [vmem:[#allocation2 + $0x2a0] sm:$0xff] %vm3160_vm3, %v3415_v30  ;;  %v3231_v41 = vsel %vm3160_vm3, %v2951_v63, -inf  ;;  %v2821_v25 = vadd.f32 %v6242_v44, %v2558_v11  ;;  %v2433_v31 = vmul.f32 %v6230_v46, %v6370_v55  ;;  %v2561_v2 = vmul.f32 %v6230_v46, %v6372_v56 }
 0x147   :  { %v3232_v5 = vmax.f32 %v6457_v32, %v3231_v41  ;;  %v3423_v23 = vsel %vm3160_vm3, %v3079_v15, -inf  ;;  %v3225_v35 = vsel %vm3160_vm3, %v2949_v50, -inf  ;;  %v2698_v29 = vadd.f32 %v6242_v44, %v2435_v13  ;;  %v6554_v56 = vpop.f32.mrf.mxu0  ;;  %v6556_v18 = vpop.f32.mrf.mxu1 }
 0x148   :  { %v3424_v9 = vmax.f32 %v6460_v26, %v3423_v23  ;;  %v3226_v62 = vmax.f32 %v6478_v3, %v3225_v35  ;;  %v3077_v55 = vmax.f32 %v2821_v25, 0.0  ;;  %v2826_v53 = vadd.f32 %v6242_v44, %v2563_v51 }
 0x149   :  { %3568 = vst.msk [vmem:[#allocation2 + $0xb8] sm:$0xff] %vm3160_vm3, %v3232_v5  ;;  %v2954_v32 = vmax.f32 %v2698_v29, 0.0  ;;  %v2696_v10 = vadd.f32 %v6242_v44, %v2433_v31  ;;  %v2824_v24 = vadd.f32 %v6242_v44, %v2561_v2  ;;  %v2436_v1 = vmul.f32 %v6230_v46, %v6389_v8  ;;  %v6570_v43 = vpop.f32.mrf.mxu0  ;;  %v6572_v14 = vpop.f32.mrf.mxu1 }
 0x14a   :  { %3632 = vst.msk [vmem:[#allocation2 + $0x2b8] sm:$0xff] %vm3160_vm3, %v3424_v9  ;;  %3566 = vst.msk [vmem:[#allocation2 + $0xa8] sm:$0xff] %vm3160_vm3, %v3226_v62  ;;  %v3417_v26 = vsel %vm3160_vm3, %v3077_v55, -inf  ;;  %v3082_v3 = vmax.f32 %v2826_v53, 0.0  ;;  %v2564_v61 = vmul.f32 %v6230_v46, %v6391_v33  ;;  %v2434_v39 = vmul.f32 %v6230_v46, %v6401_v59 }
 0x14b   :  { %v3418_v19 = vmax.f32 %v6486_v21, %v3417_v26  ;;  %v6576_v8 = vsel %vm3160_vm3, %v2954_v32, -inf  ;;  %v2952_v47 = vmax.f32 %v2696_v10, 0.0  ;;  %v3080_v58 = vmax.f32 %v2824_v24, 0.0  ;;  %v6584_v54 = vpop.f32.mrf.mxu0  ;;  %v6586_v27 = vpop.f32.mrf.mxu1 }
 0x14c   :  { %v6579_v37 = vsel %vm3160_vm3, %v3082_v3, -inf  ;;  %v2699_v34 = vadd.f32 %v6242_v44, %v2436_v1  ;;  %v2827_v33 = vadd.f32 %v6242_v44, %v2564_v61  ;;  %v2697_v59 = vadd.f32 %v6242_v44, %v2434_v39 }
 0x14d   :  { %3630 = vst.msk [vmem:[#allocation2 + $0x2a8] sm:$0xff] %vm3160_vm3, %v3418_v19  ;;  %v6590_v21 = vsel %vm3160_vm3, %v2952_v47, -inf  ;;  %v6593_v22 = vsel %vm3160_vm3, %v3080_v58, -inf  ;;  %v2562_v30 = vmul.f32 %v6230_v46, %v6403_v40  ;;  %v2439_v63 = vmul.f32 %v6230_v46, %v6416_v49  ;;  %v6601_v51 = vpop.f32.mrf.mxu0  ;;  %v6603_v41 = vpop.f32.mrf.mxu1 }
 0x14e   :  { %v2955_v11 = vmax.f32 %v2699_v34, 0.0  ;;  %v3083_v15 = vmax.f32 %v2827_v33, 0.0  ;;  %v2953_v50 = vmax.f32 %v2697_v59, 0.0  ;;  %v2567_v13 = vmul.f32 %v6230_v46, %v6418_v20 }
 0x14f   :  { %v2825_v25 = vadd.f32 %v6242_v44, %v2562_v30  ;;  %v2702_v31 = vadd.f32 %v6242_v44, %v2439_v63  ;;  %v2437_v40 = vmul.f32 %v6230_v46, %v6437_v42  ;;  %v2565_v49 = vmul.f32 %v6230_v46, %v6439_v36  ;;  %v6620_v9 = vpop.f32.mrf.mxu0  ;;  %v6622_v62 = vpop.f32.mrf.mxu1 }
 0x150   :  { %v3695_v2 = vld [vmem:[#allocation2 + $0xb0] ss:$2 sm:$0xff]  ;;  %v3823_v5 = vld [vmem:[#allocation2 + $0xb1] ss:$2 sm:$0xff]  ;;  %v6612_v23 = vsel %vm3160_vm3, %v2955_v11, -inf  ;;  %v6615_v20 = vsel %vm3160_vm3, %v3083_v15, -inf  ;;  %v2830_v35 = vadd.f32 %v6242_v44, %v2567_v13  ;;  %v2440_v29 = vmul.f32 %v6230_v46, %v6449_v45 }
 0x151   :  { %v3939_v42 = vmax.f32 %v3695_v2, %v3823_v5  ;;  %v3759_v55 = vld [vmem:[#allocation2 + $0x2b0] ss:$2 sm:$0xff]  ;;  %v3887_v36 = vld [vmem:[#allocation2 + $0x2b1] ss:$2 sm:$0xff]  ;;  %v3693_v53 = vld [vmem:[#allocation2 + $0xa0] ss:$2 sm:$0xff]  ;;  %v2700_v32 = vadd.f32 %v6242_v44, %v2437_v40  ;;  %v2828_v10 = vadd.f32 %v6242_v44, %v2565_v49  ;;  %v2568_v24 = vmul.f32 %v6230_v46, %v6451_v0  ;;  %v6631_v39 = vpop.f32.mrf.mxu0  ;;  %v6633_v19 = vpop.f32.mrf.mxu1 }
 0x152   :  { %v3971_v1 = vmax.f32 %v3759_v55, %v3887_v36  ;;  %v3821_v26 = vld [vmem:[#allocation2 + $0xa1] ss:$2 sm:$0xff]  ;;  %v6629_v3 = vsel %vm3160_vm3, %v2953_v50, -inf  ;;  %v3081_v45 = vmax.f32 %v2825_v25, 0.0  ;;  %v2958_v61 = vmax.f32 %v2702_v31, 0.0 }
 0x153   :  { %v4652_v47 = vpack.c.bf16 %v3939_v42, %v3939_v42  ;;  %v3938_v58 = vmax.f32 %v3693_v53, %v3821_v26  ;;  %v3086_v34 = vmax.f32 %v2830_v35, 0.0  ;;  %v2956_v33 = vmax.f32 %v2700_v32, 0.0  ;;  %v6640_v50 = vpop.f32.mrf.mxu0  ;;  %v6642_v13 = vpop.f32.mrf.mxu1 }
 0x154   :  { %v4684_v59 = vpack.c.bf16 %v3971_v1, %v3971_v1  ;;  %v3757_v30 = vld [vmem:[#allocation2 + $0x2a0] ss:$2 sm:$0xff]  ;;  %v3885_v63 = vld [vmem:[#allocation2 + $0x2a1] ss:$2 sm:$0xff]  ;;  %v6636_v0 = vsel %vm3160_vm3, %v3081_v45, -inf  ;;  %v3240_v11 = vsel %vm3160_vm3, %v2958_v61, -inf  ;;  %v2703_v15 = vadd.f32 %v6242_v44, %v2440_v29 }
 0x155   :  { %4260 = vst.msk [vmem:[%s7921_s4 + $0x2c] sm:$0xf] %vm4248_vm4, %v4652_v47  ;;  %v4651_v25 = vpack.c.bf16 %v3938_v58, %v3938_v58  ;;  %v3970_v31 = vmax.f32 %v3757_v30, %v3885_v63  ;;  %v3241_v40 = vmax.f32 %v6576_v8, %v3240_v11  ;;  %v3432_v49 = vsel %vm3160_vm3, %v3086_v34, -inf  ;;  %v6656_v42 = vpop.f32.mrf.mxu0  ;;  %v6658_v55 = vpop.f32.mrf.mxu1 }
 0x156   :  { %4292 = vst.msk [vmem:[%s7921_s4 + $0xac] sm:$0xf] %vm4248_vm4, %v4684_v59  ;;  %v3433_v2 = vmax.f32 %v6579_v37, %v3432_v49  ;;  %v3234_v5 = vsel %vm3160_vm3, %v2956_v33, -inf  ;;  %v3084_v35 = vmax.f32 %v2828_v10, 0.0  ;;  %v2959_v29 = vmax.f32 %v2703_v15, 0.0 }
 0x157   :  { %4259 = vst.msk [vmem:[%s7921_s4 + $0x28] sm:$0xf] %vm4248_vm4, %v4651_v25  ;;  %v4683_v8 = vpack.c.bf16 %v3970_v31, %v3970_v31  ;;  %v3235_v36 = vmax.f32 %v6590_v21, %v3234_v5  ;;  %v2831_v37 = vadd.f32 %v6242_v44, %v2568_v24  ;;  %v2438_v53 = vmul.f32 %v6230_v46, %v6467_v52  ;;  %v6676_v45 = vpop.f32.mrf.mxu0  ;;  %v6678_v21 = vpop.f32.mrf.mxu1 }
 0x158   :  { %3571 = vst.msk [vmem:[#allocation2 + $0xd0] sm:$0xff] %vm3160_vm3, %v3241_v40  ;;  %3635 = vst.msk [vmem:[#allocation2 + $0x2d0] sm:$0xff] %vm3160_vm3, %v3433_v2  ;;  %v3426_v32 = vsel %vm3160_vm3, %v3084_v35, -inf  ;;  %v3243_v10 = vsel %vm3160_vm3, %v2959_v29, -inf  ;;  %v2566_v1 = vmul.f32 %v6230_v46, %v6469_v38  ;;  %v2443_v26 = vmul.f32 %v6230_v46, %v6480_v57 }
 0x159   :  { %4291 = vst.msk [vmem:[%s7921_s4 + $0xa8] sm:$0xf] %vm4248_vm4, %v4683_v8  ;;  %v3427_v52 = vmax.f32 %v6593_v22, %v3426_v32  ;;  %v3244_v24 = vmax.f32 %v6612_v23, %v3243_v10  ;;  %v3087_v61 = vmax.f32 %v2831_v37, 0.0  ;;  %v2701_v38 = vadd.f32 %v6242_v44, %v2438_v53  ;;  %v6694_v33 = vpop.f32.mrf.mxu0  ;;  %v6696_v59 = vpop.f32.mrf.mxu1 }
 0x15a   :  { %3569 = vst.msk [vmem:[#allocation2 + $0xc0] sm:$0xff] %vm3160_vm3, %v3235_v36  ;;  %v2829_v57 = vadd.f32 %v6242_v44, %v2566_v1  ;;  %v2706_v47 = vadd.f32 %v6242_v44, %v2443_v26  ;;  %v2571_v58 = vmul.f32 %v6230_v46, %v6482_v16  ;;  %v2441_v34 = vmul.f32 %v6230_v46, %v6488_v60 }
 0x15b   :  { %3633 = vst.msk [vmem:[#allocation2 + $0x2c0] sm:$0xff] %vm3160_vm3, %v3427_v52  ;;  %3572 = vst.msk [vmem:[#allocation2 + $0xd8] sm:$0xff] %vm3160_vm3, %v3244_v24  ;;  %v3435_v22 = vsel %vm3160_vm3, %v3087_v61, -inf  ;;  %v2957_v23 = vmax.f32 %v2701_v38, 0.0  ;;  %v2569_v30 = vmul.f32 %v6230_v46, %v6490_v28  ;;  %v2444_v16 = vmul.f32 %v6230_v46, %v6509_v7  ;;  %v6707_v25 = vpop.f32.mrf.mxu0  ;;  %v6709_v31 = vpop.f32.mrf.mxu1 }
 0x15c   :  { %v3436_v63 = vmax.f32 %v6615_v20, %v3435_v22  ;;  %v3085_v60 = vmax.f32 %v2829_v57, 0.0  ;;  %v2962_v11 = vmax.f32 %v2706_v47, 0.0  ;;  %v2834_v15 = vadd.f32 %v6242_v44, %v2571_v58 }
 0x15d   :  { %v3237_v40 = vsel %vm3160_vm3, %v2957_v23, -inf  ;;  %v2704_v49 = vadd.f32 %v6242_v44, %v2441_v34  ;;  %v2832_v2 = vadd.f32 %v6242_v44, %v2569_v30  ;;  %v2707_v28 = vadd.f32 %v6242_v44, %v2444_v16  ;;  %v6721_v29 = vpop.f32.mrf.mxu0  ;;  %v6723_v8 = vpop.f32.mrf.mxu1 }
 0x15e   :  { %3636 = vst.msk [vmem:[#allocation2 + $0x2d8] sm:$0xff] %vm3160_vm3, %v3436_v63  ;;  %v3238_v7 = vmax.f32 %v6629_v3, %v3237_v40  ;;  %v3429_v20 = vsel %vm3160_vm3, %v3085_v60, -inf  ;;  %v6719_v5 = vsel %vm3160_vm3, %v2962_v11, -inf  ;;  %v3090_v35 = vmax.f32 %v2834_v15, 0.0 }
 0x15f   :  { %v3430_v36 = vmax.f32 %v6636_v0, %v3429_v20  ;;  %v2960_v37 = vmax.f32 %v2704_v49, 0.0  ;;  %v3088_v53 = vmax.f32 %v2832_v2, 0.0  ;;  %v2963_v32 = vmax.f32 %v2707_v28, 0.0  ;;  %v6736_v52 = vpop.f32.mrf.mxu0  ;;  %v6738_v0 = vpop.f32.mrf.mxu1 }
 0x160   :  { %3570 = vst.msk [vmem:[#allocation2 + $0xc8] sm:$0xff] %vm3160_vm3, %v3238_v7  ;;  %v6728_v10 = vsel %vm3160_vm3, %v3090_v35, -inf  ;;  %v2572_v3 = vmul.f32 %v6230_v46, %v6511_v48  ;;  %v2442_v1 = vmul.f32 %v6230_v46, %v6527_v12  ;;  %v2570_v26 = vmul.f32 %v6230_v46, %v6529_v6 }
 0x161   :  { %3634 = vst.msk [vmem:[#allocation2 + $0x2c8] sm:$0xff] %vm3160_vm3, %v3430_v36  ;;  %v6742_v24 = vsel %vm3160_vm3, %v2960_v37, -inf  ;;  %v6745_v61 = vsel %vm3160_vm3, %v3088_v53, -inf  ;;  %v6748_v48 = vsel %vm3160_vm3, %v2963_v32, -inf  ;;  %v2447_v12 = vmul.f32 %v6230_v46, %v6543_v17  ;;  %v6757_v22 = vpop.f32.mrf.mxu0  ;;  %v6759_v23 = vpop.f32.mrf.mxu1 }
 0x162   :  { %v3699_v38 = vld [vmem:[#allocation2 + $0xd0] ss:$2 sm:$0xff]  ;;  %v3827_v6 = vld [vmem:[#allocation2 + $0xd1] ss:$2 sm:$0xff]  ;;  %v2835_v57 = vadd.f32 %v6242_v44, %v2572_v3  ;;  %v2705_v47 = vadd.f32 %v6242_v44, %v2442_v1  ;;  %v2833_v58 = vadd.f32 %v6242_v44, %v2570_v26  ;;  %v2575_v34 = vmul.f32 %v6230_v46, %v6545_v4 }
 0x163   :  { %v3941_v30 = vmax.f32 %v3699_v38, %v3827_v6  ;;  %v2710_v16 = vadd.f32 %v6242_v44, %v2447_v12  ;;  %v2445_v17 = vmul.f32 %v6230_v46, %v6554_v56  ;;  %v2573_v63 = vmul.f32 %v6230_v46, %v6556_v18  ;;  %v6767_v49 = vpop.f32.mrf.mxu0  ;;  %v6769_v4 = vpop.f32.mrf.mxu1 }
 0x164   :  { %v3091_v60 = vmax.f32 %v2835_v57, 0.0  ;;  %v2961_v11 = vmax.f32 %v2705_v47, 0.0  ;;  %v3089_v15 = vmax.f32 %v2833_v58, 0.0  ;;  %v2838_v40 = vadd.f32 %v6242_v44, %v2575_v34 }
 0x165   :  { %v4654_v2 = vpack.c.bf16 %v3941_v30, %v3941_v30  ;;  %v3763_v28 = vld [vmem:[#allocation2 + $0x2d0] ss:$2 sm:$0xff]  ;;  %v3891_v7 = vld [vmem:[#allocation2 + $0x2d1] ss:$2 sm:$0xff]  ;;  %v2966_v20 = vmax.f32 %v2710_v16, 0.0  ;;  %v2708_v35 = vadd.f32 %v6242_v44, %v2445_v17  ;;  %v2836_v56 = vadd.f32 %v6242_v44, %v2573_v63  ;;  %v6782_v32 = vpop.f32.mrf.mxu0  ;;  %v6784_v3 = vpop.f32.mrf.mxu1 }
 0x166   :  { %v3973_v36 = vmax.f32 %v3763_v28, %v3891_v7  ;;  %v6774_v18 = vsel %vm3160_vm3, %v3091_v60, -inf  ;;  %v6777_v37 = vsel %vm3160_vm3, %v2961_v11, -inf  ;;  %v6780_v53 = vsel %vm3160_vm3, %v3089_v15, -inf }
 0x167   :  { %4262 = vst.msk [vmem:[%s7921_s4 + $0x34] sm:$0xf] %vm4248_vm4, %v4654_v2  ;;  %v3697_v1 = vld [vmem:[#allocation2 + $0xc0] ss:$2 sm:$0xff]  ;;  %v3825_v26 = vld [vmem:[#allocation2 + $0xc1] ss:$2 sm:$0xff]  ;;  %v2448_v6 = vmul.f32 %v6230_v46, %v6570_v43  ;;  %v2576_v57 = vmul.f32 %v6230_v46, %v6572_v14  ;;  %v6796_v63 = vpop.f32.mrf.mxu0  ;;  %v6798_v60 = vpop.f32.mrf.mxu1 }
 0x168   :  { %v3252_v12 = vsel %vm3160_vm3, %v2966_v20, -inf  ;;  %v3094_v38 = vmax.f32 %v2838_v40, 0.0  ;;  %v4686_v47 = vpack.c.bf16 %v3973_v36, %v3973_v36  ;;  %v3940_v58 = vmax.f32 %v3697_v1, %v3825_v26  ;;  %v3761_v34 = vld [vmem:[#allocation2 + $0x2c0] ss:$2 sm:$0xff]  ;;  %v3889_v30 = vld [vmem:[#allocation2 + $0x2c1] ss:$2 sm:$0xff] }
 0x169   :  { %v3253_v16 = vmax.f32 %v6719_v5, %v3252_v12  ;;  %v2964_v17 = vmax.f32 %v2708_v35, 0.0  ;;  %v3972_v11 = vmax.f32 %v3761_v34, %v3889_v30  ;;  %v3092_v40 = vmax.f32 %v2836_v56, 0.0  ;;  %v6810_v7 = vpop.f32.mrf.mxu0  ;;  %v6812_v20 = vpop.f32.mrf.mxu1 }
 0x16a   :  { %v3444_v15 = vsel %vm3160_vm3, %v3094_v38, -inf  ;;  %v2711_v43 = vadd.f32 %v6242_v44, %v2448_v6  ;;  %4294 = vst.msk [vmem:[%s7921_s4 + $0xb4] sm:$0xf] %vm4248_vm4, %v4686_v47  ;;  %v4653_v14 = vpack.c.bf16 %v3940_v58, %v3940_v58  ;;  %v2839_v28 = vadd.f32 %v6242_v44, %v2576_v57 }
 0x16b   :  { %3575 = vst.msk [vmem:[#allocation2 + $0xf0] sm:$0xff] %vm3160_vm3, %v3253_v16  ;;  %v3445_v5 = vmax.f32 %v6728_v10, %v3444_v15  ;;  %v3246_v2 = vsel %vm3160_vm3, %v2964_v17, -inf  ;;  %v4685_v35 = vpack.c.bf16 %v3972_v11, %v3972_v11  ;;  %v3438_v36 = vsel %vm3160_vm3, %v3092_v40, -inf  ;;  %v6828_v6 = vpop.f32.mrf.mxu1 }
 0x16c   :  { %v3247_v56 = vmax.f32 %v6742_v24, %v3246_v2  ;;  %v2967_v1 = vmax.f32 %v2711_v43, 0.0  ;;  %4261 = vst.msk [vmem:[%s7921_s4 + $0x30] sm:$0xf] %vm4248_vm4, %v4653_v14  ;;  %v3439_v10 = vmax.f32 %v6745_v61, %v3438_v36  ;;  %v3095_v26 = vmax.f32 %v2839_v28, 0.0  ;;  %v6826_v24 = vpop.f32.mrf.mxu0 }
 0x16d   :  { %3639 = vst.msk [vmem:[#allocation2 + $0x2f0] sm:$0xff] %vm3160_vm3, %v3445_v5  ;;  %v2446_v12 = vmul.f32 %v6230_v46, %v6584_v54  ;;  %v2574_v38 = vmul.f32 %v6230_v46, %v6586_v27  ;;  %v2451_v57 = vmul.f32 %v6230_v46, %v6601_v51  ;;  %v2579_v54 = vmul.f32 %v6230_v46, %v6603_v41  ;;  %v6849_v17 = vpop.f32.mrf.mxu1 }
 0x16e   :  { %4293 = vst.msk [vmem:[%s7921_s4 + $0xb0] sm:$0xf] %vm4248_vm4, %v4685_v35  ;;  %v3255_v61 = vsel %vm3160_vm3, %v2967_v1, -inf  ;;  %v2449_v27 = vmul.f32 %v6230_v46, %v6620_v9  ;;  %v3447_v58 = vsel %vm3160_vm3, %v3095_v26, -inf  ;;  %v6847_v16 = vpop.f32.mrf.mxu0  ;;  %v2577_v40 = vmul.f32 %v6230_v46, %v6622_v62 }
 0x16f   :  { %3573 = vst.msk [vmem:[#allocation2 + $0xe0] sm:$0xff] %vm3160_vm3, %v3247_v56  ;;  %3637 = vst.msk [vmem:[#allocation2 + $0x2e0] sm:$0xff] %vm3160_vm3, %v3439_v10  ;;  %v3256_v47 = vmax.f32 %v6748_v48, %v3255_v61  ;;  %v2709_v34 = vadd.f32 %v6242_v44, %v2446_v12  ;;  %v2837_v30 = vadd.f32 %v6242_v44, %v2574_v38  ;;  %v6862_v5 = vpop.f32.mrf.mxu1 }
 0x170   :  { %v3448_v51 = vmax.f32 %v6774_v18, %v3447_v58  ;;  %v2714_v41 = vadd.f32 %v6242_v44, %v2451_v57  ;;  %v2842_v9 = vadd.f32 %v6242_v44, %v2579_v54  ;;  %v2712_v11 = vadd.f32 %v6242_v44, %v2449_v27  ;;  %v6860_v14 = vpop.f32.mrf.mxu0 }
 0x171   :  { %3576 = vst.msk [vmem:[#allocation2 + $0xf8] sm:$0xff] %vm3160_vm3, %v3256_v47  ;;  %v2965_v48 = vmax.f32 %v2709_v34, 0.0  ;;  %v3093_v15 = vmax.f32 %v2837_v30, 0.0  ;;  %v2452_v43 = vmul.f32 %v6230_v46, %v6631_v39  ;;  %v2580_v35 = vmul.f32 %v6230_v46, %v6633_v19  ;;  %v6873_v10 = vpop.f32.mrf.mxu1 }
 0x172   :  { %3640 = vst.msk [vmem:[#allocation2 + $0x2f8] sm:$0xff] %vm3160_vm3, %v3448_v51  ;;  %v2970_v18 = vmax.f32 %v2714_v41, 0.0  ;;  %v3098_v2 = vmax.f32 %v2842_v9, 0.0  ;;  %v2968_v28 = vmax.f32 %v2712_v11, 0.0  ;;  %v2840_v62 = vadd.f32 %v6242_v44, %v2577_v40  ;;  %v6871_v1 = vpop.f32.mrf.mxu0 }
 0x173   :  { %v3249_v56 = vsel %vm3160_vm3, %v2965_v48, -inf  ;;  %v3441_v36 = vsel %vm3160_vm3, %v3093_v15, -inf  ;;  %v2715_v39 = vadd.f32 %v6242_v44, %v2452_v43  ;;  %v2843_v54 = vadd.f32 %v6242_v44, %v2580_v35  ;;  %v6889_v47 = vpop.f32.mrf.mxu1 }
 0x174   :  { %v3250_v26 = vmax.f32 %v6777_v37, %v3249_v56  ;;  %v3442_v12 = vmax.f32 %v6780_v53, %v3441_v36  ;;  %v6878_v38 = vsel %vm3160_vm3, %v2970_v18, -inf  ;;  %v6881_v46 = vsel %vm3160_vm3, %v3098_v2, -inf  ;;  %v6887_v27 = vpop.f32.mrf.mxu0  ;;  %v6896_v37 = vld [vmem:[%s7919_s2] ss:$0 sm:$0xff] }
 0x175   :  { %v6884_v19 = vsel %vm3160_vm3, %v2968_v28, -inf  ;;  %v3096_v61 = vmax.f32 %v2840_v62, 0.0  ;;  %v2971_v57 = vmax.f32 %v2715_v39, 0.0  ;;  %v2450_v53 = vmul.f32 %v6896_v37, %v6640_v50  ;;  %v6916_v11 = vpop.f32.mrf.mxu1 }
 0x176   :  { %3574 = vst.msk [vmem:[#allocation2 + $0xe8] sm:$0xff] %vm3160_vm3, %v3250_v26  ;;  %3638 = vst.msk [vmem:[#allocation2 + $0x2e8] sm:$0xff] %vm3160_vm3, %v3442_v12  ;;  %v2578_v58 = vmul.f32 %v6896_v37, %v6642_v13  ;;  %v2455_v44 = vmul.f32 %v6896_v37, %v6656_v42  ;;  %v2583_v34 = vmul.f32 %v6896_v37, %v6658_v55  ;;  %v3099_v41 = vmax.f32 %v2843_v54, 0.0  ;;  %v6914_v50 = vpop.f32.mrf.mxu0  ;;  %v6921_v42 = vld [vmem:[%s7920_s3] ss:$0 sm:$0xff] }
 0x177   :  { %v6907_v30 = vsel %vm3160_vm3, %v3096_v61, -inf  ;;  %v6910_v51 = vsel %vm3160_vm3, %v2971_v57, -inf  ;;  %v2453_v9 = vmul.f32 %v6896_v37, %v6676_v45  ;;  %v2713_v55 = vadd.f32 %v6921_v42, %v2450_v53  ;;  %v6935_v62 = vpop.f32.mrf.mxu1 }
 0x178   :  { %v3703_v13 = vld [vmem:[#allocation2 + $0xf0] ss:$2 sm:$0xff]  ;;  %v3831_v48 = vld [vmem:[#allocation2 + $0xf1] ss:$2 sm:$0xff]  ;;  %v2841_v15 = vadd.f32 %v6921_v42, %v2578_v58  ;;  %v2718_v40 = vadd.f32 %v6921_v42, %v2455_v44  ;;  %v2846_v43 = vadd.f32 %v6921_v42, %v2583_v34  ;;  %v6928_v28 = vsel %vm3160_vm3, %v3099_v41, -inf  ;;  %v6933_v36 = vpop.f32.mrf.mxu0 }
 0x179   :  { %v3943_v45 = vmax.f32 %v3703_v13, %v3831_v48  ;;  %v3767_v18 = vld [vmem:[#allocation2 + $0x2f0] ss:$2 sm:$0xff]  ;;  %v3895_v2 = vld [vmem:[#allocation2 + $0x2f1] ss:$2 sm:$0xff]  ;;  %v2716_v35 = vadd.f32 %v6921_v42, %v2453_v9  ;;  %v2581_v56 = vmul.f32 %v6896_v37, %v6678_v21  ;;  %v2969_v26 = vmax.f32 %v2713_v55, 0.0  ;;  %v6940_v34 = vpop.f32.mrf.mxu1 }
 0x17a   :  { %v3975_v39 = vmax.f32 %v3767_v18, %v3895_v2  ;;  %v3097_v12 = vmax.f32 %v2841_v15, 0.0  ;;  %v2974_v61 = vmax.f32 %v2718_v40, 0.0  ;;  %v3102_v54 = vmax.f32 %v2846_v43, 0.0  ;;  %v6938_v44 = vpop.f32.mrf.mxu0 }
 0x17b   :  { %v4656_v57 = vpack.c.bf16 %v3943_v45, %v3943_v45  ;;  %v2972_v53 = vmax.f32 %v2716_v35, 0.0  ;;  %v2844_v58 = vadd.f32 %v6921_v42, %v2581_v56  ;;  %v6943_v21 = vsel %vm3160_vm3, %v2969_v26, -inf  ;;  %v6962_v35 = vpop.f32.mrf.mxu1 }
 0x17c   :  { %v4688_v41 = vpack.c.bf16 %v3975_v39, %v3975_v39  ;;  %v6946_v9 = vsel %vm3160_vm3, %v3097_v12, -inf  ;;  %v3264_v13 = vsel %vm3160_vm3, %v2974_v61, -inf  ;;  %v2456_v43 = vmul.f32 %v6896_v37, %v6694_v33  ;;  %v6960_v2 = vpop.f32.mrf.mxu0 }
 0x17d   :  { %4264 = vst.msk [vmem:[%s7921_s4 + $0x3c] sm:$0xf] %vm4248_vm4, %v4656_v57  ;;  %v3701_v48 = vld [vmem:[#allocation2 + $0xe0] ss:$2 sm:$0xff]  ;;  %v3829_v55 = vld [vmem:[#allocation2 + $0xe1] ss:$2 sm:$0xff]  ;;  %v3265_v40 = vmax.f32 %v6878_v38, %v3264_v13  ;;  %v2584_v45 = vmul.f32 %v6896_v37, %v6696_v59  ;;  %v2454_v18 = vmul.f32 %v6896_v37, %v6707_v25  ;;  %v6976_v13 = vpop.f32.mrf.mxu1 }
 0x17e   :  { %v3765_v15 = vld [vmem:[#allocation2 + $0x2e0] ss:$2 sm:$0xff]  ;;  %4296 = vst.msk [vmem:[%s7921_s4 + $0xbc] sm:$0xf] %vm4248_vm4, %v4688_v41  ;;  %v3942_v56 = vmax.f32 %v3701_v48, %v3829_v55  ;;  %v3893_v38 = vld [vmem:[#allocation2 + $0x2e1] ss:$2 sm:$0xff]  ;;  %v2719_v61 = vadd.f32 %v6921_v42, %v2456_v43  ;;  %v6974_v57 = vpop.f32.mrf.mxu0  ;;  %v2582_v55 = vmul.f32 %v6896_v37, %v6709_v31 }
 0x17f   :  { %v3456_v39 = vsel %vm3160_vm3, %v3102_v54, -inf  ;;  %v3258_v33 = vsel %vm3160_vm3, %v2972_v53, -inf  ;;  %v3100_v26 = vmax.f32 %v2844_v58, 0.0  ;;  %v3974_v59 = vmax.f32 %v3765_v15, %v3893_v38  ;;  %3579 = vst.msk [vmem:[#allocation2 + $0x110] sm:$0xff] %vm3160_vm3, %v3265_v40  ;;  %v6988_v40 = vpop.f32.mrf.mxu1 }
 0x180   :  { %v3457_v25 = vmax.f32 %v6881_v46, %v3456_v39  ;;  %v3259_v12 = vmax.f32 %v6884_v19, %v3258_v33  ;;  %v4655_v41 = vpack.c.bf16 %v3942_v56, %v3942_v56  ;;  %v2847_v54 = vadd.f32 %v6921_v42, %v2584_v45  ;;  %v6986_v15 = vpop.f32.mrf.mxu0 }
 0x181   :  { %v3450_v48 = vsel %vm3160_vm3, %v3100_v26, -inf  ;;  %v2717_v53 = vadd.f32 %v6921_v42, %v2454_v18  ;;  %v4687_v58 = vpack.c.bf16 %v3974_v59, %v3974_v59  ;;  %v2975_v19 = vmax.f32 %v2719_v61, 0.0 }
 0x182   :  { %3643 = vst.msk [vmem:[#allocation2 + $0x310] sm:$0xff] %vm3160_vm3, %v3457_v25  ;;  %3577 = vst.msk [vmem:[#allocation2 + $0x100] sm:$0xff] %vm3160_vm3, %v3259_v12  ;;  %v3451_v46 = vmax.f32 %v6907_v30, %v3450_v48  ;;  %v3103_v43 = vmax.f32 %v2847_v54, 0.0  ;;  %v2459_v18 = vmul.f32 %v6896_v37, %v6721_v29  ;;  %v2587_v30 = vmul.f32 %v6896_v37, %v6723_v8  ;;  %v7009_v39 = vpop.f32.mrf.mxu0  ;;  %v7011_v8 = vpop.f32.mrf.mxu1 }
 0x183   :  { %4263 = vst.msk [vmem:[%s7921_s4 + $0x38] sm:$0xf] %vm4248_vm4, %v4655_v41  ;;  %v2973_v45 = vmax.f32 %v2717_v53, 0.0  ;;  %4295 = vst.msk [vmem:[%s7921_s4 + $0xb8] sm:$0xf] %vm4248_vm4, %v4687_v58  ;;  %v3267_v31 = vsel %vm3160_vm3, %v2975_v19, -inf  ;;  %v2845_v56 = vadd.f32 %v6921_v42, %v2582_v55  ;;  %v2457_v38 = vmul.f32 %v6896_v37, %v6736_v52 }
 0x184   :  { %3641 = vst.msk [vmem:[#allocation2 + $0x300] sm:$0xff] %vm3160_vm3, %v3451_v46  ;;  %v2585_v29 = vmul.f32 %v6896_v37, %v6738_v0  ;;  %v3268_v33 = vmax.f32 %v6910_v51, %v3267_v31  ;;  %v3459_v26 = vsel %vm3160_vm3, %v3103_v43, -inf  ;;  %v2722_v25 = vadd.f32 %v6921_v42, %v2459_v18  ;;  %v7020_v0 = vpop.f32.mrf.mxu0  ;;  %v7022_v48 = vpop.f32.mrf.mxu1 }
 0x185   :  { %v3261_v59 = vsel %vm3160_vm3, %v2973_v45, -inf  ;;  %v3460_v12 = vmax.f32 %v6928_v28, %v3459_v26  ;;  %v3101_v52 = vmax.f32 %v2845_v56, 0.0  ;;  %v2850_v41 = vadd.f32 %v6921_v42, %v2587_v30 }
 0x186   :  { %v3262_v61 = vmax.f32 %v6943_v21, %v3261_v59  ;;  %3580 = vst.msk [vmem:[#allocation2 + $0x118] sm:$0xff] %vm3160_vm3, %v3268_v33  ;;  %v2978_v51 = vmax.f32 %v2722_v25, 0.0  ;;  %v2720_v54 = vadd.f32 %v6921_v42, %v2457_v38  ;;  %v2848_v53 = vadd.f32 %v6921_v42, %v2585_v29  ;;  %v7036_v55 = vpop.f32.mrf.mxu0  ;;  %v7038_v43 = vpop.f32.mrf.mxu1 }
 0x187   :  { %v2460_v58 = vmul.f32 %v6896_v37, %v6757_v22  ;;  %3644 = vst.msk [vmem:[#allocation2 + $0x318] sm:$0xff] %vm3160_vm3, %v3460_v12  ;;  %v3453_v28 = vsel %vm3160_vm3, %v3101_v52, -inf  ;;  %v3106_v21 = vmax.f32 %v2850_v41, 0.0  ;;  %v2588_v46 = vmul.f32 %v6896_v37, %v6759_v23 }
 0x188   :  { %3578 = vst.msk [vmem:[#allocation2 + $0x108] sm:$0xff] %vm3160_vm3, %v3262_v61  ;;  %v2458_v19 = vmul.f32 %v6896_v37, %v6767_v49  ;;  %v3454_v45 = vmax.f32 %v6946_v9, %v3453_v28  ;;  %v7042_v22 = vsel %vm3160_vm3, %v2978_v51, -inf  ;;  %v2976_v18 = vmax.f32 %v2720_v54, 0.0  ;;  %v7050_v38 = vpop.f32.mrf.mxu0  ;;  %v7052_v29 = vpop.f32.mrf.mxu1 }
 0x189   :  { %v3104_v30 = vmax.f32 %v2848_v53, 0.0  ;;  %v7045_v31 = vsel %vm3160_vm3, %v3106_v21, -inf  ;;  %v2723_v56 = vadd.f32 %v6921_v42, %v2460_v58  ;;  %v2851_v23 = vadd.f32 %v6921_v42, %v2588_v46  ;;  %7922 = vst [vmem:[#allocation3_spill] sm:$0xff] %v7052_v29 }
 0x18a   :  { %v2721_v49 = vadd.f32 %v6921_v42, %v2458_v19  ;;  %3642 = vst.msk [vmem:[#allocation2 + $0x308] sm:$0xff] %vm3160_vm3, %v3454_v45  ;;  %v7056_v9 = vsel %vm3160_vm3, %v2976_v18, -inf  ;;  %v2586_v26 = vmul.f32 %v6896_v37, %v6769_v4  ;;  %v2463_v59 = vmul.f32 %v6896_v37, %v6782_v32  ;;  %v7067_v41 = vpop.f32.mrf.mxu0  ;;  %v7069_v51 = vpop.f32.mrf.mxu1 }
 0x18b   :  { %v7059_v33 = vsel %vm3160_vm3, %v3104_v30, -inf  ;;  %v2979_v25 = vmax.f32 %v2723_v56, 0.0  ;;  %v3107_v12 = vmax.f32 %v2851_v23, 0.0  ;;  %v2591_v52 = vmul.f32 %v6896_v37, %v6784_v3  ;;  %7923 = vst [vmem:[#allocation4_spill] sm:$0xff] %v7067_v41  ;;  %7924 = vst [vmem:[#allocation5_spill] sm:$0xff] %v7069_v51 }
 0x18c   :  { %v2977_v61 = vmax.f32 %v2721_v49, 0.0  ;;  %v2849_v54 = vadd.f32 %v6921_v42, %v2586_v26  ;;  %v2726_v53 = vadd.f32 %v6921_v42, %v2463_v59  ;;  %v2461_v4 = vmul.f32 %v6896_v37, %v6796_v63  ;;  %v7086_v45 = vpop.f32.mrf.mxu0  ;;  %v7088_v18 = vpop.f32.mrf.mxu1 }
 0x18d   :  { %v2589_v32 = vmul.f32 %v6896_v37, %v6798_v60  ;;  %v3707_v58 = vld [vmem:[#allocation2 + $0x110] ss:$2 sm:$0xff]  ;;  %v3835_v28 = vld [vmem:[#allocation2 + $0x111] ss:$2 sm:$0xff]  ;;  %v7078_v21 = vsel %vm3160_vm3, %v2979_v25, -inf  ;;  %v7081_v3 = vsel %vm3160_vm3, %v3107_v12, -inf  ;;  %v2854_v46 = vadd.f32 %v6921_v42, %v2591_v52 }
 0x18e   :  { %v2464_v19 = vmul.f32 %v6896_v37, %v6810_v7  ;;  %7925 = vst [vmem:[#allocation6_spill] sm:$0xff] %v7086_v45  ;;  %7926 = vst [vmem:[#allocation7_spill] sm:$0xff] %v7088_v18  ;;  %v3945_v63 = vmax.f32 %v3707_v58, %v3835_v28  ;;  %v3771_v30 = vld [vmem:[#allocation2 + $0x310] ss:$2 sm:$0xff]  ;;  %v3899_v60 = vld [vmem:[#allocation2 + $0x311] ss:$2 sm:$0xff]  ;;  %v2724_v23 = vadd.f32 %v6921_v42, %v2461_v4  ;;  %v7097_v45 = vpop.f32.mrf.mxu0  ;;  %v7099_v58 = vpop.f32.mrf.mxu1 }
 0x18f   :  { %v3705_v56 = vld [vmem:[#allocation2 + $0x100] ss:$2 sm:$0xff]  ;;  %v2852_v49 = vadd.f32 %v6921_v42, %v2589_v32  ;;  %v2592_v26 = vmul.f32 %v6896_v37, %v6812_v20  ;;  %v3977_v59 = vmax.f32 %v3771_v30, %v3899_v60  ;;  %v3833_v25 = vld [vmem:[#allocation2 + $0x101] ss:$2 sm:$0xff]  ;;  %v7095_v12 = vsel %vm3160_vm3, %v2977_v61, -inf }
 0x190   :  { %v3105_v7 = vmax.f32 %v2849_v54, 0.0  ;;  %v2982_v52 = vmax.f32 %v2726_v53, 0.0  ;;  %v4658_v28 = vpack.c.bf16 %v3945_v63, %v3945_v63  ;;  %v3944_v18 = vmax.f32 %v3705_v56, %v3833_v25  ;;  %v7106_v54 = vpop.f32.mrf.mxu0  ;;  %v7108_v53 = vpop.f32.mrf.mxu1 }
 0x191   :  { %v3110_v51 = vmax.f32 %v2854_v46, 0.0  ;;  %v2980_v4 = vmax.f32 %v2724_v23, 0.0  ;;  %v4690_v41 = vpack.c.bf16 %v3977_v59, %v3977_v59  ;;  %v3769_v32 = vld [vmem:[#allocation2 + $0x300] ss:$2 sm:$0xff]  ;;  %v3897_v29 = vld [vmem:[#allocation2 + $0x301] ss:$2 sm:$0xff]  ;;  %v2727_v61 = vadd.f32 %v6921_v42, %v2464_v19 }
 0x192   :  { %v7102_v20 = vsel %vm3160_vm3, %v3105_v7, -inf  ;;  %v3276_v30 = vsel %vm3160_vm3, %v2982_v52, -inf  ;;  %4266 = vst.msk [vmem:[%s7921_s4 + $0x44] sm:$0xf] %vm4248_vm4, %v4658_v28  ;;  %v4657_v46 = vpack.c.bf16 %v3944_v18, %v3944_v18  ;;  %v3976_v63 = vmax.f32 %v3769_v32, %v3897_v29  ;;  %v7122_v7 = vpop.f32.mrf.mxu0 }
 0x193   :  { %v3277_v60 = vmax.f32 %v7042_v22, %v3276_v30  ;;  %v3468_v56 = vsel %vm3160_vm3, %v3110_v51, -inf  ;;  %4298 = vst.msk [vmem:[%s7921_s4 + $0xc4] sm:$0xf] %vm4248_vm4, %v4690_v41  ;;  %v3270_v23 = vsel %vm3160_vm3, %v2980_v4, -inf  ;;  %v3108_v59 = vmax.f32 %v2852_v49, 0.0  ;;  %v7133_v51 = vpop.f32.mrf.mxu1 }
 0x194   :  { %v3469_v19 = vmax.f32 %v7045_v31, %v3468_v56  ;;  %v2983_v25 = vmax.f32 %v2727_v61, 0.0  ;;  %4265 = vst.msk [vmem:[%s7921_s4 + $0x40] sm:$0xf] %vm4248_vm4, %v4657_v46  ;;  %v4689_v22 = vpack.c.bf16 %v3976_v63, %v3976_v63  ;;  %v3271_v29 = vmax.f32 %v7056_v9, %v3270_v23  ;;  %v7150_v32 = vpop.f32.mrf.mxu0 }
 0x195   :  { %3583 = vst.msk [vmem:[#allocation2 + $0x130] sm:$0xff] %vm3160_vm3, %v3277_v60  ;;  %v2855_v41 = vadd.f32 %v6921_v42, %v2592_v26  ;;  %v2462_v31 = vmul.f32 %v6896_v37, %v6826_v24  ;;  %v3462_v18 = vsel %vm3160_vm3, %v3108_v59, -inf  ;;  %v2590_v52 = vmul.f32 %v6896_v37, %v6828_v6  ;;  %v7165_v60 = vpop.f32.mrf.mxu1 }
 0x196   :  { %3647 = vst.msk [vmem:[#allocation2 + $0x330] sm:$0xff] %vm3160_vm3, %v3469_v19  ;;  %v3279_v49 = vsel %vm3160_vm3, %v2983_v25, -inf  ;;  %v2467_v28 = vmul.f32 %v6896_v37, %v6847_v16  ;;  %3581 = vst.msk [vmem:[#allocation2 + $0x120] sm:$0xff] %vm3160_vm3, %v3271_v29  ;;  %v3463_v24 = vmax.f32 %v7059_v33, %v3462_v18  ;;  %v2595_v30 = vmul.f32 %v6896_v37, %v6849_v17 }
 0x197   :  { %4297 = vst.msk [vmem:[%s7921_s4 + $0xc0] sm:$0xf] %vm4248_vm4, %v4689_v22  ;;  %v3280_v9 = vmax.f32 %v7078_v21, %v3279_v49  ;;  %v3111_v26 = vmax.f32 %v2855_v41, 0.0  ;;  %v2725_v4 = vadd.f32 %v6921_v42, %v2462_v31  ;;  %v2853_v6 = vadd.f32 %v6921_v42, %v2590_v52 }
 0x198   :  { %v2730_v16 = vadd.f32 %v6921_v42, %v2467_v28  ;;  %v2465_v61 = vmul.f32 %v6896_v37, %v6860_v14  ;;  %3645 = vst.msk [vmem:[#allocation2 + $0x320] sm:$0xff] %vm3160_vm3, %v3463_v24  ;;  %v2593_v46 = vmul.f32 %v6896_v37, %v6862_v5  ;;  %v2468_v63 = vmul.f32 %v6896_v37, %v6871_v1  ;;  %v7173_v5 = vpop.f32.mrf.mxu0  ;;  %v7182_v28 = vpop.f32.mrf.mxu1 }
 0x199   :  { %3584 = vst.msk [vmem:[#allocation2 + $0x138] sm:$0xff] %vm3160_vm3, %v3280_v9  ;;  %v3471_v33 = vsel %vm3160_vm3, %v3111_v26, -inf  ;;  %v2981_v21 = vmax.f32 %v2725_v4, 0.0  ;;  %v3109_v56 = vmax.f32 %v2853_v6, 0.0  ;;  %v2858_v14 = vadd.f32 %v6921_v42, %v2595_v30 }
 0x19a   :  { %v3472_v17 = vmax.f32 %v7081_v3, %v3471_v33  ;;  %v2986_v19 = vmax.f32 %v2730_v16, 0.0  ;;  %v2728_v59 = vadd.f32 %v6921_v42, %v2465_v61  ;;  %v2856_v25 = vadd.f32 %v6921_v42, %v2593_v46  ;;  %v7206_v16 = vpop.f32.mrf.mxu0 }
 0x19b   :  { %v3273_v23 = vsel %vm3160_vm3, %v2981_v21, -inf  ;;  %v2731_v22 = vadd.f32 %v6921_v42, %v2468_v63  ;;  %v3465_v3 = vsel %vm3160_vm3, %v3109_v56, -inf  ;;  %v3114_v41 = vmax.f32 %v2858_v14, 0.0  ;;  %v7218_v56 = vpop.f32.mrf.mxu1 }
 0x19c   :  { %3648 = vst.msk [vmem:[#allocation2 + $0x338] sm:$0xff] %vm3160_vm3, %v3472_v17  ;;  %v3274_v1 = vmax.f32 %v7095_v12, %v3273_v23  ;;  %v7179_v29 = vsel %vm3160_vm3, %v2986_v19, -inf  ;;  %v3466_v31 = vmax.f32 %v7102_v20, %v3465_v3  ;;  %v2984_v18 = vmax.f32 %v2728_v59, 0.0 }
 0x19d   :  { %v3112_v49 = vmax.f32 %v2856_v25, 0.0  ;;  %v2987_v52 = vmax.f32 %v2731_v22, 0.0  ;;  %v7186_v24 = vsel %vm3160_vm3, %v3114_v41, -inf  ;;  %v2596_v12 = vmul.f32 %v6896_v37, %v6873_v10 }
 0x19e   :  { %3582 = vst.msk [vmem:[#allocation2 + $0x128] sm:$0xff] %vm3160_vm3, %v3274_v1  ;;  %v2466_v9 = vmul.f32 %v6896_v37, %v6887_v27  ;;  %v2594_v26 = vmul.f32 %v6896_v37, %v6889_v47  ;;  %3646 = vst.msk [vmem:[#allocation2 + $0x328] sm:$0xff] %vm3160_vm3, %v3466_v31  ;;  %v7196_v20 = vsel %vm3160_vm3, %v2984_v18, -inf  ;;  %v2471_v10 = vmul.f32 %v6896_v37, %v6914_v50  ;;  %v7223_v31 = vpop.f32.mrf.mxu0 }
 0x19f   :  { %v7199_v4 = vsel %vm3160_vm3, %v3112_v49, -inf  ;;  %v7202_v6 = vsel %vm3160_vm3, %v2987_v52, -inf  ;;  %v2859_v47 = vadd.f32 %v6921_v42, %v2596_v12  ;;  %v2599_v21 = vmul.f32 %v6896_v37, %v6916_v11 }
 0x1a0   :  { %v3711_v27 = vld [vmem:[#allocation2 + $0x130] ss:$2 sm:$0xff]  ;;  %v3839_v30 = vld [vmem:[#allocation2 + $0x131] ss:$2 sm:$0xff]  ;;  %v2729_v61 = vadd.f32 %v6921_v42, %v2466_v9  ;;  %v2857_v33 = vadd.f32 %v6921_v42, %v2594_v26  ;;  %v2734_v63 = vadd.f32 %v6921_v42, %v2471_v10  ;;  %v2469_v17 = vmul.f32 %v6896_v37, %v6933_v36 }
 0x1a1   :  { %v3947_v46 = vmax.f32 %v3711_v27, %v3839_v30  ;;  %v2597_v50 = vmul.f32 %v6896_v37, %v6935_v62  ;;  %v3115_v19 = vmax.f32 %v2859_v47, 0.0  ;;  %v2862_v59 = vadd.f32 %v6921_v42, %v2599_v21  ;;  %v7241_v30 = vpop.f32.mrf.mxu1 }
 0x1a2   :  { %v2985_v14 = vmax.f32 %v2729_v61, 0.0  ;;  %v3113_v23 = vmax.f32 %v2857_v33, 0.0  ;;  %v2990_v11 = vmax.f32 %v2734_v63, 0.0  ;;  %v2732_v3 = vadd.f32 %v6921_v42, %v2469_v17 }
 0x1a3   :  { %v4660_v25 = vpack.c.bf16 %v3947_v46, %v3947_v46  ;;  %v3775_v22 = vld [vmem:[#allocation2 + $0x330] ss:$2 sm:$0xff]  ;;  %v3903_v1 = vld [vmem:[#allocation2 + $0x331] ss:$2 sm:$0xff]  ;;  %v2860_v41 = vadd.f32 %v6921_v42, %v2597_v50  ;;  %v3482_v62 = vsel %vm3160_vm3, %v3115_v19, -inf  ;;  %v3118_v26 = vmax.f32 %v2862_v59, 0.0 }
 0x1a4   :  { %v3979_v36 = vmax.f32 %v3775_v22, %v3903_v1  ;;  %v7227_v18 = vsel %vm3160_vm3, %v2985_v14, -inf  ;;  %v7230_v49 = vsel %vm3160_vm3, %v3113_v23, -inf  ;;  %v3288_v9 = vsel %vm3160_vm3, %v2990_v11, -inf  ;;  %v7246_v23 = vpop.f32.mrf.mxu0 }
 0x1a5   :  { %4268 = vst.msk [vmem:[%s7921_s4 + $0x4c] sm:$0xf] %vm4248_vm4, %v4660_v25  ;;  %v3709_v52 = vld [vmem:[#allocation2 + $0x120] ss:$2 sm:$0xff]  ;;  %v3837_v12 = vld [vmem:[#allocation2 + $0x121] ss:$2 sm:$0xff]  ;;  %v2472_v10 = vmul.f32 %v6896_v37, %v6938_v44  ;;  %v2600_v27 = vmul.f32 %v6896_v37, %v6940_v34  ;;  %v3289_v46 = vmax.f32 %v7179_v29, %v3288_v9 }
 0x1a6   :  { %v4692_v47 = vpack.c.bf16 %v3979_v36, %v3979_v36  ;;  %v3946_v61 = vmax.f32 %v3709_v52, %v3837_v12  ;;  %v3773_v33 = vld [vmem:[#allocation2 + $0x320] ss:$2 sm:$0xff]  ;;  %v3901_v21 = vld [vmem:[#allocation2 + $0x321] ss:$2 sm:$0xff]  ;;  %v2988_v63 = vmax.f32 %v2732_v3, 0.0  ;;  %v3480_v50 = vsel %vm3160_vm3, %v3118_v26, -inf  ;;  %v7258_v3 = vpop.f32.mrf.mxu1  ;;  %v7282_v9 = vpop.f32.mrf.mxu0 }
 0x1a7   :  { %v3978_v17 = vmax.f32 %v3773_v33, %v3901_v21  ;;  %v3116_v19 = vmax.f32 %v2860_v41, 0.0  ;;  %v2735_v14 = vadd.f32 %v6921_v42, %v2472_v10  ;;  %3587 = vst.msk [vmem:[#allocation2 + $0x150] sm:$0xff] %vm3160_vm3, %v3289_v46  ;;  %v3481_v34 = vmax.f32 %v7186_v24, %v3480_v50 }
 0x1a8   :  { %4300 = vst.msk [vmem:[%s7921_s4 + $0xcc] sm:$0xf] %vm4248_vm4, %v4692_v47  ;;  %v4659_v44 = vpack.c.bf16 %v3946_v61, %v3946_v61  ;;  %v3282_v29 = vsel %vm3160_vm3, %v2988_v63, -inf  ;;  %v2863_v59 = vadd.f32 %v6921_v42, %v2600_v27  ;;  %v2470_v36 = vmul.f32 %v6896_v37, %v6960_v2 }
 0x1a9   :  { %v4691_v25 = vpack.c.bf16 %v3978_v17, %v3978_v17  ;;  %v3283_v22 = vmax.f32 %v7196_v20, %v3282_v29  ;;  %v3474_v1 = vsel %vm3160_vm3, %v3116_v19, -inf  ;;  %v2991_v11 = vmax.f32 %v2735_v14, 0.0  ;;  %3651 = vst.msk [vmem:[#allocation2 + $0x350] sm:$0xff] %vm3160_vm3, %v3481_v34  ;;  %v7302_v19 = vpop.f32.mrf.mxu0 }
 0x1aa   :  { %4267 = vst.msk [vmem:[%s7921_s4 + $0x48] sm:$0xf] %vm4248_vm4, %v4659_v44  ;;  %v3475_v24 = vmax.f32 %v7199_v4, %v3474_v1  ;;  %v3119_v41 = vmax.f32 %v2863_v59, 0.0  ;;  %v2598_v20 = vmul.f32 %v6896_v37, %v6962_v35  ;;  %v2475_v12 = vmul.f32 %v6896_v37, %v6974_v57 }
 0x1ab   :  { %4299 = vst.msk [vmem:[%s7921_s4 + $0xc8] sm:$0xf] %vm4248_vm4, %v4691_v25  ;;  %v3291_v52 = vsel %vm3160_vm3, %v2991_v11, -inf  ;;  %v2603_v4 = vmul.f32 %v6896_v37, %v6976_v13  ;;  %v2473_v2 = vmul.f32 %v6896_v37, %v6986_v15  ;;  %v2733_v10 = vadd.f32 %v6921_v42, %v2470_v36  ;;  %v7292_v15 = vpop.f32.mrf.mxu1 }
 0x1ac   :  { %3585 = vst.msk [vmem:[#allocation2 + $0x140] sm:$0xff] %vm3160_vm3, %v3283_v22  ;;  %3649 = vst.msk [vmem:[#allocation2 + $0x340] sm:$0xff] %vm3160_vm3, %v3475_v24  ;;  %v3292_v35 = vmax.f32 %v7202_v6, %v3291_v52  ;;  %v3483_v26 = vsel %vm3160_vm3, %v3119_v41, -inf  ;;  %v2861_v27 = vadd.f32 %v6921_v42, %v2598_v20  ;;  %v2738_v57 = vadd.f32 %v6921_v42, %v2475_v12  ;;  %v7330_v20 = vpop.f32.mrf.mxu0 }
 0x1ad   :  { %v3484_v47 = vmax.f32 %v3482_v62, %v3483_v26  ;;  %v2866_v13 = vadd.f32 %v6921_v42, %v2603_v4  ;;  %v2736_v61 = vadd.f32 %v6921_v42, %v2473_v2  ;;  %v2989_v33 = vmax.f32 %v2733_v10, 0.0 }
 0x1ae   :  { %3588 = vst.msk [vmem:[#allocation2 + $0x158] sm:$0xff] %vm3160_vm3, %v3292_v35  ;;  %v3117_v21 = vmax.f32 %v2861_v27, 0.0  ;;  %v2601_v6 = vmul.f32 %v6896_v37, %v6988_v40  ;;  %v2476_v46 = vmul.f32 %v6896_v37, %v7009_v39  ;;  %v2994_v62 = vmax.f32 %v2738_v57, 0.0 }
 0x1af   :  { %3652 = vst.msk [vmem:[#allocation2 + $0x358] sm:$0xff] %vm3160_vm3, %v3484_v47  ;;  %v3122_v63 = vmax.f32 %v2866_v13, 0.0  ;;  %v2992_v17 = vmax.f32 %v2736_v61, 0.0  ;;  %v2604_v50 = vmul.f32 %v6896_v37, %v7011_v8  ;;  %v3285_v14 = vsel %vm3160_vm3, %v2989_v33, -inf  ;;  %v7314_v8 = vpop.f32.mrf.mxu1  ;;  %v7927_v61 = vld [vmem:[#allocation3_spill] sm:$0xff] }
 0x1b0   :  { %v3477_v44 = vsel %vm3160_vm3, %v3117_v21, -inf  ;;  %v2864_v34 = vadd.f32 %v6921_v42, %v2601_v6  ;;  %v2739_v40 = vadd.f32 %v6921_v42, %v2476_v46  ;;  %v3286_v39 = vmax.f32 %v7227_v18, %v3285_v14 }
 0x1b1   :  { %v3478_v29 = vmax.f32 %v7230_v49, %v3477_v44  ;;  %v3299_v59 = vsel %vm3160_vm3, %v2994_v62, -inf  ;;  %v7312_v25 = vsel %vm3160_vm3, %v3122_v63, -inf  ;;  %v7317_v22 = vsel %vm3160_vm3, %v2992_v17, -inf  ;;  %v7344_v10 = vpop.f32.mrf.mxu1  ;;  %v7352_v63 = vpop.f32.mrf.mxu0 }
 0x1b2   :  { %v3120_v1 = vmax.f32 %v2864_v34, 0.0  ;;  %v2995_v11 = vmax.f32 %v2739_v40, 0.0  ;;  %v2867_v24 = vadd.f32 %v6921_v42, %v2604_v50  ;;  %3586 = vst.msk [vmem:[#allocation2 + $0x148] sm:$0xff] %vm3160_vm3, %v3286_v39  ;;  %v2474_v18 = vmul.f32 %v6896_v37, %v7020_v0 }
 0x1b3   :  { %3650 = vst.msk [vmem:[#allocation2 + $0x348] sm:$0xff] %vm3160_vm3, %v3478_v29  ;;  %v2602_v49 = vmul.f32 %v6896_v37, %v7022_v48  ;;  %v2479_v41 = vmul.f32 %v6896_v37, %v7036_v55  ;;  %v2607_v36 = vmul.f32 %v6896_v37, %v7038_v43  ;;  %v2477_v0 = vmul.f32 %v6896_v37, %v7050_v38 }
 0x1b4   :  { %v7333_v52 = vsel %vm3160_vm3, %v3120_v1, -inf  ;;  %v7336_v12 = vsel %vm3160_vm3, %v2995_v11, -inf  ;;  %v3123_v4 = vmax.f32 %v2867_v24, 0.0  ;;  %v2737_v35 = vadd.f32 %v6921_v42, %v2474_v18  ;;  %v7362_v1 = vpop.f32.mrf.mxu1 }
 0x1b5   :  { %v3715_v2 = vld [vmem:[#allocation2 + $0x150] ss:$2 sm:$0xff]  ;;  %v3843_v48 = vld [vmem:[#allocation2 + $0x151] ss:$2 sm:$0xff]  ;;  %v2865_v55 = vadd.f32 %v6921_v42, %v2602_v49  ;;  %v2742_v43 = vadd.f32 %v6921_v42, %v2479_v41  ;;  %v2870_v26 = vadd.f32 %v6921_v42, %v2607_v36  ;;  %v2740_v38 = vadd.f32 %v6921_v42, %v2477_v0  ;;  %v7928_v41 = vld [vmem:[#allocation4_spill] sm:$0xff] }
 0x1b6   :  { %v3949_v27 = vmax.f32 %v3715_v2, %v3843_v48  ;;  %v3779_v47 = vld [vmem:[#allocation2 + $0x350] ss:$2 sm:$0xff]  ;;  %v3907_v57 = vld [vmem:[#allocation2 + $0x351] ss:$2 sm:$0xff]  ;;  %v7347_v13 = vsel %vm3160_vm3, %v3123_v4, -inf  ;;  %v2605_v33 = vmul.f32 %v6896_v37, %v7927_v61  ;;  %v2993_v6 = vmax.f32 %v2737_v35, 0.0 }
 0x1b7   :  { %v3981_v21 = vmax.f32 %v3779_v47, %v3907_v57  ;;  %v3121_v46 = vmax.f32 %v2865_v55, 0.0  ;;  %v2998_v62 = vmax.f32 %v2742_v43, 0.0  ;;  %v3126_v50 = vmax.f32 %v2870_v26, 0.0  ;;  %v7929_v4 = vld [vmem:[#allocation5_spill] sm:$0xff]  ;;  %v7930_v2 = vld [vmem:[#allocation6_spill] sm:$0xff] }
 0x1b8   :  { %v4662_v17 = vpack.c.bf16 %v3949_v27, %v3949_v27  ;;  %v2996_v14 = vmax.f32 %v2740_v38, 0.0  ;;  %v2868_v44 = vadd.f32 %v6921_v42, %v2605_v33  ;;  %v7356_v40 = vsel %vm3160_vm3, %v2993_v6, -inf  ;;  %v7380_v27 = vpop.f32.mrf.mxu0 }
 0x1b9   :  { %v4694_v34 = vpack.c.bf16 %v3981_v21, %v3981_v21  ;;  %v7359_v39 = vsel %vm3160_vm3, %v3121_v46, -inf  ;;  %v3300_v29 = vsel %vm3160_vm3, %v2998_v62, -inf  ;;  %v3713_v11 = vld [vmem:[#allocation2 + $0x140] ss:$2 sm:$0xff]  ;;  %v3841_v24 = vld [vmem:[#allocation2 + $0x141] ss:$2 sm:$0xff]  ;;  %v2480_v36 = vmul.f32 %v6896_v37, %v7928_v41  ;;  %v7389_v62 = vpop.f32.mrf.mxu1 }
 0x1ba   :  { %4270 = vst.msk [vmem:[%s7921_s4 + $0x54] sm:$0xf] %vm4248_vm4, %v4662_v17  ;;  %v3777_v18 = vld [vmem:[#allocation2 + $0x340] ss:$2 sm:$0xff]  ;;  %v3301_v49 = vmax.f32 %v3299_v59, %v3300_v29  ;;  %v2608_v0 = vmul.f32 %v6896_v37, %v7929_v4  ;;  %v2478_v48 = vmul.f32 %v6896_v37, %v7930_v2  ;;  %v3948_v35 = vmax.f32 %v3713_v11, %v3841_v24  ;;  %v3905_v55 = vld [vmem:[#allocation2 + $0x341] ss:$2 sm:$0xff]  ;;  %v7404_v24 = vpop.f32.mrf.mxu0 }
 0x1bb   :  { %4302 = vst.msk [vmem:[%s7921_s4 + $0xd4] sm:$0xf] %vm4248_vm4, %v4694_v34  ;;  %v3492_v43 = vsel %vm3160_vm3, %v3126_v50, -inf  ;;  %v3294_v59 = vsel %vm3160_vm3, %v2996_v14, -inf  ;;  %v3124_v26 = vmax.f32 %v2868_v44, 0.0  ;;  %v3980_v47 = vmax.f32 %v3777_v18, %v3905_v55 }
 0x1bc   :  { %3591 = vst.msk [vmem:[#allocation2 + $0x170] sm:$0xff] %vm3160_vm3, %v3301_v49  ;;  %v3493_v57 = vmax.f32 %v7312_v25, %v3492_v43  ;;  %v3295_v38 = vmax.f32 %v7317_v22, %v3294_v59  ;;  %v2743_v61 = vadd.f32 %v6921_v42, %v2480_v36  ;;  %v4661_v33 = vpack.c.bf16 %v3948_v35, %v3948_v35  ;;  %v7931_v22 = vld [vmem:[#allocation7_spill] sm:$0xff]  ;;  %v7431_v59 = vpop.f32.mrf.mxu0 }
 0x1bd   :  { %v3486_v21 = vsel %vm3160_vm3, %v3124_v26, -inf  ;;  %v2871_v6 = vadd.f32 %v6921_v42, %v2608_v0  ;;  %v2741_v46 = vadd.f32 %v6921_v42, %v2478_v48  ;;  %v4693_v17 = vpack.c.bf16 %v3980_v47, %v3980_v47  ;;  %v7421_v0 = vpop.f32.mrf.mxu1 }
 0x1be   :  { %3655 = vst.msk [vmem:[#allocation2 + $0x370] sm:$0xff] %vm3160_vm3, %v3493_v57  ;;  %3589 = vst.msk [vmem:[#allocation2 + $0x160] sm:$0xff] %vm3160_vm3, %v3295_v38  ;;  %v3487_v25 = vmax.f32 %v7333_v52, %v3486_v21  ;;  %v2999_v50 = vmax.f32 %v2743_v61, 0.0  ;;  %v2606_v14 = vmul.f32 %v6896_v37, %v7931_v22  ;;  %v2483_v29 = vmul.f32 %v6896_v37, %v7097_v45 }
 0x1bf   :  { %4269 = vst.msk [vmem:[%s7921_s4 + $0x50] sm:$0xf] %vm4248_vm4, %v4661_v33  ;;  %v3127_v44 = vmax.f32 %v2871_v6, 0.0  ;;  %v2997_v34 = vmax.f32 %v2741_v46, 0.0  ;;  %v2611_v11 = vmul.f32 %v6896_v37, %v7099_v58  ;;  %4301 = vst.msk [vmem:[%s7921_s4 + $0xd0] sm:$0xf] %vm4248_vm4, %v4693_v17  ;;  %v2481_v49 = vmul.f32 %v6896_v37, %v7106_v54  ;;  %v7444_v33 = vpop.f32.mrf.mxu1 }
 0x1c0   :  { %3653 = vst.msk [vmem:[#allocation2 + $0x360] sm:$0xff] %vm3160_vm3, %v3487_v25  ;;  %v3303_v52 = vsel %vm3160_vm3, %v2999_v50, -inf  ;;  %v2869_v18 = vadd.f32 %v6921_v42, %v2606_v14  ;;  %v2609_v45 = vmul.f32 %v6896_v37, %v7108_v53  ;;  %v2746_v4 = vadd.f32 %v6921_v42, %v2483_v29  ;;  %v7463_v50 = vpop.f32.mrf.mxu0 }
 0x1c1   :  { %v3304_v58 = vmax.f32 %v7336_v12, %v3303_v52  ;;  %v3495_v41 = vsel %vm3160_vm3, %v3127_v44, -inf  ;;  %v3297_v36 = vsel %vm3160_vm3, %v2997_v34, -inf  ;;  %v2874_v54 = vadd.f32 %v6921_v42, %v2611_v11 }
 0x1c2   :  { %v3496_v2 = vmax.f32 %v7347_v13, %v3495_v41  ;;  %v3298_v48 = vmax.f32 %v7356_v40, %v3297_v36  ;;  %v3125_v35 = vmax.f32 %v2869_v18, 0.0  ;;  %v3002_v53 = vmax.f32 %v2746_v4, 0.0  ;;  %v7473_v18 = vpop.f32.mrf.mxu1 }
 0x1c3   :  { %3592 = vst.msk [vmem:[#allocation2 + $0x178] sm:$0xff] %vm3160_vm3, %v3304_v58  ;;  %v2744_v12 = vadd.f32 %v6921_v42, %v2481_v49  ;;  %v2872_v55 = vadd.f32 %v6921_v42, %v2609_v45  ;;  %v2484_v43 = vmul.f32 %v6896_v37, %v7122_v7  ;;  %v3130_v40 = vmax.f32 %v2874_v54, 0.0  ;;  %v7488_v54 = vpop.f32.mrf.mxu0 }
 0x1c4   :  { %3656 = vst.msk [vmem:[#allocation2 + $0x378] sm:$0xff] %vm3160_vm3, %v3496_v2  ;;  %3590 = vst.msk [vmem:[#allocation2 + $0x168] sm:$0xff] %vm3160_vm3, %v3298_v48  ;;  %v3489_v13 = vsel %vm3160_vm3, %v3125_v35, -inf  ;;  %v2612_v26 = vmul.f32 %v6896_v37, %v7133_v51  ;;  %v2482_v47 = vmul.f32 %v6896_v37, %v7150_v32  ;;  %v7442_v38 = vsel %vm3160_vm3, %v3002_v53, -inf }
 0x1c5   :  { %v3490_v57 = vmax.f32 %v7359_v39, %v3489_v13  ;;  %v3000_v7 = vmax.f32 %v2744_v12, 0.0  ;;  %v3128_v61 = vmax.f32 %v2872_v55, 0.0  ;;  %v7447_v21 = vsel %vm3160_vm3, %v3130_v40, -inf }
 0x1c6   :  { %v2747_v6 = vadd.f32 %v6921_v42, %v2484_v43  ;;  %v2875_v46 = vadd.f32 %v6921_v42, %v2612_v26  ;;  %v2745_v51 = vadd.f32 %v6921_v42, %v2482_v47  ;;  %v2610_v17 = vmul.f32 %v6896_v37, %v7165_v60 }
 0x1c7   :  { %3654 = vst.msk [vmem:[#allocation2 + $0x368] sm:$0xff] %vm3160_vm3, %v3490_v57  ;;  %v7454_v32 = vsel %vm3160_vm3, %v3000_v7, -inf  ;;  %v7457_v39 = vsel %vm3160_vm3, %v3128_v61, -inf  ;;  %v2487_v25 = vmul.f32 %v6896_v37, %v7173_v5  ;;  %v2615_v34 = vmul.f32 %v6896_v37, %v7182_v28  ;;  %v7493_v57 = vpop.f32.mrf.mxu1 }
 0x1c8   :  { %v3003_v22 = vmax.f32 %v2747_v6, 0.0  ;;  %v3131_v14 = vmax.f32 %v2875_v46, 0.0  ;;  %v3001_v44 = vmax.f32 %v2745_v51, 0.0  ;;  %v2873_v29 = vadd.f32 %v6921_v42, %v2610_v17 }
 0x1c9   :  { %v2750_v11 = vadd.f32 %v6921_v42, %v2487_v25  ;;  %v2485_v52 = vmul.f32 %v6896_v37, %v7206_v16  ;;  %v2613_v60 = vmul.f32 %v6896_v37, %v7218_v56  ;;  %v2878_v28 = vadd.f32 %v6921_v42, %v2615_v34 }
 0x1ca   :  { %v3719_v5 = vld [vmem:[#allocation2 + $0x170] ss:$2 sm:$0xff]  ;;  %v3847_v49 = vld [vmem:[#allocation2 + $0x171] ss:$2 sm:$0xff]  ;;  %v7476_v45 = vsel %vm3160_vm3, %v3003_v22, -inf  ;;  %v7479_v58 = vsel %vm3160_vm3, %v3131_v14, -inf  ;;  %v2488_v41 = vmul.f32 %v6896_v37, %v7223_v31  ;;  %v2616_v35 = vmul.f32 %v6896_v37, %v7241_v30  ;;  %v7506_v14 = vpop.f32.mrf.mxu0 }
 0x1cb   :  { %v3951_v36 = vmax.f32 %v3719_v5, %v3847_v49  ;;  %v3783_v16 = vld [vmem:[#allocation2 + $0x370] ss:$2 sm:$0xff]  ;;  %v3911_v4 = vld [vmem:[#allocation2 + $0x371] ss:$2 sm:$0xff]  ;;  %v3717_v2 = vld [vmem:[#allocation2 + $0x160] ss:$2 sm:$0xff]  ;;  %v2748_v56 = vadd.f32 %v6921_v42, %v2485_v52  ;;  %v2876_v48 = vadd.f32 %v6921_v42, %v2613_v60  ;;  %v7528_v49 = vpop.f32.mrf.mxu1 }
 0x1cc   :  { %v3983_v53 = vmax.f32 %v3783_v16, %v3911_v4  ;;  %v3845_v12 = vld [vmem:[#allocation2 + $0x161] ss:$2 sm:$0xff]  ;;  %v7491_v55 = vsel %vm3160_vm3, %v3001_v44, -inf  ;;  %v3129_v43 = vmax.f32 %v2873_v29, 0.0  ;;  %v3006_v31 = vmax.f32 %v2750_v11, 0.0 }
 0x1cd   :  { %v4664_v13 = vpack.c.bf16 %v3951_v36, %v3951_v36  ;;  %v3950_v40 = vmax.f32 %v3717_v2, %v3845_v12  ;;  %v3134_v26 = vmax.f32 %v2878_v28, 0.0  ;;  %v3004_v47 = vmax.f32 %v2748_v56, 0.0  ;;  %v7547_v4 = vld [vmem:[%s7920_s3] ss:$0 sm:$0xff] }
 0x1ce   :  { %v4696_v7 = vpack.c.bf16 %v3983_v53, %v3983_v53  ;;  %v3781_v61 = vld [vmem:[#allocation2 + $0x360] ss:$2 sm:$0xff]  ;;  %v3909_v6 = vld [vmem:[#allocation2 + $0x361] ss:$2 sm:$0xff]  ;;  %v7496_v37 = vsel %vm3160_vm3, %v3129_v43, -inf  ;;  %v3312_v30 = vsel %vm3160_vm3, %v3006_v31, -inf  ;;  %v2751_v46 = vadd.f32 %v6921_v42, %v2488_v41  ;;  %v7565_v43 = vpop.f32.mrf.mxu1 }
 0x1cf   :  { %4272 = vst.msk [vmem:[%s7921_s4 + $0x5c] sm:$0xf] %vm4248_vm4, %v4664_v13  ;;  %v4663_v51 = vpack.c.bf16 %v3950_v40, %v3950_v40  ;;  %v3982_v17 = vmax.f32 %v3781_v61, %v3909_v6  ;;  %v3313_v25 = vmax.f32 %v7442_v38, %v3312_v30  ;;  %v3504_v22 = vsel %vm3160_vm3, %v3134_v26, -inf }
 0x1d0   :  { %4304 = vst.msk [vmem:[%s7921_s4 + $0xdc] sm:$0xf] %vm4248_vm4, %v4696_v7  ;;  %v3505_v44 = vmax.f32 %v7447_v21, %v3504_v22  ;;  %v3306_v34 = vsel %vm3160_vm3, %v3004_v47, -inf  ;;  %v3132_v29 = vmax.f32 %v2876_v48, 0.0  ;;  %v3007_v11 = vmax.f32 %v2751_v46, 0.0 }
 0x1d1   :  { %4271 = vst.msk [vmem:[%s7921_s4 + $0x58] sm:$0xf] %vm4248_vm4, %v4663_v51  ;;  %v4695_v38 = vpack.c.bf16 %v3982_v17, %v3982_v17  ;;  %v3307_v52 = vmax.f32 %v7454_v32, %v3306_v34  ;;  %v2879_v60 = vadd.f32 %v6921_v42, %v2616_v35  ;;  %v7524_v21 = vld [vmem:[%s7919_s2] ss:$0 sm:$0xff] }
 0x1d2   :  { %3595 = vst.msk [vmem:[#allocation2 + $0x190] sm:$0xff] %vm3160_vm3, %v3313_v25  ;;  %v2486_v5 = vmul.f32 %v7524_v21, %v7246_v23  ;;  %3659 = vst.msk [vmem:[#allocation2 + $0x390] sm:$0xff] %vm3160_vm3, %v3505_v44  ;;  %v3498_v28 = vsel %vm3160_vm3, %v3132_v29, -inf  ;;  %v3315_v41 = vsel %vm3160_vm3, %v3007_v11, -inf  ;;  %v2614_v32 = vmul.f32 %v7524_v21, %v7258_v3  ;;  %v7582_v25 = vpop.f32.mrf.mxu1 }
 0x1d3   :  { %v2491_v42 = vmul.f32 %v7524_v21, %v7282_v9  ;;  %4303 = vst.msk [vmem:[%s7921_s4 + $0xd8] sm:$0xf] %vm4248_vm4, %v4695_v38  ;;  %v3499_v23 = vmax.f32 %v7457_v39, %v3498_v28  ;;  %v3316_v36 = vmax.f32 %v7476_v45, %v3315_v41  ;;  %v3135_v16 = vmax.f32 %v2879_v60, 0.0  ;;  %v7550_v9 = vpop.f32.mrf.mxu0 }
 0x1d4   :  { %3593 = vst.msk [vmem:[#allocation2 + $0x180] sm:$0xff] %vm3160_vm3, %v3307_v52  ;;  %v2749_v3 = vadd.f32 %v7547_v4, %v2486_v5  ;;  %v2877_v2 = vadd.f32 %v7547_v4, %v2614_v32  ;;  %v2619_v48 = vmul.f32 %v7524_v21, %v7292_v15  ;;  %v2489_v39 = vmul.f32 %v7524_v21, %v7302_v19 }
 0x1d5   :  { %v2754_v56 = vadd.f32 %v7547_v4, %v2491_v42  ;;  %3657 = vst.msk [vmem:[#allocation2 + $0x380] sm:$0xff] %vm3160_vm3, %v3499_v23  ;;  %3596 = vst.msk [vmem:[#allocation2 + $0x198] sm:$0xff] %vm3160_vm3, %v3316_v36  ;;  %v3507_v45 = vsel %vm3160_vm3, %v3135_v16, -inf  ;;  %v2617_v53 = vmul.f32 %v7524_v21, %v7314_v8  ;;  %v2492_v12 = vmul.f32 %v7524_v21, %v7330_v20  ;;  %v7573_v8 = vpop.f32.mrf.mxu0  ;;  %v7618_v23 = vpop.f32.mrf.mxu1 }
 0x1d6   :  { %v3005_v35 = vmax.f32 %v2749_v3, 0.0  ;;  %v3508_v15 = vmax.f32 %v7479_v58, %v3507_v45  ;;  %v3133_v31 = vmax.f32 %v2877_v2, 0.0  ;;  %v2882_v19 = vadd.f32 %v7547_v4, %v2619_v48 }
 0x1d7   :  { %v3010_v13 = vmax.f32 %v2754_v56, 0.0  ;;  %v2752_v26 = vadd.f32 %v7547_v4, %v2489_v39  ;;  %v2880_v47 = vadd.f32 %v7547_v4, %v2617_v53  ;;  %v2755_v7 = vadd.f32 %v7547_v4, %v2492_v12  ;;  %v7606_v38 = vpop.f32.mrf.mxu0 }
 0x1d8   :  { %v3309_v40 = vsel %vm3160_vm3, %v3005_v35, -inf  ;;  %3660 = vst.msk [vmem:[#allocation2 + $0x398] sm:$0xff] %vm3160_vm3, %v3508_v15  ;;  %v3501_v58 = vsel %vm3160_vm3, %v3133_v31, -inf  ;;  %v3138_v6 = vmax.f32 %v2882_v19, 0.0  ;;  %v2490_v44 = vmul.f32 %v7524_v21, %v7352_v63 }
 0x1d9   :  { %v3310_v20 = vmax.f32 %v7491_v55, %v3309_v40  ;;  %v7579_v61 = vsel %vm3160_vm3, %v3010_v13, -inf  ;;  %v3502_v30 = vmax.f32 %v7496_v37, %v3501_v58  ;;  %v3008_v46 = vmax.f32 %v2752_v26, 0.0  ;;  %v7623_v53 = vpop.f32.mrf.mxu0 }
 0x1da   :  { %v3136_v51 = vmax.f32 %v2880_v47, 0.0  ;;  %v3011_v17 = vmax.f32 %v2755_v7, 0.0  ;;  %v7586_v22 = vsel %vm3160_vm3, %v3138_v6, -inf  ;;  %v2620_v55 = vmul.f32 %v7524_v21, %v7344_v10  ;;  %v7641_v7 = vpop.f32.mrf.mxu1 }
 0x1db   :  { %3594 = vst.msk [vmem:[#allocation2 + $0x188] sm:$0xff] %vm3160_vm3, %v3310_v20  ;;  %v2618_v34 = vmul.f32 %v7524_v21, %v7362_v1  ;;  %3658 = vst.msk [vmem:[#allocation2 + $0x388] sm:$0xff] %vm3160_vm3, %v3502_v30  ;;  %v7596_v37 = vsel %vm3160_vm3, %v3008_v46, -inf  ;;  %v2495_v10 = vmul.f32 %v7524_v21, %v7380_v27  ;;  %v2753_v60 = vadd.f32 %v7547_v4, %v2490_v44 }
 0x1dc   :  { %v7599_v29 = vsel %vm3160_vm3, %v3136_v51, -inf  ;;  %v7602_v11 = vsel %vm3160_vm3, %v3011_v17, -inf  ;;  %v3723_v63 = vld [vmem:[#allocation2 + $0x190] ss:$2 sm:$0xff]  ;;  %v3851_v52 = vld [vmem:[#allocation2 + $0x191] ss:$2 sm:$0xff]  ;;  %v2883_v1 = vadd.f32 %v7547_v4, %v2620_v55  ;;  %v2623_v28 = vmul.f32 %v7524_v21, %v7389_v62 }
 0x1dd   :  { %v2881_v5 = vadd.f32 %v7547_v4, %v2618_v34  ;;  %v3953_v41 = vmax.f32 %v3723_v63, %v3851_v52  ;;  %v2758_v32 = vadd.f32 %v7547_v4, %v2495_v10  ;;  %v2493_v42 = vmul.f32 %v7524_v21, %v7404_v24  ;;  %v7646_v10 = vpop.f32.mrf.mxu0 }
 0x1de   :  { %v2621_v27 = vmul.f32 %v7524_v21, %v7421_v0  ;;  %v3139_v36 = vmax.f32 %v2883_v1, 0.0  ;;  %v3009_v16 = vmax.f32 %v2753_v60, 0.0  ;;  %v2886_v2 = vadd.f32 %v7547_v4, %v2623_v28  ;;  %v7658_v28 = vpop.f32.mrf.mxu1 }
 0x1df   :  { %v3137_v3 = vmax.f32 %v2881_v5, 0.0  ;;  %v4666_v56 = vpack.c.bf16 %v3953_v41, %v3953_v41  ;;  %v3787_v48 = vld [vmem:[#allocation2 + $0x390] ss:$2 sm:$0xff]  ;;  %v3915_v39 = vld [vmem:[#allocation2 + $0x391] ss:$2 sm:$0xff]  ;;  %v3014_v62 = vmax.f32 %v2758_v32, 0.0  ;;  %v2756_v45 = vadd.f32 %v7547_v4, %v2493_v42 }
 0x1e0   :  { %v2884_v35 = vadd.f32 %v7547_v4, %v2621_v27  ;;  %v3985_v24 = vmax.f32 %v3787_v48, %v3915_v39  ;;  %v3518_v0 = vsel %vm3160_vm3, %v3139_v36, -inf  ;;  %v7627_v12 = vsel %vm3160_vm3, %v3009_v16, -inf  ;;  %v7682_v36 = vpop.f32.mrf.mxu0 }
 0x1e1   :  { %v7630_v15 = vsel %vm3160_vm3, %v3137_v3, -inf  ;;  %4274 = vst.msk [vmem:[%s7921_s4 + $0x64] sm:$0xf] %vm4248_vm4, %v4666_v56  ;;  %v3324_v19 = vsel %vm3160_vm3, %v3014_v62, -inf  ;;  %v3142_v40 = vmax.f32 %v2886_v2, 0.0  ;;  %v2496_v26 = vmul.f32 %v7524_v21, %v7431_v59 }
 0x1e2   :  { %v3721_v31 = vld [vmem:[#allocation2 + $0x180] ss:$2 sm:$0xff]  ;;  %v3849_v13 = vld [vmem:[#allocation2 + $0x181] ss:$2 sm:$0xff]  ;;  %v2624_v47 = vmul.f32 %v7524_v21, %v7444_v33  ;;  %v4698_v20 = vpack.c.bf16 %v3985_v24, %v3985_v24  ;;  %v3325_v46 = vmax.f32 %v7579_v61, %v3324_v19  ;;  %v3012_v51 = vmax.f32 %v2756_v45, 0.0 }
 0x1e3   :  { %v3952_v58 = vmax.f32 %v3721_v31, %v3849_v13  ;;  %v3785_v6 = vld [vmem:[#allocation2 + $0x380] ss:$2 sm:$0xff]  ;;  %v3913_v30 = vld [vmem:[#allocation2 + $0x381] ss:$2 sm:$0xff]  ;;  %v3516_v55 = vsel %vm3160_vm3, %v3142_v40, -inf  ;;  %v3140_v44 = vmax.f32 %v2884_v35, 0.0  ;;  %v2759_v34 = vadd.f32 %v7547_v4, %v2496_v26  ;;  %v7702_v13 = vpop.f32.mrf.mxu0 }
 0x1e4   :  { %v3984_v17 = vmax.f32 %v3785_v6, %v3913_v30  ;;  %4306 = vst.msk [vmem:[%s7921_s4 + $0xe4] sm:$0xf] %vm4248_vm4, %v4698_v20  ;;  %v3517_v33 = vmax.f32 %v7586_v22, %v3516_v55  ;;  %v3318_v61 = vsel %vm3160_vm3, %v3012_v51, -inf  ;;  %v2887_v63 = vadd.f32 %v7547_v4, %v2624_v47 }
 0x1e5   :  { %v4665_v59 = vpack.c.bf16 %v3952_v58, %v3952_v58  ;;  %3599 = vst.msk [vmem:[#allocation2 + $0x1b0] sm:$0xff] %vm3160_vm3, %v3325_v46  ;;  %v3319_v1 = vmax.f32 %v7596_v37, %v3318_v61  ;;  %v3510_v60 = vsel %vm3160_vm3, %v3140_v44, -inf  ;;  %v3015_v5 = vmax.f32 %v2759_v34, 0.0  ;;  %v7730_v44 = vpop.f32.mrf.mxu0 }
 0x1e6   :  { %v4697_v52 = vpack.c.bf16 %v3984_v17, %v3984_v17  ;;  %3663 = vst.msk [vmem:[#allocation2 + $0x3b0] sm:$0xff] %vm3160_vm3, %v3517_v33  ;;  %v3511_v22 = vmax.f32 %v7599_v29, %v3510_v60  ;;  %v3143_v41 = vmax.f32 %v2887_v63, 0.0  ;;  %v2494_v32 = vmul.f32 %v7524_v21, %v7463_v50 }
 0x1e7   :  { %4273 = vst.msk [vmem:[%s7921_s4 + $0x60] sm:$0xf] %vm4248_vm4, %v4665_v59  ;;  %v2622_v37 = vmul.f32 %v7524_v21, %v7473_v18  ;;  %v3327_v42 = vsel %vm3160_vm3, %v3015_v5, -inf  ;;  %v2499_v27 = vmul.f32 %v7524_v21, %v7488_v54  ;;  %v2627_v29 = vmul.f32 %v7524_v21, %v7493_v57 }
 0x1e8   :  { %4305 = vst.msk [vmem:[%s7921_s4 + $0xe0] sm:$0xf] %vm4248_vm4, %v4697_v52  ;;  %v2497_v50 = vmul.f32 %v7524_v21, %v7506_v14  ;;  %v3328_v18 = vmax.f32 %v7602_v11, %v3327_v42  ;;  %v3519_v16 = vsel %vm3160_vm3, %v3143_v41, -inf  ;;  %v2757_v3 = vadd.f32 %v7547_v4, %v2494_v32  ;;  %v7692_v14 = vpop.f32.mrf.mxu1 }
 0x1e9   :  { %3597 = vst.msk [vmem:[#allocation2 + $0x1a0] sm:$0xff] %vm3160_vm3, %v3319_v1  ;;  %3661 = vst.msk [vmem:[#allocation2 + $0x3a0] sm:$0xff] %vm3160_vm3, %v3511_v22  ;;  %v2885_v2 = vadd.f32 %v7547_v4, %v2622_v37  ;;  %v3520_v56 = vmax.f32 %v3518_v0, %v3519_v16  ;;  %v2762_v54 = vadd.f32 %v7547_v4, %v2499_v27 }
 0x1ea   :  { %v2890_v57 = vadd.f32 %v7547_v4, %v2627_v29  ;;  %v2760_v48 = vadd.f32 %v7547_v4, %v2497_v50  ;;  %3600 = vst.msk [vmem:[#allocation2 + $0x1b8] sm:$0xff] %vm3160_vm3, %v3328_v18  ;;  %v3013_v39 = vmax.f32 %v2757_v3, 0.0  ;;  %v2625_v11 = vmul.f32 %v7524_v21, %v7528_v49  ;;  %v7752_v50 = vpop.f32.mrf.mxu0 }
 0x1eb   :  { %v3141_v62 = vmax.f32 %v2885_v2, 0.0  ;;  %v2500_v45 = vmul.f32 %v7524_v21, %v7550_v9  ;;  %3664 = vst.msk [vmem:[#allocation2 + $0x3b8] sm:$0xff] %vm3160_vm3, %v3520_v56  ;;  %v3018_v35 = vmax.f32 %v2762_v54, 0.0  ;;  %v2628_v31 = vmul.f32 %v7524_v21, %v7565_v43  ;;  %v7714_v43 = vpop.f32.mrf.mxu1 }
 0x1ec   :  { %v3146_v24 = vmax.f32 %v2890_v57, 0.0  ;;  %v3016_v0 = vmax.f32 %v2760_v48, 0.0  ;;  %v3321_v19 = vsel %vm3160_vm3, %v3013_v39, -inf  ;;  %v2888_v26 = vadd.f32 %v7547_v4, %v2625_v11 }
 0x1ed   :  { %v3513_v40 = vsel %vm3160_vm3, %v3141_v62, -inf  ;;  %v2763_v49 = vadd.f32 %v7547_v4, %v2500_v45  ;;  %v3322_v9 = vmax.f32 %v7627_v12, %v3321_v19  ;;  %v3335_v20 = vsel %vm3160_vm3, %v3018_v35, -inf  ;;  %v7744_v1 = vpop.f32.mrf.mxu1 }
 0x1ee   :  { %v3514_v47 = vmax.f32 %v7630_v15, %v3513_v40  ;;  %v7712_v58 = vsel %vm3160_vm3, %v3146_v24, -inf  ;;  %v7717_v6 = vsel %vm3160_vm3, %v3016_v0, -inf  ;;  %v3144_v30 = vmax.f32 %v2888_v26, 0.0 }
 0x1ef   :  { %v3019_v46 = vmax.f32 %v2763_v49, 0.0  ;;  %v2891_v51 = vadd.f32 %v7547_v4, %v2628_v31  ;;  %3598 = vst.msk [vmem:[#allocation2 + $0x1a8] sm:$0xff] %vm3160_vm3, %v3322_v9  ;;  %v2498_v12 = vmul.f32 %v7524_v21, %v7573_v8  ;;  %v2626_v15 = vmul.f32 %v7524_v21, %v7582_v25  ;;  %v7762_v48 = vpop.f32.mrf.mxu1  ;;  %v1838_v9 = vpop.f32.mrf.mxu0 }
 0x1f0   :  { %3662 = vst.msk [vmem:[#allocation2 + $0x3a8] sm:$0xff] %vm3160_vm3, %v3514_v47  ;;  %v2503_v17 = vmul.f32 %v7524_v21, %v7606_v38  ;;  %v2631_v55 = vmul.f32 %v7524_v21, %v7618_v23  ;;  %v7733_v34 = vsel %vm3160_vm3, %v3144_v30, -inf  ;;  %v2501_v8 = vmul.f32 %v7524_v21, %v7623_v53 }
 0x1f1   :  { %v7736_v59 = vsel %vm3160_vm3, %v3019_v46, -inf  ;;  %v3147_v33 = vmax.f32 %v2891_v51, 0.0  ;;  %v3727_v61 = vld [vmem:[#allocation2 + $0x1b0] ss:$2 sm:$0xff]  ;;  %v3855_v25 = vld [vmem:[#allocation2 + $0x1b1] ss:$2 sm:$0xff]  ;;  %v2761_v63 = vadd.f32 %v7547_v4, %v2498_v12  ;;  %v2889_v38 = vadd.f32 %v7547_v4, %v2626_v15  ;;  %v2350_v12 = vpop.f32.mrf.mxu1 }
 0x1f2   :  { %v2766_v23 = vadd.f32 %v7547_v4, %v2503_v17  ;;  %v2894_v52 = vadd.f32 %v7547_v4, %v2631_v55  ;;  %v3955_v60 = vmax.f32 %v3727_v61, %v3855_v25  ;;  %v3791_v5 = vld [vmem:[#allocation2 + $0x3b0] ss:$2 sm:$0xff]  ;;  %v3919_v22 = vld [vmem:[#allocation2 + $0x3b1] ss:$2 sm:$0xff]  ;;  %v2764_v53 = vadd.f32 %v7547_v4, %v2501_v8  ;;  %v4965_v25 = vpop.f32.mrf.mxu0 }
 0x1f3   :  { %v7747_v41 = vsel %vm3160_vm3, %v3147_v33, -inf  ;;  %v2629_v32 = vmul.f32 %v7524_v21, %v7641_v7  ;;  %v3987_v37 = vmax.f32 %v3791_v5, %v3919_v22  ;;  %v3017_v42 = vmax.f32 %v2761_v63, 0.0 }
 0x1f4   :  { %v3145_v27 = vmax.f32 %v2889_v38, 0.0  ;;  %v3022_v29 = vmax.f32 %v2766_v23, 0.0  ;;  %v4668_v18 = vpack.c.bf16 %v3955_v60, %v3955_v60  ;;  %v3150_v16 = vmax.f32 %v2894_v52, 0.0  ;;  %v5093_v60 = vpop.f32.mrf.mxu1 }
 0x1f5   :  { %v3020_v3 = vmax.f32 %v2764_v53, 0.0  ;;  %v2892_v2 = vadd.f32 %v7547_v4, %v2629_v32  ;;  %v4700_v56 = vpack.c.bf16 %v3987_v37, %v3987_v37  ;;  %v7756_v54 = vsel %vm3160_vm3, %v3017_v42, -inf  ;;  %v1851_v42 = vpop.f32.mrf.mxu0 }
 0x1f6   :  { %v7759_v57 = vsel %vm3160_vm3, %v3145_v27, -inf  ;;  %v3336_v7 = vsel %vm3160_vm3, %v3022_v29, -inf  ;;  %4276 = vst.msk [vmem:[%s7921_s4 + $0x6c] sm:$0xf] %vm4248_vm4, %v4668_v18  ;;  %v3725_v39 = vld [vmem:[#allocation2 + $0x1a0] ss:$2 sm:$0xff]  ;;  %v2504_v35 = vmul.f32 %v7524_v21, %v7646_v10  ;;  %v2632_v24 = vmul.f32 %v7524_v21, %v7658_v28 }
 0x1f7   :  { %v3853_v62 = vld [vmem:[#allocation2 + $0x1a1] ss:$2 sm:$0xff]  ;;  %v3789_v11 = vld [vmem:[#allocation2 + $0x3a0] ss:$2 sm:$0xff]  ;;  %v3337_v45 = vmax.f32 %v3335_v20, %v3336_v7  ;;  %v2502_v0 = vmul.f32 %v7524_v21, %v7682_v36  ;;  %4308 = vst.msk [vmem:[%s7921_s4 + $0xec] sm:$0xf] %vm4248_vm4, %v4700_v56  ;;  %v2507_v8 = vmul.f32 %v7524_v21, %v7702_v13  ;;  %v2635_v61 = vmul.f32 %v7524_v21, %v7714_v43  ;;  %v2363_v56 = vpop.f32.mrf.mxu1 }
 0x1f8   :  { %v3954_v31 = vmax.f32 %v3725_v39, %v3853_v62  ;;  %v3917_v19 = vld [vmem:[#allocation2 + $0x3a1] ss:$2 sm:$0xff]  ;;  %v3528_v40 = vsel %vm3160_vm3, %v3150_v16, -inf  ;;  %v3330_v26 = vsel %vm3160_vm3, %v3020_v3, -inf  ;;  %v3148_v49 = vmax.f32 %v2892_v2, 0.0 }
 0x1f9   :  { %v3986_v10 = vmax.f32 %v3789_v11, %v3917_v19  ;;  %3603 = vst.msk [vmem:[#allocation2 + $0x1d0] sm:$0xff] %vm3160_vm3, %v3337_v45  ;;  %v3529_v28 = vmax.f32 %v7712_v58, %v3528_v40  ;;  %v3331_v36 = vmax.f32 %v7717_v6, %v3330_v26  ;;  %v2767_v47 = vadd.f32 %v7547_v4, %v2504_v35  ;;  %v5094_v26 = vpop.f32.mrf.mxu1 }
 0x1fa   :  { %v4667_v20 = vpack.c.bf16 %v3954_v31, %v3954_v31  ;;  %v3522_v30 = vsel %vm3160_vm3, %v3148_v49, -inf  ;;  %v2895_v46 = vadd.f32 %v7547_v4, %v2632_v24  ;;  %v2765_v51 = vadd.f32 %v7547_v4, %v2502_v0 }
 0x1fb   :  { %v4699_v15 = vpack.c.bf16 %v3986_v10, %v3986_v10  ;;  %3667 = vst.msk [vmem:[#allocation2 + $0x3d0] sm:$0xff] %vm3160_vm3, %v3529_v28  ;;  %3601 = vst.msk [vmem:[#allocation2 + $0x1c0] sm:$0xff] %vm3160_vm3, %v3331_v36  ;;  %v3523_v17 = vmax.f32 %v7733_v34, %v3522_v30  ;;  %v3023_v58 = vmax.f32 %v2767_v47, 0.0  ;;  %v2630_v6 = vmul.f32 %v7524_v21, %v7692_v14 }
 0x1fc   :  { %4275 = vst.msk [vmem:[%s7921_s4 + $0x68] sm:$0xf] %vm4248_vm4, %v4667_v20  ;;  %v3151_v55 = vmax.f32 %v2895_v46, 0.0  ;;  %v3021_v33 = vmax.f32 %v2765_v51, 0.0  ;;  %v2505_v63 = vmul.f32 %v7524_v21, %v7730_v44  ;;  %v2633_v13 = vmul.f32 %v7524_v21, %v7744_v1 }
 0x1fd   :  { %4307 = vst.msk [vmem:[%s7921_s4 + $0xe8] sm:$0xf] %vm4248_vm4, %v4699_v15  ;;  %v3339_v14 = vsel %vm3160_vm3, %v3023_v58, -inf  ;;  %v2893_v34 = vadd.f32 %v7547_v4, %v2630_v6  ;;  %v2770_v52 = vadd.f32 %v7547_v4, %v2507_v8  ;;  %v2898_v32 = vadd.f32 %v7547_v4, %v2635_v61 }
 0x1fe   :  { %3665 = vst.msk [vmem:[#allocation2 + $0x3c0] sm:$0xff] %vm3160_vm3, %v3523_v17  ;;  %v3340_v43 = vmax.f32 %v7736_v59, %v3339_v14  ;;  %v3531_v38 = vsel %vm3160_vm3, %v3151_v55, -inf  ;;  %v3333_v23 = vsel %vm3160_vm3, %v3021_v33, -inf  ;;  %v2768_v1 = vadd.f32 %v7547_v4, %v2505_v63 }
 0x1ff   :  { %v3532_v5 = vmax.f32 %v7747_v41, %v3531_v38  ;;  %v3334_v22 = vmax.f32 %v7756_v54, %v3333_v23  ;;  %v3149_v53 = vmax.f32 %v2893_v34, 0.0  ;;  %v3026_v44 = vmax.f32 %v2770_v52, 0.0 }
 0x200   :  { %3604 = vst.msk [vmem:[#allocation2 + $0x1d8] sm:$0xff] %vm3160_vm3, %v3340_v43  ;;  %v2896_v59 = vadd.f32 %v7547_v4, %v2633_v13  ;;  %v2508_v37 = vmul.f32 %v7524_v21, %v7752_v50  ;;  %v3154_v27 = vmax.f32 %v2898_v32, 0.0  ;;  %v2636_v29 = vmul.f32 %v7524_v21, %v7762_v48 }
 0x201   :  { %3668 = vst.msk [vmem:[#allocation2 + $0x3d8] sm:$0xff] %vm3160_vm3, %v3532_v5  ;;  %3602 = vst.msk [vmem:[#allocation2 + $0x1c8] sm:$0xff] %vm3160_vm3, %v3334_v22  ;;  %v3525_v41 = vsel %vm3160_vm3, %v3149_v53, -inf  ;;  %v2506_v18 = vmul.f32 %v7524_v21, %v1838_v9  ;;  %v3024_v3 = vmax.f32 %v2768_v1, 0.0  ;;  %v3347_v39 = vsel %vm3160_vm3, %v3026_v44, -inf  ;;  %v2366_v53 = vpop.f32.mrf.mxu1 }
 0x202   :  { %v3526_v16 = vmax.f32 %v7759_v57, %v3525_v41  ;;  %v3152_v2 = vmax.f32 %v2896_v59, 0.0  ;;  %v2771_v50 = vadd.f32 %v7547_v4, %v2508_v37  ;;  %v7832_v54 = vadd.f32 %v7547_v4, %v2636_v29  ;;  %v4966_v57 = vpop.f32.mrf.mxu0 }
 0x203   :  { %v7835_v7 = vadd.f32 %v7547_v4, %v2506_v18  ;;  %v3539_v48 = vsel %vm3160_vm3, %v3154_v27, -inf  ;;  %v2511_v62 = vmul.f32 %v7524_v21, %v4965_v25  ;;  %v3341_v11 = vsel %vm3160_vm3, %v3024_v3, -inf }
 0x204   :  { %3666 = vst.msk [vmem:[#allocation2 + $0x3c8] sm:$0xff] %vm3160_vm3, %v3526_v16  ;;  %v7843_v45 = vsel %vm3160_vm3, %v3152_v2, -inf  ;;  %v2634_v35 = vmul.f32 %v7524_v21, %v2350_v12  ;;  %v2639_v24 = vmul.f32 %v7524_v21, %v5093_v60  ;;  %v3027_v0 = vmax.f32 %v2771_v50, 0.0  ;;  %v1854_v23 = vpop.f32.mrf.mxu0 }
 0x205   :  { %v2774_v31 = vadd.f32 %v7547_v4, %v2511_v62  ;;  %v2509_v19 = vmul.f32 %v7524_v21, %v1851_v42  ;;  %v2637_v40 = vmul.f32 %v7524_v21, %v2363_v56  ;;  %v3155_v10 = vmax.f32 %v7832_v54, 0.0 }
 0x206   :  { %v3025_v28 = vmax.f32 %v7835_v7, 0.0  ;;  %v2902_v36 = vadd.f32 %v7547_v4, %v2639_v24  ;;  %v2512_v47 = vmul.f32 %v7524_v21, %v4966_v57  ;;  %v2640_v55 = vmul.f32 %v7524_v21, %v5094_v26 }
 0x207   :  { %v3731_v49 = vld [vmem:[#allocation2 + $0x1d0] ss:$2 sm:$0xff]  ;;  %v3859_v9 = vld [vmem:[#allocation2 + $0x1d1] ss:$2 sm:$0xff]  ;;  %v2772_v12 = vadd.f32 %v7547_v4, %v2509_v19  ;;  %v3030_v58 = vmax.f32 %v2774_v31, 0.0  ;;  %v2900_v6 = vadd.f32 %v7547_v4, %v2637_v40  ;;  %v2897_v13 = vadd.f32 %v7547_v4, %v2634_v35 }
 0x208   :  { %v3957_v20 = vmax.f32 %v3731_v49, %v3859_v9  ;;  %v3795_v30 = vld [vmem:[#allocation2 + $0x3d0] ss:$2 sm:$0xff]  ;;  %v3923_v46 = vld [vmem:[#allocation2 + $0x3d1] ss:$2 sm:$0xff]  ;;  %v3729_v51 = vld [vmem:[#allocation2 + $0x1c0] ss:$2 sm:$0xff]  ;;  %v2775_v38 = vadd.f32 %v7547_v4, %v2512_v47  ;;  %v2903_v41 = vadd.f32 %v7547_v4, %v2640_v55  ;;  %v2510_v27 = vmul.f32 %v7524_v21, %v1854_v23 }
 0x209   :  { %v3989_v15 = vmax.f32 %v3795_v30, %v3923_v46  ;;  %v3857_v17 = vld [vmem:[#allocation2 + $0x1c1] ss:$2 sm:$0xff]  ;;  %v3158_v61 = vmax.f32 %v2902_v36, 0.0  ;;  %v3028_v25 = vmax.f32 %v2772_v12, 0.0  ;;  %v3348_v43 = vsel %vm3160_vm3, %v3030_v58, -inf }
 0x20a   :  { %v4670_v33 = vpack.c.bf16 %v3957_v20, %v3957_v20  ;;  %v3956_v8 = vmax.f32 %v3729_v51, %v3857_v17  ;;  %v3349_v5 = vmax.f32 %v3347_v39, %v3348_v43  ;;  %v3156_v1 = vmax.f32 %v2900_v6, 0.0 }
 0x20b   :  { %v4702_v14 = vpack.c.bf16 %v3989_v15, %v3989_v15  ;;  %v3793_v34 = vld [vmem:[#allocation2 + $0x3c0] ss:$2 sm:$0xff]  ;;  %v3921_v63 = vld [vmem:[#allocation2 + $0x3c1] ss:$2 sm:$0xff]  ;;  %v3540_v22 = vsel %vm3160_vm3, %v3158_v61, -inf  ;;  %v3342_v44 = vsel %vm3160_vm3, %v3028_v25, -inf  ;;  %v2638_v3 = vmul.f32 %v7524_v21, %v2366_v53 }
 0x20c   :  { %4278 = vst.msk [vmem:[%s7921_s4 + $0x74] sm:$0xf] %vm4248_vm4, %v4670_v33  ;;  %v4669_v52 = vpack.c.bf16 %v3956_v8, %v3956_v8  ;;  %v3988_v60 = vmax.f32 %v3793_v34, %v3921_v63  ;;  %v3541_v32 = vmax.f32 %v3539_v48, %v3540_v22  ;;  %v3031_v59 = vmax.f32 %v2775_v38, 0.0 }
 0x20d   :  { %4310 = vst.msk [vmem:[%s7921_s4 + $0xf4] sm:$0xf] %vm4248_vm4, %v4702_v14  ;;  %v3343_v42 = vmax.f32 %v3341_v11, %v3342_v44  ;;  %v3350_v29 = vsel %vm3160_vm3, %v3027_v0, -inf  ;;  %v3534_v18 = vsel %vm3160_vm3, %v3156_v1, -inf  ;;  %v3159_v50 = vmax.f32 %v2903_v41, 0.0 }
 0x20e   :  { %4277 = vst.msk [vmem:[%s7921_s4 + $0x70] sm:$0xf] %vm4248_vm4, %v4669_v52  ;;  %v4701_v37 = vpack.c.bf16 %v3988_v60, %v3988_v60  ;;  %v3351_v16 = vsel %vm3160_vm3, %v3031_v59, -inf  ;;  %v3535_v2 = vmax.f32 %v7843_v45, %v3534_v18  ;;  %v2773_v54 = vadd.f32 %v7547_v4, %v2510_v27 }
 0x20f   :  { %3607 = vst.msk [vmem:[#allocation2 + $0x1f0] sm:$0xff] %vm3160_vm3, %v3349_v5  ;;  %3671 = vst.msk [vmem:[#allocation2 + $0x3f0] sm:$0xff] %vm3160_vm3, %v3541_v32  ;;  %v3352_v56 = vmax.f32 %v3350_v29, %v3351_v16  ;;  %v3153_v7 = vmax.f32 %v2897_v13, 0.0  ;;  %v2901_v39 = vadd.f32 %v7547_v4, %v2638_v3  ;;  %v3542_v48 = vsel %vm3160_vm3, %v3155_v10, -inf }
 0x210   :  { %4309 = vst.msk [vmem:[%s7921_s4 + $0xf0] sm:$0xf] %vm4248_vm4, %v4701_v37  ;;  %v3543_v21 = vsel %vm3160_vm3, %v3159_v50, -inf  ;;  %v3029_v62 = vmax.f32 %v2773_v54, 0.0  ;;  %v3344_v45 = vsel %vm3160_vm3, %v3025_v28, -inf }
 0x211   :  { %3605 = vst.msk [vmem:[#allocation2 + $0x1e0] sm:$0xff] %vm3160_vm3, %v3343_v42  ;;  %3669 = vst.msk [vmem:[#allocation2 + $0x3e0] sm:$0xff] %vm3160_vm3, %v3535_v2  ;;  %v3544_v57 = vmax.f32 %v3542_v48, %v3543_v21  ;;  %v3157_v11 = vmax.f32 %v2901_v39, 0.0  ;;  %v3536_v24 = vsel %vm3160_vm3, %v3153_v7, -inf }
 0x212   :  { %3608 = vst.msk [vmem:[#allocation2 + $0x1f8] sm:$0xff] %vm3160_vm3, %v3352_v56  ;;  %v3345_v35 = vsel %vm3160_vm3, %v3029_v62, -inf }
 0x213   :  { %3672 = vst.msk [vmem:[#allocation2 + $0x3f8] sm:$0xff] %vm3160_vm3, %v3544_v57  ;;  %v3346_v4 = vmax.f32 %v3344_v45, %v3345_v35  ;;  %v3537_v0 = vsel %vm3160_vm3, %v3157_v11, -inf }
 0x214   :  { %v3538_v31 = vmax.f32 %v3536_v24, %v3537_v0 }
 0x215   :  { %3606 = vst.msk [vmem:[#allocation2 + $0x1e8] sm:$0xff] %vm3160_vm3, %v3346_v4 }
 0x216   :  { %3670 = vst.msk [vmem:[#allocation2 + $0x3e8] sm:$0xff] %vm3160_vm3, %v3538_v31 }
 0x219   :  { %v3735_v19 = vld [vmem:[#allocation2 + $0x1f0] ss:$2 sm:$0xff]  ;;  %v3863_v40 = vld [vmem:[#allocation2 + $0x1f1] ss:$2 sm:$0xff] }
 0x21a   :  { %v3959_v26 = vmax.f32 %v3735_v19, %v3863_v40  ;;  %v3799_v9 = vld [vmem:[#allocation2 + $0x3f0] ss:$2 sm:$0xff]  ;;  %v3927_v10 = vld [vmem:[#allocation2 + $0x3f1] ss:$2 sm:$0xff] }
 0x21b   :  { %v3991_v28 = vmax.f32 %v3799_v9, %v3927_v10 }
 0x21c   :  { %v4672_v49 = vpack.c.bf16 %v3959_v26, %v3959_v26  ;;  %v3733_v36 = vld [vmem:[#allocation2 + $0x1e0] ss:$2 sm:$0xff]  ;;  %v3861_v47 = vld [vmem:[#allocation2 + $0x1e1] ss:$2 sm:$0xff] }
 0x21d   :  { %v4704_v20 = vpack.c.bf16 %v3991_v28, %v3991_v28  ;;  %v3958_v30 = vmax.f32 %v3733_v36, %v3861_v47  ;;  %v3797_v46 = vld [vmem:[#allocation2 + $0x3e0] ss:$2 sm:$0xff]  ;;  %v3925_v51 = vld [vmem:[#allocation2 + $0x3e1] ss:$2 sm:$0xff] }
 0x21e   :  { %4280 = vst.msk [vmem:[%s7921_s4 + $0x7c] sm:$0xf] %vm4248_vm4, %v4672_v49  ;;  %v3990_v12 = vmax.f32 %v3797_v46, %v3925_v51 }
 0x21f   :  { %4312 = vst.msk [vmem:[%s7921_s4 + $0xfc] sm:$0xf] %vm4248_vm4, %v4704_v20  ;;  %v4671_v15 = vpack.c.bf16 %v3958_v30, %v3958_v30 }
 0x220   :  { %v4703_v17 = vpack.c.bf16 %v3990_v12, %v3990_v12 }
 0x221   :  { %4279 = vst.msk [vmem:[%s7921_s4 + $0x78] sm:$0xf] %vm4248_vm4, %v4671_v15 }
 0x222   :  { %4311 = vst.msk [vmem:[%s7921_s4 + $0xf8] sm:$0xf] %vm4248_vm4, %v4703_v17 }

// kernel: conv_net_forward.5
= control target key start
LH: loop header
LB: loop body
LE: loop exit
PB: predicated region body
PF: predicated region fallthrough
CT: control target
= control target key end

     0   :  { %v2447_v0 = vmov 0   ;;  %vm887_vm0 = vcmask 1041408   ;;  %vm790_vm1 = vcmask 556032   ;;  %vm1675_vm2 = vcmask 523264   ;;  %s3323_s1 = inlined_call_operand.vmem [shape: bf16[324,64], index: 1, kind: input, shape index: {}]   ;;  %s3324_s0 = inlined_call_operand.vmem [shape: bf16[512,324], index: 0, kind: input, shape index: {}]   ;;  %s3325_s2 = inlined_call_operand.vmem [shape: f32[1,64], index: 2, kind: input, shape index: {}]   ;;  %s3326_s3 = inlined_call_operand.vmem [shape: f32[1,64], index: 3, kind: input, shape index: {}]   ;;  %s3327_s4 = inlined_call_operand.vmem [shape: bf16[128,64], index: 4, kind: output, shape index: {}]  }
   0x1   :  { %891 = vmatprep.subr.bf16.mxu0 %v2447_v0  ;;  %2262 = vmatprep.subr.bf16.mxu1 %v2447_v0  ;;  %v2296_v1 = vld [vmem:[%s3323_s1 + $0x38] sm:$0xff]   ;;  %v2297_v2 = vld [vmem:[%s3323_s1 + $0x30] sm:$0xff]   ;;  %v2298_v3 = vld [vmem:[%s3323_s1 + $0x28] sm:$0xff]   ;;  %vm1947_vm3 = vcmask 519168  }
   0x2   :  { %892 = vmatpush1.bf16.msra.mxu0 %v2296_v1  ;;  %2278 = vmatpush1.bf16.msra.mxu1 %v2296_v1  ;;  %v2299_v4 = vld [vmem:[%s3323_s1 + $0x20] sm:$0xff]   ;;  %v2300_v5 = vld [vmem:[%s3323_s1 + $0x18] sm:$0xff]   ;;  %v2301_v7 = vld [vmem:[%s3323_s1 + $0x10] sm:$0xff]  }
   0x3   :  { %893 = vmatprep.subr.bf16.mxu0 %v2447_v0  ;;  %2263 = vmatprep.subr.bf16.mxu1 %v2447_v0  ;;  %v2314_v6 = vld [vmem:[%s3324_s0 + $0x4] ss:$12 sps:$4 sm:$0xff]   ;;  %v2302_v9 = vld [vmem:[%s3323_s1 + $0x8] sm:$0xff]   ;;  %v2304_v11 = vld [vmem:[%s3323_s1 + $0x78] sm:$0xff]  }
   0x4   :  { %v2317_v8 = vld [vmem:[%s3324_s0 + $0x244] ss:$12 sps:$4 sm:$0xff]   ;;  %923 = vmatprep.mubr.bf16.mxu0 %v2314_v6  ;;  %v2306_v13 = vld [vmem:[%s3323_s1 + $0x68] sm:$0xff]   ;;  %v2308_v15 = vld [vmem:[%s3323_s1 + $0x58] sm:$0xff]  }
   0x5   :  { %1115 = vmatprep.mubr.bf16.mxu1 %v2317_v8  ;;  %v2303_v10 = vld [vmem:[%s3323_s1] sm:$0xff]   ;;  %v2305_v12 = vld [vmem:[%s3323_s1 + $0x70] sm:$0xff]   ;;  %v2310_v17 = vld [vmem:[%s3323_s1 + $0x48] sm:$0xff]  }
   0x6   :  { %894 = vmatpush1.bf16.msra.mxu0 %v2297_v2  ;;  %2279 = vmatpush1.bf16.msra.mxu1 %v2297_v2  ;;  %v2307_v14 = vld [vmem:[%s3323_s1 + $0x60] sm:$0xff]   ;;  %v2309_v16 = vld [vmem:[%s3323_s1 + $0x50] sm:$0xff]   ;;  %v2319_v22 = vld [vmem:[%s3324_s0 + $0x1c] ss:$12 sps:$4 sm:$0xff]  }
   0x7   :  { %895 = vmatprep.subr.bf16.mxu0 %v2447_v0  ;;  %2264 = vmatprep.subr.bf16.mxu1 %v2447_v0  ;;  %v2311_v18 = vld [vmem:[%s3323_s1 + $0x40] sm:$0xff]   ;;  %v2321_v23 = vld [vmem:[%s3324_s0 + $0x25c] ss:$12 sps:$4 sm:$0xff]   ;;  %v2338_v26 = vld [vmem:[%s3323_s1 + $0x90] sm:$0xff]  }
   0x8   :  { %v2318_v19 = vld [vmem:[%s3323_s1 + $0xa0] ss:$0 sps:$4 sm:$0x33]   ;;  %v2325_v25 = vld [vmem:[%s3323_s1 + $0x98] sm:$0xff]   ;;  %v2349_v31 = vld [vmem:[%s3323_s1 + $0x88] sm:$0xff]  }
   0x9   :  { %v2312_v20 = vld [vmem:[%s3324_s0] ss:$12 sps:$4 sm:$0xff]   ;;  %v889_v24 = vsel %vm887_vm0, %v2318_v19, 0  ;;  %v2323_v27 = vld [vmem:[%s3324_s0 + $0x18] ss:$12 sps:$4 sm:$0xff]  }
   0xa   :  { %896 = vmatpush1.bf16.msra.mxu0 %v2298_v3  ;;  %2280 = vmatpush1.bf16.msra.mxu1 %v2298_v3  ;;  %v2315_v21 = vld [vmem:[%s3324_s0 + $0x240] ss:$12 sps:$4 sm:$0xff]   ;;  %v2324_v28 = vld [vmem:[%s3324_s0 + $0x258] ss:$12 sps:$4 sm:$0xff]   ;;  %v2330_v32 = vld [vmem:[%s3324_s0 + $0x30] ss:$12 sps:$4 sm:$0xff]  }
   0xb   :  { %897 = vmatprep.subr.bf16.mxu0 %v2447_v0  ;;  %2265 = vmatprep.subr.bf16.mxu1 %v2447_v0  ;;  %v2326_v29 = vld [vmem:[%s3324_s0 + $0x34] ss:$12 sps:$4 sm:$0xff]   ;;  %v2331_v33 = vld [vmem:[%s3324_s0 + $0x270] ss:$12 sps:$4 sm:$0xff]   ;;  %v2332_v35 = vld [vmem:[%s3324_s0 + $0x4c] ss:$12 sps:$4 sm:$0xff]  }
   0xc   :  { %v2328_v30 = vld [vmem:[%s3324_s0 + $0x274] ss:$12 sps:$4 sm:$0xff]   ;;  %v2334_v36 = vld [vmem:[%s3324_s0 + $0x28c] ss:$12 sps:$4 sm:$0xff]   ;;  %v2339_v39 = vld [vmem:[%s3324_s0 + $0x64] ss:$12 sps:$4 sm:$0xff]  }
   0xd   :  { %v2358_v34 = vld [vmem:[%s3323_s1 + $0x80] sm:$0xff]   ;;  %v2336_v37 = vld [vmem:[%s3324_s0 + $0x48] ss:$12 sps:$4 sm:$0xff]   ;;  %v2356_v49 = vld [vmem:[%s3324_s0 + $0x90] ss:$12 sps:$4 sm:$0xff]  }
   0xe   :  { %898 = vmatpush1.bf16.msra.mxu0 %v2299_v4  ;;  %2281 = vmatpush1.bf16.msra.mxu1 %v2299_v4  ;;  %v2337_v38 = vld [vmem:[%s3324_s0 + $0x288] ss:$12 sps:$4 sm:$0xff]   ;;  %v2341_v40 = vld [vmem:[%s3324_s0 + $0x2a4] ss:$12 sps:$4 sm:$0xff]   ;;  %v2343_v41 = vld [vmem:[%s3324_s0 + $0x60] ss:$12 sps:$4 sm:$0xff]  }
   0xf   :  { %899 = vmatprep.subr.bf16.mxu0 %v2447_v0  ;;  %2266 = vmatprep.subr.bf16.mxu1 %v2447_v0  ;;  %v2344_v42 = vld [vmem:[%s3324_s0 + $0x2a0] ss:$12 sps:$4 sm:$0xff]   ;;  %v2345_v43 = vld [vmem:[%s3324_s0 + $0x7c] ss:$12 sps:$4 sm:$0xff]   ;;  %v2350_v45 = vld [vmem:[%s3324_s0 + $0x78] ss:$12 sps:$4 sm:$0xff]  }
  0x10   :  { %v2347_v44 = vld [vmem:[%s3324_s0 + $0x2bc] ss:$12 sps:$4 sm:$0xff]   ;;  %v2351_v46 = vld [vmem:[%s3324_s0 + $0x2b8] ss:$12 sps:$4 sm:$0xff]   ;;  %v2352_v47 = vld [vmem:[%s3324_s0 + $0x94] ss:$12 sps:$4 sm:$0xff]  }
  0x11   :  { %v2354_v48 = vld [vmem:[%s3324_s0 + $0x2d4] ss:$12 sps:$4 sm:$0xff]   ;;  %v2357_v50 = vld [vmem:[%s3324_s0 + $0x2d0] ss:$12 sps:$4 sm:$0xff]   ;;  %v2359_v51 = vld [vmem:[%s3324_s0 + $0xac] ss:$12 sps:$4 sm:$0xff]  }
  0x12   :  { %900 = vmatpush1.bf16.msra.mxu0 %v2300_v5  ;;  %2282 = vmatpush1.bf16.msra.mxu1 %v2300_v5  ;;  %v2361_v52 = vld [vmem:[%s3324_s0 + $0x2ec] ss:$12 sps:$4 sm:$0xff]   ;;  %v2363_v53 = vld [vmem:[%s3324_s0 + $0xa8] ss:$12 sps:$4 sm:$0xff]   ;;  %v2365_v55 = vld [vmem:[%s3324_s0 + $0xc4] ss:$12 sps:$4 sm:$0xff]  }
  0x13   :  { %901 = vmatprep.subr.bf16.mxu0 %v2447_v0  ;;  %2267 = vmatprep.subr.bf16.mxu1 %v2447_v0  ;;  %v2364_v54 = vld [vmem:[%s3324_s0 + $0x2e8] ss:$12 sps:$4 sm:$0xff]   ;;  %v2368_v57 = vld [vmem:[%s3324_s0 + $0xc0] ss:$12 sps:$4 sm:$0xff]   ;;  %v2372_v60 = vld [vmem:[%s3324_s0 + $0x38] ss:$12 sps:$4 sm:$0xff]  }
  0x14   :  { %v2367_v56 = vld [vmem:[%s3324_s0 + $0x8] ss:$12 sps:$4 sm:$0xff]   ;;  %v2369_v58 = vld [vmem:[%s3324_s0 + $0x20] ss:$12 sps:$4 sm:$0xff]   ;;  %v2373_v61 = vld [vmem:[%s3324_s0 + $0xd8] ss:$12 sps:$4 sm:$0xff]  }
  0x15   :  { %v2370_v59 = vld [vmem:[%s3324_s0 + $0xdc] ss:$12 sps:$4 sm:$0xff]   ;;  %v2375_v63 = vld [vmem:[%s3324_s0 + $0xf4] ss:$12 sps:$4 sm:$0xff]   ;;  %v2380_v3 = vld [vmem:[%s3324_s0 + $0x10c] ss:$12 sps:$4 sm:$0xff]  }
  0x16   :  { %902 = vmatpush1.bf16.msra.mxu0 %v2301_v7  ;;  %2283 = vmatpush1.bf16.msra.mxu1 %v2301_v7  ;;  %v2374_v62 = vld [vmem:[%s3324_s0 + $0x50] ss:$12 sps:$4 sm:$0xff]   ;;  %v2379_v2 = vld [vmem:[%s3324_s0 + $0x80] ss:$12 sps:$4 sm:$0xff]   ;;  %v2382_v4 = vld [vmem:[%s3324_s0 + $0x98] ss:$12 sps:$4 sm:$0xff]  }
  0x17   :  { %903 = vmatprep.subr.bf16.mxu0 %v2447_v0  ;;  %2268 = vmatprep.subr.bf16.mxu1 %v2447_v0  ;;  %v2378_v1 = vld [vmem:[%s3324_s0 + $0xf0] ss:$12 sps:$4 sm:$0xff]   ;;  %v2383_v5 = vld [vmem:[%s3324_s0 + $0x108] ss:$12 sps:$4 sm:$0xff]  }
  0x18   :  { %v2384_v6 = vld [vmem:[%s3324_s0 + $0xb0] ss:$12 sps:$4 sm:$0xff]   ;;  %v2387_v8 = vld [vmem:[%s3324_s0 + $0xc8] ss:$12 sps:$4 sm:$0xff]  }
  0x19   :  { %v2385_v7 = vld [vmem:[%s3324_s0 + $0x124] ss:$12 sps:$4 sm:$0xff]  }
  0x1a   :  { %904 = vmatpush1.bf16.msra.mxu0 %v2302_v9  ;;  %2284 = vmatpush1.bf16.msra.mxu1 %v2302_v9  ;;  %v2388_v9 = vld [vmem:[%s3324_s0 + $0x120] ss:$12 sps:$4 sm:$0xff]  }
  0x1b   :  { %905 = vmatprep.subr.bf16.mxu0 %v2447_v0  ;;  %2269 = vmatprep.subr.bf16.mxu1 %v2447_v0 }
  0x1e   :  { %906 = vmatpush1.bf16.msra.mxu0 %v2303_v10  ;;  %2285 = vmatpush1.bf16.msra.mxu1 %v2303_v10  ;;  %v2389_v10 = vld [vmem:[%s3324_s0 + $0xe0] ss:$12 sps:$4 sm:$0xff]  }
  0x1f   :  { %907 = vmatprep.subr.bf16.mxu0 %v2447_v0  ;;  %2270 = vmatprep.subr.bf16.mxu1 %v2447_v0 }
  0x22   :  { %908 = vmatpush2.bf16.msra.mxu0 %v2304_v11  ;;  %2286 = vmatpush2.bf16.msra.mxu1 %v2304_v11  ;;  %v2390_v11 = vld [vmem:[%s3324_s0 + $0x13c] ss:$12 sps:$4 sm:$0xff]  }
  0x23   :  { %909 = vmatprep.subr.bf16.mxu0 %v2447_v0  ;;  %2271 = vmatprep.subr.bf16.mxu1 %v2447_v0 }
  0x26   :  { %910 = vmatpush2.bf16.msra.mxu0 %v2305_v12  ;;  %2287 = vmatpush2.bf16.msra.mxu1 %v2305_v12  ;;  %v2392_v12 = vld [vmem:[%s3324_s0 + $0xf8] ss:$12 sps:$4 sm:$0xff]  }
  0x27   :  { %911 = vmatprep.subr.bf16.mxu0 %v2447_v0  ;;  %2272 = vmatprep.subr.bf16.mxu1 %v2447_v0 }
  0x2a   :  { %912 = vmatpush2.bf16.msra.mxu0 %v2306_v13  ;;  %2288 = vmatpush2.bf16.msra.mxu1 %v2306_v13  ;;  %v2393_v13 = vld [vmem:[%s3324_s0 + $0x138] ss:$12 sps:$4 sm:$0xff]  }
  0x2b   :  { %913 = vmatprep.subr.bf16.mxu0 %v2447_v0  ;;  %2273 = vmatprep.subr.bf16.mxu1 %v2447_v0 }
  0x2e   :  { %914 = vmatpush2.bf16.msra.mxu0 %v2307_v14  ;;  %2289 = vmatpush2.bf16.msra.mxu1 %v2307_v14  ;;  %v2394_v14 = vld [vmem:[%s3324_s0 + $0x110] ss:$12 sps:$4 sm:$0xff]  }
  0x2f   :  { %915 = vmatprep.subr.bf16.mxu0 %v2447_v0  ;;  %2274 = vmatprep.subr.bf16.mxu1 %v2447_v0 }
  0x32   :  { %916 = vmatpush2.bf16.msra.mxu0 %v2308_v15  ;;  %2290 = vmatpush2.bf16.msra.mxu1 %v2308_v15  ;;  %v2395_v15 = vld [vmem:[%s3324_s0 + $0x154] ss:$12 sps:$4 sm:$0xff]  }
  0x33   :  { %917 = vmatprep.subr.bf16.mxu0 %v2447_v0  ;;  %2275 = vmatprep.subr.bf16.mxu1 %v2447_v0 }
  0x36   :  { %918 = vmatpush2.bf16.msra.mxu0 %v2309_v16  ;;  %2291 = vmatpush2.bf16.msra.mxu1 %v2309_v16  ;;  %v2397_v16 = vld [vmem:[%s3324_s0 + $0x128] ss:$12 sps:$4 sm:$0xff]  }
  0x37   :  { %919 = vmatprep.subr.bf16.mxu0 %v2447_v0  ;;  %2276 = vmatprep.subr.bf16.mxu1 %v2447_v0 }
  0x3a   :  { %920 = vmatpush2.bf16.msra.mxu0 %v2310_v17  ;;  %2292 = vmatpush2.bf16.msra.mxu1 %v2310_v17  ;;  %v2398_v17 = vld [vmem:[%s3324_s0 + $0x150] ss:$12 sps:$4 sm:$0xff]  }
  0x3b   :  { %921 = vmatprep.subr.bf16.mxu0 %v2447_v0  ;;  %2277 = vmatprep.subr.bf16.mxu1 %v2447_v0  ;;  %v2377_v0 = vld [vmem:[%s3324_s0 + $0x68] ss:$12 sps:$4 sm:$0xff]  }
  0x3e   :  { %922 = vmatpush2.bf16.msra.mxu0 %v2311_v18  ;;  %2293 = vmatpush2.bf16.msra.mxu1 %v2311_v18  ;;  %v2399_v18 = vld [vmem:[%s3324_s0 + $0x140] ss:$12 sps:$4 sm:$0xff]  }
  0x3f   :  { %2294 = vmatprep.subr.msk.bf16.mxu1 %vm887_vm0, %v2318_v19  ;;  %v2400_v19 = vld [vmem:[%s3324_s0 + $0x16c] ss:$12 sps:$4 sm:$0xff]  }
  0x41   :  { %924 = vmatmul.mubr.bf16.vlgmr.msra.gmra.mxu0 %v2312_v20  ;;  %1116 = vmatmul.mubr.bf16.vlgmr.msra.gmra.mxu1 %v2315_v21  ;;  %v2402_v20 = vld [vmem:[%s3324_s0 + $0x158] ss:$12 sps:$4 sm:$0xff]   ;;  %v2403_v21 = vld [vmem:[%s3324_s0 + $0x168] ss:$12 sps:$4 sm:$0xff]  }
  0x42   :  { %2189 = vmatpush3.bf16.msra.mxu1 %v889_v24  ;;  %931 = vmatprep.mubr.bf16.mxu0 %v2319_v22  ;;  %v2404_v22 = vld [vmem:[%s3324_s0 + $0x170] ss:$12 sps:$4 sm:$0xff]   ;;  %v2407_v24 = vld [vmem:[%s3324_s0 + $0x188] ss:$12 sps:$4 sm:$0xff]  }
  0x43   :  { %1123 = vmatprep.mubr.bf16.mxu1 %v2321_v23  ;;  %2190 = vmatprep.subr.bf16.mxu1 %v2325_v25  ;;  %v2405_v23 = vld [vmem:[%s3324_s0 + $0x184] ss:$12 sps:$4 sm:$0xff]  }
  0x46   :  { %2191 = vmatpush3.bf16.msra.mxu1 %v2325_v25  ;;  %v2408_v25 = vld [vmem:[%s3324_s0 + $0x180] ss:$12 sps:$4 sm:$0xff]  }
  0x47   :  { %2192 = vmatprep.subr.bf16.mxu1 %v2338_v26 }
  0x49   :  { %932 = vmatmul.mubr.bf16.gmra.mxu0 %v2323_v27  ;;  %1124 = vmatmul.mubr.bf16.gmra.mxu1 %v2324_v28  ;;  %v2410_v27 = vld [vmem:[%s3324_s0 + $0x19c] ss:$12 sps:$4 sm:$0xff]   ;;  %v2412_v28 = vld [vmem:[%s3324_s0 + $0x1b8] ss:$12 sps:$4 sm:$0xff]  }
  0x4a   :  { %939 = vmatprep.mubr.bf16.mxu0 %v2326_v29  ;;  %1131 = vmatprep.mubr.bf16.mxu1 %v2328_v30  ;;  %v2413_v29 = vld [vmem:[%s3324_s0 + $0x198] ss:$12 sps:$4 sm:$0xff]   ;;  %v2414_v30 = vld [vmem:[%s3324_s0 + $0x1d0] ss:$12 sps:$4 sm:$0xff]  }
  0x4b   :  { %2193 = vmatpush3.bf16.msra.mxu1 %v2338_v26  ;;  %v2409_v26 = vld [vmem:[%s3324_s0 + $0x1a0] ss:$12 sps:$4 sm:$0xff]  }
  0x4c   :  { %2194 = vmatprep.subr.bf16.mxu1 %v2349_v31 }
  0x4f   :  { %2195 = vmatpush3.bf16.msra.mxu1 %v2349_v31  ;;  %v2415_v31 = vld [vmem:[%s3324_s0 + $0x1b4] ss:$12 sps:$4 sm:$0xff]  }
  0x50   :  { %2196 = vmatprep.subr.bf16.mxu1 %v2358_v34 }
  0x51   :  { %940 = vmatmul.mubr.bf16.gmra.mxu0 %v2330_v32  ;;  %1132 = vmatmul.mubr.bf16.gmra.mxu1 %v2331_v33  ;;  %v2417_v32 = vld [vmem:[%s3324_s0 + $0x1e8] ss:$12 sps:$4 sm:$0xff]   ;;  %v2418_v33 = vld [vmem:[%s3324_s0 + $0x1b0] ss:$12 sps:$4 sm:$0xff]  }
  0x52   :  { %947 = vmatprep.mubr.bf16.mxu0 %v2332_v35  ;;  %1139 = vmatprep.mubr.bf16.mxu1 %v2334_v36  ;;  %v2420_v35 = vld [vmem:[%s3324_s0 + $0x1cc] ss:$12 sps:$4 sm:$0xff]  }
  0x53   :  { %2197 = vmatpush3.bf16.msra.mxu1 %v2358_v34  ;;  %v2419_v34 = vld [vmem:[%s3324_s0 + $0x200] ss:$12 sps:$4 sm:$0xff]   ;;  %v2422_v36 = vld [vmem:[%s3324_s0 + $0x218] ss:$12 sps:$4 sm:$0xff]  }
  0x59   :  { %948 = vmatmul.mubr.bf16.gmra.mxu0 %v2336_v37  ;;  %1140 = vmatmul.mubr.bf16.gmra.mxu1 %v2337_v38  ;;  %v2423_v37 = vld [vmem:[%s3324_s0 + $0x1c8] ss:$12 sps:$4 sm:$0xff]   ;;  %v2424_v38 = vld [vmem:[%s3324_s0 + $0x230] ss:$12 sps:$4 sm:$0xff]  }
  0x5a   :  { %955 = vmatprep.mubr.bf16.mxu0 %v2339_v39  ;;  %1147 = vmatprep.mubr.bf16.mxu1 %v2341_v40  ;;  %v2425_v39 = vld [vmem:[%s3324_s0 + $0x1e4] ss:$12 sps:$4 sm:$0xff]   ;;  %v2427_v40 = vld [vmem:[%s3324_s0 + $0x248] ss:$12 sps:$4 sm:$0xff]  }
  0x61   :  { %956 = vmatmul.mubr.bf16.gmra.mxu0 %v2343_v41  ;;  %1148 = vmatmul.mubr.bf16.gmra.mxu1 %v2344_v42  ;;  %v2428_v41 = vld [vmem:[%s3324_s0 + $0x1e0] ss:$12 sps:$4 sm:$0xff]  }
  0x62   :  { %963 = vmatprep.mubr.bf16.mxu0 %v2345_v43  ;;  %1155 = vmatprep.mubr.bf16.mxu1 %v2347_v44  ;;  %v2429_v42 = vld [vmem:[%s3324_s0 + $0x260] ss:$12 sps:$4 sm:$0xff]   ;;  %v2430_v43 = vld [vmem:[%s3324_s0 + $0x1fc] ss:$12 sps:$4 sm:$0xff]   ;;  %v2432_v44 = vld [vmem:[%s3324_s0 + $0x278] ss:$12 sps:$4 sm:$0xff]  }
  0x69   :  { %964 = vmatmul.mubr.bf16.gmra.mxu0 %v2350_v45  ;;  %1156 = vmatmul.mubr.bf16.gmra.mxu1 %v2351_v46  ;;  %v2433_v45 = vld [vmem:[%s3324_s0 + $0x1f8] ss:$12 sps:$4 sm:$0xff]   ;;  %v2434_v46 = vld [vmem:[%s3324_s0 + $0x290] ss:$12 sps:$4 sm:$0xff]  }
  0x6a   :  { %971 = vmatprep.mubr.bf16.mxu0 %v2352_v47  ;;  %1163 = vmatprep.mubr.bf16.mxu1 %v2354_v48  ;;  %v2435_v47 = vld [vmem:[%s3324_s0 + $0x214] ss:$12 sps:$4 sm:$0xff]  }
  0x6b   :  { %v2437_v48 = vld [vmem:[%s3324_s0 + $0x2a8] ss:$12 sps:$4 sm:$0xff]  }
  0x71   :  { %972 = vmatmul.mubr.bf16.gmra.mxu0 %v2356_v49  ;;  %1164 = vmatmul.mubr.bf16.gmra.mxu1 %v2357_v50  ;;  %v2438_v49 = vld [vmem:[%s3324_s0 + $0x210] ss:$12 sps:$4 sm:$0xff]   ;;  %v2439_v50 = vld [vmem:[%s3324_s0 + $0x2c0] ss:$12 sps:$4 sm:$0xff]  }
  0x72   :  { %979 = vmatprep.mubr.bf16.mxu0 %v2359_v51  ;;  %1171 = vmatprep.mubr.bf16.mxu1 %v2361_v52  ;;  %v2440_v51 = vld [vmem:[%s3324_s0 + $0x22c] ss:$12 sps:$4 sm:$0xff]  }
  0x73   :  { %v2442_v52 = vld [vmem:[%s3324_s0 + $0x2d8] ss:$12 sps:$4 sm:$0xff]  }
  0x79   :  { %980 = vmatmul.mubr.bf16.gmra.mxu0 %v2363_v53  ;;  %1172 = vmatmul.mubr.bf16.gmra.mxu1 %v2364_v54  ;;  %v2443_v53 = vld [vmem:[%s3324_s0 + $0x228] ss:$12 sps:$4 sm:$0xff]   ;;  %v2444_v54 = vld [vmem:[%s3324_s0 + $0x2f0] ss:$12 sps:$4 sm:$0xff]  }
  0x7a   :  { %987 = vmatprep.mubr.bf16.mxu0 %v2365_v55  ;;  %2198 = vmatprep.mubr.msk.bf16.mxu1 %vm790_vm1, %v2367_v56 }
  0x81   :  { %988 = vmatmul.mubr.bf16.gmra.mxu0 %v2368_v57  ;;  %2199 = vmatmul.mubr.msk.bf16.vlgmr.msra.gmra.mxu1 %vm790_vm1, %v2369_v58 }
  0x82   :  { %995 = vmatprep.mubr.bf16.mxu0 %v2370_v59  ;;  %2202 = vmatprep.mubr.msk.bf16.mxu1 %vm790_vm1, %v2372_v60 }
  0x89   :  { %996 = vmatmul.mubr.bf16.gmra.mxu0 %v2373_v61  ;;  %2203 = vmatmul.mubr.msk.bf16.gmra.mxu1 %vm790_vm1, %v2374_v62 }
  0x8a   :  { %1003 = vmatprep.mubr.bf16.mxu0 %v2375_v63  ;;  %2206 = vmatprep.mubr.msk.bf16.mxu1 %vm790_vm1, %v2377_v0 }
  0x91   :  { %1004 = vmatmul.mubr.bf16.gmra.mxu0 %v2378_v1  ;;  %2207 = vmatmul.mubr.msk.bf16.gmra.mxu1 %vm790_vm1, %v2379_v2 }
  0x92   :  { %1011 = vmatprep.mubr.bf16.mxu0 %v2380_v3  ;;  %2210 = vmatprep.mubr.msk.bf16.mxu1 %vm790_vm1, %v2382_v4 }
  0x99   :  { %1012 = vmatmul.mubr.bf16.gmra.mxu0 %v2383_v5  ;;  %2211 = vmatmul.mubr.msk.bf16.gmra.mxu1 %vm790_vm1, %v2384_v6 }
  0x9a   :  { %1019 = vmatprep.mubr.bf16.mxu0 %v2385_v7  ;;  %2214 = vmatprep.mubr.msk.bf16.mxu1 %vm790_vm1, %v2387_v8 }
  0xa1   :  { %1020 = vmatmul.mubr.bf16.gmra.mxu0 %v2388_v9  ;;  %2215 = vmatmul.mubr.msk.bf16.gmra.mxu1 %vm790_vm1, %v2389_v10 }
  0xa2   :  { %1027 = vmatprep.mubr.bf16.mxu0 %v2390_v11  ;;  %2218 = vmatprep.mubr.msk.bf16.mxu1 %vm790_vm1, %v2392_v12 }
  0xa9   :  { %1028 = vmatmul.mubr.bf16.gmra.mxu0 %v2393_v13  ;;  %2219 = vmatmul.mubr.msk.bf16.gmra.mxu1 %vm790_vm1, %v2394_v14 }
  0xaa   :  { %1035 = vmatprep.mubr.bf16.mxu0 %v2395_v15  ;;  %2222 = vmatprep.mubr.msk.bf16.mxu1 %vm790_vm1, %v2397_v16 }
  0xb1   :  { %1036 = vmatmul.mubr.bf16.gmra.mxu0 %v2398_v17  ;;  %2223 = vmatmul.mubr.msk.bf16.gmra.mxu1 %vm790_vm1, %v2399_v18 }
  0xb2   :  { %1043 = vmatprep.mubr.bf16.mxu0 %v2400_v19  ;;  %2226 = vmatprep.mubr.msk.bf16.mxu1 %vm790_vm1, %v2402_v20 }
  0xb9   :  { %1044 = vmatmul.mubr.bf16.gmra.mxu0 %v2403_v21  ;;  %2227 = vmatmul.mubr.msk.bf16.gmra.mxu1 %vm790_vm1, %v2404_v22 }
  0xba   :  { %1051 = vmatprep.mubr.bf16.mxu0 %v2405_v23  ;;  %2230 = vmatprep.mubr.msk.bf16.mxu1 %vm790_vm1, %v2407_v24 }
  0xc1   :  { %1052 = vmatmul.mubr.bf16.gmra.mxu0 %v2408_v25  ;;  %2231 = vmatmul.mubr.msk.bf16.gmra.mxu1 %vm790_vm1, %v2409_v26 }
  0xc2   :  { %1059 = vmatprep.mubr.bf16.mxu0 %v2410_v27  ;;  %2234 = vmatprep.mubr.msk.bf16.mxu1 %vm790_vm1, %v2412_v28 }
  0xc9   :  { %1060 = vmatmul.mubr.bf16.gmra.mxu0 %v2413_v29  ;;  %2235 = vmatmul.mubr.msk.bf16.gmra.mxu1 %vm790_vm1, %v2414_v30 }
  0xca   :  { %1067 = vmatprep.mubr.bf16.mxu0 %v2415_v31  ;;  %2238 = vmatprep.mubr.msk.bf16.mxu1 %vm790_vm1, %v2417_v32 }
  0xd1   :  { %1068 = vmatmul.mubr.bf16.gmra.mxu0 %v2418_v33  ;;  %2239 = vmatmul.mubr.msk.bf16.gmra.mxu1 %vm790_vm1, %v2419_v34 }
  0xd2   :  { %1075 = vmatprep.mubr.bf16.mxu0 %v2420_v35  ;;  %2242 = vmatprep.mubr.msk.bf16.mxu1 %vm790_vm1, %v2422_v36 }
  0xd9   :  { %1076 = vmatmul.mubr.bf16.gmra.mxu0 %v2423_v37  ;;  %2243 = vmatmul.mubr.msk.bf16.gmra.mxu1 %vm790_vm1, %v2424_v38 }
  0xda   :  { %1083 = vmatprep.mubr.bf16.mxu0 %v2425_v39  ;;  %2246 = vmatprep.mubr.msk.bf16.mxu1 %vm790_vm1, %v2427_v40 }
  0xe1   :  { %1084 = vmatmul.mubr.bf16.gmra.mxu0 %v2428_v41  ;;  %2247 = vmatmul.mubr.msk.bf16.gmra.mxu1 %vm790_vm1, %v2429_v42 }
  0xe2   :  { %1091 = vmatprep.mubr.bf16.mxu0 %v2430_v43  ;;  %2250 = vmatprep.mubr.msk.bf16.mxu1 %vm790_vm1, %v2432_v44 }
  0xe9   :  { %1092 = vmatmul.mubr.bf16.gmra.mxu0 %v2433_v45  ;;  %2251 = vmatmul.mubr.msk.bf16.gmra.mxu1 %vm790_vm1, %v2434_v46 }
  0xea   :  { %1099 = vmatprep.mubr.bf16.mxu0 %v2435_v47  ;;  %2254 = vmatprep.mubr.msk.bf16.mxu1 %vm790_vm1, %v2437_v48 }
  0xf1   :  { %1100 = vmatmul.mubr.bf16.gmra.mxu0 %v2438_v49  ;;  %2255 = vmatmul.mubr.msk.bf16.gmra.mxu1 %vm790_vm1, %v2439_v50 }
  0xf2   :  { %1107 = vmatprep.mubr.bf16.mxu0 %v2440_v51  ;;  %2258 = vmatprep.mubr.msk.bf16.mxu1 %vm790_vm1, %v2442_v52 }
  0xf9   :  { %1108 = vmatmul.mubr.bf16.gmra.mxu0 %v2443_v53  ;;  %2259 = vmatmul.mubr.msk.bf16.gmra.mxu1 %vm790_vm1, %v2444_v54 }
 0x101   :  { %v2888_v55 = vpop.f32.mrf.mxu0  ;;  %v2890_v56 = vpop.f32.mrf.mxu1 }
 0x103   :  { %v927_v57 = vpop.f32.mrf.mxu0  ;;  %v1119_v58 = vpop.f32.mrf.mxu1 }
 0x105   :  { %v2892_v59 = vpop.f32.mrf.mxu0  ;;  %v2894_v60 = vpop.f32.mrf.mxu1 }
 0x107   :  { %v930_v61 = vpop.f32.mrf.mxu0  ;;  %v1122_v62 = vpop.f32.mrf.mxu1 }
 0x108   :  { %v2955_v61 = vld [vmem:[%s3325_s2] ss:$0 sm:$0xff] }
 0x109   :  { %v933_v63 = vpop.f32.mrf.mxu0  ;;  %v2896_v0 = vpop.f32.mrf.mxu1 }
 0x10b   :  { %v935_v1 = vpop.f32.mrf.mxu0  ;;  %v1127_v2 = vpop.f32.mrf.mxu1 }
 0x10c   :  { %v2960_v1 = vld [vmem:[%s3326_s3] ss:$0 sm:$0xff] }
 0x10d   :  { %v2898_v3 = vpop.f32.mrf.mxu0  ;;  %v2900_v4 = vpop.f32.mrf.mxu1 }
 0x10f   :  { %v938_v5 = vpop.f32.mrf.mxu0  ;;  %v1130_v6 = vpop.f32.mrf.mxu1 }
 0x111   :  { %v2902_v7 = vpop.f32.mrf.mxu0  ;;  %v2904_v8 = vpop.f32.mrf.mxu1 }
 0x113   :  { %v943_v9 = vpop.f32.mrf.mxu0  ;;  %v1135_v10 = vpop.f32.mrf.mxu1 }
 0x115   :  { %v2906_v11 = vpop.f32.mrf.mxu0  ;;  %v2908_v12 = vpop.f32.mrf.mxu1 }
 0x117   :  { %v946_v13 = vpop.f32.mrf.mxu0  ;;  %v1138_v14 = vpop.f32.mrf.mxu1 }
 0x119   :  { %v2910_v15 = vpop.f32.mrf.mxu0  ;;  %v2912_v16 = vpop.f32.mrf.mxu1 }
 0x11b   :  { %v951_v17 = vpop.f32.mrf.mxu0  ;;  %v1143_v18 = vpop.f32.mrf.mxu1 }
 0x11d   :  { %v2914_v19 = vpop.f32.mrf.mxu0  ;;  %v2916_v20 = vpop.f32.mrf.mxu1 }
 0x11f   :  { %v954_v21 = vpop.f32.mrf.mxu0  ;;  %v1146_v22 = vpop.f32.mrf.mxu1 }
 0x121   :  { %v2918_v23 = vpop.f32.mrf.mxu0  ;;  %v2920_v24 = vpop.f32.mrf.mxu1 }
 0x123   :  { %v959_v25 = vpop.f32.mrf.mxu0  ;;  %v1151_v26 = vpop.f32.mrf.mxu1 }
 0x125   :  { %v2922_v27 = vpop.f32.mrf.mxu0  ;;  %v2924_v28 = vpop.f32.mrf.mxu1 }
 0x127   :  { %v962_v29 = vpop.f32.mrf.mxu0  ;;  %v1154_v30 = vpop.f32.mrf.mxu1 }
 0x129   :  { %v2926_v31 = vpop.f32.mrf.mxu0  ;;  %v2928_v32 = vpop.f32.mrf.mxu1 }
 0x12b   :  { %v967_v33 = vpop.f32.mrf.mxu0  ;;  %v1159_v34 = vpop.f32.mrf.mxu1 }
 0x12d   :  { %v2930_v35 = vpop.f32.mrf.mxu0  ;;  %v2932_v36 = vpop.f32.mrf.mxu1 }
 0x12f   :  { %v970_v37 = vpop.f32.mrf.mxu0  ;;  %v1162_v38 = vpop.f32.mrf.mxu1 }
 0x131   :  { %v2934_v39 = vpop.f32.mrf.mxu0  ;;  %v2936_v40 = vpop.f32.mrf.mxu1 }
 0x133   :  { %v975_v41 = vpop.f32.mrf.mxu0  ;;  %v1167_v42 = vpop.f32.mrf.mxu1 }
 0x135   :  { %v2938_v43 = vpop.f32.mrf.mxu0  ;;  %v2940_v44 = vpop.f32.mrf.mxu1 }
 0x137   :  { %v978_v45 = vpop.f32.mrf.mxu0  ;;  %v1170_v46 = vpop.f32.mrf.mxu1 }
 0x139   :  { %v2942_v47 = vpop.f32.mrf.mxu0  ;;  %v2944_v48 = vpop.f32.mrf.mxu1 }
 0x13b   :  { %v983_v49 = vpop.f32.mrf.mxu0  ;;  %v1175_v50 = vpop.f32.mrf.mxu1 }
 0x13d   :  { %v2946_v51 = vpop.f32.mrf.mxu0  ;;  %v2948_v52 = vpop.f32.mrf.mxu1 }
 0x13f   :  { %v986_v53 = vpop.f32.mrf.mxu0  ;;  %v1178_v54 = vpop.f32.mrf.mxu1 }
 0x141   :  { %v2950_v57 = vpop.f32.mrf.mxu0  ;;  %v2200_v58 = vpop.f32.mrf.mxu1 }
 0x142   :  { %v1223_v62 = vadd.f32 %v2200_v58, %v933_v63 }
 0x143   :  { %v991_v2 = vpop.f32.mrf.mxu0  ;;  %v1214_v5 = vpop.f32.mrf.mxu1 }
 0x144   :  { %v1478_v6 = vmul.f32 %v2955_v61, %v1223_v62  ;;  %v1215_v9 = vadd.f32 %v1214_v5, %v2888_v55 }
 0x145   :  { %v2964_v10 = vpop.f32.mrf.mxu0  ;;  %v2201_v13 = vpop.f32.mrf.mxu1 }
 0x146   :  { %v1549_v14 = vadd.f32 %v2960_v1, %v1478_v6  ;;  %v1476_v17 = vmul.f32 %v2955_v61, %v1215_v9  ;;  %v1226_v63 = vadd.f32 %v2201_v13, %v2898_v3 }
 0x147   :  { %v994_v18 = vpop.f32.mrf.mxu0  ;;  %v1217_v21 = vpop.f32.mrf.mxu1 }
 0x148   :  { %v1613_v22 = vmax.f32 %v1549_v14, 0.0  ;;  %v1547_v25 = vadd.f32 %v2960_v1, %v1476_v17  ;;  %v1479_v26 = vmul.f32 %v2955_v61, %v1226_v63  ;;  %v1218_v29 = vadd.f32 %v1217_v21, %v2892_v59 }
 0x149   :  { %v2972_v55 = vpop.f32.mrf.mxu0  ;;  %v2204_v30 = vpop.f32.mrf.mxu1 }
 0x14a   :  { %v1611_v33 = vmax.f32 %v1547_v25, 0.0  ;;  %v1550_v34 = vadd.f32 %v2960_v1, %v1479_v26  ;;  %v1477_v37 = vmul.f32 %v2955_v61, %v1218_v29  ;;  %v1677_v3 = vsel %vm1675_vm2, %v1613_v22, -inf }
 0x14b   :  { %v1239_v38 = vadd.f32 %v2204_v30, %v2910_v15  ;;  %v999_v41 = vpop.f32.mrf.mxu0  ;;  %v1230_v42 = vpop.f32.mrf.mxu1 }
 0x14c   :  { %v1676_v45 = vsel %vm1675_vm2, %v1611_v33, -inf  ;;  %v1614_v46 = vmax.f32 %v1550_v34, 0.0  ;;  %v1548_v49 = vadd.f32 %v2960_v1, %v1477_v37  ;;  %v1231_v59 = vadd.f32 %v1230_v42, %v2902_v7 }
 0x14d   :  { %v1678_v50 = vmax.f32 %v1676_v45, %v1677_v3  ;;  %v1482_v53 = vmul.f32 %v2955_v61, %v1239_v38  ;;  %v2982_v54 = vpop.f32.mrf.mxu0  ;;  %v2205_v58 = vpop.f32.mrf.mxu1 }
 0x14e   :  { %v1612_v62 = vmax.f32 %v1548_v49, 0.0  ;;  %v1480_v2 = vmul.f32 %v2955_v61, %v1231_v59  ;;  %v1242_v15 = vadd.f32 %v2205_v58, %v2914_v19  ;;  %v1680_v5 = vsel %vm1675_vm2, %v1614_v46, -inf }
 0x14f   :  { %1772 = vst.msk [vmem:[#allocation2] sm:$0xff] %vm1675_vm2, %v1678_v50  ;;  %v1553_v6 = vadd.f32 %v2960_v1, %v1482_v53  ;;  %v1002_v9 = vpop.f32.mrf.mxu0  ;;  %v1233_v13 = vpop.f32.mrf.mxu1 }
 0x150   :  { %v1679_v7 = vsel %vm1675_vm2, %v1612_v62, -inf  ;;  %v1551_v14 = vadd.f32 %v2960_v1, %v1480_v2  ;;  %v1483_v17 = vmul.f32 %v2955_v61, %v1242_v15  ;;  %v1234_v63 = vadd.f32 %v1233_v13, %v2906_v11 }
 0x151   :  { %v1681_v18 = vmax.f32 %v1679_v7, %v1680_v5  ;;  %v1617_v21 = vmax.f32 %v1553_v6, 0.0  ;;  %v2993_v22 = vpop.f32.mrf.mxu0  ;;  %v2208_v19 = vpop.f32.mrf.mxu1 }
 0x152   :  { %v1615_v25 = vmax.f32 %v1551_v14, 0.0  ;;  %v1554_v26 = vadd.f32 %v2960_v1, %v1483_v17  ;;  %v1481_v29 = vmul.f32 %v2955_v61, %v1234_v63  ;;  %v1255_v30 = vadd.f32 %v2208_v19, %v2926_v31 }
 0x153   :  { %1773 = vst.msk [vmem:[#allocation2 + $0x8] sm:$0xff] %vm1675_vm2, %v1681_v18  ;;  %v1683_v33 = vsel %vm1675_vm2, %v1617_v21, -inf  ;;  %v1007_v34 = vpop.f32.mrf.mxu0  ;;  %v1246_v37 = vpop.f32.mrf.mxu1 }
 0x154   :  { %v1682_v11 = vsel %vm1675_vm2, %v1615_v25, -inf  ;;  %v1618_v3 = vmax.f32 %v1554_v26, 0.0  ;;  %v1552_v38 = vadd.f32 %v2960_v1, %v1481_v29  ;;  %v1486_v41 = vmul.f32 %v2955_v61, %v1255_v30 }
 0x155   :  { %v1684_v42 = vmax.f32 %v1682_v11, %v1683_v33  ;;  %v1247_v45 = vadd.f32 %v1246_v37, %v2918_v23  ;;  %v3004_v46 = vpop.f32.mrf.mxu0  ;;  %v2209_v49 = vpop.f32.mrf.mxu1 }
 0x156   :  { %v1616_v31 = vmax.f32 %v1552_v38, 0.0  ;;  %v1557_v59 = vadd.f32 %v2960_v1, %v1486_v41  ;;  %v1258_v50 = vadd.f32 %v2209_v49, %v2930_v35  ;;  %v1686_v2 = vsel %vm1675_vm2, %v1618_v3, -inf }
 0x157   :  { %1774 = vst.msk [vmem:[#allocation2 + $0x10] sm:$0xff] %vm1675_vm2, %v1684_v42  ;;  %v1484_v53 = vmul.f32 %v2955_v61, %v1247_v45  ;;  %v1010_v58 = vpop.f32.mrf.mxu0  ;;  %v1249_v62 = vpop.f32.mrf.mxu1 }
 0x158   :  { %v1685_v15 = vsel %vm1675_vm2, %v1616_v31, -inf  ;;  %v1487_v23 = vmul.f32 %v2955_v61, %v1258_v50  ;;  %v1250_v5 = vadd.f32 %v1249_v62, %v2922_v27  ;;  %v1621_v9 = vmax.f32 %v1557_v59, 0.0 }
 0x159   :  { %v1687_v6 = vmax.f32 %v1685_v15, %v1686_v2  ;;  %v1555_v13 = vadd.f32 %v2960_v1, %v1484_v53  ;;  %v3015_v7 = vpop.f32.mrf.mxu0  ;;  %v2212_v35 = vpop.f32.mrf.mxu1 }
 0x15a   :  { %v1804_v14 = vld [vmem:[#allocation2] ss:$2 sm:$0xff]  ;;  %v1836_v17 = vld [vmem:[#allocation2 + $0x1] ss:$2 sm:$0xff]  ;;  %v1558_v63 = vadd.f32 %v2960_v1, %v1487_v23  ;;  %v1485_v18 = vmul.f32 %v2955_v61, %v1250_v5  ;;  %v1271_v21 = vadd.f32 %v2212_v35, %v2942_v47  ;;  %v1689_v11 = vsel %vm1675_vm2, %v1621_v9, -inf }
 0x15b   :  { %v1867_v19 = vmax.f32 %v1804_v14, %v1836_v17  ;;  %1775 = vst.msk [vmem:[#allocation2 + $0x18] sm:$0xff] %vm1675_vm2, %v1687_v6  ;;  %v1619_v27 = vmax.f32 %v1555_v13, 0.0  ;;  %v1015_v25 = vpop.f32.mrf.mxu0  ;;  %v1262_v26 = vpop.f32.mrf.mxu1 }
 0x15c   :  { %v1622_v29 = vmax.f32 %v1558_v63, 0.0  ;;  %v1556_v30 = vadd.f32 %v2960_v1, %v1485_v18  ;;  %v1490_v33 = vmul.f32 %v2955_v61, %v1271_v21  ;;  %v1263_v34 = vadd.f32 %v1262_v26, %v2934_v39 }
 0x15d   :  { %v2135_v37 = vpack.c.bf16 %v1867_v19, %v1867_v19  ;;  %v1688_v3 = vsel %vm1675_vm2, %v1619_v27, -inf  ;;  %v3026_v47 = vpop.f32.mrf.mxu0  ;;  %v2213_v38 = vpop.f32.mrf.mxu1 }
 0x15e   :  { %v1690_v41 = vmax.f32 %v1688_v3, %v1689_v11  ;;  %v1620_v42 = vmax.f32 %v1556_v30, 0.0  ;;  %v1561_v45 = vadd.f32 %v2960_v1, %v1490_v33  ;;  %v1488_v49 = vmul.f32 %v2955_v61, %v1263_v34 }
 0x15f   :  { %1948 = vst.msk [vmem:[%s3327_s4] sm:$0xf] %vm1947_vm3, %v2135_v37  ;;  %v1274_v39 = vadd.f32 %v2213_v38, %v2946_v51  ;;  %v1018_v31 = vpop.f32.mrf.mxu0  ;;  %v1265_v59 = vpop.f32.mrf.mxu1  ;;  %v1692_v50 = vsel %vm1675_vm2, %v1622_v29, -inf }
 0x160   :  { %1776 = vst.msk [vmem:[#allocation2 + $0x20] sm:$0xff] %vm1675_vm2, %v1690_v41  ;;  %v1691_v53 = vsel %vm1675_vm2, %v1620_v42, -inf  ;;  %v1266_v58 = vadd.f32 %v1265_v59, %v2938_v43  ;;  %v1625_v2 = vmax.f32 %v1561_v45, 0.0  ;;  %v1559_v15 = vadd.f32 %v2960_v1, %v1488_v49 }
 0x161   :  { %v1693_v62 = vmax.f32 %v1691_v53, %v1692_v50  ;;  %v1491_v23 = vmul.f32 %v2955_v61, %v1274_v39  ;;  %v3041_v5 = vpop.f32.mrf.mxu0  ;;  %v2216_v6 = vpop.f32.mrf.mxu1 }
 0x162   :  { %v1806_v51 = vld [vmem:[#allocation2 + $0x10] ss:$2 sm:$0xff]  ;;  %v1838_v9 = vld [vmem:[#allocation2 + $0x11] ss:$2 sm:$0xff]  ;;  %v1489_v13 = vmul.f32 %v2955_v61, %v1266_v58  ;;  %v1287_v35 = vadd.f32 %v2216_v6, %v2972_v55  ;;  %v1623_v17 = vmax.f32 %v1559_v15, 0.0  ;;  %v1695_v26 = vsel %vm1675_vm2, %v1625_v2, -inf }
 0x163   :  { %v1868_v14 = vmax.f32 %v1806_v51, %v1838_v9  ;;  %1777 = vst.msk [vmem:[#allocation2 + $0x28] sm:$0xff] %vm1675_vm2, %v1693_v62  ;;  %v1562_v43 = vadd.f32 %v2960_v1, %v1491_v23  ;;  %v1023_v63 = vpop.f32.mrf.mxu0  ;;  %v1278_v18 = vpop.f32.mrf.mxu1 }
 0x164   :  { %v1560_v21 = vadd.f32 %v2960_v1, %v1489_v13  ;;  %v1494_v19 = vmul.f32 %v2955_v61, %v1287_v35  ;;  %v1279_v27 = vadd.f32 %v1278_v18, %v2950_v57  ;;  %v1694_v29 = vsel %vm1675_vm2, %v1623_v17, -inf }
 0x165   :  { %v2136_v25 = vpack.c.bf16 %v1868_v14, %v1868_v14  ;;  %v1626_v55 = vmax.f32 %v1562_v43, 0.0  ;;  %v3052_v30 = vpop.f32.mrf.mxu0  ;;  %v2217_v33 = vpop.f32.mrf.mxu1  ;;  %v1696_v34 = vmax.f32 %v1694_v29, %v1695_v26 }
 0x166   :  { %v1624_v37 = vmax.f32 %v1560_v21, 0.0  ;;  %v1565_v11 = vadd.f32 %v2960_v1, %v1494_v19  ;;  %v1492_v3 = vmul.f32 %v2955_v61, %v1279_v27  ;;  %v1290_v38 = vadd.f32 %v2217_v33, %v2982_v54 }
 0x167   :  { %1949 = vst.msk [vmem:[%s3327_s4 + $0x4] sm:$0xf] %vm1947_vm3, %v2136_v25  ;;  %v1698_v57 = vsel %vm1675_vm2, %v1626_v55, -inf  ;;  %v1026_v41 = vpop.f32.mrf.mxu0  ;;  %v1281_v42 = vpop.f32.mrf.mxu1 }
 0x168   :  { %1778 = vst.msk [vmem:[#allocation2 + $0x30] sm:$0xff] %vm1675_vm2, %v1696_v34  ;;  %v1697_v45 = vsel %vm1675_vm2, %v1624_v37, -inf  ;;  %v1629_v49 = vmax.f32 %v1565_v11, 0.0  ;;  %v1563_v39 = vadd.f32 %v2960_v1, %v1492_v3  ;;  %v1282_v31 = vadd.f32 %v1281_v42, %v2964_v10 }
 0x169   :  { %v1699_v59 = vmax.f32 %v1697_v45, %v1698_v57  ;;  %v1495_v50 = vmul.f32 %v2955_v61, %v1290_v38  ;;  %v1029_v53 = vpop.f32.mrf.mxu0  ;;  %v2220_v58 = vpop.f32.mrf.mxu1 }
 0x16a   :  { %v1808_v62 = vld [vmem:[#allocation2 + $0x20] ss:$2 sm:$0xff]  ;;  %v1840_v2 = vld [vmem:[#allocation2 + $0x21] ss:$2 sm:$0xff]  ;;  %v1627_v15 = vmax.f32 %v1563_v39, 0.0  ;;  %v1493_v54 = vmul.f32 %v2955_v61, %v1282_v31  ;;  %v1303_v23 = vadd.f32 %v2220_v58, %v3015_v7  ;;  %v1701_v51 = vsel %vm1675_vm2, %v1629_v49, -inf }
 0x16b   :  { %v1869_v6 = vmax.f32 %v1808_v62, %v1840_v2  ;;  %1779 = vst.msk [vmem:[#allocation2 + $0x38] sm:$0xff] %vm1675_vm2, %v1699_v59  ;;  %v1566_v9 = vadd.f32 %v2960_v1, %v1495_v50  ;;  %v1031_v10 = vpop.f32.mrf.mxu0  ;;  %v1294_v13 = vpop.f32.mrf.mxu1 }
 0x16c   :  { %v1700_v35 = vsel %vm1675_vm2, %v1627_v15, -inf  ;;  %v1564_v14 = vadd.f32 %v2960_v1, %v1493_v54  ;;  %v1498_v17 = vmul.f32 %v2955_v61, %v1303_v23  ;;  %v1295_v43 = vadd.f32 %v1294_v13, %v2993_v22 }
 0x16d   :  { %v2137_v63 = vpack.c.bf16 %v1869_v6, %v1869_v6  ;;  %v1702_v18 = vmax.f32 %v1700_v35, %v1701_v51  ;;  %v1630_v7 = vmax.f32 %v1566_v9, 0.0  ;;  %v1032_v21 = vpop.f32.mrf.mxu0  ;;  %v2221_v19 = vpop.f32.mrf.mxu1 }
 0x16e   :  { %v1628_v27 = vmax.f32 %v1564_v14, 0.0  ;;  %v1569_v25 = vadd.f32 %v2960_v1, %v1498_v17  ;;  %v1496_v26 = vmul.f32 %v2955_v61, %v1295_v43  ;;  %v1306_v29 = vadd.f32 %v2221_v19, %v3026_v47 }
 0x16f   :  { %1950 = vst.msk [vmem:[%s3327_s4 + $0x8] sm:$0xf] %vm1947_vm3, %v2137_v63  ;;  %v1704_v22 = vsel %vm1675_vm2, %v1630_v7, -inf  ;;  %v1034_v55 = vpop.f32.mrf.mxu0  ;;  %v1297_v33 = vpop.f32.mrf.mxu1 }
 0x170   :  { %1780 = vst.msk [vmem:[#allocation2 + $0x40] sm:$0xff] %vm1675_vm2, %v1702_v18  ;;  %v1703_v34 = vsel %vm1675_vm2, %v1628_v27, -inf  ;;  %v1633_v37 = vmax.f32 %v1569_v25, 0.0  ;;  %v1567_v11 = vadd.f32 %v2960_v1, %v1496_v26  ;;  %v1499_v3 = vmul.f32 %v2955_v61, %v1306_v29 }
 0x171   :  { %v1705_v57 = vmax.f32 %v1703_v34, %v1704_v22  ;;  %v1298_v47 = vadd.f32 %v1297_v33, %v3004_v46  ;;  %v1037_v38 = vpop.f32.mrf.mxu0  ;;  %v2224_v41 = vpop.f32.mrf.mxu1 }
 0x172   :  { %v1810_v42 = vld [vmem:[#allocation2 + $0x30] ss:$2 sm:$0xff]  ;;  %v1842_v45 = vld [vmem:[#allocation2 + $0x31] ss:$2 sm:$0xff]  ;;  %v1631_v49 = vmax.f32 %v1567_v11, 0.0  ;;  %v1570_v39 = vadd.f32 %v2960_v1, %v1499_v3  ;;  %v1319_v31 = vadd.f32 %v2224_v41, %v1029_v53  ;;  %v1707_v2 = vsel %vm1675_vm2, %v1633_v37, -inf }
 0x173   :  { %v1870_v59 = vmax.f32 %v1810_v42, %v1842_v45  ;;  %1781 = vst.msk [vmem:[#allocation2 + $0x48] sm:$0xff] %vm1675_vm2, %v1705_v57  ;;  %v1497_v50 = vmul.f32 %v2955_v61, %v1298_v47  ;;  %v1039_v58 = vpop.f32.mrf.mxu0  ;;  %v1310_v62 = vpop.f32.mrf.mxu1 }
 0x174   :  { %v1706_v15 = vsel %vm1675_vm2, %v1631_v49, -inf  ;;  %v1502_v46 = vmul.f32 %v2955_v61, %v1319_v31  ;;  %v1311_v54 = vadd.f32 %v1310_v62, %v3041_v5  ;;  %v1634_v51 = vmax.f32 %v1570_v39, 0.0 }
 0x175   :  { %v2138_v23 = vpack.c.bf16 %v1870_v59, %v1870_v59  ;;  %v1708_v6 = vmax.f32 %v1706_v15, %v1707_v2  ;;  %v1568_v53 = vadd.f32 %v2960_v1, %v1497_v50  ;;  %v1040_v9 = vpop.f32.mrf.mxu0  ;;  %v2225_v10 = vpop.f32.mrf.mxu1 }
 0x176   :  { %v1573_v13 = vadd.f32 %v2960_v1, %v1502_v46  ;;  %v1500_v35 = vmul.f32 %v2955_v61, %v1311_v54  ;;  %v1322_v14 = vadd.f32 %v2225_v10, %v1032_v21  ;;  %v1710_v27 = vsel %vm1675_vm2, %v1634_v51, -inf }
 0x177   :  { %1951 = vst.msk [vmem:[%s3327_s4 + $0xc] sm:$0xf] %vm1947_vm3, %v2138_v23  ;;  %v1632_v5 = vmax.f32 %v1568_v53, 0.0  ;;  %v1042_v17 = vpop.f32.mrf.mxu0  ;;  %v1313_v43 = vpop.f32.mrf.mxu1 }
 0x178   :  { %1782 = vst.msk [vmem:[#allocation2 + $0x50] sm:$0xff] %vm1675_vm2, %v1708_v6  ;;  %v1637_v63 = vmax.f32 %v1573_v13, 0.0  ;;  %v1571_v18 = vadd.f32 %v2960_v1, %v1500_v35  ;;  %v1503_v7 = vmul.f32 %v2955_v61, %v1322_v14  ;;  %v1314_v19 = vadd.f32 %v1313_v43, %v3052_v30 }
 0x179   :  { %v1709_v21 = vsel %vm1675_vm2, %v1632_v5, -inf  ;;  %v1045_v25 = vpop.f32.mrf.mxu0  ;;  %v2228_v26 = vpop.f32.mrf.mxu1 }
 0x17a   :  { %v1812_v29 = vld [vmem:[#allocation2 + $0x40] ss:$2 sm:$0xff]  ;;  %v1844_v22 = vld [vmem:[#allocation2 + $0x41] ss:$2 sm:$0xff]  ;;  %v1711_v55 = vmax.f32 %v1709_v21, %v1710_v27  ;;  %v1635_v33 = vmax.f32 %v1571_v18, 0.0  ;;  %v1574_v34 = vadd.f32 %v2960_v1, %v1503_v7  ;;  %v1501_v11 = vmul.f32 %v2955_v61, %v1314_v19 }
 0x17b   :  { %v1871_v37 = vmax.f32 %v1812_v29, %v1844_v22  ;;  %v1335_v3 = vadd.f32 %v2228_v26, %v1045_v25  ;;  %v1047_v57 = vpop.f32.mrf.mxu0  ;;  %v1326_v47 = vpop.f32.mrf.mxu1  ;;  %v1713_v30 = vsel %vm1675_vm2, %v1637_v63, -inf }
 0x17c   :  { %1783 = vst.msk [vmem:[#allocation2 + $0x58] sm:$0xff] %vm1675_vm2, %v1711_v55  ;;  %v1712_v41 = vsel %vm1675_vm2, %v1635_v33, -inf  ;;  %v1638_v42 = vmax.f32 %v1574_v34, 0.0  ;;  %v1327_v45 = vadd.f32 %v1326_v47, %v1037_v38  ;;  %v1572_v31 = vadd.f32 %v2960_v1, %v1501_v11 }
 0x17d   :  { %v2139_v49 = vpack.c.bf16 %v1871_v37, %v1871_v37  ;;  %v1714_v39 = vmax.f32 %v1712_v41, %v1713_v30  ;;  %v1506_v59 = vmul.f32 %v2955_v61, %v1335_v3  ;;  %v1048_v50 = vpop.f32.mrf.mxu0  ;;  %v2229_v58 = vpop.f32.mrf.mxu1 }
 0x17e   :  { %v1504_v62 = vmul.f32 %v2955_v61, %v1327_v45  ;;  %v1338_v2 = vadd.f32 %v2229_v58, %v1048_v50  ;;  %v1636_v15 = vmax.f32 %v1572_v31, 0.0  ;;  %v1716_v53 = vsel %vm1675_vm2, %v1638_v42, -inf }
 0x17f   :  { %1952 = vst.msk [vmem:[%s3327_s4 + $0x10] sm:$0xf] %vm1947_vm3, %v2139_v49  ;;  %v1577_v38 = vadd.f32 %v2960_v1, %v1506_v59  ;;  %v1050_v46 = vpop.f32.mrf.mxu0  ;;  %v1329_v54 = vpop.f32.mrf.mxu1 }
 0x180   :  { %1784 = vst.msk [vmem:[#allocation2 + $0x60] sm:$0xff] %vm1675_vm2, %v1714_v39  ;;  %v1575_v23 = vadd.f32 %v2960_v1, %v1504_v62  ;;  %v1507_v6 = vmul.f32 %v2955_v61, %v1338_v2  ;;  %v1330_v51 = vadd.f32 %v1329_v54, %v1040_v9  ;;  %v1715_v10 = vsel %vm1675_vm2, %v1636_v15, -inf }
 0x181   :  { %v1641_v13 = vmax.f32 %v1577_v38, 0.0  ;;  %v1053_v35 = vpop.f32.mrf.mxu0  ;;  %v2232_v14 = vpop.f32.mrf.mxu1  ;;  %v1717_v5 = vmax.f32 %v1715_v10, %v1716_v53 }
 0x182   :  { %v1639_v17 = vmax.f32 %v1575_v23, 0.0  ;;  %v1578_v43 = vadd.f32 %v2960_v1, %v1507_v6  ;;  %v1505_v63 = vmul.f32 %v2955_v61, %v1330_v51 }
 0x183   :  { %v1814_v18 = vld [vmem:[#allocation2 + $0x50] ss:$2 sm:$0xff]  ;;  %v1846_v7 = vld [vmem:[#allocation2 + $0x51] ss:$2 sm:$0xff]  ;;  %v1719_v19 = vsel %vm1675_vm2, %v1641_v13, -inf  ;;  %v1055_v27 = vpop.f32.mrf.mxu0  ;;  %v1342_v21 = vpop.f32.mrf.mxu1  ;;  %1785 = vst.msk [vmem:[#allocation2 + $0x68] sm:$0xff] %vm1675_vm2, %v1717_v5 }
 0x184   :  { %v1872_v9 = vmax.f32 %v1814_v18, %v1846_v7  ;;  %v1718_v25 = vsel %vm1675_vm2, %v1639_v17, -inf  ;;  %v1642_v26 = vmax.f32 %v1578_v43, 0.0  ;;  %v1576_v29 = vadd.f32 %v2960_v1, %v1505_v63 }
 0x185   :  { %v1720_v22 = vmax.f32 %v1718_v25, %v1719_v19  ;;  %v1343_v55 = vadd.f32 %v1342_v21, %v1053_v35  ;;  %v1056_v33 = vpop.f32.mrf.mxu0  ;;  %v2233_v34 = vpop.f32.mrf.mxu1 }
 0x186   :  { %v2140_v37 = vpack.c.bf16 %v1872_v9, %v1872_v9  ;;  %v1640_v11 = vmax.f32 %v1576_v29, 0.0  ;;  %v1722_v30 = vsel %vm1675_vm2, %v1642_v26, -inf }
 0x187   :  { %1786 = vst.msk [vmem:[#allocation2 + $0x70] sm:$0xff] %vm1675_vm2, %v1720_v22  ;;  %v1508_v3 = vmul.f32 %v2955_v61, %v1343_v55  ;;  %v1058_v57 = vpop.f32.mrf.mxu0  ;;  %v1345_v47 = vpop.f32.mrf.mxu1 }
 0x188   :  { %1953 = vst.msk [vmem:[%s3327_s4 + $0x14] sm:$0xf] %vm1947_vm3, %v2140_v37  ;;  %v1721_v41 = vsel %vm1675_vm2, %v1640_v11, -inf  ;;  %v1346_v42 = vadd.f32 %v1345_v47, %v1056_v33 }
 0x189   :  { %v1723_v45 = vmax.f32 %v1721_v41, %v1722_v30  ;;  %v1579_v49 = vadd.f32 %v2960_v1, %v1508_v3  ;;  %v1061_v39 = vpop.f32.mrf.mxu0  ;;  %v2236_v31 = vpop.f32.mrf.mxu1 }
 0x18a   :  { %v1509_v59 = vmul.f32 %v2955_v61, %v1346_v42  ;;  %v1351_v50 = vadd.f32 %v2232_v14, %v1061_v39  ;;  %v1816_v58 = vld [vmem:[#allocation2 + $0x60] ss:$2 sm:$0xff]  ;;  %v1848_v62 = vld [vmem:[#allocation2 + $0x61] ss:$2 sm:$0xff] }
 0x18b   :  { %1787 = vst.msk [vmem:[#allocation2 + $0x78] sm:$0xff] %vm1675_vm2, %v1723_v45  ;;  %v1063_v2 = vpop.f32.mrf.mxu0  ;;  %v1358_v15 = vpop.f32.mrf.mxu1  ;;  %v1873_v38 = vmax.f32 %v1816_v58, %v1848_v62  ;;  %v1643_v54 = vmax.f32 %v1579_v49, 0.0 }
 0x18c   :  { %v1510_v46 = vmul.f32 %v2955_v61, %v1351_v50  ;;  %v1580_v53 = vadd.f32 %v2960_v1, %v1509_v59 }
 0x18d   :  { %v1064_v23 = vpop.f32.mrf.mxu0  ;;  %v2237_v6 = vpop.f32.mrf.mxu1  ;;  %v2141_v51 = vpack.c.bf16 %v1873_v38, %v1873_v38  ;;  %v1724_v43 = vsel %vm1675_vm2, %v1643_v54, -inf }
 0x18e   :  { %v1581_v10 = vadd.f32 %v2960_v1, %v1510_v46  ;;  %v1354_v13 = vadd.f32 %v2233_v34, %v1064_v23  ;;  %v1644_v27 = vmax.f32 %v1580_v53, 0.0 }
 0x18f   :  { %v1066_v35 = vpop.f32.mrf.mxu0  ;;  %v1361_v14 = vpop.f32.mrf.mxu1  ;;  %1954 = vst.msk [vmem:[%s3327_s4 + $0x18] sm:$0xf] %vm1947_vm3, %v2141_v51 }
 0x190   :  { %v1645_v5 = vmax.f32 %v1581_v10, 0.0  ;;  %v1511_v17 = vmul.f32 %v2955_v61, %v1354_v13  ;;  %v1727_v57 = vsel %vm1675_vm2, %v1644_v27, -inf }
 0x191   :  { %v1069_v63 = vpop.f32.mrf.mxu0  ;;  %v3153_v18 = vpop.f32.mrf.mxu1 }
 0x192   :  { %v1818_v7 = vld [vmem:[#allocation2 + $0x70] ss:$2 sm:$0xff]  ;;  %v1850_v19 = vld [vmem:[#allocation2 + $0x71] ss:$2 sm:$0xff]  ;;  %v1725_v21 = vsel %vm1675_vm2, %v1645_v5, -inf  ;;  %v1582_v9 = vadd.f32 %v2960_v1, %v1511_v17  ;;  %v1359_v25 = vadd.f32 %v1358_v15, %v1069_v63 }
 0x193   :  { %v1874_v26 = vmax.f32 %v1818_v7, %v1850_v19  ;;  %v1726_v29 = vmax.f32 %v1724_v43, %v1725_v21  ;;  %v1071_v22 = vpop.f32.mrf.mxu0  ;;  %v1374_v55 = vpop.f32.mrf.mxu1 }
 0x194   :  { %v1646_v33 = vmax.f32 %v1582_v9, 0.0  ;;  %v1512_v37 = vmul.f32 %v2955_v61, %v1359_v25 }
 0x195   :  { %v2142_v34 = vpack.c.bf16 %v1874_v26, %v1874_v26  ;;  %1788 = vst.msk [vmem:[#allocation2 + $0x80] sm:$0xff] %vm1675_vm2, %v1726_v29  ;;  %v1072_v11 = vpop.f32.mrf.mxu0  ;;  %v3159_v3 = vpop.f32.mrf.mxu1 }
 0x196   :  { %v1728_v47 = vsel %vm1675_vm2, %v1646_v33, -inf  ;;  %v1362_v30 = vadd.f32 %v1361_v14, %v1072_v11  ;;  %v1583_v49 = vadd.f32 %v2960_v1, %v1512_v37 }
 0x197   :  { %1955 = vst.msk [vmem:[%s3327_s4 + $0x1c] sm:$0xf] %vm1947_vm3, %v2142_v34  ;;  %v1729_v41 = vmax.f32 %v1727_v57, %v1728_v47  ;;  %v1074_v42 = vpop.f32.mrf.mxu0  ;;  %v1377_v45 = vpop.f32.mrf.mxu1 }
 0x198   :  { %v1513_v39 = vmul.f32 %v2955_v61, %v1362_v30  ;;  %v1647_v38 = vmax.f32 %v1583_v49, 0.0 }
 0x199   :  { %1789 = vst.msk [vmem:[#allocation2 + $0x88] sm:$0xff] %vm1675_vm2, %v1729_v41  ;;  %v1077_v59 = vpop.f32.mrf.mxu0  ;;  %v3170_v50 = vpop.f32.mrf.mxu1 }
 0x19a   :  { %v1367_v58 = vadd.f32 %v2236_v31, %v1077_v59  ;;  %v1584_v46 = vadd.f32 %v2960_v1, %v1513_v39  ;;  %v1730_v43 = vsel %vm1675_vm2, %v1647_v38, -inf }
 0x19b   :  { %v1079_v62 = vpop.f32.mrf.mxu0  ;;  %v3172_v2 = vpop.f32.mrf.mxu1 }
 0x19c   :  { %v1514_v15 = vmul.f32 %v2955_v61, %v1367_v58  ;;  %v1648_v63 = vmax.f32 %v1584_v46, 0.0 }
 0x19d   :  { %v1080_v54 = vpop.f32.mrf.mxu0  ;;  %v3176_v23 = vpop.f32.mrf.mxu1 }
 0x19e   :  { %v1585_v51 = vadd.f32 %v2960_v1, %v1514_v15  ;;  %v1370_v53 = vadd.f32 %v2237_v6, %v1080_v54 }
 0x19f   :  { %v1082_v10 = vpop.f32.mrf.mxu0  ;;  %v3179_v13 = vpop.f32.mrf.mxu1 }
 0x1a0   :  { %v1820_v35 = vld [vmem:[#allocation2 + $0x80] ss:$2 sm:$0xff]  ;;  %v1852_v14 = vld [vmem:[#allocation2 + $0x81] ss:$2 sm:$0xff]  ;;  %v1649_v31 = vmax.f32 %v1585_v51, 0.0  ;;  %v1515_v5 = vmul.f32 %v2955_v61, %v1370_v53 }
 0x1a1   :  { %v1875_v17 = vmax.f32 %v1820_v35, %v1852_v14  ;;  %v1085_v7 = vpop.f32.mrf.mxu0  ;;  %v2248_v19 = vpop.f32.mrf.mxu1 }
 0x1a2   :  { %v1731_v27 = vsel %vm1675_vm2, %v1649_v31, -inf  ;;  %v1586_v21 = vadd.f32 %v2960_v1, %v1515_v5  ;;  %v1375_v9 = vadd.f32 %v1374_v55, %v1085_v7  ;;  %v1415_v6 = vadd.f32 %v2248_v19, %v2896_v0 }
 0x1a3   :  { %v2143_v25 = vpack.c.bf16 %v1875_v17, %v1875_v17  ;;  %v1732_v26 = vmax.f32 %v1730_v43, %v1731_v27  ;;  %v1087_v29 = vpop.f32.mrf.mxu0  ;;  %v1406_v22 = vpop.f32.mrf.mxu1  ;;  %v1733_v55 = vsel %vm1675_vm2, %v1648_v63, -inf }
 0x1a4   :  { %v1650_v33 = vmax.f32 %v1586_v21, 0.0  ;;  %v1516_v34 = vmul.f32 %v2955_v61, %v1375_v9  ;;  %v1526_v37 = vmul.f32 %v2955_v61, %v1415_v6  ;;  %v1407_v11 = vadd.f32 %v1406_v22, %v2890_v56 }
 0x1a5   :  { %1956 = vst.msk [vmem:[%s3327_s4 + $0x20] sm:$0xf] %vm1947_vm3, %v2143_v25  ;;  %v1088_v0 = vpop.f32.mrf.mxu0  ;;  %v2249_v57 = vpop.f32.mrf.mxu1 }
 0x1a6   :  { %1790 = vst.msk [vmem:[#allocation2 + $0x90] sm:$0xff] %vm1675_vm2, %v1732_v26  ;;  %v1734_v47 = vsel %vm1675_vm2, %v1650_v33, -inf  ;;  %v1587_v30 = vadd.f32 %v2960_v1, %v1516_v34  ;;  %v1597_v41 = vadd.f32 %v2960_v1, %v1526_v37  ;;  %v1524_v42 = vmul.f32 %v2955_v61, %v1407_v11 }
 0x1a7   :  { %v1735_v56 = vmax.f32 %v1733_v55, %v1734_v47  ;;  %v1378_v49 = vadd.f32 %v1377_v45, %v1088_v0  ;;  %v1418_v39 = vadd.f32 %v2249_v57, %v2900_v4  ;;  %v1090_v59 = vpop.f32.mrf.mxu0  ;;  %v1409_v58 = vpop.f32.mrf.mxu1 }
 0x1a8   :  { %v1661_v62 = vmax.f32 %v1597_v41, 0.0  ;;  %v1595_v15 = vadd.f32 %v2960_v1, %v1524_v42  ;;  %v1410_v38 = vadd.f32 %v1409_v58, %v2894_v60  ;;  %v1651_v46 = vmax.f32 %v1587_v30, 0.0 }
 0x1a9   :  { %1791 = vst.msk [vmem:[#allocation2 + $0x98] sm:$0xff] %vm1675_vm2, %v1735_v56  ;;  %v1517_v54 = vmul.f32 %v2955_v61, %v1378_v49  ;;  %v1527_v51 = vmul.f32 %v2955_v61, %v1418_v39  ;;  %v1093_v53 = vpop.f32.mrf.mxu0  ;;  %v2252_v10 = vpop.f32.mrf.mxu1 }
 0x1aa   :  { %v1659_v35 = vmax.f32 %v1595_v15, 0.0  ;;  %v1525_v45 = vmul.f32 %v2955_v61, %v1410_v38  ;;  %v1383_v31 = vadd.f32 %v3153_v18, %v1093_v53  ;;  %v1431_v60 = vadd.f32 %v2252_v10, %v2912_v16 }
 0x1ab   :  { %v1588_v4 = vadd.f32 %v2960_v1, %v1517_v54  ;;  %v1598_v14 = vadd.f32 %v2960_v1, %v1527_v51  ;;  %v1095_v5 = vpop.f32.mrf.mxu0  ;;  %v1422_v17 = vpop.f32.mrf.mxu1  ;;  %v1749_v43 = vsel %vm1675_vm2, %v1661_v62, -inf  ;;  %v1736_v27 = vsel %vm1675_vm2, %v1651_v46, -inf }
 0x1ac   :  { %v1748_v63 = vsel %vm1675_vm2, %v1659_v35, -inf  ;;  %v1596_v7 = vadd.f32 %v2960_v1, %v1525_v45  ;;  %v1423_v19 = vadd.f32 %v1422_v17, %v2904_v8  ;;  %v1518_v6 = vmul.f32 %v2955_v61, %v1383_v31 }
 0x1ad   :  { %v1750_v21 = vmax.f32 %v1748_v63, %v1749_v43  ;;  %v1662_v9 = vmax.f32 %v1598_v14, 0.0  ;;  %v1096_v25 = vpop.f32.mrf.mxu0  ;;  %v2253_v18 = vpop.f32.mrf.mxu1  ;;  %v1530_v16 = vmul.f32 %v2955_v61, %v1431_v60  ;;  %v1652_v33 = vmax.f32 %v1588_v4, 0.0 }
 0x1ae   :  { %v1660_v26 = vmax.f32 %v1596_v7, 0.0  ;;  %v1528_v29 = vmul.f32 %v2955_v61, %v1423_v19  ;;  %v1386_v22 = vadd.f32 %v3159_v3, %v1096_v25  ;;  %v1589_v34 = vadd.f32 %v2960_v1, %v1518_v6 }
 0x1af   :  { %1796 = vst.msk [vmem:[#allocation2 + $0xc0] sm:$0xff] %vm1675_vm2, %v1750_v21  ;;  %v1752_v8 = vsel %vm1675_vm2, %v1662_v9, -inf  ;;  %v1434_v37 = vadd.f32 %v2253_v18, %v2916_v20  ;;  %v1098_v11 = vpop.f32.mrf.mxu0  ;;  %v1425_v55 = vpop.f32.mrf.mxu1  ;;  %v1601_v30 = vadd.f32 %v2960_v1, %v1530_v16 }
 0x1b0   :  { %v1822_v0 = vld [vmem:[#allocation2 + $0x90] ss:$2 sm:$0xff]  ;;  %v1854_v57 = vld [vmem:[#allocation2 + $0x91] ss:$2 sm:$0xff]  ;;  %v1751_v47 = vsel %vm1675_vm2, %v1660_v26, -inf  ;;  %v1599_v41 = vadd.f32 %v2960_v1, %v1528_v29  ;;  %v1519_v3 = vmul.f32 %v2955_v61, %v1386_v22  ;;  %v1653_v49 = vmax.f32 %v1589_v34, 0.0 }
 0x1b1   :  { %v1876_v42 = vmax.f32 %v1822_v0, %v1854_v57  ;;  %v1753_v56 = vmax.f32 %v1751_v47, %v1752_v8  ;;  %v1531_v39 = vmul.f32 %v2955_v61, %v1434_v37  ;;  %v1101_v59 = vpop.f32.mrf.mxu0  ;;  %v2256_v58 = vpop.f32.mrf.mxu1  ;;  %v1665_v20 = vmax.f32 %v1601_v30, 0.0 }
 0x1b2   :  { %v1663_v62 = vmax.f32 %v1599_v41, 0.0  ;;  %v1590_v15 = vadd.f32 %v2960_v1, %v1519_v3  ;;  %v1426_v38 = vadd.f32 %v1425_v55, %v2908_v12  ;;  %v1737_v54 = vsel %vm1675_vm2, %v1653_v49, -inf }
 0x1b3   :  { %v2144_v46 = vpack.c.bf16 %v1876_v42, %v1876_v42  ;;  %1797 = vst.msk [vmem:[#allocation2 + $0xc8] sm:$0xff] %vm1675_vm2, %v1753_v56  ;;  %v1602_v51 = vadd.f32 %v2960_v1, %v1531_v39  ;;  %v1391_v53 = vadd.f32 %v3172_v2, %v1101_v59  ;;  %v1103_v10 = vpop.f32.mrf.mxu0  ;;  %v1438_v35 = vpop.f32.mrf.mxu1  ;;  %v1738_v45 = vmax.f32 %v1736_v27, %v1737_v54 }
 0x1b4   :  { %v1755_v4 = vsel %vm1675_vm2, %v1665_v20, -inf  ;;  %v1754_v14 = vsel %vm1675_vm2, %v1663_v62, -inf  ;;  %v1654_v31 = vmax.f32 %v1590_v15, 0.0  ;;  %v1739_v12 = vsel %vm1675_vm2, %v1652_v33, -inf  ;;  %v2446_v10 = vld [vmem:[%s3325_s2] ss:$0 sm:$0xff] }
 0x1b5   :  { %1957 = vst.msk [vmem:[%s3327_s4 + $0x24] sm:$0xf] %vm1947_vm3, %v2144_v46  ;;  %v1756_v60 = vmax.f32 %v1754_v14, %v1755_v4  ;;  %v1529_v5 = vmul.f32 %v2955_v61, %v1426_v38  ;;  %v1520_v2 = vmul.f32 %v2955_v61, %v1391_v53  ;;  %v1104_v17 = vpop.f32.mrf.mxu0  ;;  %v2257_v43 = vpop.f32.mrf.mxu1  ;;  %v1447_v7 = vadd.f32 %v2256_v58, %v2928_v32  ;;  %v2445_v46 = vld [vmem:[%s3326_s3] ss:$0 sm:$0xff] }
 0x1b6   :  { %1792 = vst.msk [vmem:[#allocation2 + $0xa0] sm:$0xff] %vm1675_vm2, %v1738_v45  ;;  %v1740_v63 = vsel %vm1675_vm2, %v1654_v31, -inf  ;;  %v1439_v19 = vadd.f32 %v1438_v35, %v2920_v24  ;;  %v1394_v27 = vadd.f32 %v3179_v13, %v1104_v17  ;;  %v1666_v9 = vmax.f32 %v1602_v51, 0.0 }
 0x1b7   :  { %1798 = vst.msk [vmem:[#allocation2 + $0xd0] sm:$0xff] %vm1675_vm2, %v1756_v60  ;;  %v1741_v21 = vmax.f32 %v1739_v12, %v1740_v63  ;;  %v1600_v6 = vadd.f32 %v2960_v1, %v1529_v5  ;;  %v1106_v25 = vpop.f32.mrf.mxu0  ;;  %v1441_v18 = vpop.f32.mrf.mxu1  ;;  %v3251_v26 = vadd.f32 %v2960_v1, %v1520_v2  ;;  %v1534_v16 = vmul.f32 %v2955_v61, %v1447_v7 }
 0x1b8   :  { %v1532_v29 = vmul.f32 %v2955_v61, %v1439_v19  ;;  %v1450_v32 = vadd.f32 %v2257_v43, %v2932_v36  ;;  %v1442_v13 = vadd.f32 %v1441_v18, %v2924_v28  ;;  %v1521_v55 = vmul.f32 %v2955_v61, %v1394_v27 }
 0x1b9   :  { %1793 = vst.msk [vmem:[#allocation2 + $0xa8] sm:$0xff] %vm1675_vm2, %v1741_v21  ;;  %v1664_v24 = vmax.f32 %v1600_v6, 0.0  ;;  %v1109_v22 = vpop.f32.mrf.mxu0  ;;  %v2260_v33 = vpop.f32.mrf.mxu1  ;;  %v1605_v37 = vadd.f32 %v2960_v1, %v1534_v16  ;;  %v1758_v36 = vsel %vm1675_vm2, %v1666_v9, -inf  ;;  %v1655_v42 = vmax.f32 %v3251_v26, 0.0 }
 0x1ba   :  { %v1828_v8 = vld [vmem:[#allocation2 + $0xc0] ss:$2 sm:$0xff]  ;;  %v1860_v34 = vld [vmem:[#allocation2 + $0xc1] ss:$2 sm:$0xff]  ;;  %v1603_v11 = vadd.f32 %v2960_v1, %v1532_v29  ;;  %v1535_v0 = vmul.f32 %v2955_v61, %v1450_v32  ;;  %v1533_v30 = vmul.f32 %v2955_v61, %v1442_v13  ;;  %v1399_v20 = vadd.f32 %v3170_v50, %v1109_v22 }
 0x1bb   :  { %v1879_v57 = vmax.f32 %v1828_v8, %v1860_v34  ;;  %v1757_v47 = vsel %vm1675_vm2, %v1664_v24, -inf  ;;  %v1111_v28 = vpop.f32.mrf.mxu0  ;;  %v1454_v41 = vpop.f32.mrf.mxu1  ;;  %v1669_v56 = vmax.f32 %v1605_v37, 0.0  ;;  %v1592_v54 = vadd.f32 %v2445_v46, %v1521_v55 }
 0x1bc   :  { %v1759_v3 = vmax.f32 %v1757_v47, %v1758_v36  ;;  %v1667_v49 = vmax.f32 %v1603_v11, 0.0  ;;  %v1606_v59 = vadd.f32 %v2960_v1, %v1535_v0  ;;  %v1604_v58 = vadd.f32 %v2960_v1, %v1533_v30 }
 0x1bd   :  { %v2147_v39 = vpack.c.bf16 %v1879_v57, %v1879_v57  ;;  %v1112_v62 = vpop.f32.mrf.mxu0  ;;  %v2261_v15 = vpop.f32.mrf.mxu1  ;;  %v1761_v61 = vsel %vm1675_vm2, %v1669_v56, -inf  ;;  %v1463_v51 = vadd.f32 %v2260_v33, %v2944_v48  ;;  %v1522_v35 = vmul.f32 %v2446_v10, %v1399_v20 }
 0x1be   :  { %1799 = vst.msk [vmem:[#allocation2 + $0xd8] sm:$0xff] %vm1675_vm2, %v1759_v3  ;;  %v1760_v38 = vsel %vm1675_vm2, %v1667_v49, -inf  ;;  %v1670_v50 = vmax.f32 %v1606_v59, 0.0  ;;  %v1668_v53 = vmax.f32 %v1604_v58, 0.0  ;;  %v1455_v12 = vadd.f32 %v1454_v41, %v2936_v40 }
 0x1bf   :  { %1960 = vst.msk [vmem:[%s3327_s4 + $0x30] sm:$0xf] %vm1947_vm3, %v2147_v39  ;;  %v1762_v1 = vmax.f32 %v1760_v38, %v1761_v61  ;;  %v1114_v45 = vpop.f32.mrf.mxu0  ;;  %v1538_v31 = vmul.f32 %v2446_v10, %v1463_v51  ;;  %v1402_v48 = vadd.f32 %v3176_v23, %v1112_v62  ;;  %v1466_v60 = vadd.f32 %v2261_v15, %v2948_v52  ;;  %v1457_v5 = vpop.f32.mrf.mxu1 }
 0x1c0   :  { %v1824_v4 = vld [vmem:[#allocation2 + $0xa0] ss:$2 sm:$0xff]  ;;  %v1856_v14 = vld [vmem:[#allocation2 + $0xa1] ss:$2 sm:$0xff]  ;;  %v1764_v17 = vsel %vm1675_vm2, %v1670_v50, -inf  ;;  %v1763_v43 = vsel %vm1675_vm2, %v1668_v53, -inf  ;;  %v1593_v63 = vadd.f32 %v2445_v46, %v1522_v35  ;;  %v1536_v27 = vmul.f32 %v2446_v10, %v1455_v12 }
 0x1c1   :  { %v1877_v2 = vmax.f32 %v1824_v4, %v1856_v14  ;;  %1800 = vst.msk [vmem:[#allocation2 + $0xe0] sm:$0xff] %vm1675_vm2, %v1762_v1  ;;  %v1765_v7 = vmax.f32 %v1763_v43, %v1764_v17  ;;  %v1609_v19 = vadd.f32 %v2445_v46, %v1538_v31  ;;  %v1523_v21 = vmul.f32 %v2446_v10, %v1402_v48 }
 0x1c2   :  { %v1657_v6 = vmax.f32 %v1593_v63, 0.0  ;;  %v1539_v40 = vmul.f32 %v2446_v10, %v1466_v60  ;;  %v1458_v23 = vadd.f32 %v1457_v5, %v2940_v44  ;;  %v1742_v52 = vsel %vm1675_vm2, %v1655_v42, -inf }
 0x1c3   :  { %v2145_v9 = vpack.c.bf16 %v1877_v2, %v1877_v2  ;;  %1801 = vst.msk [vmem:[#allocation2 + $0xe8] sm:$0xff] %vm1675_vm2, %v1765_v7  ;;  %v1673_v25 = vmax.f32 %v1609_v19, 0.0  ;;  %v1607_v18 = vadd.f32 %v2445_v46, %v1536_v27  ;;  %v1594_v26 = vadd.f32 %v2445_v46, %v1523_v21 }
 0x1c4   :  { %v1656_v32 = vmax.f32 %v1592_v54, 0.0  ;;  %v1743_v24 = vsel %vm1675_vm2, %v1657_v6, -inf  ;;  %v1610_v13 = vadd.f32 %v2445_v46, %v1539_v40  ;;  %v1537_v22 = vmul.f32 %v2446_v10, %v1458_v23 }
 0x1c5   :  { %1958 = vst.msk [vmem:[%s3327_s4 + $0x28] sm:$0xf] %vm1947_vm3, %v2145_v9  ;;  %v1830_v16 = vld [vmem:[#allocation2 + $0xd0] ss:$2 sm:$0xff]  ;;  %v1862_v29 = vld [vmem:[#allocation2 + $0xd1] ss:$2 sm:$0xff]  ;;  %v1744_v33 = vmax.f32 %v1742_v52, %v1743_v24 }
 0x1c6   :  { %v1880_v44 = vmax.f32 %v1830_v16, %v1862_v29  ;;  %v1671_v8 = vmax.f32 %v1607_v18, 0.0  ;;  %v1658_v34 = vmax.f32 %v1594_v26, 0.0  ;;  %v1674_v37 = vmax.f32 %v1610_v13, 0.0 }
 0x1c7   :  { %v1608_v11 = vadd.f32 %v2445_v46, %v1537_v22  ;;  %1794 = vst.msk [vmem:[#allocation2 + $0xb0] sm:$0xff] %vm1675_vm2, %v1744_v33  ;;  %v1767_v0 = vsel %vm1675_vm2, %v1673_v25, -inf  ;;  %v1745_v36 = vsel %vm1675_vm2, %v1656_v32, -inf }
 0x1c8   :  { %v2148_v55 = vpack.c.bf16 %v1880_v44, %v1880_v44  ;;  %v1766_v57 = vsel %vm1675_vm2, %v1671_v8, -inf  ;;  %v1746_v30 = vsel %vm1675_vm2, %v1658_v34, -inf  ;;  %v1770_v56 = vsel %vm1675_vm2, %v1674_v37, -inf }
 0x1c9   :  { %v1768_v47 = vmax.f32 %v1766_v57, %v1767_v0  ;;  %v1672_v28 = vmax.f32 %v1608_v11, 0.0  ;;  %v1747_v41 = vmax.f32 %v1745_v36, %v1746_v30 }
 0x1ca   :  { %1961 = vst.msk [vmem:[%s3327_s4 + $0x34] sm:$0xf] %vm1947_vm3, %v2148_v55  ;;  %v1832_v3 = vld [vmem:[#allocation2 + $0xe0] ss:$2 sm:$0xff]  ;;  %v1864_v42 = vld [vmem:[#allocation2 + $0xe1] ss:$2 sm:$0xff] }
 0x1cb   :  { %1802 = vst.msk [vmem:[#allocation2 + $0xf0] sm:$0xff] %vm1675_vm2, %v1768_v47  ;;  %v1769_v49 = vsel %vm1675_vm2, %v1672_v28, -inf  ;;  %v1881_v39 = vmax.f32 %v1832_v3, %v1864_v42  ;;  %1795 = vst.msk [vmem:[#allocation2 + $0xb8] sm:$0xff] %vm1675_vm2, %v1747_v41 }
 0x1cc   :  { %v1771_v59 = vmax.f32 %v1769_v49, %v1770_v56 }
 0x1cd   :  { %v2149_v58 = vpack.c.bf16 %v1881_v39, %v1881_v39 }
 0x1ce   :  { %1803 = vst.msk [vmem:[#allocation2 + $0xf8] sm:$0xff] %vm1675_vm2, %v1771_v59 }
 0x1cf   :  { %1962 = vst.msk [vmem:[%s3327_s4 + $0x38] sm:$0xf] %vm1947_vm3, %v2149_v58 }
 0x1d2   :  { %v1826_v20 = vld [vmem:[#allocation2 + $0xb0] ss:$2 sm:$0xff]  ;;  %v1858_v62 = vld [vmem:[#allocation2 + $0xb1] ss:$2 sm:$0xff] }
 0x1d3   :  { %v1878_v15 = vmax.f32 %v1826_v20, %v1858_v62 }
 0x1d5   :  { %v1834_v61 = vld [vmem:[#allocation2 + $0xf0] ss:$2 sm:$0xff]  ;;  %v1866_v38 = vld [vmem:[#allocation2 + $0xf1] ss:$2 sm:$0xff]  ;;  %v2146_v46 = vpack.c.bf16 %v1878_v15, %v1878_v15 }
 0x1d6   :  { %v1882_v54 = vmax.f32 %v1834_v61, %v1866_v38 }
 0x1d7   :  { %1959 = vst.msk [vmem:[%s3327_s4 + $0x2c] sm:$0xf] %vm1947_vm3, %v2146_v46 }
 0x1d8   :  { %v2150_v51 = vpack.c.bf16 %v1882_v54, %v1882_v54 }
 0x1da   :  { %1963 = vst.msk [vmem:[%s3327_s4 + $0x3c] sm:$0xf] %vm1947_vm3, %v2150_v51 }

// kernel: conv_net_forward.6
= control target key start
LH: loop header
LB: loop body
LE: loop exit
PB: predicated region body
PF: predicated region fallthrough
CT: control target
= control target key end

     0   :  { %vm492_vm0 = vcmask 523264   ;;  %s1418_s1 = inlined_call_operand.vmem [shape: bf16[576,128], index: 1, kind: input, shape index: {}]   ;;  %s1419_s0 = inlined_call_operand.vmem [shape: bf16[96,576], index: 0, kind: input, shape index: {}]   ;;  %s1420_s2 = inlined_call_operand.vmem [shape: f32[1,128], index: 2, kind: input, shape index: {}]   ;;  %s1421_s3 = inlined_call_operand.vmem [shape: f32[1,128], index: 3, kind: input, shape index: {}]   ;;  %s1422_s4 = inlined_call_operand.vmem [shape: bf16[24,128], index: 4, kind: output, shape index: {}]  }
   0x1   :  { %v1077_v0 = vld [vmem:[%s1418_s1 + $0x78] sm:$0xff]   ;;  %v1081_v4 = vld [vmem:[%s1418_s1 + $0x70] sm:$0xff]   ;;  %v1085_v8 = vld [vmem:[%s1418_s1 + $0x68] sm:$0xff]  }
   0x2   :  { %v1078_v1 = vld [vmem:[%s1418_s1 + $0xf8] sm:$0xff]   ;;  %935 = vmatprep.subr.bf16.mxu0 %v1077_v0  ;;  %v1082_v5 = vld [vmem:[%s1418_s1 + $0xf0] sm:$0xff]   ;;  %v1086_v9 = vld [vmem:[%s1418_s1 + $0xe8] sm:$0xff]  }
   0x3   :  { %v1079_v2 = vld [vmem:[%s1418_s1 + $0x38] sm:$0xff]   ;;  %987 = vmatprep.subr.bf16.mxu1 %v1078_v1  ;;  %v1083_v6 = vld [vmem:[%s1418_s1 + $0x30] sm:$0xff]   ;;  %v1087_v10 = vld [vmem:[%s1418_s1 + $0x28] sm:$0xff]  }
   0x4   :  { %v1080_v3 = vld [vmem:[%s1418_s1 + $0xb8] sm:$0xff]   ;;  %936 = vmatpush3.bf16.msra.mxu0 %v1079_v2  ;;  %v1084_v7 = vld [vmem:[%s1418_s1 + $0xb0] sm:$0xff]   ;;  %v1088_v11 = vld [vmem:[%s1418_s1 + $0xa8] sm:$0xff]  }
   0x5   :  { %988 = vmatpush3.bf16.msra.mxu1 %v1080_v3  ;;  %937 = vmatprep.subr.bf16.mxu0 %v1081_v4  ;;  %v1089_v12 = vld [vmem:[%s1418_s1 + $0x60] sm:$0xff]   ;;  %v1093_v16 = vld [vmem:[%s1418_s1 + $0x58] sm:$0xff]   ;;  %v1097_v20 = vld [vmem:[%s1418_s1 + $0x50] sm:$0xff]  }
   0x6   :  { %989 = vmatprep.subr.bf16.mxu1 %v1082_v5  ;;  %v1090_v13 = vld [vmem:[%s1418_s1 + $0xe0] sm:$0xff]   ;;  %v1094_v17 = vld [vmem:[%s1418_s1 + $0xd8] sm:$0xff]   ;;  %v1098_v21 = vld [vmem:[%s1418_s1 + $0xd0] sm:$0xff]  }
   0x7   :  { %v1091_v14 = vld [vmem:[%s1418_s1 + $0x20] sm:$0xff]   ;;  %v1095_v18 = vld [vmem:[%s1418_s1 + $0x18] sm:$0xff]   ;;  %v1099_v22 = vld [vmem:[%s1418_s1 + $0x10] sm:$0xff]  }
   0x8   :  { %938 = vmatpush3.bf16.msra.mxu0 %v1083_v6  ;;  %v1092_v15 = vld [vmem:[%s1418_s1 + $0xa0] sm:$0xff]   ;;  %v1096_v19 = vld [vmem:[%s1418_s1 + $0x98] sm:$0xff]   ;;  %v1100_v23 = vld [vmem:[%s1418_s1 + $0x90] sm:$0xff]  }
   0x9   :  { %990 = vmatpush3.bf16.msra.mxu1 %v1084_v7  ;;  %939 = vmatprep.subr.bf16.mxu0 %v1085_v8  ;;  %v1101_v24 = vld [vmem:[%s1418_s1 + $0x48] sm:$0xff]   ;;  %v1105_v28 = vld [vmem:[%s1418_s1 + $0x40] sm:$0xff]   ;;  %v1115_v36 = vld [vmem:[%s1418_s1 + $0x118] sm:$0xff]  }
   0xa   :  { %991 = vmatprep.subr.bf16.mxu1 %v1086_v9  ;;  %v1102_v25 = vld [vmem:[%s1418_s1 + $0xc8] sm:$0xff]   ;;  %v1106_v29 = vld [vmem:[%s1418_s1 + $0xc0] sm:$0xff]   ;;  %v1122_v39 = vld [vmem:[%s1418_s1 + $0x110] sm:$0xff]  }
   0xb   :  { %v1103_v26 = vld [vmem:[%s1418_s1 + $0x8] sm:$0xff]   ;;  %v1107_v30 = vld [vmem:[%s1418_s1] sm:$0xff]   ;;  %v1125_v43 = vld [vmem:[%s1419_s0 + $0x5c] ss:$20 sps:$4 sm:$0xff]  }
   0xc   :  { %940 = vmatpush3.bf16.msra.mxu0 %v1087_v10  ;;  %v1104_v27 = vld [vmem:[%s1418_s1 + $0x88] sm:$0xff]   ;;  %v1108_v31 = vld [vmem:[%s1418_s1 + $0x80] sm:$0xff]   ;;  %v1129_v47 = vld [vmem:[%s1419_s0 + $0x7c] ss:$20 sps:$4 sm:$0xff]  }
   0xd   :  { %992 = vmatpush3.bf16.msra.mxu1 %v1088_v11  ;;  %941 = vmatprep.subr.bf16.mxu0 %v1089_v12  ;;  %v1109_v32 = vld [vmem:[%s1419_s0] ss:$20 sps:$4 sm:$0xff]   ;;  %v1111_v33 = vld [vmem:[%s1419_s0 + $0x4] ss:$20 sps:$4 sm:$0xff]   ;;  %v1112_v34 = vld [vmem:[%s1419_s0 + $0x8] ss:$20 sps:$4 sm:$0xff]  }
   0xe   :  { %993 = vmatprep.subr.bf16.mxu1 %v1090_v13  ;;  %v1114_v35 = vld [vmem:[%s1419_s0 + $0xc] ss:$20 sps:$4 sm:$0xff]   ;;  %543 = vmatprep.mubr.bf16.mxu0 %v1111_v33  ;;  %v1118_v38 = vld [vmem:[%s1419_s0 + $0x34] ss:$20 sps:$4 sm:$0xff]   ;;  %v1121_v41 = vld [vmem:[%s1419_s0 + $0x30] ss:$20 sps:$4 sm:$0xff]  }
   0xf   :  { %624 = vmatprep.mubr.bf16.mxu1 %v1114_v35  ;;  %v1116_v37 = vld [vmem:[%s1419_s0 + $0x2c] ss:$20 sps:$4 sm:$0xff]   ;;  %v1120_v40 = vld [vmem:[%s1419_s0 + $0x28] ss:$20 sps:$4 sm:$0xff]   ;;  %v1127_v45 = vld [vmem:[%s1419_s0 + $0x50] ss:$20 sps:$4 sm:$0xff]  }
  0x10   :  { %942 = vmatpush3.bf16.msra.mxu0 %v1091_v14  ;;  %v1123_v42 = vld [vmem:[%s1419_s0 + $0x54] ss:$20 sps:$4 sm:$0xff]   ;;  %v1128_v46 = vld [vmem:[%s1419_s0 + $0x58] ss:$20 sps:$4 sm:$0xff]   ;;  %v1142_v48 = vld [vmem:[%s1418_s1 + $0x100] sm:$0xff]  }
  0x11   :  { %994 = vmatpush3.bf16.msra.mxu1 %v1092_v15  ;;  %943 = vmatprep.subr.bf16.mxu0 %v1093_v16  ;;  %v1135_v44 = vld [vmem:[%s1418_s1 + $0x108] sm:$0xff]   ;;  %v1131_v49 = vld [vmem:[%s1419_s0 + $0x84] ss:$20 sps:$4 sm:$0xff]   ;;  %v1134_v51 = vld [vmem:[%s1419_s0 + $0x80] ss:$20 sps:$4 sm:$0xff]  }
  0x12   :  { %995 = vmatprep.subr.bf16.mxu1 %v1094_v17  ;;  %v1133_v50 = vld [vmem:[%s1419_s0 + $0x78] ss:$20 sps:$4 sm:$0xff]   ;;  %v1140_v54 = vld [vmem:[%s1419_s0 + $0xa0] ss:$20 sps:$4 sm:$0xff]   ;;  %v1141_v55 = vld [vmem:[%s1419_s0 + $0xa8] ss:$20 sps:$4 sm:$0xff]  }
  0x13   :  { %v1136_v52 = vld [vmem:[%s1419_s0 + $0xa4] ss:$20 sps:$4 sm:$0xff]   ;;  %v1138_v53 = vld [vmem:[%s1419_s0 + $0xac] ss:$20 sps:$4 sm:$0xff]   ;;  %v1145_v57 = vld [vmem:[%s1419_s0 + $0xd4] ss:$20 sps:$4 sm:$0xff]  }
  0x14   :  { %944 = vmatpush3.bf16.msra.mxu0 %v1095_v18  ;;  %v1143_v56 = vld [vmem:[%s1419_s0 + $0xcc] ss:$20 sps:$4 sm:$0xff]   ;;  %v1147_v58 = vld [vmem:[%s1419_s0 + $0xc8] ss:$20 sps:$4 sm:$0xff]   ;;  %v1148_v59 = vld [vmem:[%s1419_s0 + $0xd0] ss:$20 sps:$4 sm:$0xff]  }
  0x15   :  { %996 = vmatpush3.bf16.msra.mxu1 %v1096_v19  ;;  %945 = vmatprep.subr.bf16.mxu0 %v1097_v20  ;;  %v1149_v60 = vld [vmem:[%s1419_s0 + $0x10] ss:$20 sps:$4 sm:$0xff]   ;;  %v1150_v61 = vld [vmem:[%s1419_s0 + $0x60] ss:$20 sps:$4 sm:$0xff]   ;;  %v1151_v62 = vld [vmem:[%s1419_s0 + $0x38] ss:$20 sps:$4 sm:$0xff]  }
  0x16   :  { %997 = vmatprep.subr.bf16.mxu1 %v1098_v21  ;;  %v1152_v63 = vld [vmem:[%s1419_s0 + $0x88] ss:$20 sps:$4 sm:$0xff]   ;;  %v1153_v0 = vld [vmem:[%s1419_s0 + $0xb0] ss:$20 sps:$4 sm:$0xff]   ;;  %v1154_v1 = vld [vmem:[%s1419_s0 + $0xd8] ss:$20 sps:$4 sm:$0xff]  }
  0x18   :  { %946 = vmatpush3.bf16.msra.mxu0 %v1099_v22 }
  0x19   :  { %998 = vmatpush3.bf16.msra.mxu1 %v1100_v23  ;;  %947 = vmatprep.subr.bf16.mxu0 %v1101_v24 }
  0x1a   :  { %999 = vmatprep.subr.bf16.mxu1 %v1102_v25 }
  0x1c   :  { %948 = vmatpush3.bf16.msra.mxu0 %v1103_v26 }
  0x1d   :  { %1000 = vmatpush3.bf16.msra.mxu1 %v1104_v27  ;;  %949 = vmatprep.subr.bf16.mxu0 %v1105_v28 }
  0x1e   :  { %1001 = vmatprep.subr.bf16.mxu1 %v1106_v29 }
  0x20   :  { %950 = vmatpush3.bf16.msra.mxu0 %v1107_v30 }
  0x21   :  { %1002 = vmatpush3.bf16.msra.mxu1 %v1108_v31  ;;  %1049 = vmatprep.subr.bf16.mxu0 %v1115_v36 }
  0x22   :  { %1069 = vmatprep.subr.bf16.mxu1 %v1115_v36 }
  0x23   :  { %544 = vmatmul.mubr.bf16.vlgmr.msra.gmra.mxu0 %v1109_v32 }
  0x24   :  { %625 = vmatmul.mubr.bf16.vlgmr.msra.gmra.mxu1 %v1112_v34  ;;  %551 = vmatprep.mubr.bf16.mxu0 %v1116_v37 }
  0x25   :  { %1073 = vmatpush3.bf16.msra.mxu1 %v1115_v36  ;;  %632 = vmatprep.mubr.bf16.mxu1 %v1118_v38 }
  0x26   :  { %1050 = vmatpush3.bf16.msra.mxu0 %v1115_v36  ;;  %1070 = vmatprep.subr.bf16.mxu1 %v1122_v39 }
  0x27   :  { %1051 = vmatprep.subr.bf16.mxu0 %v1122_v39 }
  0x29   :  { %1074 = vmatpush3.bf16.msra.mxu1 %v1122_v39 }
  0x2a   :  { %1052 = vmatpush3.bf16.msra.mxu0 %v1122_v39  ;;  %1071 = vmatprep.subr.bf16.mxu1 %v1135_v44 }
  0x2b   :  { %552 = vmatmul.mubr.bf16.gmra.mxu0 %v1120_v40  ;;  %1053 = vmatprep.subr.bf16.mxu0 %v1135_v44 }
  0x2c   :  { %633 = vmatmul.mubr.bf16.gmra.mxu1 %v1121_v41  ;;  %559 = vmatprep.mubr.bf16.mxu0 %v1123_v42 }
  0x2d   :  { %640 = vmatprep.mubr.bf16.mxu1 %v1125_v43  ;;  %1075 = vmatpush3.bf16.msra.mxu1 %v1135_v44 }
  0x2e   :  { %1054 = vmatpush3.bf16.msra.mxu0 %v1135_v44  ;;  %1072 = vmatprep.subr.bf16.mxu1 %v1142_v48 }
  0x2f   :  { %1055 = vmatprep.subr.bf16.mxu0 %v1142_v48 }
  0x31   :  { %1076 = vmatpush3.bf16.msra.mxu1 %v1142_v48 }
  0x32   :  { %1056 = vmatpush3.bf16.msra.mxu0 %v1142_v48 }
  0x33   :  { %560 = vmatmul.mubr.bf16.gmra.mxu0 %v1127_v45 }
  0x34   :  { %641 = vmatmul.mubr.bf16.gmra.mxu1 %v1128_v46  ;;  %567 = vmatprep.mubr.bf16.mxu0 %v1129_v47 }
  0x35   :  { %648 = vmatprep.mubr.bf16.mxu1 %v1131_v49 }
  0x3b   :  { %568 = vmatmul.mubr.bf16.gmra.mxu0 %v1133_v50 }
  0x3c   :  { %649 = vmatmul.mubr.bf16.gmra.mxu1 %v1134_v51  ;;  %575 = vmatprep.mubr.bf16.mxu0 %v1136_v52 }
  0x3d   :  { %656 = vmatprep.mubr.bf16.mxu1 %v1138_v53 }
  0x43   :  { %576 = vmatmul.mubr.bf16.gmra.mxu0 %v1140_v54 }
  0x44   :  { %657 = vmatmul.mubr.bf16.gmra.mxu1 %v1141_v55  ;;  %583 = vmatprep.mubr.bf16.mxu0 %v1143_v56 }
  0x45   :  { %664 = vmatprep.mubr.bf16.mxu1 %v1145_v57 }
  0x4b   :  { %584 = vmatmul.mubr.bf16.gmra.mxu0 %v1147_v58 }
  0x4c   :  { %665 = vmatmul.mubr.bf16.gmra.mxu1 %v1148_v59  ;;  %1057 = vmatprep.mubr.msk.bf16.mxu0 %vm492_vm0, %v1149_v60 }
  0x4d   :  { %1061 = vmatprep.mubr.msk.bf16.mxu1 %vm492_vm0, %v1150_v61 }
  0x53   :  { %1058 = vmatmul.mubr.msk.bf16.vlgmr.msra.gmra.mxu0 %vm492_vm0, %v1151_v62 }
  0x54   :  { %1062 = vmatmul.mubr.msk.bf16.vlgmr.msra.gmra.mxu1 %vm492_vm0, %v1152_v63 }
  0x55   :  { %1065 = vmatprep.mubr.msk.bf16.mxu1 %vm492_vm0, %v1153_v0 }
  0x5c   :  { %1066 = vmatmul.mubr.msk.bf16.gmra.mxu1 %vm492_vm0, %v1154_v1 }
  0xe3   :  { %v951_v2 = vpop.f32.mrf.mxu0 }
  0xe4   :  { %v1003_v3 = vpop.f32.mrf.mxu1 }
  0xe5   :  { %v952_v4 = vpop.f32.mrf.mxu0 }
  0xe6   :  { %v1004_v5 = vpop.f32.mrf.mxu1  ;;  %v953_v48 = vadd.f32 %v952_v4, %v951_v2  ;;  %v1381_v2 = vld [vmem:[%s1420_s2] ss:$0 sm:$0xff] }
  0xe7   :  { %v954_v6 = vpop.f32.mrf.mxu0  ;;  %v1005_v49 = vadd.f32 %v1004_v5, %v1003_v3 }
  0xe8   :  { %v1006_v7 = vpop.f32.mrf.mxu1 }
  0xe9   :  { %v955_v8 = vpop.f32.mrf.mxu0 }
  0xea   :  { %v1007_v9 = vpop.f32.mrf.mxu1  ;;  %v956_v53 = vadd.f32 %v955_v8, %v954_v6  ;;  %v627_v6 = vadd.f32 %v1005_v49, %v953_v48 }
  0xeb   :  { %v957_v10 = vpop.f32.mrf.mxu0  ;;  %v1008_v54 = vadd.f32 %v1007_v9, %v1006_v7 }
  0xec   :  { %v1009_v11 = vpop.f32.mrf.mxu1 }
  0xed   :  { %v958_v12 = vpop.f32.mrf.mxu0  ;;  %v630_v8 = vadd.f32 %v1008_v54, %v956_v53 }
  0xee   :  { %v1010_v13 = vpop.f32.mrf.mxu1  ;;  %v959_v44 = vadd.f32 %v958_v12, %v957_v10 }
  0xef   :  { %v960_v14 = vpop.f32.mrf.mxu0  ;;  %v1011_v45 = vadd.f32 %v1010_v13, %v1009_v11 }
  0xf0   :  { %v1012_v15 = vpop.f32.mrf.mxu1 }
  0xf1   :  { %v961_v16 = vpop.f32.mrf.mxu0  ;;  %v635_v61 = vadd.f32 %v1011_v45, %v959_v44 }
  0xf2   :  { %v1013_v17 = vpop.f32.mrf.mxu1  ;;  %v962_v55 = vadd.f32 %v961_v16, %v960_v14 }
  0xf3   :  { %v963_v18 = vpop.f32.mrf.mxu0  ;;  %v1014_v56 = vadd.f32 %v1013_v17, %v1012_v15 }
  0xf4   :  { %v1015_v19 = vpop.f32.mrf.mxu1 }
  0xf5   :  { %v964_v20 = vpop.f32.mrf.mxu0  ;;  %v638_v7 = vadd.f32 %v1014_v56, %v962_v55 }
  0xf6   :  { %v1016_v21 = vpop.f32.mrf.mxu1  ;;  %v965_v58 = vadd.f32 %v964_v20, %v963_v18 }
  0xf7   :  { %v966_v22 = vpop.f32.mrf.mxu0  ;;  %v1017_v59 = vadd.f32 %v1016_v21, %v1015_v19 }
  0xf8   :  { %v1018_v23 = vpop.f32.mrf.mxu1 }
  0xf9   :  { %v967_v24 = vpop.f32.mrf.mxu0  ;;  %v643_v15 = vadd.f32 %v1017_v59, %v965_v58 }
  0xfa   :  { %v1019_v25 = vpop.f32.mrf.mxu1  ;;  %v968_v62 = vadd.f32 %v967_v24, %v966_v22 }
  0xfb   :  { %v969_v26 = vpop.f32.mrf.mxu0  ;;  %v1020_v63 = vadd.f32 %v1019_v25, %v1018_v23  ;;  %v1387_v23 = vld [vmem:[%s1421_s3] ss:$0 sm:$0xff] }
  0xfc   :  { %v1021_v27 = vpop.f32.mrf.mxu1 }
  0xfd   :  { %v970_v28 = vpop.f32.mrf.mxu0  ;;  %v646_v20 = vadd.f32 %v1020_v63, %v968_v62 }
  0xfe   :  { %v1022_v29 = vpop.f32.mrf.mxu1  ;;  %v971_v50 = vadd.f32 %v970_v28, %v969_v26 }
  0xff   :  { %v972_v30 = vpop.f32.mrf.mxu0  ;;  %v1023_v51 = vadd.f32 %v1022_v29, %v1021_v27 }
 0x100   :  { %v1024_v31 = vpop.f32.mrf.mxu1 }
 0x101   :  { %v973_v32 = vpop.f32.mrf.mxu0  ;;  %v651_v3 = vadd.f32 %v1023_v51, %v971_v50 }
 0x102   :  { %v1025_v33 = vpop.f32.mrf.mxu1  ;;  %v974_v0 = vadd.f32 %v973_v32, %v972_v30 }
 0x103   :  { %v975_v34 = vpop.f32.mrf.mxu0  ;;  %v1026_v1 = vadd.f32 %v1025_v33, %v1024_v31 }
 0x104   :  { %v1027_v35 = vpop.f32.mrf.mxu1 }
 0x105   :  { %v976_v36 = vpop.f32.mrf.mxu0  ;;  %v654_v19 = vadd.f32 %v1026_v1, %v974_v0 }
 0x106   :  { %v1028_v37 = vpop.f32.mrf.mxu1  ;;  %v977_v9 = vadd.f32 %v976_v36, %v975_v34 }
 0x107   :  { %v978_v38 = vpop.f32.mrf.mxu0  ;;  %v1029_v12 = vadd.f32 %v1028_v37, %v1027_v35 }
 0x108   :  { %v1030_v39 = vpop.f32.mrf.mxu1 }
 0x109   :  { %v979_v40 = vpop.f32.mrf.mxu0  ;;  %v659_v36 = vadd.f32 %v1029_v12, %v977_v9 }
 0x10a   :  { %v1031_v41 = vpop.f32.mrf.mxu1  ;;  %v980_v27 = vadd.f32 %v979_v40, %v978_v38 }
 0x10b   :  { %v981_v42 = vpop.f32.mrf.mxu0  ;;  %v1032_v28 = vadd.f32 %v1031_v41, %v1030_v39 }
 0x10c   :  { %v1033_v43 = vpop.f32.mrf.mxu1 }
 0x10d   :  { %v982_v46 = vpop.f32.mrf.mxu0  ;;  %v662_v50 = vadd.f32 %v1032_v28, %v980_v27 }
 0x10e   :  { %v1034_v47 = vpop.f32.mrf.mxu1  ;;  %v983_v21 = vadd.f32 %v982_v46, %v981_v42 }
 0x10f   :  { %v984_v52 = vpop.f32.mrf.mxu0  ;;  %v1035_v22 = vadd.f32 %v1034_v47, %v1033_v43 }
 0x110   :  { %v1036_v57 = vpop.f32.mrf.mxu1 }
 0x111   :  { %v985_v60 = vpop.f32.mrf.mxu0  ;;  %v667_v41 = vadd.f32 %v1035_v22, %v983_v21 }
 0x112   :  { %v1037_v10 = vpop.f32.mrf.mxu1  ;;  %v986_v32 = vadd.f32 %v985_v60, %v984_v52 }
 0x113   :  { %v1059_v11 = vpop.f32.mrf.mxu0  ;;  %v1038_v37 = vadd.f32 %v1037_v10, %v1036_v57 }
 0x114   :  { %v716_v4 = vadd.f32 %v1059_v11, %v635_v61  ;;  %v1063_v5 = vpop.f32.mrf.mxu1 }
 0x115   :  { %v732_v13 = vadd.f32 %v1063_v5, %v651_v3  ;;  %v707_v14 = vpop.f32.mrf.mxu0  ;;  %v670_v59 = vadd.f32 %v1038_v37, %v986_v32 }
 0x116   :  { %v763_v16 = vmul.f32 %v1381_v2, %v716_v4  ;;  %v708_v17 = vadd.f32 %v707_v14, %v627_v6  ;;  %v723_v18 = vpop.f32.mrf.mxu1 }
 0x117   :  { %v767_v24 = vmul.f32 %v1381_v2, %v732_v13  ;;  %v724_v25 = vadd.f32 %v723_v18, %v643_v15  ;;  %v1060_v26 = vpop.f32.mrf.mxu0 }
 0x118   :  { %v761_v29 = vmul.f32 %v1381_v2, %v708_v17  ;;  %v719_v30 = vadd.f32 %v1060_v26, %v638_v7  ;;  %v1064_v31 = vpop.f32.mrf.mxu1  ;;  %v782_v42 = vadd.f32 %v1387_v23, %v763_v16 }
 0x119   :  { %v765_v33 = vmul.f32 %v1381_v2, %v724_v25  ;;  %v735_v34 = vadd.f32 %v1064_v31, %v654_v19  ;;  %v710_v35 = vpop.f32.mrf.mxu0  ;;  %v786_v38 = vadd.f32 %v1387_v23, %v767_v24 }
 0x11a   :  { %v764_v43 = vmul.f32 %v1381_v2, %v719_v30  ;;  %v711_v44 = vadd.f32 %v710_v35, %v630_v8  ;;  %v726_v45 = vpop.f32.mrf.mxu1  ;;  %v780_v46 = vadd.f32 %v1387_v23, %v761_v29  ;;  %v794_v55 = vmax.f32 %v782_v42, 0.0 }
 0x11b   :  { %v768_v39 = vmul.f32 %v1381_v2, %v735_v34  ;;  %v727_v40 = vadd.f32 %v726_v45, %v646_v20  ;;  %v784_v51 = vadd.f32 %v1387_v23, %v765_v33  ;;  %v798_v60 = vmax.f32 %v786_v38, 0.0 }
 0x11c   :  { %v783_v47 = vadd.f32 %v1387_v23, %v764_v43  ;;  %v762_v48 = vmul.f32 %v1381_v2, %v711_v44  ;;  %v1067_v49 = vpop.f32.mrf.mxu1  ;;  %v792_v0 = vmax.f32 %v780_v46, 0.0 }
 0x11d   :  { %v787_v52 = vadd.f32 %v1387_v23, %v768_v39  ;;  %v766_v53 = vmul.f32 %v1381_v2, %v727_v40  ;;  %v748_v54 = vadd.f32 %v1067_v49, %v667_v41  ;;  %v796_v4 = vmax.f32 %v784_v51, 0.0 }
 0x11e   :  { %v795_v56 = vmax.f32 %v783_v47, 0.0  ;;  %v781_v57 = vadd.f32 %v1387_v23, %v762_v48  ;;  %v739_v58 = vpop.f32.mrf.mxu1 }
 0x11f   :  { %v799_v61 = vmax.f32 %v787_v52, 0.0  ;;  %v785_v62 = vadd.f32 %v1387_v23, %v766_v53  ;;  %v740_v63 = vadd.f32 %v739_v58, %v659_v36  ;;  %v771_v11 = vmul.f32 %v1381_v2, %v748_v54 }
 0x120   :  { %v805_v1 = vmax.f32 %v794_v55, %v795_v56  ;;  %v793_v10 = vmax.f32 %v781_v57, 0.0  ;;  %v1068_v3 = vpop.f32.mrf.mxu1 }
 0x121   :  { %v807_v5 = vmax.f32 %v798_v60, %v799_v61  ;;  %v797_v6 = vmax.f32 %v785_v62, 0.0  ;;  %v769_v7 = vmul.f32 %v1381_v2, %v740_v63  ;;  %v751_v9 = vadd.f32 %v1068_v3, %v670_v59 }
 0x122   :  { %811 = vst [vmem:[#allocation2 + $0x8] sm:$0xff] %v805_v1  ;;  %v804_v8 = vmax.f32 %v792_v0, %v793_v10  ;;  %v742_v12 = vpop.f32.mrf.mxu1  ;;  %v790_v15 = vadd.f32 %v1387_v23, %v771_v11 }
 0x123   :  { %813 = vst [vmem:[#allocation2 + $0x18] sm:$0xff] %v807_v5  ;;  %v806_v13 = vmax.f32 %v796_v4, %v797_v6  ;;  %v743_v14 = vadd.f32 %v742_v12, %v662_v50  ;;  %v772_v16 = vmul.f32 %v1381_v2, %v751_v9  ;;  %v788_v17 = vadd.f32 %v1387_v23, %v769_v7 }
 0x124   :  { %810 = vst [vmem:[#allocation2] sm:$0xff] %v804_v8  ;;  %v802_v21 = vmax.f32 %v790_v15, 0.0 }
 0x125   :  { %812 = vst [vmem:[#allocation2 + $0x10] sm:$0xff] %v806_v13  ;;  %v770_v18 = vmul.f32 %v1381_v2, %v743_v14  ;;  %v791_v19 = vadd.f32 %v1387_v23, %v772_v16  ;;  %v800_v24 = vmax.f32 %v788_v17, 0.0 }
 0x127   :  { %v789_v20 = vadd.f32 %v1387_v23, %v770_v18  ;;  %v803_v22 = vmax.f32 %v791_v19, 0.0 }
 0x129   :  { %v801_v25 = vmax.f32 %v789_v20, 0.0  ;;  %v809_v26 = vmax.f32 %v802_v21, %v803_v22 }
 0x12b   :  { %v816_v27 = vld [vmem:[#allocation2] ss:$2 sm:$0xff]  ;;  %v822_v28 = vld [vmem:[#allocation2 + $0x1] ss:$2 sm:$0xff]  ;;  %v808_v29 = vmax.f32 %v800_v24, %v801_v25  ;;  %815 = vst [vmem:[#allocation2 + $0x28] sm:$0xff] %v809_v26 }
 0x12c   :  { %v827_v30 = vmax.f32 %v816_v27, %v822_v28  ;;  %v818_v31 = vld [vmem:[#allocation2 + $0x10] ss:$2 sm:$0xff]  ;;  %v824_v32 = vld [vmem:[#allocation2 + $0x11] ss:$2 sm:$0xff] }
 0x12d   :  { %v828_v33 = vmax.f32 %v818_v31, %v824_v32  ;;  %814 = vst [vmem:[#allocation2 + $0x20] sm:$0xff] %v808_v29 }
 0x12f   :  { %v933_v34 = vpack.c.bf16 %v828_v33, %v827_v30 }
 0x131   :  { %934 = vst [vmem:[%s1422_s4] sm:$0xff] %v933_v34  }
 0x134   :  { %v820_v2 = vld [vmem:[#allocation2 + $0x20] ss:$2 sm:$0xff]  ;;  %v826_v23 = vld [vmem:[#allocation2 + $0x21] ss:$2 sm:$0xff] }
 0x135   :  { %v829_v35 = vmax.f32 %v820_v2, %v826_v23 }
 0x137   :  { %v929_v36 = vpack.c.bf16 %v829_v35, %v829_v35 }
 0x139   :  { %845 = vst [vmem:[%s1422_s4 + $0x8] sm:$0xf] %v929_v36 }

// kernel: conv_net_forward.7
= control target key start
LH: loop header
LB: loop body
LE: loop exit
PB: predicated region body
PF: predicated region fallthrough
CT: control target
= control target key end

     0   :  { %vm5998_vm0 = vmmov 0   ;;  %s7798_s1 = inlined_call_operand.vmem [shape: bf16[1152,640], index: 1, kind: input, shape index: {}]   ;;  %s7799_s0 = inlined_call_operand.vmem [shape: bf16[16,1152], index: 0, kind: input, shape index: {}]   ;;  %s7800_s4 = inlined_call_operand.vmem [shape: bf16[640,384], index: 4, kind: input, shape index: {}]   ;;  %s7801_s2 = inlined_call_operand.vmem [shape: f32[1,640], index: 2, kind: input, shape index: {}]   ;;  %s7802_s3 = inlined_call_operand.vmem [shape: f32[1,640], index: 3, kind: input, shape index: {}]   ;;  %s7803_s7 = inlined_call_operand.vmem [shape: bf16[384,128], index: 7, kind: input, shape index: {}]   ;;  %s7804_s5 = inlined_call_operand.vmem [shape: f32[1,384], index: 5, kind: input, shape index: {}]   ;;  %s7805_s6 = inlined_call_operand.vmem [shape: f32[1,384], index: 6, kind: input, shape index: {}]   ;;  %s7806_s8 = inlined_call_operand.vmem [shape: f32[1,128], index: 8, kind: input, shape index: {}]   ;;  %s7807_s9 = inlined_call_operand.vmem [shape: f32[1,128], index: 9, kind: input, shape index: {}]   ;;  %s7808_s10 = inlined_call_operand.vmem [shape: f32[16,128], index: 10, kind: output, shape index: {}]  }
   0x1   :  { %v5286_v0 = vld [vmem:[%s7798_s1 + $0x11c] ss:$20 sps:$4 sm:$0xff]   ;;  %v5290_v2 = vld [vmem:[%s7798_s1 + $0x118] ss:$20 sps:$4 sm:$0xff]   ;;  %v5292_v4 = vld [vmem:[%s7798_s1 + $0xf4] ss:$20 sps:$4 sm:$0xff]  }
   0x2   :  { %v5288_v1 = vld [vmem:[%s7798_s1 + $0x39c] ss:$20 sps:$4 sm:$0xff]   ;;  %2396 = vmatprep.subr.bf16.mxu0 %v5286_v0  ;;  %v5291_v3 = vld [vmem:[%s7798_s1 + $0x398] ss:$20 sps:$4 sm:$0xff]   ;;  %v5294_v5 = vld [vmem:[%s7798_s1 + $0x374] ss:$20 sps:$4 sm:$0xff]  }
   0x3   :  { %2439 = vmatprep.subr.bf16.mxu1 %v5288_v1  ;;  %2397 = vmatpush1.bf16.msra.mxu0 %v5290_v2  ;;  %v5296_v6 = vld [vmem:[%s7798_s1 + $0xf0] ss:$20 sps:$4 sm:$0xff]   ;;  %v5298_v8 = vld [vmem:[%s7798_s1 + $0xcc] ss:$20 sps:$4 sm:$0xff]   ;;  %v5302_v10 = vld [vmem:[%s7798_s1 + $0xc8] ss:$20 sps:$4 sm:$0xff]  }
   0x4   :  { %2440 = vmatpush1.bf16.msra.mxu1 %v5291_v3  ;;  %2398 = vmatprep.subr.bf16.mxu0 %v5292_v4  ;;  %v5297_v7 = vld [vmem:[%s7798_s1 + $0x370] ss:$20 sps:$4 sm:$0xff]   ;;  %v5300_v9 = vld [vmem:[%s7798_s1 + $0x34c] ss:$20 sps:$4 sm:$0xff]   ;;  %v5303_v11 = vld [vmem:[%s7798_s1 + $0x348] ss:$20 sps:$4 sm:$0xff]  }
   0x5   :  { %2441 = vmatprep.subr.bf16.mxu1 %v5294_v5  ;;  %v5304_v12 = vld [vmem:[%s7798_s1 + $0xa4] ss:$20 sps:$4 sm:$0xff]   ;;  %v5308_v14 = vld [vmem:[%s7798_s1 + $0xa0] ss:$20 sps:$4 sm:$0xff]   ;;  %v5310_v16 = vld [vmem:[%s7798_s1 + $0x7c] ss:$20 sps:$4 sm:$0xff]  }
   0x6   :  { %v5306_v13 = vld [vmem:[%s7798_s1 + $0x324] ss:$20 sps:$4 sm:$0xff]   ;;  %v5309_v15 = vld [vmem:[%s7798_s1 + $0x320] ss:$20 sps:$4 sm:$0xff]   ;;  %v5312_v17 = vld [vmem:[%s7798_s1 + $0x2fc] ss:$20 sps:$4 sm:$0xff]  }
   0x7   :  { %2399 = vmatpush1.bf16.msra.mxu0 %v5296_v6  ;;  %v5314_v18 = vld [vmem:[%s7798_s1 + $0x78] ss:$20 sps:$4 sm:$0xff]   ;;  %v5316_v20 = vld [vmem:[%s7798_s1 + $0x54] ss:$20 sps:$4 sm:$0xff]   ;;  %v5320_v22 = vld [vmem:[%s7798_s1 + $0x50] ss:$20 sps:$4 sm:$0xff]  }
   0x8   :  { %2442 = vmatpush1.bf16.msra.mxu1 %v5297_v7  ;;  %2400 = vmatprep.subr.bf16.mxu0 %v5298_v8  ;;  %v5315_v19 = vld [vmem:[%s7798_s1 + $0x2f8] ss:$20 sps:$4 sm:$0xff]   ;;  %v5318_v21 = vld [vmem:[%s7798_s1 + $0x2d4] ss:$20 sps:$4 sm:$0xff]   ;;  %v5321_v23 = vld [vmem:[%s7798_s1 + $0x2d0] ss:$20 sps:$4 sm:$0xff]  }
   0x9   :  { %2443 = vmatprep.subr.bf16.mxu1 %v5300_v9  ;;  %v5322_v24 = vld [vmem:[%s7798_s1 + $0x2c] ss:$20 sps:$4 sm:$0xff]   ;;  %v5326_v26 = vld [vmem:[%s7798_s1 + $0x28] ss:$20 sps:$4 sm:$0xff]   ;;  %v5328_v28 = vld [vmem:[%s7798_s1 + $0x4] ss:$20 sps:$4 sm:$0xff]  }
   0xa   :  { %v5324_v25 = vld [vmem:[%s7798_s1 + $0x2ac] ss:$20 sps:$4 sm:$0xff]   ;;  %v5327_v27 = vld [vmem:[%s7798_s1 + $0x2a8] ss:$20 sps:$4 sm:$0xff]   ;;  %v5330_v29 = vld [vmem:[%s7798_s1 + $0x284] ss:$20 sps:$4 sm:$0xff]  }
   0xb   :  { %2401 = vmatpush1.bf16.msra.mxu0 %v5302_v10  ;;  %v5332_v30 = vld [vmem:[%s7798_s1] ss:$20 sps:$4 sm:$0xff]   ;;  %v5334_v32 = vld [vmem:[%s7798_s1 + $0x25c] ss:$20 sps:$4 sm:$0xff]   ;;  %v5338_v34 = vld [vmem:[%s7798_s1 + $0x258] ss:$20 sps:$4 sm:$0xff]  }
   0xc   :  { %2444 = vmatpush1.bf16.msra.mxu1 %v5303_v11  ;;  %2402 = vmatprep.subr.bf16.mxu0 %v5304_v12  ;;  %v5333_v31 = vld [vmem:[%s7798_s1 + $0x280] ss:$20 sps:$4 sm:$0xff]   ;;  %v5336_v33 = vld [vmem:[%s7798_s1 + $0x4dc] ss:$20 sps:$4 sm:$0xff]   ;;  %v5339_v35 = vld [vmem:[%s7798_s1 + $0x4d8] ss:$20 sps:$4 sm:$0xff]  }
   0xd   :  { %2445 = vmatprep.subr.bf16.mxu1 %v5306_v13  ;;  %v5340_v36 = vld [vmem:[%s7798_s1 + $0x234] ss:$20 sps:$4 sm:$0xff]   ;;  %v5344_v38 = vld [vmem:[%s7798_s1 + $0x230] ss:$20 sps:$4 sm:$0xff]   ;;  %v5346_v40 = vld [vmem:[%s7798_s1 + $0x20c] ss:$20 sps:$4 sm:$0xff]  }
   0xe   :  { %v5342_v37 = vld [vmem:[%s7798_s1 + $0x4b4] ss:$20 sps:$4 sm:$0xff]   ;;  %v5345_v39 = vld [vmem:[%s7798_s1 + $0x4b0] ss:$20 sps:$4 sm:$0xff]   ;;  %v5348_v41 = vld [vmem:[%s7798_s1 + $0x48c] ss:$20 sps:$4 sm:$0xff]  }
   0xf   :  { %2403 = vmatpush1.bf16.msra.mxu0 %v5308_v14  ;;  %v5350_v42 = vld [vmem:[%s7798_s1 + $0x208] ss:$20 sps:$4 sm:$0xff]   ;;  %v5352_v44 = vld [vmem:[%s7798_s1 + $0x1e4] ss:$20 sps:$4 sm:$0xff]   ;;  %v5356_v46 = vld [vmem:[%s7798_s1 + $0x1e0] ss:$20 sps:$4 sm:$0xff]  }
  0x10   :  { %2446 = vmatpush1.bf16.msra.mxu1 %v5309_v15  ;;  %2404 = vmatprep.subr.bf16.mxu0 %v5310_v16  ;;  %v5351_v43 = vld [vmem:[%s7798_s1 + $0x488] ss:$20 sps:$4 sm:$0xff]   ;;  %v5354_v45 = vld [vmem:[%s7798_s1 + $0x464] ss:$20 sps:$4 sm:$0xff]   ;;  %v5357_v47 = vld [vmem:[%s7798_s1 + $0x460] ss:$20 sps:$4 sm:$0xff]  }
  0x11   :  { %2447 = vmatprep.subr.bf16.mxu1 %v5312_v17  ;;  %v6201_v48 = vld [vmem:[%s7799_s0 + $0x4] ss:$36 sps:$4 sm:$0xff]   ;;  %v5358_v49 = vld [vmem:[%s7798_s1 + $0x1bc] ss:$20 sps:$4 sm:$0xff]   ;;  %v5362_v52 = vld [vmem:[%s7798_s1 + $0x1b8] ss:$20 sps:$4 sm:$0xff]  }
  0x12   :  { %v6209_v50 = vld [vmem:[%s7799_s0 + $0xc] ss:$36 sps:$4 sm:$0xff]   ;;  %2428 = vmatprep.mubr.bf16.mxu0 %v6201_v48  ;;  %v5364_v54 = vld [vmem:[%s7798_s1 + $0x194] ss:$20 sps:$4 sm:$0xff]   ;;  %v5376_v62 = vld [vmem:[%s7798_s1 + $0x144] ss:$20 sps:$4 sm:$0xff]  }
  0x13   :  { %2405 = vmatpush1.bf16.msra.mxu0 %v5314_v18  ;;  %v5360_v51 = vld [vmem:[%s7798_s1 + $0x43c] ss:$20 sps:$4 sm:$0xff]   ;;  %2471 = vmatprep.mubr.bf16.mxu1 %v6209_v50  ;;  %v5363_v53 = vld [vmem:[%s7798_s1 + $0x438] ss:$20 sps:$4 sm:$0xff]   ;;  %v5366_v55 = vld [vmem:[%s7798_s1 + $0x414] ss:$20 sps:$4 sm:$0xff]  }
  0x14   :  { %2448 = vmatpush1.bf16.msra.mxu1 %v5315_v19  ;;  %2406 = vmatprep.subr.bf16.mxu0 %v5316_v20  ;;  %v5368_v56 = vld [vmem:[%s7798_s1 + $0x190] ss:$20 sps:$4 sm:$0xff]   ;;  %v5370_v58 = vld [vmem:[%s7798_s1 + $0x16c] ss:$20 sps:$4 sm:$0xff]   ;;  %v5374_v60 = vld [vmem:[%s7798_s1 + $0x168] ss:$20 sps:$4 sm:$0xff]  }
  0x15   :  { %2449 = vmatprep.subr.bf16.mxu1 %v5318_v21  ;;  %v5369_v57 = vld [vmem:[%s7798_s1 + $0x410] ss:$20 sps:$4 sm:$0xff]   ;;  %v5372_v59 = vld [vmem:[%s7798_s1 + $0x3ec] ss:$20 sps:$4 sm:$0xff]   ;;  %v5375_v61 = vld [vmem:[%s7798_s1 + $0x3e8] ss:$20 sps:$4 sm:$0xff]  }
  0x16   :  { %v5378_v63 = vld [vmem:[%s7798_s1 + $0x3c4] ss:$20 sps:$4 sm:$0xff]   ;;  %v5380_v0 = vld [vmem:[%s7798_s1 + $0x140] ss:$20 sps:$4 sm:$0xff]   ;;  %v5390_v2 = vld [vmem:[%s7798_s1 + $0x61c] ss:$20 sps:$4 sm:$0xff]  }
  0x17   :  { %2407 = vmatpush1.bf16.msra.mxu0 %v5320_v22  ;;  %v5381_v1 = vld [vmem:[%s7798_s1 + $0x3c0] ss:$20 sps:$4 sm:$0xff]   ;;  %v5393_v3 = vld [vmem:[%s7798_s1 + $0x89c] ss:$20 sps:$4 sm:$0xff]   ;;  %v5387_v5 = vld [vmem:[%s7799_s0 + $0x8] ss:$36 sps:$4 sm:$0xff]  }
  0x18   :  { %2450 = vmatpush1.bf16.msra.mxu1 %v5321_v23  ;;  %2408 = vmatprep.subr.bf16.mxu0 %v5322_v24  ;;  %v6267_v4 = vld [vmem:[%s7799_s0] ss:$36 sps:$4 sm:$0xff]   ;;  %v5388_v6 = vld [vmem:[%s7798_s1 + $0x618] ss:$20 sps:$4 sm:$0xff]   ;;  %v5396_v8 = vld [vmem:[%s7798_s1 + $0x5f4] ss:$20 sps:$4 sm:$0xff]  }
  0x19   :  { %2451 = vmatprep.subr.bf16.mxu1 %v5324_v25  ;;  %v5391_v7 = vld [vmem:[%s7798_s1 + $0x898] ss:$20 sps:$4 sm:$0xff]   ;;  %v5399_v9 = vld [vmem:[%s7798_s1 + $0x874] ss:$20 sps:$4 sm:$0xff]   ;;  %v5394_v10 = vld [vmem:[%s7798_s1 + $0x5f0] ss:$20 sps:$4 sm:$0xff]  }
  0x1a   :  { %v5397_v11 = vld [vmem:[%s7798_s1 + $0x870] ss:$20 sps:$4 sm:$0xff]   ;;  %v5402_v12 = vld [vmem:[%s7798_s1 + $0x5cc] ss:$20 sps:$4 sm:$0xff]   ;;  %v5400_v14 = vld [vmem:[%s7798_s1 + $0x5c8] ss:$20 sps:$4 sm:$0xff]  }
  0x1b   :  { %2409 = vmatpush1.bf16.msra.mxu0 %v5326_v26  ;;  %v5405_v13 = vld [vmem:[%s7798_s1 + $0x84c] ss:$20 sps:$4 sm:$0xff]   ;;  %v5403_v15 = vld [vmem:[%s7798_s1 + $0x848] ss:$20 sps:$4 sm:$0xff]   ;;  %v5408_v16 = vld [vmem:[%s7798_s1 + $0x5a4] ss:$20 sps:$4 sm:$0xff]  }
  0x1c   :  { %2452 = vmatpush1.bf16.msra.mxu1 %v5327_v27  ;;  %2410 = vmatprep.subr.bf16.mxu0 %v5328_v28  ;;  %v5411_v17 = vld [vmem:[%s7798_s1 + $0x824] ss:$20 sps:$4 sm:$0xff]   ;;  %v5406_v18 = vld [vmem:[%s7798_s1 + $0x5a0] ss:$20 sps:$4 sm:$0xff]   ;;  %v5414_v20 = vld [vmem:[%s7798_s1 + $0x57c] ss:$20 sps:$4 sm:$0xff]  }
  0x1d   :  { %2453 = vmatprep.subr.bf16.mxu1 %v5330_v29  ;;  %v5409_v19 = vld [vmem:[%s7798_s1 + $0x820] ss:$20 sps:$4 sm:$0xff]   ;;  %v5417_v21 = vld [vmem:[%s7798_s1 + $0x7fc] ss:$20 sps:$4 sm:$0xff]   ;;  %v5412_v22 = vld [vmem:[%s7798_s1 + $0x578] ss:$20 sps:$4 sm:$0xff]  }
  0x1e   :  { %v5415_v23 = vld [vmem:[%s7798_s1 + $0x7f8] ss:$20 sps:$4 sm:$0xff]   ;;  %v5420_v24 = vld [vmem:[%s7798_s1 + $0x554] ss:$20 sps:$4 sm:$0xff]   ;;  %v5418_v26 = vld [vmem:[%s7798_s1 + $0x550] ss:$20 sps:$4 sm:$0xff]  }
  0x1f   :  { %2411 = vmatpush1.bf16.msra.mxu0 %v5332_v30  ;;  %v5423_v25 = vld [vmem:[%s7798_s1 + $0x7d4] ss:$20 sps:$4 sm:$0xff]   ;;  %v5421_v27 = vld [vmem:[%s7798_s1 + $0x7d0] ss:$20 sps:$4 sm:$0xff]   ;;  %v5426_v28 = vld [vmem:[%s7798_s1 + $0x52c] ss:$20 sps:$4 sm:$0xff]  }
  0x20   :  { %2454 = vmatpush1.bf16.msra.mxu1 %v5333_v31  ;;  %2412 = vmatprep.subr.bf16.mxu0 %v5334_v32  ;;  %v5429_v29 = vld [vmem:[%s7798_s1 + $0x7ac] ss:$20 sps:$4 sm:$0xff]   ;;  %v5424_v30 = vld [vmem:[%s7798_s1 + $0x528] ss:$20 sps:$4 sm:$0xff]   ;;  %v5432_v32 = vld [vmem:[%s7798_s1 + $0x504] ss:$20 sps:$4 sm:$0xff]  }
  0x21   :  { %2455 = vmatprep.subr.bf16.mxu1 %v5336_v33  ;;  %v5427_v31 = vld [vmem:[%s7798_s1 + $0x7a8] ss:$20 sps:$4 sm:$0xff]   ;;  %v5435_v33 = vld [vmem:[%s7798_s1 + $0x784] ss:$20 sps:$4 sm:$0xff]  }
  0x23   :  { %2413 = vmatpush2.bf16.msra.mxu0 %v5338_v34  ;;  %v6360_v34 = vld [vmem:[%s7799_s0 + $0x14] ss:$36 sps:$4 sm:$0xff]  }
  0x24   :  { %2456 = vmatpush2.bf16.msra.mxu1 %v5339_v35  ;;  %2414 = vmatprep.subr.bf16.mxu0 %v5340_v36  ;;  %v5489_v35 = vld [vmem:[%s7799_s0 + $0x1c] ss:$36 sps:$4 sm:$0xff]  }
  0x25   :  { %2457 = vmatprep.subr.bf16.mxu1 %v5342_v37  ;;  %v5430_v36 = vld [vmem:[%s7798_s1 + $0x500] ss:$20 sps:$4 sm:$0xff]  }
  0x26   :  { %v5433_v37 = vld [vmem:[%s7798_s1 + $0x780] ss:$20 sps:$4 sm:$0xff]  }
  0x27   :  { %2415 = vmatpush2.bf16.msra.mxu0 %v5344_v38  ;;  %v5438_v38 = vld [vmem:[%s7798_s1 + $0x75c] ss:$20 sps:$4 sm:$0xff]  }
  0x28   :  { %2458 = vmatpush2.bf16.msra.mxu1 %v5345_v39  ;;  %2416 = vmatprep.subr.bf16.mxu0 %v5346_v40  ;;  %v5441_v39 = vld [vmem:[%s7798_s1 + $0x9dc] ss:$20 sps:$4 sm:$0xff]   ;;  %v5436_v40 = vld [vmem:[%s7798_s1 + $0x758] ss:$20 sps:$4 sm:$0xff]  }
  0x29   :  { %2459 = vmatprep.subr.bf16.mxu1 %v5348_v41  ;;  %v5439_v41 = vld [vmem:[%s7798_s1 + $0x9d8] ss:$20 sps:$4 sm:$0xff]  }
  0x2b   :  { %2417 = vmatpush2.bf16.msra.mxu0 %v5350_v42  ;;  %v5444_v42 = vld [vmem:[%s7798_s1 + $0x734] ss:$20 sps:$4 sm:$0xff]  }
  0x2c   :  { %2460 = vmatpush2.bf16.msra.mxu1 %v5351_v43  ;;  %2418 = vmatprep.subr.bf16.mxu0 %v5352_v44  ;;  %v5447_v43 = vld [vmem:[%s7798_s1 + $0x9b4] ss:$20 sps:$4 sm:$0xff]   ;;  %v5442_v44 = vld [vmem:[%s7798_s1 + $0x730] ss:$20 sps:$4 sm:$0xff]  }
  0x2d   :  { %2461 = vmatprep.subr.bf16.mxu1 %v5354_v45  ;;  %v5445_v45 = vld [vmem:[%s7798_s1 + $0x9b0] ss:$20 sps:$4 sm:$0xff]  }
  0x2f   :  { %2419 = vmatpush2.bf16.msra.mxu0 %v5356_v46  ;;  %v5450_v46 = vld [vmem:[%s7798_s1 + $0x70c] ss:$20 sps:$4 sm:$0xff]  }
  0x30   :  { %2462 = vmatpush2.bf16.msra.mxu1 %v5357_v47  ;;  %2420 = vmatprep.subr.bf16.mxu0 %v5358_v49  ;;  %v5453_v47 = vld [vmem:[%s7798_s1 + $0x98c] ss:$20 sps:$4 sm:$0xff]   ;;  %v5448_v49 = vld [vmem:[%s7798_s1 + $0x708] ss:$20 sps:$4 sm:$0xff]  }
  0x31   :  { %2463 = vmatprep.subr.bf16.mxu1 %v5360_v51  ;;  %v5451_v51 = vld [vmem:[%s7798_s1 + $0x988] ss:$20 sps:$4 sm:$0xff]  }
  0x33   :  { %2421 = vmatpush2.bf16.msra.mxu0 %v5362_v52  ;;  %v5456_v52 = vld [vmem:[%s7798_s1 + $0x6e4] ss:$20 sps:$4 sm:$0xff]  }
  0x34   :  { %2464 = vmatpush2.bf16.msra.mxu1 %v5363_v53  ;;  %2422 = vmatprep.subr.bf16.mxu0 %v5364_v54  ;;  %v5459_v53 = vld [vmem:[%s7798_s1 + $0x964] ss:$20 sps:$4 sm:$0xff]   ;;  %v5454_v54 = vld [vmem:[%s7798_s1 + $0x6e0] ss:$20 sps:$4 sm:$0xff]  }
  0x35   :  { %2465 = vmatprep.subr.bf16.mxu1 %v5366_v55  ;;  %v5457_v55 = vld [vmem:[%s7798_s1 + $0x960] ss:$20 sps:$4 sm:$0xff]  }
  0x37   :  { %2423 = vmatpush2.bf16.msra.mxu0 %v5368_v56  ;;  %v5462_v56 = vld [vmem:[%s7798_s1 + $0x6bc] ss:$20 sps:$4 sm:$0xff]  }
  0x38   :  { %2466 = vmatpush2.bf16.msra.mxu1 %v5369_v57  ;;  %2424 = vmatprep.subr.bf16.mxu0 %v5370_v58  ;;  %v5465_v57 = vld [vmem:[%s7798_s1 + $0x93c] ss:$20 sps:$4 sm:$0xff]   ;;  %v5460_v58 = vld [vmem:[%s7798_s1 + $0x6b8] ss:$20 sps:$4 sm:$0xff]  }
  0x39   :  { %2467 = vmatprep.subr.bf16.mxu1 %v5372_v59  ;;  %v5463_v59 = vld [vmem:[%s7798_s1 + $0x938] ss:$20 sps:$4 sm:$0xff]  }
  0x3b   :  { %2425 = vmatpush2.bf16.msra.mxu0 %v5374_v60  ;;  %v5468_v60 = vld [vmem:[%s7798_s1 + $0x694] ss:$20 sps:$4 sm:$0xff]  }
  0x3c   :  { %2468 = vmatpush2.bf16.msra.mxu1 %v5375_v61  ;;  %2426 = vmatprep.subr.bf16.mxu0 %v5376_v62  ;;  %v5471_v61 = vld [vmem:[%s7798_s1 + $0x914] ss:$20 sps:$4 sm:$0xff]   ;;  %v5466_v62 = vld [vmem:[%s7798_s1 + $0x690] ss:$20 sps:$4 sm:$0xff]  }
  0x3d   :  { %2469 = vmatprep.subr.bf16.mxu1 %v5378_v63  ;;  %v5469_v63 = vld [vmem:[%s7798_s1 + $0x910] ss:$20 sps:$4 sm:$0xff]  }
  0x3f   :  { %2427 = vmatpush2.bf16.msra.mxu0 %v5380_v0  ;;  %v5474_v0 = vld [vmem:[%s7798_s1 + $0x66c] ss:$20 sps:$4 sm:$0xff]  }
  0x40   :  { %2470 = vmatpush2.bf16.msra.mxu1 %v5381_v1  ;;  %2482 = vmatprep.subr.bf16.mxu0 %v5390_v2  ;;  %v5477_v1 = vld [vmem:[%s7798_s1 + $0x8ec] ss:$20 sps:$4 sm:$0xff]   ;;  %v5472_v2 = vld [vmem:[%s7798_s1 + $0x668] ss:$20 sps:$4 sm:$0xff]  }
  0x41   :  { %2525 = vmatprep.subr.bf16.mxu1 %v5393_v3  ;;  %v5475_v3 = vld [vmem:[%s7798_s1 + $0x8e8] ss:$20 sps:$4 sm:$0xff]  }
  0x42   :  { %2429 = vmatmul.mubr.bf16.vlgmr.msra.gmra.mxu0 %v6267_v4 }
  0x43   :  { %2472 = vmatmul.mubr.bf16.vlgmr.msra.gmra.mxu1 %v5387_v5  ;;  %2483 = vmatpush1.bf16.msra.mxu0 %v5388_v6  ;;  %v5480_v5 = vld [vmem:[%s7798_s1 + $0x644] ss:$20 sps:$4 sm:$0xff]  }
  0x44   :  { %2526 = vmatpush1.bf16.msra.mxu1 %v5391_v7  ;;  %2484 = vmatprep.subr.bf16.mxu0 %v5396_v8  ;;  %v5483_v6 = vld [vmem:[%s7798_s1 + $0x8c4] ss:$20 sps:$4 sm:$0xff]   ;;  %v5478_v7 = vld [vmem:[%s7798_s1 + $0x640] ss:$20 sps:$4 sm:$0xff]  }
  0x45   :  { %2527 = vmatprep.subr.bf16.mxu1 %v5399_v9  ;;  %2514 = vmatprep.mubr.bf16.mxu0 %v6360_v34  ;;  %v5481_v8 = vld [vmem:[%s7798_s1 + $0x8c0] ss:$20 sps:$4 sm:$0xff]   ;;  %v5492_v9 = vld [vmem:[%s7798_s1 + $0xb1c] ss:$20 sps:$4 sm:$0xff]  }
  0x46   :  { %2557 = vmatprep.mubr.bf16.mxu1 %v5489_v35  ;;  %v5523_v35 = vld [vmem:[%s7798_s1 + $0x58] ss:$20 sps:$4 sm:$0xff]  }
  0x47   :  { %2485 = vmatpush1.bf16.msra.mxu0 %v5394_v10  ;;  %v5495_v10 = vld [vmem:[%s7798_s1 + $0x124] ss:$20 sps:$4 sm:$0xff]  }
  0x48   :  { %2528 = vmatpush1.bf16.msra.mxu1 %v5397_v11  ;;  %2486 = vmatprep.subr.bf16.mxu0 %v5402_v12  ;;  %v6477_v11 = vld [vmem:[%s7799_s0 + $0x10] ss:$36 sps:$4 sm:$0xff]   ;;  %v5487_v12 = vld [vmem:[%s7799_s0 + $0x18] ss:$36 sps:$4 sm:$0xff]  }
  0x49   :  { %2529 = vmatprep.subr.bf16.mxu1 %v5405_v13  ;;  %v5490_v13 = vld [vmem:[%s7798_s1 + $0xb18] ss:$20 sps:$4 sm:$0xff]  }
  0x4b   :  { %2487 = vmatpush1.bf16.msra.mxu0 %v5400_v14  ;;  %v5493_v14 = vld [vmem:[%s7798_s1 + $0x120] ss:$20 sps:$4 sm:$0xff]  }
  0x4c   :  { %2530 = vmatpush1.bf16.msra.mxu1 %v5403_v15  ;;  %2488 = vmatprep.subr.bf16.mxu0 %v5408_v16  ;;  %v5498_v15 = vld [vmem:[%s7798_s1 + $0xaf4] ss:$20 sps:$4 sm:$0xff]   ;;  %v5501_v16 = vld [vmem:[%s7798_s1 + $0xfc] ss:$20 sps:$4 sm:$0xff]  }
  0x4d   :  { %2531 = vmatprep.subr.bf16.mxu1 %v5411_v17  ;;  %v5496_v17 = vld [vmem:[%s7798_s1 + $0xaf0] ss:$20 sps:$4 sm:$0xff]  }
  0x4f   :  { %2489 = vmatpush1.bf16.msra.mxu0 %v5406_v18  ;;  %v5499_v18 = vld [vmem:[%s7798_s1 + $0xf8] ss:$20 sps:$4 sm:$0xff]  }
  0x50   :  { %2532 = vmatpush1.bf16.msra.mxu1 %v5409_v19  ;;  %2490 = vmatprep.subr.bf16.mxu0 %v5414_v20  ;;  %v5504_v19 = vld [vmem:[%s7798_s1 + $0xacc] ss:$20 sps:$4 sm:$0xff]   ;;  %v5507_v20 = vld [vmem:[%s7798_s1 + $0xd4] ss:$20 sps:$4 sm:$0xff]  }
  0x51   :  { %2533 = vmatprep.subr.bf16.mxu1 %v5417_v21  ;;  %v5996_v21 = vmov 0  }
  0x53   :  { %2491 = vmatpush1.bf16.msra.mxu0 %v5412_v22  ;;  %v5502_v22 = vld [vmem:[%s7798_s1 + $0xac8] ss:$20 sps:$4 sm:$0xff]  }
  0x54   :  { %2534 = vmatpush1.bf16.msra.mxu1 %v5415_v23  ;;  %2492 = vmatprep.subr.bf16.mxu0 %v5420_v24  ;;  %v5505_v23 = vld [vmem:[%s7798_s1 + $0xd0] ss:$20 sps:$4 sm:$0xff]  }
  0x55   :  { %2535 = vmatprep.subr.bf16.mxu1 %v5423_v25  ;;  %v5510_v24 = vld [vmem:[%s7798_s1 + $0xaa4] ss:$20 sps:$4 sm:$0xff]   ;;  %v5508_v25 = vld [vmem:[%s7798_s1 + $0xaa0] ss:$20 sps:$4 sm:$0xff]  }
  0x57   :  { %2493 = vmatpush1.bf16.msra.mxu0 %v5418_v26  ;;  %v5511_v26 = vld [vmem:[%s7798_s1 + $0xa8] ss:$20 sps:$4 sm:$0xff]  }
  0x58   :  { %2536 = vmatpush1.bf16.msra.mxu1 %v5421_v27  ;;  %2494 = vmatprep.subr.bf16.mxu0 %v5426_v28  ;;  %v5516_v27 = vld [vmem:[%s7798_s1 + $0xa7c] ss:$20 sps:$4 sm:$0xff]   ;;  %v5519_v28 = vld [vmem:[%s7798_s1 + $0x84] ss:$20 sps:$4 sm:$0xff]  }
  0x59   :  { %2537 = vmatprep.subr.bf16.mxu1 %v5429_v29  ;;  %v5514_v29 = vld [vmem:[%s7798_s1 + $0xa78] ss:$20 sps:$4 sm:$0xff]  }
  0x5b   :  { %2495 = vmatpush1.bf16.msra.mxu0 %v5424_v30  ;;  %v5517_v30 = vld [vmem:[%s7798_s1 + $0x80] ss:$20 sps:$4 sm:$0xff]  }
  0x5c   :  { %2538 = vmatpush1.bf16.msra.mxu1 %v5427_v31  ;;  %2496 = vmatprep.subr.bf16.mxu0 %v5432_v32  ;;  %v5522_v31 = vld [vmem:[%s7798_s1 + $0xa54] ss:$20 sps:$4 sm:$0xff]   ;;  %v5525_v32 = vld [vmem:[%s7798_s1 + $0x5c] ss:$20 sps:$4 sm:$0xff]  }
  0x5d   :  { %2539 = vmatprep.subr.bf16.mxu1 %v5435_v33  ;;  %v5520_v33 = vld [vmem:[%s7798_s1 + $0xa50] ss:$20 sps:$4 sm:$0xff]  }
  0x5f   :  { %2497 = vmatpush1.bf16.msra.mxu0 %v5430_v36  ;;  %v5528_v36 = vld [vmem:[%s7798_s1 + $0xa2c] ss:$20 sps:$4 sm:$0xff]  }
  0x60   :  { %2540 = vmatpush1.bf16.msra.mxu1 %v5433_v37  ;;  %2498 = vmatprep.subr.bf16.mxu0 %v5438_v38  ;;  %v5531_v37 = vld [vmem:[%s7798_s1 + $0x34] ss:$20 sps:$4 sm:$0xff]  }
  0x61   :  { %2541 = vmatprep.subr.bf16.mxu1 %v5441_v39  ;;  %v5526_v38 = vld [vmem:[%s7798_s1 + $0xa28] ss:$20 sps:$4 sm:$0xff]   ;;  %v5529_v39 = vld [vmem:[%s7798_s1 + $0x30] ss:$20 sps:$4 sm:$0xff]  }
  0x63   :  { %2499 = vmatpush2.bf16.msra.mxu0 %v5436_v40  ;;  %v5534_v40 = vld [vmem:[%s7798_s1 + $0xa04] ss:$20 sps:$4 sm:$0xff]  }
  0x64   :  { %2542 = vmatpush2.bf16.msra.mxu1 %v5439_v41  ;;  %2500 = vmatprep.subr.bf16.mxu0 %v5444_v42  ;;  %v5537_v41 = vld [vmem:[%s7798_s1 + $0xc] ss:$20 sps:$4 sm:$0xff]  }
  0x65   :  { %2543 = vmatprep.subr.bf16.mxu1 %v5447_v43  ;;  %v5532_v42 = vld [vmem:[%s7798_s1 + $0xa00] ss:$20 sps:$4 sm:$0xff]   ;;  %v5535_v43 = vld [vmem:[%s7798_s1 + $0x8] ss:$20 sps:$4 sm:$0xff]  }
  0x67   :  { %2501 = vmatpush2.bf16.msra.mxu0 %v5442_v44  ;;  %v5541_v44 = vld [vmem:[%s7798_s1 + $0x264] ss:$20 sps:$4 sm:$0xff]  }
  0x68   :  { %2544 = vmatpush2.bf16.msra.mxu1 %v5445_v45  ;;  %2502 = vmatprep.subr.bf16.mxu0 %v5450_v46  ;;  %v5544_v45 = vld [vmem:[%s7798_s1 + $0x3a4] ss:$20 sps:$4 sm:$0xff]  }
  0x69   :  { %2545 = vmatprep.subr.bf16.mxu1 %v5453_v47  ;;  %v6584_v46 = vld [vmem:[%s7799_s0 + $0x20] ss:$36 sps:$4 sm:$0xff]  }
  0x6a   :  { %v5539_v47 = vld [vmem:[%s7798_s1 + $0x260] ss:$20 sps:$4 sm:$0xff]  }
  0x6b   :  { %2503 = vmatpush2.bf16.msra.mxu0 %v5448_v49  ;;  %v5542_v49 = vld [vmem:[%s7798_s1 + $0x3a0] ss:$20 sps:$4 sm:$0xff]  }
  0x6c   :  { %2546 = vmatpush2.bf16.msra.mxu1 %v5451_v51  ;;  %2504 = vmatprep.subr.bf16.mxu0 %v5456_v52  ;;  %v5547_v51 = vld [vmem:[%s7798_s1 + $0x23c] ss:$20 sps:$4 sm:$0xff]  }
  0x6d   :  { %2547 = vmatprep.subr.bf16.mxu1 %v5459_v53  ;;  %v5550_v52 = vld [vmem:[%s7798_s1 + $0x37c] ss:$20 sps:$4 sm:$0xff]   ;;  %v5545_v53 = vld [vmem:[%s7798_s1 + $0x238] ss:$20 sps:$4 sm:$0xff]  }
  0x6f   :  { %2505 = vmatpush2.bf16.msra.mxu0 %v5454_v54  ;;  %v5548_v54 = vld [vmem:[%s7798_s1 + $0x378] ss:$20 sps:$4 sm:$0xff]  }
  0x70   :  { %2548 = vmatpush2.bf16.msra.mxu1 %v5457_v55  ;;  %2506 = vmatprep.subr.bf16.mxu0 %v5462_v56  ;;  %v5553_v55 = vld [vmem:[%s7798_s1 + $0x214] ss:$20 sps:$4 sm:$0xff]  }
  0x71   :  { %2549 = vmatprep.subr.bf16.mxu1 %v5465_v57  ;;  %v5556_v56 = vld [vmem:[%s7798_s1 + $0x354] ss:$20 sps:$4 sm:$0xff]   ;;  %v5551_v57 = vld [vmem:[%s7798_s1 + $0x210] ss:$20 sps:$4 sm:$0xff]  }
  0x73   :  { %2507 = vmatpush2.bf16.msra.mxu0 %v5460_v58  ;;  %v5554_v58 = vld [vmem:[%s7798_s1 + $0x350] ss:$20 sps:$4 sm:$0xff]  }
  0x74   :  { %2550 = vmatpush2.bf16.msra.mxu1 %v5463_v59  ;;  %2508 = vmatprep.subr.bf16.mxu0 %v5468_v60  ;;  %v5559_v59 = vld [vmem:[%s7798_s1 + $0x1ec] ss:$20 sps:$4 sm:$0xff]   ;;  %v5557_v60 = vld [vmem:[%s7798_s1 + $0x1e8] ss:$20 sps:$4 sm:$0xff]  }
  0x75   :  { %2551 = vmatprep.subr.bf16.mxu1 %v5471_v61  ;;  %v5560_v61 = vld [vmem:[%s7798_s1 + $0x328] ss:$20 sps:$4 sm:$0xff]  }
  0x77   :  { %2509 = vmatpush2.bf16.msra.mxu0 %v5466_v62  ;;  %v5565_v62 = vld [vmem:[%s7798_s1 + $0x1c4] ss:$20 sps:$4 sm:$0xff]  }
  0x78   :  { %2552 = vmatpush2.bf16.msra.mxu1 %v5469_v63  ;;  %2510 = vmatprep.subr.bf16.mxu0 %v5474_v0  ;;  %v5568_v63 = vld [vmem:[%s7798_s1 + $0x304] ss:$20 sps:$4 sm:$0xff]   ;;  %v5563_v0 = vld [vmem:[%s7798_s1 + $0x1c0] ss:$20 sps:$4 sm:$0xff]  }
  0x79   :  { %2553 = vmatprep.subr.bf16.mxu1 %v5477_v1  ;;  %v5566_v1 = vld [vmem:[%s7798_s1 + $0x300] ss:$20 sps:$4 sm:$0xff]  }
  0x7b   :  { %2511 = vmatpush2.bf16.msra.mxu0 %v5472_v2  ;;  %v5571_v2 = vld [vmem:[%s7798_s1 + $0x19c] ss:$20 sps:$4 sm:$0xff]  }
  0x7c   :  { %2554 = vmatpush2.bf16.msra.mxu1 %v5475_v3  ;;  %2512 = vmatprep.subr.bf16.mxu0 %v5480_v5  ;;  %v5574_v3 = vld [vmem:[%s7798_s1 + $0x2dc] ss:$20 sps:$4 sm:$0xff]   ;;  %v5569_v5 = vld [vmem:[%s7798_s1 + $0x198] ss:$20 sps:$4 sm:$0xff]  }
  0x7d   :  { %2555 = vmatprep.subr.bf16.mxu1 %v5483_v6  ;;  %v5572_v6 = vld [vmem:[%s7798_s1 + $0x2d8] ss:$20 sps:$4 sm:$0xff]  }
  0x7f   :  { %2513 = vmatpush2.bf16.msra.mxu0 %v5478_v7  ;;  %v5577_v7 = vld [vmem:[%s7798_s1 + $0x174] ss:$20 sps:$4 sm:$0xff]  }
  0x80   :  { %2556 = vmatpush2.bf16.msra.mxu1 %v5481_v8  ;;  %2568 = vmatprep.subr.bf16.mxu0 %v5492_v9  ;;  %v5580_v8 = vld [vmem:[%s7798_s1 + $0x2b4] ss:$20 sps:$4 sm:$0xff]   ;;  %v5575_v9 = vld [vmem:[%s7798_s1 + $0x170] ss:$20 sps:$4 sm:$0xff]  }
  0x81   :  { %2611 = vmatprep.subr.bf16.mxu1 %v5495_v10  ;;  %v5578_v10 = vld [vmem:[%s7798_s1 + $0x2b0] ss:$20 sps:$4 sm:$0xff]  }
  0x82   :  { %2515 = vmatmul.mubr.bf16.vlgmr.msra.gmra.mxu0 %v6477_v11 }
  0x83   :  { %2558 = vmatmul.mubr.bf16.vlgmr.msra.gmra.mxu1 %v5487_v12  ;;  %2569 = vmatpush1.bf16.msra.mxu0 %v5490_v13  ;;  %v5583_v12 = vld [vmem:[%s7798_s1 + $0x14c] ss:$20 sps:$4 sm:$0xff]  }
  0x84   :  { %2612 = vmatpush1.bf16.msra.mxu1 %v5493_v14  ;;  %2570 = vmatprep.subr.bf16.mxu0 %v5498_v15  ;;  %v5586_v13 = vld [vmem:[%s7798_s1 + $0x28c] ss:$20 sps:$4 sm:$0xff]   ;;  %v5581_v14 = vld [vmem:[%s7798_s1 + $0x148] ss:$20 sps:$4 sm:$0xff]  }
  0x85   :  { %2613 = vmatprep.subr.bf16.mxu1 %v5501_v16  ;;  %2600 = vmatprep.mubr.bf16.mxu0 %v5996_v21  ;;  %v5584_v15 = vld [vmem:[%s7798_s1 + $0x288] ss:$20 sps:$4 sm:$0xff]   ;;  %v5589_v16 = vld [vmem:[%s7798_s1 + $0x4e4] ss:$20 sps:$4 sm:$0xff]  }
  0x86   :  { %2643 = vmatprep.mubr.bf16.mxu1 %v6201_v48  ;;  %v5513_v48 = vld [vmem:[%s7798_s1 + $0xac] ss:$20 sps:$4 sm:$0xff]  }
  0x87   :  { %2571 = vmatpush1.bf16.msra.mxu0 %v5496_v17  ;;  %v5592_v17 = vld [vmem:[%s7798_s1 + $0x624] ss:$20 sps:$4 sm:$0xff]  }
  0x88   :  { %2614 = vmatpush1.bf16.msra.mxu1 %v5499_v18  ;;  %2572 = vmatprep.subr.bf16.mxu0 %v5504_v19  ;;  %v5587_v18 = vld [vmem:[%s7798_s1 + $0x4e0] ss:$20 sps:$4 sm:$0xff]  }
  0x89   :  { %2615 = vmatprep.subr.bf16.mxu1 %v5507_v20  ;;  %v5590_v19 = vld [vmem:[%s7798_s1 + $0x620] ss:$20 sps:$4 sm:$0xff]   ;;  %v5595_v20 = vld [vmem:[%s7798_s1 + $0x4bc] ss:$20 sps:$4 sm:$0xff]  }
  0x8b   :  { %2573 = vmatpush1.bf16.msra.mxu0 %v5502_v22  ;;  %v5598_v22 = vld [vmem:[%s7798_s1 + $0x5fc] ss:$20 sps:$4 sm:$0xff]  }
  0x8c   :  { %2616 = vmatpush1.bf16.msra.mxu1 %v5505_v23  ;;  %2574 = vmatprep.subr.bf16.mxu0 %v5510_v24  ;;  %v5593_v23 = vld [vmem:[%s7798_s1 + $0x4b8] ss:$20 sps:$4 sm:$0xff]  }
  0x8d   :  { %2617 = vmatprep.subr.bf16.mxu1 %v5513_v48  ;;  %v5596_v24 = vld [vmem:[%s7798_s1 + $0x5f8] ss:$20 sps:$4 sm:$0xff]   ;;  %v5601_v48 = vld [vmem:[%s7798_s1 + $0x494] ss:$20 sps:$4 sm:$0xff]  }
  0x8f   :  { %2575 = vmatpush1.bf16.msra.mxu0 %v5508_v25  ;;  %v5599_v25 = vld [vmem:[%s7798_s1 + $0x490] ss:$20 sps:$4 sm:$0xff]  }
  0x90   :  { %2618 = vmatpush1.bf16.msra.mxu1 %v5511_v26  ;;  %2576 = vmatprep.subr.bf16.mxu0 %v5516_v27  ;;  %v5602_v26 = vld [vmem:[%s7798_s1 + $0x5d0] ss:$20 sps:$4 sm:$0xff]   ;;  %v5607_v27 = vld [vmem:[%s7798_s1 + $0x46c] ss:$20 sps:$4 sm:$0xff]  }
  0x91   :  { %2619 = vmatprep.subr.bf16.mxu1 %v5519_v28  ;;  %v5610_v28 = vld [vmem:[%s7798_s1 + $0x5ac] ss:$20 sps:$4 sm:$0xff]  }
  0x93   :  { %2577 = vmatpush1.bf16.msra.mxu0 %v5514_v29  ;;  %v5608_v29 = vld [vmem:[%s7798_s1 + $0x5a8] ss:$20 sps:$4 sm:$0xff]  }
  0x94   :  { %2620 = vmatpush1.bf16.msra.mxu1 %v5517_v30  ;;  %2578 = vmatprep.subr.bf16.mxu0 %v5522_v31  ;;  %v5613_v30 = vld [vmem:[%s7798_s1 + $0x444] ss:$20 sps:$4 sm:$0xff]  }
  0x95   :  { %2621 = vmatprep.subr.bf16.mxu1 %v5525_v32  ;;  %v5616_v31 = vld [vmem:[%s7798_s1 + $0x584] ss:$20 sps:$4 sm:$0xff]   ;;  %v5611_v32 = vld [vmem:[%s7798_s1 + $0x440] ss:$20 sps:$4 sm:$0xff]  }
  0x97   :  { %2579 = vmatpush1.bf16.msra.mxu0 %v5520_v33  ;;  %v5614_v33 = vld [vmem:[%s7798_s1 + $0x580] ss:$20 sps:$4 sm:$0xff]  }
  0x98   :  { %2622 = vmatpush1.bf16.msra.mxu1 %v5523_v35  ;;  %2580 = vmatprep.subr.bf16.mxu0 %v5528_v36  ;;  %v5619_v35 = vld [vmem:[%s7798_s1 + $0x41c] ss:$20 sps:$4 sm:$0xff]  }
  0x99   :  { %2623 = vmatprep.subr.bf16.mxu1 %v5531_v37  ;;  %v5622_v36 = vld [vmem:[%s7798_s1 + $0x55c] ss:$20 sps:$4 sm:$0xff]   ;;  %v5617_v37 = vld [vmem:[%s7798_s1 + $0x418] ss:$20 sps:$4 sm:$0xff]  }
  0x9b   :  { %2581 = vmatpush1.bf16.msra.mxu0 %v5526_v38  ;;  %v5620_v38 = vld [vmem:[%s7798_s1 + $0x558] ss:$20 sps:$4 sm:$0xff]  }
  0x9c   :  { %2624 = vmatpush1.bf16.msra.mxu1 %v5529_v39  ;;  %2582 = vmatprep.subr.bf16.mxu0 %v5534_v40  ;;  %v5625_v39 = vld [vmem:[%s7798_s1 + $0x3f4] ss:$20 sps:$4 sm:$0xff]  }
  0x9d   :  { %2625 = vmatprep.subr.bf16.mxu1 %v5537_v41  ;;  %v5628_v40 = vld [vmem:[%s7798_s1 + $0x534] ss:$20 sps:$4 sm:$0xff]   ;;  %v5623_v41 = vld [vmem:[%s7798_s1 + $0x3f0] ss:$20 sps:$4 sm:$0xff]  }
  0x9f   :  { %2583 = vmatpush1.bf16.msra.mxu0 %v5532_v42  ;;  %v5626_v42 = vld [vmem:[%s7798_s1 + $0x530] ss:$20 sps:$4 sm:$0xff]  }
  0xa0   :  { %2626 = vmatpush1.bf16.msra.mxu1 %v5535_v43  ;;  %2654 = vmatprep.subr.bf16.mxu0 %v5544_v45  ;;  %v5631_v43 = vld [vmem:[%s7798_s1 + $0x3cc] ss:$20 sps:$4 sm:$0xff]   ;;  %v5629_v45 = vld [vmem:[%s7798_s1 + $0x3c8] ss:$20 sps:$4 sm:$0xff]  }
  0xa1   :  { %2627 = vmatprep.subr.bf16.mxu1 %v5541_v44  ;;  %v5634_v44 = vld [vmem:[%s7798_s1 + $0x50c] ss:$20 sps:$4 sm:$0xff]  }
  0xa2   :  { %2601 = vmatmul.mubr.bf16.vlgmr.msra.gmra.mxu0 %v6584_v46 }
  0xa3   :  { %2655 = vmatpush1.bf16.msra.mxu0 %v5542_v49  ;;  %2686 = vmatprep.mubr.bf16.mxu0 %v6209_v50  ;;  %v5562_v50 = vld [vmem:[%s7798_s1 + $0x32c] ss:$20 sps:$4 sm:$0xff]   ;;  %v5637_v49 = vld [vmem:[%s7798_s1 + $0x764] ss:$20 sps:$4 sm:$0xff]  }
  0xa4   :  { %2628 = vmatpush2.bf16.msra.mxu1 %v5539_v47  ;;  %2656 = vmatprep.subr.bf16.mxu0 %v5550_v52  ;;  %v5632_v47 = vld [vmem:[%s7798_s1 + $0x508] ss:$20 sps:$4 sm:$0xff]   ;;  %v5635_v52 = vld [vmem:[%s7798_s1 + $0x760] ss:$20 sps:$4 sm:$0xff]  }
  0xa5   :  { %2629 = vmatprep.subr.bf16.mxu1 %v5547_v51  ;;  %v5640_v51 = vld [vmem:[%s7798_s1 + $0x8a4] ss:$20 sps:$4 sm:$0xff]  }
  0xa7   :  { %2657 = vmatpush1.bf16.msra.mxu0 %v5548_v54  ;;  %v5643_v54 = vld [vmem:[%s7798_s1 + $0x73c] ss:$20 sps:$4 sm:$0xff]  }
  0xa8   :  { %2630 = vmatpush2.bf16.msra.mxu1 %v5545_v53  ;;  %2658 = vmatprep.subr.bf16.mxu0 %v5556_v56  ;;  %v5638_v53 = vld [vmem:[%s7798_s1 + $0x8a0] ss:$20 sps:$4 sm:$0xff]   ;;  %v5641_v56 = vld [vmem:[%s7798_s1 + $0x738] ss:$20 sps:$4 sm:$0xff]  }
  0xa9   :  { %2631 = vmatprep.subr.bf16.mxu1 %v5553_v55  ;;  %v5646_v55 = vld [vmem:[%s7798_s1 + $0x87c] ss:$20 sps:$4 sm:$0xff]  }
  0xab   :  { %2659 = vmatpush1.bf16.msra.mxu0 %v5554_v58  ;;  %v5644_v58 = vld [vmem:[%s7798_s1 + $0x878] ss:$20 sps:$4 sm:$0xff]  }
  0xac   :  { %2632 = vmatpush2.bf16.msra.mxu1 %v5551_v57  ;;  %2660 = vmatprep.subr.bf16.mxu0 %v5562_v50  ;;  %v6800_v57 = vld [vmem:[%s7799_s0 + $0x8] ss:$36 sps:$4 sm:$0xff]  }
  0xad   :  { %2633 = vmatprep.subr.bf16.mxu1 %v5559_v59  ;;  %v5649_v59 = vld [vmem:[%s7798_s1 + $0x714] ss:$20 sps:$4 sm:$0xff]  }
  0xae   :  { %v5652_v50 = vld [vmem:[%s7798_s1 + $0x854] ss:$20 sps:$4 sm:$0xff]  }
  0xaf   :  { %2661 = vmatpush1.bf16.msra.mxu0 %v5560_v61  ;;  %v6818_v61 = vld [vmem:[%s7799_s0 + $0x1c] ss:$36 sps:$4 sm:$0xff]  }
  0xb0   :  { %2634 = vmatpush2.bf16.msra.mxu1 %v5557_v60  ;;  %2662 = vmatprep.subr.bf16.mxu0 %v5568_v63  ;;  %v5647_v60 = vld [vmem:[%s7798_s1 + $0x710] ss:$20 sps:$4 sm:$0xff]   ;;  %v5655_v63 = vld [vmem:[%s7798_s1 + $0x6ec] ss:$20 sps:$4 sm:$0xff]  }
  0xb1   :  { %2635 = vmatprep.subr.bf16.mxu1 %v5565_v62  ;;  %v5650_v62 = vld [vmem:[%s7798_s1 + $0x850] ss:$20 sps:$4 sm:$0xff]  }
  0xb3   :  { %2663 = vmatpush1.bf16.msra.mxu0 %v5566_v1  ;;  %v5653_v1 = vld [vmem:[%s7798_s1 + $0x6e8] ss:$20 sps:$4 sm:$0xff]  }
  0xb4   :  { %2636 = vmatpush2.bf16.msra.mxu1 %v5563_v0  ;;  %2664 = vmatprep.subr.bf16.mxu0 %v5574_v3  ;;  %v5658_v0 = vld [vmem:[%s7798_s1 + $0x82c] ss:$20 sps:$4 sm:$0xff]   ;;  %v5661_v3 = vld [vmem:[%s7798_s1 + $0x6c4] ss:$20 sps:$4 sm:$0xff]  }
  0xb5   :  { %2637 = vmatprep.subr.bf16.mxu1 %v5571_v2  ;;  %v5656_v2 = vld [vmem:[%s7798_s1 + $0x828] ss:$20 sps:$4 sm:$0xff]  }
  0xb7   :  { %2665 = vmatpush1.bf16.msra.mxu0 %v5572_v6  ;;  %v5659_v6 = vld [vmem:[%s7798_s1 + $0x6c0] ss:$20 sps:$4 sm:$0xff]  }
  0xb8   :  { %2638 = vmatpush2.bf16.msra.mxu1 %v5569_v5  ;;  %2666 = vmatprep.subr.bf16.mxu0 %v5580_v8  ;;  %v5664_v5 = vld [vmem:[%s7798_s1 + $0x804] ss:$20 sps:$4 sm:$0xff]   ;;  %v5667_v8 = vld [vmem:[%s7798_s1 + $0x69c] ss:$20 sps:$4 sm:$0xff]  }
  0xb9   :  { %2639 = vmatprep.subr.bf16.mxu1 %v5577_v7  ;;  %v5662_v7 = vld [vmem:[%s7798_s1 + $0x800] ss:$20 sps:$4 sm:$0xff]  }
  0xbb   :  { %2667 = vmatpush1.bf16.msra.mxu0 %v5578_v10  ;;  %v5665_v10 = vld [vmem:[%s7798_s1 + $0x698] ss:$20 sps:$4 sm:$0xff]  }
  0xbc   :  { %2640 = vmatpush2.bf16.msra.mxu1 %v5575_v9  ;;  %2668 = vmatprep.subr.bf16.mxu0 %v5586_v13  ;;  %v5670_v9 = vld [vmem:[%s7798_s1 + $0x7dc] ss:$20 sps:$4 sm:$0xff]   ;;  %v5673_v13 = vld [vmem:[%s7798_s1 + $0x674] ss:$20 sps:$4 sm:$0xff]  }
  0xbd   :  { %2641 = vmatprep.subr.bf16.mxu1 %v5583_v12  ;;  %v5668_v12 = vld [vmem:[%s7798_s1 + $0x7d8] ss:$20 sps:$4 sm:$0xff]  }
  0xbf   :  { %2669 = vmatpush1.bf16.msra.mxu0 %v5584_v15  ;;  %v5671_v15 = vld [vmem:[%s7798_s1 + $0x670] ss:$20 sps:$4 sm:$0xff]  }
  0xc0   :  { %2642 = vmatpush2.bf16.msra.mxu1 %v5581_v14  ;;  %2670 = vmatprep.subr.bf16.mxu0 %v5589_v16  ;;  %v5676_v14 = vld [vmem:[%s7798_s1 + $0x7b4] ss:$20 sps:$4 sm:$0xff]   ;;  %v5674_v16 = vld [vmem:[%s7798_s1 + $0x7b0] ss:$20 sps:$4 sm:$0xff]  }
  0xc1   :  { %2697 = vmatprep.subr.bf16.mxu1 %v5592_v17  ;;  %v5679_v17 = vld [vmem:[%s7798_s1 + $0x64c] ss:$20 sps:$4 sm:$0xff]  }
  0xc3   :  { %2644 = vmatmul.mubr.bf16.vlgmr.msra.gmra.mxu1 %v6267_v4  ;;  %2671 = vmatpush2.bf16.msra.mxu0 %v5587_v18  ;;  %v5604_v4 = vld [vmem:[%s7798_s1 + $0x5d4] ss:$20 sps:$4 sm:$0xff]   ;;  %v5682_v18 = vld [vmem:[%s7798_s1 + $0x78c] ss:$20 sps:$4 sm:$0xff]  }
  0xc4   :  { %2698 = vmatpush1.bf16.msra.mxu1 %v5590_v19  ;;  %2672 = vmatprep.subr.bf16.mxu0 %v5595_v20  ;;  %v5677_v19 = vld [vmem:[%s7798_s1 + $0x648] ss:$20 sps:$4 sm:$0xff]  }
  0xc5   :  { %2699 = vmatprep.subr.bf16.mxu1 %v5598_v22  ;;  %2729 = vmatprep.mubr.bf16.mxu1 %v6360_v34  ;;  %v5605_v34 = vld [vmem:[%s7798_s1 + $0x468] ss:$20 sps:$4 sm:$0xff]   ;;  %v5685_v22 = vld [vmem:[%s7798_s1 + $0x9e4] ss:$20 sps:$4 sm:$0xff]  }
  0xc6   :  { %v5680_v20 = vld [vmem:[%s7798_s1 + $0x788] ss:$20 sps:$4 sm:$0xff]  }
  0xc7   :  { %2673 = vmatpush2.bf16.msra.mxu0 %v5593_v23  ;;  %v5688_v23 = vld [vmem:[%s7798_s1 + $0xb24] ss:$20 sps:$4 sm:$0xff]  }
  0xc8   :  { %2700 = vmatpush1.bf16.msra.mxu1 %v5596_v24  ;;  %2674 = vmatprep.subr.bf16.mxu0 %v5601_v48  ;;  %v5683_v24 = vld [vmem:[%s7798_s1 + $0x9e0] ss:$20 sps:$4 sm:$0xff]  }
  0xc9   :  { %2701 = vmatprep.subr.bf16.mxu1 %v5604_v4  ;;  %v5686_v48 = vld [vmem:[%s7798_s1 + $0xb20] ss:$20 sps:$4 sm:$0xff]   ;;  %v5691_v4 = vld [vmem:[%s7798_s1 + $0x9bc] ss:$20 sps:$4 sm:$0xff]  }
  0xcb   :  { %2675 = vmatpush2.bf16.msra.mxu0 %v5599_v25  ;;  %v5694_v25 = vld [vmem:[%s7798_s1 + $0xafc] ss:$20 sps:$4 sm:$0xff]  }
  0xcc   :  { %2702 = vmatpush1.bf16.msra.mxu1 %v5602_v26  ;;  %2676 = vmatprep.subr.bf16.mxu0 %v5607_v27  ;;  %v5689_v26 = vld [vmem:[%s7798_s1 + $0x9b8] ss:$20 sps:$4 sm:$0xff]  }
  0xcd   :  { %2703 = vmatprep.subr.bf16.mxu1 %v5610_v28  ;;  %v5692_v27 = vld [vmem:[%s7798_s1 + $0xaf8] ss:$20 sps:$4 sm:$0xff]   ;;  %v5697_v28 = vld [vmem:[%s7798_s1 + $0x994] ss:$20 sps:$4 sm:$0xff]  }
  0xcf   :  { %2677 = vmatpush2.bf16.msra.mxu0 %v5605_v34  ;;  %v5700_v34 = vld [vmem:[%s7798_s1 + $0xad4] ss:$20 sps:$4 sm:$0xff]  }
  0xd0   :  { %2704 = vmatpush1.bf16.msra.mxu1 %v5608_v29  ;;  %2678 = vmatprep.subr.bf16.mxu0 %v5613_v30  ;;  %v5698_v29 = vld [vmem:[%s7798_s1 + $0xad0] ss:$20 sps:$4 sm:$0xff]   ;;  %v5703_v30 = vld [vmem:[%s7798_s1 + $0x96c] ss:$20 sps:$4 sm:$0xff]  }
  0xd1   :  { %2705 = vmatprep.subr.bf16.mxu1 %v5616_v31  ;;  %v5706_v31 = vld [vmem:[%s7798_s1 + $0xaac] ss:$20 sps:$4 sm:$0xff]  }
  0xd3   :  { %2679 = vmatpush2.bf16.msra.mxu0 %v5611_v32  ;;  %v5701_v32 = vld [vmem:[%s7798_s1 + $0x968] ss:$20 sps:$4 sm:$0xff]  }
  0xd4   :  { %2706 = vmatpush1.bf16.msra.mxu1 %v5614_v33  ;;  %2680 = vmatprep.subr.bf16.mxu0 %v5619_v35  ;;  %v5704_v33 = vld [vmem:[%s7798_s1 + $0xaa8] ss:$20 sps:$4 sm:$0xff]   ;;  %v5709_v35 = vld [vmem:[%s7798_s1 + $0x944] ss:$20 sps:$4 sm:$0xff]  }
  0xd5   :  { %2707 = vmatprep.subr.bf16.mxu1 %v5622_v36  ;;  %v5712_v36 = vld [vmem:[%s7798_s1 + $0xa84] ss:$20 sps:$4 sm:$0xff]  }
  0xd7   :  { %2681 = vmatpush2.bf16.msra.mxu0 %v5617_v37  ;;  %v5707_v37 = vld [vmem:[%s7798_s1 + $0x940] ss:$20 sps:$4 sm:$0xff]  }
  0xd8   :  { %2708 = vmatpush1.bf16.msra.mxu1 %v5620_v38  ;;  %2682 = vmatprep.subr.bf16.mxu0 %v5625_v39  ;;  %v5710_v38 = vld [vmem:[%s7798_s1 + $0xa80] ss:$20 sps:$4 sm:$0xff]   ;;  %v5715_v39 = vld [vmem:[%s7798_s1 + $0x91c] ss:$20 sps:$4 sm:$0xff]  }
  0xd9   :  { %2709 = vmatprep.subr.bf16.mxu1 %v5628_v40  ;;  %v5718_v40 = vld [vmem:[%s7798_s1 + $0xa5c] ss:$20 sps:$4 sm:$0xff]  }
  0xdb   :  { %2683 = vmatpush2.bf16.msra.mxu0 %v5623_v41  ;;  %v5713_v41 = vld [vmem:[%s7798_s1 + $0x918] ss:$20 sps:$4 sm:$0xff]  }
  0xdc   :  { %2710 = vmatpush1.bf16.msra.mxu1 %v5626_v42  ;;  %2684 = vmatprep.subr.bf16.mxu0 %v5631_v43  ;;  %v5716_v42 = vld [vmem:[%s7798_s1 + $0xa58] ss:$20 sps:$4 sm:$0xff]   ;;  %v5721_v43 = vld [vmem:[%s7798_s1 + $0x8f4] ss:$20 sps:$4 sm:$0xff]  }
  0xdd   :  { %2711 = vmatprep.subr.bf16.mxu1 %v5634_v44  ;;  %v5724_v44 = vld [vmem:[%s7798_s1 + $0xa34] ss:$20 sps:$4 sm:$0xff]  }
  0xdf   :  { %2685 = vmatpush2.bf16.msra.mxu0 %v5629_v45  ;;  %v5719_v45 = vld [vmem:[%s7798_s1 + $0x8f0] ss:$20 sps:$4 sm:$0xff]  }
  0xe0   :  { %2712 = vmatpush1.bf16.msra.mxu1 %v5632_v47  ;;  %2740 = vmatprep.subr.bf16.mxu0 %v5640_v51  ;;  %v5722_v47 = vld [vmem:[%s7798_s1 + $0xa30] ss:$20 sps:$4 sm:$0xff]   ;;  %v5730_v51 = vld [vmem:[%s7798_s1 + $0xa0c] ss:$20 sps:$4 sm:$0xff]  }
  0xe1   :  { %2713 = vmatprep.subr.bf16.mxu1 %v5637_v49  ;;  %v5727_v49 = vld [vmem:[%s7798_s1 + $0x8cc] ss:$20 sps:$4 sm:$0xff]  }
  0xe2   :  { %2687 = vmatmul.mubr.bf16.vlgmr.msra.gmra.mxu0 %v6800_v57 }
  0xe3   :  { %2741 = vmatpush1.bf16.msra.mxu0 %v5638_v53  ;;  %2772 = vmatprep.mubr.bf16.mxu0 %v6818_v61  ;;  %v5728_v53 = vld [vmem:[%s7798_s1 + $0xa08] ss:$20 sps:$4 sm:$0xff]  }
  0xe4   :  { %2714 = vmatpush2.bf16.msra.mxu1 %v5635_v52  ;;  %2742 = vmatprep.subr.bf16.mxu0 %v5646_v55  ;;  %v5725_v52 = vld [vmem:[%s7798_s1 + $0x8c8] ss:$20 sps:$4 sm:$0xff]  }
  0xe5   :  { %2715 = vmatprep.subr.bf16.mxu1 %v5643_v54  ;;  %v5731_v54 = vld [vmem:[%s7798_s1 + $0x268] ss:$20 sps:$4 sm:$0xff]  }
  0xe6   :  { %v5732_v55 = vld [vmem:[%s7798_s1 + $0x4e8] ss:$20 sps:$4 sm:$0xff]  }
  0xe7   :  { %2743 = vmatpush1.bf16.msra.mxu0 %v5644_v58  ;;  %v5734_v58 = vld [vmem:[%s7798_s1 + $0x3a8] ss:$20 sps:$4 sm:$0xff]  }
  0xe8   :  { %2716 = vmatpush2.bf16.msra.mxu1 %v5641_v56  ;;  %2744 = vmatprep.subr.bf16.mxu0 %v5652_v50  ;;  %v5733_v56 = vld [vmem:[%s7798_s1 + $0x128] ss:$20 sps:$4 sm:$0xff]   ;;  %v5736_v50 = vld [vmem:[%s7798_s1 + $0x4c0] ss:$20 sps:$4 sm:$0xff]  }
  0xe9   :  { %2717 = vmatprep.subr.bf16.mxu1 %v5649_v59  ;;  %v5735_v59 = vld [vmem:[%s7798_s1 + $0x240] ss:$20 sps:$4 sm:$0xff]  }
  0xeb   :  { %2745 = vmatpush1.bf16.msra.mxu0 %v5650_v62  ;;  %v5737_v62 = vld [vmem:[%s7798_s1 + $0x100] ss:$20 sps:$4 sm:$0xff]  }
  0xec   :  { %2718 = vmatpush2.bf16.msra.mxu1 %v5647_v60  ;;  %2746 = vmatprep.subr.bf16.mxu0 %v5658_v0  ;;  %v7003_v60 = vld [vmem:[%s7799_s0 + $0x18] ss:$36 sps:$4 sm:$0xff]  }
  0xed   :  { %2719 = vmatprep.subr.bf16.mxu1 %v5655_v63  ;;  %v5738_v63 = vld [vmem:[%s7798_s1 + $0x380] ss:$20 sps:$4 sm:$0xff]   ;;  %v5739_v0 = vld [vmem:[%s7798_s1 + $0x218] ss:$20 sps:$4 sm:$0xff]  }
  0xef   :  { %2747 = vmatpush1.bf16.msra.mxu0 %v5656_v2  ;;  %v5742_v2 = vld [vmem:[%s7798_s1 + $0x358] ss:$20 sps:$4 sm:$0xff]  }
  0xf0   :  { %2720 = vmatpush2.bf16.msra.mxu1 %v5653_v1  ;;  %2748 = vmatprep.subr.bf16.mxu0 %v5664_v5  ;;  %v5740_v1 = vld [vmem:[%s7798_s1 + $0x498] ss:$20 sps:$4 sm:$0xff]  }
  0xf1   :  { %2721 = vmatprep.subr.bf16.mxu1 %v5661_v3  ;;  %v5990_v3 = vld [vmem:[%s7799_s0 + $0x4] ss:$36 sps:$4 sm:$0xff]   ;;  %v5991_v5 = vld [vmem:[%s7799_s0 + $0xc] ss:$36 sps:$4 sm:$0xff]  }
  0xf3   :  { %2749 = vmatpush1.bf16.msra.mxu0 %v5662_v7  ;;  %v5744_v7 = vld [vmem:[%s7798_s1 + $0x470] ss:$20 sps:$4 sm:$0xff]  }
  0xf4   :  { %2722 = vmatpush2.bf16.msra.mxu1 %v5659_v6  ;;  %2750 = vmatprep.subr.bf16.mxu0 %v5670_v9  ;;  %v5743_v6 = vld [vmem:[%s7798_s1 + $0x1f0] ss:$20 sps:$4 sm:$0xff]  }
  0xf5   :  { %2723 = vmatprep.subr.bf16.mxu1 %v5667_v8  ;;  %v5745_v8 = vld [vmem:[%s7798_s1 + $0xb0] ss:$20 sps:$4 sm:$0xff]  }
  0xf6   :  { %v5746_v9 = vld [vmem:[%s7798_s1 + $0x330] ss:$20 sps:$4 sm:$0xff]  }
  0xf7   :  { %2751 = vmatpush1.bf16.msra.mxu0 %v5668_v12  ;;  %v5748_v12 = vld [vmem:[%s7798_s1 + $0x448] ss:$20 sps:$4 sm:$0xff]  }
  0xf8   :  { %2724 = vmatpush2.bf16.msra.mxu1 %v5665_v10  ;;  %2752 = vmatprep.subr.bf16.mxu0 %v5676_v14  ;;  %v5747_v10 = vld [vmem:[%s7798_s1 + $0x1c8] ss:$20 sps:$4 sm:$0xff]  }
  0xf9   :  { %2725 = vmatprep.subr.bf16.mxu1 %v5673_v13  ;;  %v5749_v13 = vld [vmem:[%s7798_s1 + $0x88] ss:$20 sps:$4 sm:$0xff]  }
  0xfa   :  { %v5750_v14 = vld [vmem:[%s7798_s1 + $0x308] ss:$20 sps:$4 sm:$0xff]  }
  0xfb   :  { %2753 = vmatpush1.bf16.msra.mxu0 %v5674_v16  ;;  %v5752_v16 = vld [vmem:[%s7798_s1 + $0x420] ss:$20 sps:$4 sm:$0xff]  }
  0xfc   :  { %2726 = vmatpush2.bf16.msra.mxu1 %v5671_v15  ;;  %2754 = vmatprep.subr.bf16.mxu0 %v5682_v18  ;;  %v5751_v15 = vld [vmem:[%s7798_s1 + $0x1a0] ss:$20 sps:$4 sm:$0xff]  }
  0xfd   :  { %2727 = vmatprep.subr.bf16.mxu1 %v5679_v17  ;;  %v5753_v17 = vld [vmem:[%s7798_s1 + $0x60] ss:$20 sps:$4 sm:$0xff]  }
  0xfe   :  { %v5754_v18 = vld [vmem:[%s7798_s1 + $0x2e0] ss:$20 sps:$4 sm:$0xff]  }
  0xff   :  { %2755 = vmatpush1.bf16.msra.mxu0 %v5680_v20  ;;  %v5756_v20 = vld [vmem:[%s7798_s1 + $0x3f8] ss:$20 sps:$4 sm:$0xff]  }
 0x100   :  { %2728 = vmatpush2.bf16.msra.mxu1 %v5677_v19  ;;  %2756 = vmatprep.subr.bf16.mxu0 %v5685_v22  ;;  %v5755_v19 = vld [vmem:[%s7798_s1 + $0x178] ss:$20 sps:$4 sm:$0xff]  }
 0x101   :  { %2783 = vmatprep.subr.bf16.mxu1 %v5688_v23  ;;  %v5757_v22 = vld [vmem:[%s7798_s1 + $0x38] ss:$20 sps:$4 sm:$0xff]  }
 0x102   :  { %v5758_v23 = vld [vmem:[%s7798_s1 + $0x2b8] ss:$20 sps:$4 sm:$0xff]  }
 0x103   :  { %2730 = vmatmul.mubr.bf16.vlgmr.msra.gmra.mxu1 %v6477_v11  ;;  %2757 = vmatpush2.bf16.msra.mxu0 %v5683_v24  ;;  %v5695_v11 = vld [vmem:[%s7798_s1 + $0x990] ss:$20 sps:$4 sm:$0xff]  }
 0x104   :  { %2784 = vmatpush1.bf16.msra.mxu1 %v5686_v48  ;;  %2758 = vmatprep.subr.bf16.mxu0 %v5691_v4  ;;  %v5759_v24 = vld [vmem:[%s7798_s1 + $0x150] ss:$20 sps:$4 sm:$0xff]  }
 0x105   :  { %2785 = vmatprep.subr.bf16.mxu1 %v5694_v25  ;;  %2815 = vmatprep.mubr.bf16.mxu1 %v5996_v21  ;;  %v5760_v48 = vld [vmem:[%s7798_s1 + $0x3d0] ss:$20 sps:$4 sm:$0xff]  }
 0x106   :  { %v5761_v4 = vld [vmem:[%s7798_s1 + $0x10] ss:$20 sps:$4 sm:$0xff]  }
 0x107   :  { %2759 = vmatpush2.bf16.msra.mxu0 %v5689_v26  ;;  %v5762_v25 = vld [vmem:[%s7798_s1 + $0x290] ss:$20 sps:$4 sm:$0xff]   ;;  %v5763_v26 = vld [vmem:[%s7798_s1 + $0x768] ss:$20 sps:$4 sm:$0xff]  }
 0x108   :  { %2786 = vmatpush1.bf16.msra.mxu1 %v5692_v27  ;;  %2760 = vmatprep.subr.bf16.mxu0 %v5697_v28  ;;  %v5764_v27 = vld [vmem:[%s7798_s1 + $0x9e8] ss:$20 sps:$4 sm:$0xff]  }
 0x109   :  { %2787 = vmatprep.subr.bf16.mxu1 %v5700_v34  ;;  %v5765_v28 = vld [vmem:[%s7798_s1 + $0x628] ss:$20 sps:$4 sm:$0xff]  }
 0x10a   :  { %v5766_v34 = vld [vmem:[%s7798_s1 + $0x8a8] ss:$20 sps:$4 sm:$0xff]  }
 0x10b   :  { %2761 = vmatpush2.bf16.msra.mxu0 %v5695_v11  ;;  %v5767_v11 = vld [vmem:[%s7798_s1 + $0x740] ss:$20 sps:$4 sm:$0xff]  }
 0x10c   :  { %2788 = vmatpush1.bf16.msra.mxu1 %v5698_v29  ;;  %2762 = vmatprep.subr.bf16.mxu0 %v5703_v30  ;;  %v5768_v29 = vld [vmem:[%s7798_s1 + $0x9c0] ss:$20 sps:$4 sm:$0xff]  }
 0x10d   :  { %2789 = vmatprep.subr.bf16.mxu1 %v5706_v31  ;;  %v5769_v30 = vld [vmem:[%s7798_s1 + $0x600] ss:$20 sps:$4 sm:$0xff]  }
 0x10e   :  { %v5770_v31 = vld [vmem:[%s7798_s1 + $0x880] ss:$20 sps:$4 sm:$0xff]  }
 0x10f   :  { %2763 = vmatpush2.bf16.msra.mxu0 %v5701_v32  ;;  %v5992_v32 = vld [vmem:[%s7799_s0] ss:$36 sps:$4 sm:$0xff]  }
 0x110   :  { %2790 = vmatpush1.bf16.msra.mxu1 %v5704_v33  ;;  %2764 = vmatprep.subr.bf16.mxu0 %v5709_v35  ;;  %v5771_v33 = vld [vmem:[%s7798_s1 + $0x718] ss:$20 sps:$4 sm:$0xff]  }
 0x111   :  { %2791 = vmatprep.subr.bf16.mxu1 %v5712_v36  ;;  %v5772_v35 = vld [vmem:[%s7798_s1 + $0x998] ss:$20 sps:$4 sm:$0xff]  }
 0x112   :  { %v5773_v36 = vld [vmem:[%s7798_s1 + $0x5d8] ss:$20 sps:$4 sm:$0xff]  }
 0x113   :  { %2765 = vmatpush2.bf16.msra.mxu0 %v5707_v37  ;;  %v5993_v37 = vld [vmem:[%s7799_s0 + $0x14] ss:$36 sps:$4 sm:$0xff]  }
 0x114   :  { %2792 = vmatpush1.bf16.msra.mxu1 %v5710_v38  ;;  %2766 = vmatprep.subr.bf16.mxu0 %v5715_v39  ;;  %v7135_v38 = vpop.f32.mrf.mxu0  ;;  %v5775_v39 = vld [vmem:[%s7798_s1 + $0x6f0] ss:$20 sps:$4 sm:$0xff]  }
 0x115   :  { %2793 = vmatprep.subr.bf16.mxu1 %v5718_v40  ;;  %v5776_v40 = vld [vmem:[%s7798_s1 + $0x970] ss:$20 sps:$4 sm:$0xff]  }
 0x117   :  { %2767 = vmatpush2.bf16.msra.mxu0 %v5713_v41  ;;  %v7143_v41 = vpop.f32.mrf.mxu1 }
 0x118   :  { %2794 = vmatpush1.bf16.msra.mxu1 %v5716_v42  ;;  %2768 = vmatprep.subr.bf16.mxu0 %v5721_v43  ;;  %v2432_v42 = vpop.f32.mrf.mxu0  ;;  %v5778_v43 = vld [vmem:[%s7798_s1 + $0x830] ss:$20 sps:$4 sm:$0xff]  }
 0x119   :  { %2795 = vmatprep.subr.bf16.mxu1 %v5724_v44  ;;  %v5779_v44 = vld [vmem:[%s7798_s1 + $0x6c8] ss:$20 sps:$4 sm:$0xff]  }
 0x11b   :  { %2769 = vmatpush2.bf16.msra.mxu0 %v5719_v45  ;;  %v5780_v45 = vld [vmem:[%s7798_s1 + $0x948] ss:$20 sps:$4 sm:$0xff]  }
 0x11c   :  { %2796 = vmatpush1.bf16.msra.mxu1 %v5722_v47  ;;  %2770 = vmatprep.subr.bf16.mxu0 %v5727_v49  ;;  %v5781_v47 = vld [vmem:[%s7798_s1 + $0x588] ss:$20 sps:$4 sm:$0xff]  }
 0x11d   :  { %2797 = vmatprep.subr.bf16.mxu1 %v5730_v51  ;;  %v5782_v49 = vld [vmem:[%s7798_s1 + $0x808] ss:$20 sps:$4 sm:$0xff]   ;;  %v2475_v51 = vpop.f32.mrf.mxu1 }
 0x11f   :  { %2771 = vmatpush2.bf16.msra.mxu0 %v5725_v52  ;;  %v7163_v52 = vpop.f32.mrf.mxu0 }
 0x120   :  { %2798 = vmatpush1.bf16.msra.mxu1 %v5728_v53  ;;  %5042 = vmatprep.subr.bf16.mxu0 %v5731_v54  ;;  %v5783_v53 = vld [vmem:[%s7798_s1 + $0x6a0] ss:$20 sps:$4 sm:$0xff]  }
 0x121   :  { %5064 = vmatprep.subr.bf16.mxu1 %v5732_v55  ;;  %v5784_v54 = vld [vmem:[%s7798_s1 + $0x920] ss:$20 sps:$4 sm:$0xff]  }
 0x122   :  { %2773 = vmatmul.mubr.bf16.vlgmr.msra.gmra.mxu0 %v7003_v60  ;;  %v5785_v55 = vld [vmem:[%s7798_s1 + $0x560] ss:$20 sps:$4 sm:$0xff]  }
 0x123   :  { %2816 = vmatmul.mubr.bf16.vlgmr.msra.gmra.mxu1 %v6584_v46  ;;  %5043 = vmatpush3.bf16.msra.mxu0 %v5733_v56  ;;  %v5741_v46 = vld [vmem:[%s7798_s1 + $0xd8] ss:$20 sps:$4 sm:$0xff]   ;;  %v5786_v56 = vld [vmem:[%s7798_s1 + $0x7e0] ss:$20 sps:$4 sm:$0xff]  }
 0x124   :  { %5065 = vmatpush3.bf16.msra.mxu1 %v5734_v58  ;;  %5044 = vmatprep.subr.bf16.mxu0 %v5735_v59  ;;  %v7177_v58 = vpop.f32.mrf.mxu1  ;;  %v2436_v59 = vpop.f32.mrf.mxu0 }
 0x125   :  { %5066 = vmatprep.subr.bf16.mxu1 %v5736_v50  ;;  %2858 = vmatprep.mubr.bf16.mxu0 %v5990_v3  ;;  %v5787_v50 = vld [vmem:[%s7798_s1 + $0x678] ss:$20 sps:$4 sm:$0xff]  }
 0x126   :  { %2899 = vmatprep.mubr.bf16.mxu1 %v5991_v5  ;;  %v5791_v5 = vld [vmem:[%s7798_s1 + $0x650] ss:$20 sps:$4 sm:$0xff]  }
 0x127   :  { %5045 = vmatpush3.bf16.msra.mxu0 %v5737_v62  ;;  %v5788_v62 = vld [vmem:[%s7798_s1 + $0x8f8] ss:$20 sps:$4 sm:$0xff]  }
 0x128   :  { %5067 = vmatpush3.bf16.msra.mxu1 %v5738_v63  ;;  %5046 = vmatprep.subr.bf16.mxu0 %v5739_v0  ;;  %v2479_v0 = vpop.f32.mrf.mxu1 }
 0x129   :  { %5068 = vmatprep.subr.bf16.mxu1 %v5740_v1  ;;  %v5789_v1 = vld [vmem:[%s7798_s1 + $0x538] ss:$20 sps:$4 sm:$0xff]  }
 0x12b   :  { %5047 = vmatpush3.bf16.msra.mxu0 %v5741_v46  ;;  %v5790_v46 = vld [vmem:[%s7798_s1 + $0x7b8] ss:$20 sps:$4 sm:$0xff]  }
 0x12c   :  { %5069 = vmatpush3.bf16.msra.mxu1 %v5742_v2  ;;  %5048 = vmatprep.subr.bf16.mxu0 %v5743_v6  ;;  %v5792_v6 = vld [vmem:[%s7798_s1 + $0x8d0] ss:$20 sps:$4 sm:$0xff]  }
 0x12d   :  { %5070 = vmatprep.subr.bf16.mxu1 %v5744_v7  ;;  %v3033_v7 = vlaneseq }
 0x12f   :  { %5049 = vmatpush3.bf16.msra.mxu0 %v5745_v8  ;;  %v5793_v8 = vld [vmem:[%s7798_s1 + $0x510] ss:$20 sps:$4 sm:$0xff]  }
 0x130   :  { %5071 = vmatpush3.bf16.msra.mxu1 %v5746_v9  ;;  %5050 = vmatprep.subr.bf16.mxu0 %v5747_v10  ;;  %v5794_v9 = vld [vmem:[%s7798_s1 + $0x790] ss:$20 sps:$4 sm:$0xff]  }
 0x131   :  { %5072 = vmatprep.subr.bf16.mxu1 %v5748_v12 }
 0x133   :  { %5051 = vmatpush3.bf16.msra.mxu0 %v5749_v13  ;;  %v5797_v13 = vld [vmem:[%s7800_s4 + $0xac] ss:$12 sps:$4 sm:$0xff]  }
 0x134   :  { %5073 = vmatpush3.bf16.msra.mxu1 %v5750_v14  ;;  %5052 = vmatprep.subr.bf16.mxu0 %v5751_v15  ;;  %v2476_v14 = vadd.f32 %v2475_v51, %v2432_v42  ;;  %v7212_v15 = vshrl.u32 %v3033_v7, 7  ;;  %v5813_v51 = vld [vmem:[%s7800_s4 + $0x4c] ss:$12 sps:$4 sm:$0xff]  }
 0x135   :  { %5074 = vmatprep.subr.bf16.mxu1 %v5752_v16  ;;  %v5823_v7 = vld [vmem:[%s7800_s4] ss:$12 sps:$4 sm:$0xff]  }
 0x137   :  { %5053 = vmatpush3.bf16.msra.mxu0 %v5753_v17  ;;  %v5795_v17 = vld [vmem:[%s7800_s4 + $0xa8] ss:$12 sps:$4 sm:$0xff]  }
 0x138   :  { %5075 = vmatpush3.bf16.msra.mxu1 %v5754_v18  ;;  %5054 = vmatprep.subr.bf16.mxu0 %v5755_v19  ;;  %v5798_v18 = vld [vmem:[%s7798_s1 + $0xb28] ss:$20 sps:$4 sm:$0xff]   ;;  %v7221_v19 = vsub.s32 1, %v7212_v15 }
 0x139   :  { %5076 = vmatprep.subr.bf16.mxu1 %v5756_v20 }
 0x13b   :  { %5055 = vmatpush3.bf16.msra.mxu0 %v5757_v22 }
 0x13c   :  { %5077 = vmatpush3.bf16.msra.mxu1 %v5758_v23  ;;  %5056 = vmatprep.subr.bf16.mxu0 %v5759_v24  ;;  %v5997_v23 = vmov 0.0   ;;  %v5801_v24 = vld [vmem:[%s7800_s4 + $0x94] ss:$12 sps:$4 sm:$0xff]  }
 0x13d   :  { %5078 = vmatprep.subr.bf16.mxu1 %v5760_v48  ;;  %v2480_v48 = vadd.f32 %v2479_v0, %v2436_v59  ;;  %v5814_v59 = vld [vmem:[%s7798_s1 + $0xa88] ss:$20 sps:$4 sm:$0xff]  }
 0x13e   :  { %v5815_v0 = vld [vmem:[%s7800_s4 + $0x30] ss:$12 sps:$4 sm:$0xff]  }
 0x13f   :  { %5057 = vmatpush3.bf16.msra.mxu0 %v5761_v4 }
 0x140   :  { %5079 = vmatpush3.bf16.msra.mxu1 %v5762_v25  ;;  %5086 = vmatprep.subr.bf16.mxu0 %v5763_v26  ;;  %v7234_v25 = vld [vmem:[%s7801_s2] sm:$0x1f]  ;;  %v5994_v26 = vld [vmem:[%s7799_s0 + $0x10] ss:$36 sps:$4 sm:$0xff]  }
 0x141   :  { %5108 = vmatprep.subr.bf16.mxu1 %v5764_v27 }
 0x142   :  { %2859 = vmatmul.mubr.bf16.vlgmr.msra.gmra.mxu0 %v5992_v32  ;;  %v7185_v63 = vpop.f32.mrf.mxu0 }
 0x143   :  { %2900 = vmatmul.mubr.bf16.vlgmr.msra.gmra.mxu1 %v6800_v57  ;;  %5087 = vmatpush3.bf16.msra.mxu0 %v5765_v28  ;;  %v5774_v57 = vld [vmem:[%s7798_s1 + $0x858] ss:$20 sps:$4 sm:$0xff]   ;;  %v7193_v3 = vpop.f32.mrf.mxu1 }
 0x144   :  { %5109 = vmatpush3.bf16.msra.mxu1 %v5766_v34  ;;  %5088 = vmatprep.subr.bf16.mxu0 %v5767_v11  ;;  %v2518_v2 = vpop.f32.mrf.mxu0  ;;  %v3040_v34 = vrot.slane %v7234_v25, %v7221_v19  ;;  %v5799_v11 = vld [vmem:[%s7800_s4 + $0x90] ss:$12 sps:$4 sm:$0xff]  }
 0x145   :  { %5110 = vmatprep.subr.bf16.mxu1 %v5768_v29  ;;  %2940 = vmatprep.mubr.bf16.mxu0 %v5993_v37  ;;  %v2561_v12 = vpop.f32.mrf.mxu1  ;;  %v2519_v16 = vadd.f32 %v2518_v2, %v2476_v14  ;;  %v5802_v29 = vld [vmem:[%s7798_s1 + $0xb00] ss:$20 sps:$4 sm:$0xff]   ;;  %v5819_v2 = vld [vmem:[%s7800_s4 + $0x18] ss:$12 sps:$4 sm:$0xff]  }
 0x146   :  { %2981 = vmatprep.mubr.bf16.mxu1 %v6818_v61  ;;  %v5777_v61 = vld [vmem:[%s7798_s1 + $0x5b0] ss:$20 sps:$4 sm:$0xff]   ;;  %v7207_v10 = vpop.f32.mrf.mxu0  ;;  %v5851_v14 = vld [vmem:[%s7800_s4 + $0x228] ss:$12 sps:$4 sm:$0xff]  }
 0x147   :  { %5089 = vmatpush3.bf16.msra.mxu0 %v5769_v30  ;;  %v7223_v22 = vpop.f32.mrf.mxu1  ;;  %v2562_v27 = vadd.f32 %v2561_v12, %v2519_v16  ;;  %v5853_v12 = vld [vmem:[%s7800_s4 + $0x22c] ss:$12 sps:$4 sm:$0xff]   ;;  %v5832_v16 = vld [vmem:[%s7800_s4 + $0x154] ss:$12 sps:$4 sm:$0xff]  }
 0x148   :  { %5111 = vmatpush3.bf16.msra.mxu1 %v5770_v31  ;;  %5090 = vmatprep.subr.bf16.mxu0 %v5771_v33  ;;  %v2522_v20 = vpop.f32.mrf.mxu0  ;;  %v7257_v33 = vld [vmem:[%s7802_s3] sm:$0x1f] }
 0x149   :  { %5112 = vmatprep.subr.bf16.mxu1 %v5772_v35  ;;  %v2523_v28 = vadd.f32 %v2522_v20, %v2480_v48  ;;  %v2565_v30 = vpop.f32.mrf.mxu1  ;;  %v3077_v37 = vrot.slane %v7257_v33, %v7221_v19  ;;  %v5830_v20 = vld [vmem:[%s7800_s4 + $0x150] ss:$12 sps:$4 sm:$0xff]  }
 0x14a   :  { %v5835_v48 = vld [vmem:[%s7800_s4 + $0x13c] ss:$12 sps:$4 sm:$0xff]  }
 0x14b   :  { %5091 = vmatpush3.bf16.msra.mxu0 %v5773_v36  ;;  %v2566_v36 = vadd.f32 %v2565_v30, %v2523_v28  ;;  %v5857_v28 = vld [vmem:[%s7800_s4 + $0x1f8] ss:$12 sps:$4 sm:$0xff]   ;;  %v2474_v30 = vadd.f32 %v7143_v41, %v7135_v38 }
 0x14c   :  { %5113 = vmatpush3.bf16.msra.mxu1 %v5774_v57  ;;  %5092 = vmatprep.subr.bf16.mxu0 %v5775_v39  ;;  %v5803_v39 = vld [vmem:[%s7800_s4 + $0x78] ss:$12 sps:$4 sm:$0xff]  }
 0x14d   :  { %5114 = vmatprep.subr.bf16.mxu1 %v5776_v40  ;;  %v5806_v40 = vld [vmem:[%s7798_s1 + $0xad8] ss:$20 sps:$4 sm:$0xff]  }
 0x14e   :  { %v5865_v38 = vld [vmem:[%s7800_s4 + $0x1cc] ss:$12 sps:$4 sm:$0xff]  }
 0x14f   :  { %5093 = vmatpush3.bf16.msra.mxu0 %v5777_v61  ;;  %v5809_v61 = vld [vmem:[%s7800_s4 + $0x64] ss:$12 sps:$4 sm:$0xff]  }
 0x150   :  { %5115 = vmatpush3.bf16.msra.mxu1 %v5778_v43  ;;  %5094 = vmatprep.subr.bf16.mxu0 %v5779_v44 }
 0x151   :  { %5116 = vmatprep.subr.bf16.mxu1 %v5780_v45 }
 0x153   :  { %5095 = vmatpush3.bf16.msra.mxu0 %v5781_v47  ;;  %v5807_v47 = vld [vmem:[%s7800_s4 + $0x60] ss:$12 sps:$4 sm:$0xff]  }
 0x154   :  { %5117 = vmatpush3.bf16.msra.mxu1 %v5782_v49  ;;  %5096 = vmatprep.subr.bf16.mxu0 %v5783_v53  ;;  %v5810_v49 = vld [vmem:[%s7798_s1 + $0xab0] ss:$20 sps:$4 sm:$0xff]  }
 0x155   :  { %5118 = vmatprep.subr.bf16.mxu1 %v5784_v54 }
 0x157   :  { %5097 = vmatpush3.bf16.msra.mxu0 %v5785_v55 }
 0x158   :  { %5119 = vmatpush3.bf16.msra.mxu1 %v5786_v56  ;;  %5098 = vmatprep.subr.bf16.mxu0 %v5787_v50  ;;  %v5811_v56 = vld [vmem:[%s7800_s4 + $0x48] ss:$12 sps:$4 sm:$0xff]  }
 0x159   :  { %5120 = vmatprep.subr.bf16.mxu1 %v5788_v62  ;;  %v5817_v62 = vld [vmem:[%s7800_s4 + $0x34] ss:$12 sps:$4 sm:$0xff]  }
 0x15b   :  { %5099 = vmatpush3.bf16.msra.mxu0 %v5789_v1  ;;  %v5818_v1 = vld [vmem:[%s7798_s1 + $0xa60] ss:$20 sps:$4 sm:$0xff]  }
 0x15c   :  { %5121 = vmatpush3.bf16.msra.mxu1 %v5790_v46  ;;  %5100 = vmatprep.subr.bf16.mxu0 %v5791_v5  ;;  %v5821_v46 = vld [vmem:[%s7800_s4 + $0x1c] ss:$12 sps:$4 sm:$0xff]   ;;  %v5822_v5 = vld [vmem:[%s7798_s1 + $0xa38] ss:$20 sps:$4 sm:$0xff]  }
 0x15d   :  { %5122 = vmatprep.subr.bf16.mxu1 %v5792_v6  ;;  %v5825_v6 = vld [vmem:[%s7800_s4 + $0x4] ss:$12 sps:$4 sm:$0xff]  }
 0x15f   :  { %5101 = vmatpush3.bf16.msra.mxu0 %v5793_v8  ;;  %v5826_v8 = vld [vmem:[%s7798_s1 + $0xa10] ss:$20 sps:$4 sm:$0xff]  }
 0x160   :  { %5123 = vmatpush3.bf16.msra.mxu1 %v5794_v9  ;;  %5223 = vmatprep.subr.bf16.mxu0 %v5997_v23  ;;  %v5829_v9 = vld [vmem:[%s7800_s4 + $0x16c] ss:$12 sps:$4 sm:$0xff]  }
 0x161   :  { %3920 = vmatprep.subr.bf16.mxu1 %v5797_v13  ;;  %v5827_v13 = vld [vmem:[%s7800_s4 + $0x168] ss:$12 sps:$4 sm:$0xff]  }
 0x162   :  { %v7229_v4 = vpop.f32.mrf.mxu0  ;;  %2941 = vmatmul.mubr.bf16.vlgmr.msra.gmra.mxu0 %v5994_v26  ;;  %v5859_v26 = vld [vmem:[%s7800_s4 + $0x1fc] ss:$12 sps:$4 sm:$0xff]  }
 0x163   :  { %2982 = vmatmul.mubr.bf16.vlgmr.msra.gmra.mxu1 %v7003_v60  ;;  %5224 = vmatpush3.bf16.msra.mxu0 %v5798_v18  ;;  %v5805_v60 = vld [vmem:[%s7800_s4 + $0x7c] ss:$12 sps:$4 sm:$0xff]   ;;  %v5995_v18 = vld [vmem:[%s7799_s0 + $0x20] ss:$36 sps:$4 sm:$0xff]  }
 0x164   :  { %3921 = vmatpush1.bf16.msra.mxu1 %v5795_v17  ;;  %v2604_v31 = vpop.f32.mrf.mxu0  ;;  %5225 = vmatprep.subr.bf16.mxu0 %v5997_v23  ;;  %v5856_v17 = vld [vmem:[%s7800_s4 + $0x214] ss:$12 sps:$4 sm:$0xff]  }
 0x165   :  { %3922 = vmatprep.subr.bf16.mxu1 %v5801_v24  ;;  %v2605_v32 = vadd.f32 %v2604_v31, %v2562_v27  ;;  %5239 = vmatprep.mubr.msk.bf16.mxu0 %vm5998_vm0, %v5997_v23  ;;  %v5854_v24 = vld [vmem:[%s7800_s4 + $0x210] ss:$12 sps:$4 sm:$0xff]   ;;  %v5833_v27 = vld [vmem:[%s7800_s4 + $0x138] ss:$12 sps:$4 sm:$0xff]  }
 0x166   :  { %v7259_v35 = vpop.f32.mrf.mxu0 }
 0x167   :  { %v3059_v57 = vmul.f32 %v3040_v34, %v2605_v32  ;;  %5226 = vmatpush3.bf16.msra.mxu0 %v5802_v29  ;;  %v5862_v29 = vld [vmem:[%s7800_s4 + $0x1e4] ss:$12 sps:$4 sm:$0xff]   ;;  %v5841_v32 = vld [vmem:[%s7800_s4 + $0x10c] ss:$12 sps:$4 sm:$0xff]  }
 0x168   :  { %3923 = vmatpush1.bf16.msra.mxu1 %v5799_v11  ;;  %v2608_v42 = vpop.f32.mrf.mxu0  ;;  %5227 = vmatprep.subr.bf16.mxu0 %v5997_v23  ;;  %v5838_v11 = vld [vmem:[%s7800_s4 + $0x124] ss:$12 sps:$4 sm:$0xff]  }
 0x169   :  { %3924 = vmatprep.subr.bf16.mxu1 %v5805_v60  ;;  %v2609_v43 = vadd.f32 %v2608_v42, %v2566_v36  ;;  %v3096_v44 = vadd.f32 %v3077_v37, %v3059_v57  ;;  %v2517_v60 = vadd.f32 %v7185_v63, %v2474_v30  ;;  %v5839_v63 = vld [vmem:[%s7800_s4 + $0x108] ss:$12 sps:$4 sm:$0xff]   ;;  %v5898_v30 = vld [vmem:[%s7800_s4 + $0x244] ss:$12 sps:$4 sm:$0xff]  }
 0x16a   :  { %v5863_v36 = vld [vmem:[%s7800_s4 + $0x1c8] ss:$12 sps:$4 sm:$0xff]  }
 0x16b   :  { %v3064_v45 = vmul.f32 %v3040_v34, %v2609_v43  ;;  %5228 = vmatpush3.bf16.msra.mxu0 %v5806_v40  ;;  %v3106_v54 = vmax.f32 %v3096_v44, 0.0  ;;  %v2478_v34 = vadd.f32 %v7177_v58, %v7163_v52  ;;  %v5836_v52 = vld [vmem:[%s7800_s4 + $0x120] ss:$12 sps:$4 sm:$0xff]   ;;  %v2560_v57 = vadd.f32 %v7193_v3, %v2517_v60  ;;  %v5842_v3 = vld [vmem:[%s7800_s4 + $0xf0] ss:$12 sps:$4 sm:$0xff]  }
 0x16c   :  { %3925 = vmatpush1.bf16.msra.mxu1 %v5803_v39  ;;  %5229 = vmatprep.subr.bf16.mxu0 %v5997_v23  ;;  %v5860_v58 = vld [vmem:[%s7800_s4 + $0x1e0] ss:$12 sps:$4 sm:$0xff]   ;;  %v5847_v43 = vld [vmem:[%s7800_s4 + $0xdc] ss:$12 sps:$4 sm:$0xff]  }
 0x16d   :  { %3926 = vmatprep.subr.bf16.mxu1 %v5809_v61  ;;  %v3101_v53 = vadd.f32 %v3077_v37, %v3064_v45  ;;  %v2521_v31 = vadd.f32 %v7207_v10, %v2478_v34  ;;  %v7388_v10 = vsub.s32 0, %v7212_v15  ;;  %v5868_v39 = vld [vmem:[%s7800_s4 + $0x1b4] ss:$12 sps:$4 sm:$0xff]   ;;  %v2603_v40 = vadd.f32 %v7229_v4, %v2560_v57  ;;  %v5871_v4 = vld [vmem:[%s7800_s4 + $0x19c] ss:$12 sps:$4 sm:$0xff]  }
 0x16e   :  { %v5927_v34 = vld [vmem:[%s7800_s4 + $0x360] ss:$12 sps:$4 sm:$0xff]   ;;  %v5945_v57 = vld [vmem:[%s7800_s4 + $0x304] ss:$12 sps:$4 sm:$0xff]  }
 0x16f   :  { %v3111_v55 = vmax.f32 %v3101_v53, 0.0  ;;  %5230 = vmatpush3.bf16.msra.mxu0 %v5810_v49  ;;  %v2564_v41 = vadd.f32 %v7223_v22, %v2521_v31  ;;  %v5844_v22 = vld [vmem:[%s7800_s4 + $0xf4] ss:$12 sps:$4 sm:$0xff]   ;;  %v3036_v42 = vrot.slane %v7234_v25, %v7388_v10  ;;  %v3073_v45 = vrot.slane %v7257_v33, %v7388_v10  ;;  %v5869_v49 = vld [vmem:[%s7800_s4 + $0x198] ss:$12 sps:$4 sm:$0xff]  }
 0x170   :  { %3927 = vmatpush1.bf16.msra.mxu1 %v5807_v47  ;;  %5231 = vmatprep.subr.bf16.mxu0 %v5997_v23  ;;  %v5845_v47 = vld [vmem:[%s7800_s4 + $0xd8] ss:$12 sps:$4 sm:$0xff]   ;;  %v5931_v31 = vld [vmem:[%s7800_s4 + $0x348] ss:$12 sps:$4 sm:$0xff]  }
 0x171   :  { %3928 = vmatprep.subr.bf16.mxu1 %v5813_v51  ;;  %v7290_v50 = vpack.c.bf16 %v3111_v55, %v3106_v54  ;;  %v2607_v37 = vadd.f32 %v7259_v35, %v2564_v41  ;;  %v5866_v35 = vld [vmem:[%s7800_s4 + $0x1b0] ss:$12 sps:$4 sm:$0xff]   ;;  %v3058_v44 = vmul.f32 %v3036_v42, %v2603_v40  ;;  %v5937_v60 = vld [vmem:[%s7800_s4 + $0x334] ss:$12 sps:$4 sm:$0xff]  }
 0x172   :  { %v5850_v53 = vld [vmem:[%s7800_s4 + $0xc4] ss:$12 sps:$4 sm:$0xff]   ;;  %v5941_v41 = vld [vmem:[%s7800_s4 + $0x31c] ss:$12 sps:$4 sm:$0xff]  }
 0x173   :  { %5232 = vmatpush3.bf16.msra.mxu0 %v5814_v59  ;;  %3952 = vmatprep.mubr.bf16.mxu1 %v7290_v50  ;;  %v3063_v61 = vmul.f32 %v3036_v42, %v2607_v37  ;;  %v5874_v54 = vld [vmem:[%s7800_s4 + $0x184] ss:$12 sps:$4 sm:$0xff]   ;;  %v3095_v55 = vadd.f32 %v3073_v45, %v3058_v44  ;;  %v5872_v59 = vld [vmem:[%s7800_s4 + $0x180] ss:$12 sps:$4 sm:$0xff]  }
 0x174   :  { %3929 = vmatpush1.bf16.msra.mxu1 %v5811_v56  ;;  %5233 = vmatprep.subr.bf16.mxu0 %v5997_v23  ;;  %v5848_v56 = vld [vmem:[%s7800_s4 + $0xc0] ss:$12 sps:$4 sm:$0xff]  }
 0x175   :  { %3930 = vmatprep.subr.bf16.mxu1 %v5817_v62  ;;  %v3100_v51 = vadd.f32 %v3073_v45, %v3063_v61  ;;  %v5943_v37 = vld [vmem:[%s7800_s4 + $0x300] ss:$12 sps:$4 sm:$0xff]  }
 0x177   :  { %5234 = vmatpush3.bf16.msra.mxu0 %v5818_v1  ;;  %v3110_v62 = vmax.f32 %v3100_v51, 0.0  ;;  %v3105_v1 = vmax.f32 %v3095_v55, 0.0 }
 0x178   :  { %3931 = vmatpush1.bf16.msra.mxu1 %v5815_v0  ;;  %5235 = vmatprep.subr.bf16.mxu0 %v5997_v23  ;;  %v5877_v0 = vld [vmem:[%s7800_s4 + $0x2ec] ss:$12 sps:$4 sm:$0xff]  }
 0x179   :  { %3932 = vmatprep.subr.bf16.mxu1 %v5821_v46  ;;  %v5875_v46 = vld [vmem:[%s7800_s4 + $0x2e8] ss:$12 sps:$4 sm:$0xff]  }
 0x17b   :  { %5236 = vmatpush3.bf16.msra.mxu0 %v5822_v5  ;;  %v5880_v5 = vld [vmem:[%s7800_s4 + $0x2d4] ss:$12 sps:$4 sm:$0xff]  }
 0x17c   :  { %3933 = vmatpush1.bf16.msra.mxu1 %v5819_v2  ;;  %5237 = vmatprep.subr.bf16.mxu0 %v5997_v23  ;;  %v7445_v2 = vpack.c.bf16 %v3110_v62, %v3105_v1 }
 0x17d   :  { %3934 = vmatprep.subr.bf16.mxu1 %v5825_v6  ;;  %v5878_v6 = vld [vmem:[%s7800_s4 + $0x2d0] ss:$12 sps:$4 sm:$0xff]  }
 0x17f   :  { %5238 = vmatpush3.bf16.msra.mxu0 %v5826_v8  ;;  %v5881_v8 = vld [vmem:[%s7800_s4 + $0x2b8] ss:$12 sps:$4 sm:$0xff]  }
 0x180   :  { %3935 = vmatpush1.bf16.msra.mxu1 %v5823_v7  ;;  %3963 = vmatprep.subr.bf16.mxu0 %v5853_v12  ;;  %v5883_v7 = vld [vmem:[%s7800_s4 + $0x2bc] ss:$12 sps:$4 sm:$0xff]  }
 0x181   :  { %3936 = vmatprep.subr.bf16.mxu1 %v5829_v9  ;;  %v5886_v9 = vld [vmem:[%s7800_s4 + $0x2a4] ss:$12 sps:$4 sm:$0xff]   ;;  %v5915_v12 = vld [vmem:[%s7800_s4 + $0x3a8] ss:$12 sps:$4 sm:$0xff]  }
 0x182   :  { %5240 = vmatmul.mubr.bf16.vlgmr.msra.gmra.mxu0 %v5995_v18  ;;  %v5887_v18 = vld [vmem:[%s7800_s4 + $0x288] ss:$12 sps:$4 sm:$0xff]  }
 0x183   :  { %3964 = vmatpush1.bf16.msra.mxu0 %v5851_v14  ;;  %v5889_v14 = vld [vmem:[%s7800_s4 + $0x28c] ss:$12 sps:$4 sm:$0xff]  }
 0x184   :  { %3937 = vmatpush2.bf16.msra.mxu1 %v5827_v13  ;;  %3965 = vmatprep.subr.bf16.mxu0 %v5856_v17  ;;  %v5917_v13 = vld [vmem:[%s7800_s4 + $0x3ac] ss:$12 sps:$4 sm:$0xff]   ;;  %v5919_v17 = vld [vmem:[%s7800_s4 + $0x390] ss:$12 sps:$4 sm:$0xff]  }
 0x185   :  { %3938 = vmatprep.subr.bf16.mxu1 %v5832_v16  ;;  %v5921_v16 = vld [vmem:[%s7800_s4 + $0x394] ss:$12 sps:$4 sm:$0xff]  }
 0x187   :  { %3966 = vmatpush1.bf16.msra.mxu0 %v5854_v24  ;;  %v5892_v24 = vld [vmem:[%s7800_s4 + $0x274] ss:$12 sps:$4 sm:$0xff]  }
 0x188   :  { %3939 = vmatpush2.bf16.msra.mxu1 %v5830_v20  ;;  %3967 = vmatprep.subr.bf16.mxu0 %v5859_v26  ;;  %v5925_v20 = vld [vmem:[%s7800_s4 + $0x37c] ss:$12 sps:$4 sm:$0xff]  }
 0x189   :  { %3940 = vmatprep.subr.bf16.mxu1 %v5835_v48  ;;  %v5923_v48 = vld [vmem:[%s7800_s4 + $0x378] ss:$12 sps:$4 sm:$0xff]   ;;  %v5890_v26 = vld [vmem:[%s7800_s4 + $0x270] ss:$12 sps:$4 sm:$0xff]  }
 0x18b   :  { %3968 = vmatpush1.bf16.msra.mxu0 %v5857_v28  ;;  %v5895_v28 = vld [vmem:[%s7800_s4 + $0x25c] ss:$12 sps:$4 sm:$0xff]  }
 0x18c   :  { %3941 = vmatpush2.bf16.msra.mxu1 %v5833_v27  ;;  %3969 = vmatprep.subr.bf16.mxu0 %v5862_v29  ;;  %v5929_v27 = vld [vmem:[%s7800_s4 + $0x364] ss:$12 sps:$4 sm:$0xff]   ;;  %v5933_v29 = vld [vmem:[%s7800_s4 + $0x34c] ss:$12 sps:$4 sm:$0xff]  }
 0x18d   :  { %3942 = vmatprep.subr.bf16.mxu1 %v5838_v11  ;;  %v5893_v11 = vld [vmem:[%s7800_s4 + $0x258] ss:$12 sps:$4 sm:$0xff]  }
 0x18f   :  { %3970 = vmatpush1.bf16.msra.mxu0 %v5860_v58  ;;  %v5899_v58 = vld [vmem:[%s7800_s4 + $0x170] ss:$12 sps:$4 sm:$0xff]  }
 0x190   :  { %3943 = vmatpush2.bf16.msra.mxu1 %v5836_v52  ;;  %3971 = vmatprep.subr.bf16.mxu0 %v5865_v38  ;;  %v5896_v52 = vld [vmem:[%s7800_s4 + $0x240] ss:$12 sps:$4 sm:$0xff]   ;;  %v2645_v38 = vpop.f32.mrf.mxu1 }
 0x191   :  { %3944 = vmatprep.subr.bf16.mxu1 %v5841_v32  ;;  %v5935_v32 = vld [vmem:[%s7800_s4 + $0x330] ss:$12 sps:$4 sm:$0xff]  }
 0x193   :  { %3972 = vmatpush1.bf16.msra.mxu0 %v5863_v36  ;;  %v2647_v36 = vpop.f32.mrf.mxu1 }
 0x194   :  { %3945 = vmatpush2.bf16.msra.mxu1 %v5839_v63  ;;  %3973 = vmatprep.subr.bf16.mxu0 %v5868_v39  ;;  %v5939_v63 = vld [vmem:[%s7800_s4 + $0x318] ss:$12 sps:$4 sm:$0xff]   ;;  %v5947_v39 = vld [vmem:[%s7800_s4 + $0x2f0] ss:$12 sps:$4 sm:$0xff]  }
 0x195   :  { %3946 = vmatprep.subr.bf16.mxu1 %v5844_v22  ;;  %v2649_v22 = vpop.f32.mrf.mxu1 }
 0x197   :  { %3974 = vmatpush1.bf16.msra.mxu0 %v5866_v35  ;;  %v2651_v40 = vpop.f32.mrf.mxu1 }
 0x198   :  { %3947 = vmatpush2.bf16.msra.mxu1 %v5842_v3  ;;  %3975 = vmatprep.subr.bf16.mxu0 %v5871_v4 }
 0x199   :  { %3948 = vmatprep.subr.bf16.mxu1 %v5847_v43 }
 0x19b   :  { %3976 = vmatpush1.bf16.msra.mxu0 %v5869_v49 }
 0x19c   :  { %3949 = vmatpush2.bf16.msra.mxu1 %v5845_v47  ;;  %3977 = vmatprep.subr.bf16.mxu0 %v5874_v54 }
 0x19d   :  { %3950 = vmatprep.subr.bf16.mxu1 %v5850_v53  ;;  %v3047_v53 = vsub.s32 3, %v7212_v15 }
 0x19f   :  { %3978 = vmatpush1.bf16.msra.mxu0 %v5872_v59 }
 0x1a0   :  { %3951 = vmatpush2.bf16.msra.mxu1 %v5848_v56  ;;  %3979 = vmatprep.subr.bf16.mxu0 %v5877_v0  ;;  %v7547_v56 = vsub.s32 2, %v7212_v15 }
 0x1a1   :  { %4006 = vmatprep.subr.bf16.mxu1 %v5917_v13 }
 0x1a2   :  { %v2688_v42 = vpop.f32.mrf.mxu0 }
 0x1a3   :  { %3953 = vmatmul.mubr.bf16.vlgmr.msra.gmra.mxu1 %v7445_v2  ;;  %3980 = vmatpush2.bf16.msra.mxu0 %v5875_v46  ;;  %v2689_v44 = vadd.f32 %v2688_v42, %v2645_v38  ;;  %v5904_v42 = vld [vmem:[%s7800_s4 + $0x80] ss:$12 sps:$4 sm:$0xff]  }
 0x1a4   :  { %4038 = vmatprep.mubr.bf16.mxu1 %v5996_v21  ;;  %3981 = vmatprep.subr.bf16.mxu0 %v5880_v5  ;;  %v5884_v21 = vld [vmem:[%s7800_s4 + $0x2a0] ss:$12 sps:$4 sm:$0xff]   ;;  %v2690_v35 = vpop.f32.mrf.mxu0 }
 0x1a5   :  { %4007 = vmatpush1.bf16.msra.mxu1 %v5915_v12  ;;  %v2691_v49 = vadd.f32 %v2690_v35, %v2647_v36  ;;  %v5907_v35 = vld [vmem:[%s7800_s4 + $0x110] ss:$12 sps:$4 sm:$0xff]  }
 0x1a6   :  { %4008 = vmatprep.subr.bf16.mxu1 %v5921_v16  ;;  %v2692_v43 = vpop.f32.mrf.mxu0 }
 0x1a7   :  { %3982 = vmatpush2.bf16.msra.mxu0 %v5878_v6  ;;  %v2693_v59 = vadd.f32 %v2692_v43, %v2649_v22  ;;  %v5901_v22 = vld [vmem:[%s7800_s4 + $0x158] ss:$12 sps:$4 sm:$0xff]  }
 0x1a8   :  { %3983 = vmatprep.subr.bf16.mxu0 %v5883_v7  ;;  %v2694_v45 = vpop.f32.mrf.mxu0  ;;  %v5909_v43 = vld [vmem:[%s7800_s4 + $0xf8] ss:$12 sps:$4 sm:$0xff]  }
 0x1a9   :  { %4009 = vmatpush1.bf16.msra.mxu1 %v5919_v17  ;;  %v2695_v5 = vadd.f32 %v2694_v45, %v2651_v40  ;;  %v5903_v40 = vld [vmem:[%s7800_s4 + $0x140] ss:$12 sps:$4 sm:$0xff]  }
 0x1aa   :  { %4010 = vmatprep.subr.bf16.mxu1 %v5925_v20  ;;  %v5912_v45 = vld [vmem:[%s7800_s4 + $0x20] ss:$12 sps:$4 sm:$0xff]  }
 0x1ab   :  { %3984 = vmatpush2.bf16.msra.mxu0 %v5881_v8  ;;  %v3048_v8 = vrot.slane %v7234_v25, %v3047_v53 }
 0x1ac   :  { %3985 = vmatprep.subr.bf16.mxu0 %v5886_v9 }
 0x1ad   :  { %4011 = vmatpush1.bf16.msra.mxu1 %v5923_v48  ;;  %v3085_v48 = vrot.slane %v7257_v33, %v3047_v53  ;;  %v5922_v53 = vld [vmem:[%s7800_s4 + $0x398] ss:$12 sps:$4 sm:$0xff]  }
 0x1ae   :  { %4012 = vmatprep.subr.bf16.mxu1 %v5929_v27 }
 0x1af   :  { %3986 = vmatpush2.bf16.msra.mxu0 %v5884_v21  ;;  %v3044_v21 = vrot.slane %v7234_v25, %v7547_v56 }
 0x1b0   :  { %3987 = vmatprep.subr.bf16.mxu0 %v5889_v14 }
 0x1b1   :  { %4013 = vmatpush1.bf16.msra.mxu1 %v5927_v34  ;;  %v3081_v34 = vrot.slane %v7257_v33, %v7547_v56 }
 0x1b2   :  { %4014 = vmatprep.subr.bf16.mxu1 %v5933_v29 }
 0x1b3   :  { %3988 = vmatpush2.bf16.msra.mxu0 %v5887_v18 }
 0x1b4   :  { %3989 = vmatprep.subr.bf16.mxu0 %v5892_v24 }
 0x1b5   :  { %4015 = vmatpush1.bf16.msra.mxu1 %v5931_v31 }
 0x1b6   :  { %4016 = vmatprep.subr.bf16.mxu1 %v5937_v60 }
 0x1b7   :  { %3990 = vmatpush2.bf16.msra.mxu0 %v5890_v26 }
 0x1b8   :  { %3991 = vmatprep.subr.bf16.mxu0 %v5895_v28 }
 0x1b9   :  { %4017 = vmatpush1.bf16.msra.mxu1 %v5935_v32 }
 0x1ba   :  { %4018 = vmatprep.subr.bf16.mxu1 %v5941_v41 }
 0x1bb   :  { %3992 = vmatpush2.bf16.msra.mxu0 %v5893_v11 }
 0x1bc   :  { %3993 = vmatprep.subr.bf16.mxu0 %v5898_v30 }
 0x1bd   :  { %4019 = vmatpush1.bf16.msra.mxu1 %v5939_v63 }
 0x1be   :  { %4020 = vmatprep.subr.bf16.mxu1 %v5945_v57  ;;  %v5900_v57 = vld [vmem:[%s7800_s4 + $0xb0] ss:$12 sps:$4 sm:$0xff]  }
 0x1bf   :  { %3994 = vmatpush2.bf16.msra.mxu0 %v5896_v52 }
 0x1c0   :  { %5139 = vmatprep.subr.bf16.mxu0 %v5899_v58 }
 0x1c1   :  { %4021 = vmatpush1.bf16.msra.mxu1 %v5943_v37 }
 0x1c2   :  { %5161 = vmatprep.subr.bf16.mxu1 %v5947_v39  ;;  %v5902_v39 = vld [vmem:[%s7800_s4 + $0x98] ss:$12 sps:$4 sm:$0xff]  }
 0x1c3   :  { %v2731_v3 = vpop.f32.mrf.mxu1 }
 0x1c4   :  { %v2732_v51 = vadd.f32 %v2731_v3, %v2689_v44  ;;  %v5905_v3 = vld [vmem:[%s7800_s4 + $0x128] ss:$12 sps:$4 sm:$0xff]   ;;  %v5911_v44 = vld [vmem:[%s7800_s4 + $0xe0] ss:$12 sps:$4 sm:$0xff]  }
 0x1c5   :  { %v2733_v61 = vpop.f32.mrf.mxu1 }
 0x1c6   :  { %v2734_v62 = vadd.f32 %v2733_v61, %v2691_v49  ;;  %v5908_v61 = vld [vmem:[%s7800_s4 + $0x50] ss:$12 sps:$4 sm:$0xff]   ;;  %v5914_v49 = vld [vmem:[%s7800_s4 + $0x8] ss:$12 sps:$4 sm:$0xff]  }
 0x1c7   :  { %v2735_v4 = vpop.f32.mrf.mxu1 }
 0x1c8   :  { %v2736_v6 = vadd.f32 %v2735_v4, %v2693_v59  ;;  %v5910_v4 = vld [vmem:[%s7800_s4 + $0x38] ss:$12 sps:$4 sm:$0xff]   ;;  %v5934_v59 = vld [vmem:[%s7800_s4 + $0x350] ss:$12 sps:$4 sm:$0xff]  }
 0x1c9   :  { %v2737_v47 = vpop.f32.mrf.mxu1 }
 0x1ca   :  { %v2738_v14 = vadd.f32 %v2737_v47, %v2695_v5  ;;  %v5913_v47 = vld [vmem:[%s7800_s4 + $0xc8] ss:$12 sps:$4 sm:$0xff]  }
 0x1e2   :  { %v2774_v54 = vpop.f32.mrf.mxu0 }
 0x1e3   :  { %v2817_v55 = vpop.f32.mrf.mxu1  ;;  %v2775_v0 = vadd.f32 %v2774_v54, %v2732_v51  ;;  %v5918_v51 = vld [vmem:[%s7800_s4 + $0x3b0] ss:$12 sps:$4 sm:$0xff]   ;;  %v5926_v54 = vld [vmem:[%s7800_s4 + $0x380] ss:$12 sps:$4 sm:$0xff]  }
 0x1e4   :  { %v2776_v1 = vpop.f32.mrf.mxu0 }
 0x1e5   :  { %v2819_v46 = vpop.f32.mrf.mxu1  ;;  %v2777_v7 = vadd.f32 %v2776_v1, %v2734_v62  ;;  %v2818_v9 = vadd.f32 %v2817_v55, %v2775_v0  ;;  %v5938_v1 = vld [vmem:[%s7800_s4 + $0x338] ss:$12 sps:$4 sm:$0xff]  }
 0x1e6   :  { %v2778_v12 = vpop.f32.mrf.mxu0 }
 0x1e7   :  { %v2821_v13 = vpop.f32.mrf.mxu1  ;;  %v2779_v16 = vadd.f32 %v2778_v12, %v2736_v6  ;;  %v2820_v17 = vadd.f32 %v2819_v46, %v2777_v7  ;;  %v3060_v28 = vmul.f32 %v3044_v21, %v2818_v9  ;;  %v5942_v6 = vld [vmem:[%s7800_s4 + $0x320] ss:$12 sps:$4 sm:$0xff]  }
 0x1e8   :  { %v2780_v18 = vpop.f32.mrf.mxu0 }
 0x1e9   :  { %v2823_v20 = vpop.f32.mrf.mxu1  ;;  %v3061_v24 = vmul.f32 %v3048_v8, %v2820_v17  ;;  %v2781_v26 = vadd.f32 %v2780_v18, %v2738_v14  ;;  %v2822_v27 = vadd.f32 %v2821_v13, %v2779_v16  ;;  %v3097_v58 = vadd.f32 %v3081_v34, %v3060_v28 }
 0x1eb   :  { %v3065_v11 = vmul.f32 %v3044_v21, %v2822_v27  ;;  %v2824_v29 = vadd.f32 %v2823_v20, %v2781_v26  ;;  %v3098_v30 = vadd.f32 %v3085_v48, %v3061_v24  ;;  %v3107_v63 = vmax.f32 %v3097_v58, 0.0  ;;  %v5946_v21 = vld [vmem:[%s7800_s4 + $0x308] ss:$12 sps:$4 sm:$0xff]  }
 0x1ed   :  { %v3102_v31 = vadd.f32 %v3081_v34, %v3065_v11  ;;  %v3066_v52 = vmul.f32 %v3048_v8, %v2824_v29  ;;  %v3108_v38 = vmax.f32 %v3098_v30, 0.0 }
 0x1ef   :  { %v3103_v60 = vadd.f32 %v3085_v48, %v3066_v52  ;;  %v3112_v32 = vmax.f32 %v3102_v31, 0.0  ;;  %v3051_v31 = vsub.s32 4, %v7212_v15 }
 0x1f1   :  { %v3113_v41 = vmax.f32 %v3103_v60, 0.0  ;;  %v7560_v37 = vpack.c.bf16 %v3112_v32, %v3107_v63 }
 0x1f3   :  { %v7555_v36 = vpack.c.bf16 %v3113_v41, %v3108_v38  ;;  %v3052_v41 = vrot.slane %v7234_v25, %v3051_v31 }
 0x1f5   :  { %3995 = vmatprep.mubr.bf16.mxu0 %v7555_v36 }
 0x1f6   :  { %3996 = vmatmul.mubr.bf16.vlgmr.msra.gmra.mxu0 %v7560_v37 }
 0x1f7   :  { %5140 = vmatpush3.bf16.msra.mxu0 %v5900_v57  ;;  %4081 = vmatprep.mubr.bf16.mxu0 %v7290_v50  ;;  %v5906_v50 = vld [vmem:[%s7800_s4 + $0x68] ss:$12 sps:$4 sm:$0xff]  }
 0x1f8   :  { %5141 = vmatprep.subr.bf16.mxu0 %v5901_v22 }
 0x1fb   :  { %5142 = vmatpush3.bf16.msra.mxu0 %v5902_v39 }
 0x1fc   :  { %5143 = vmatprep.subr.bf16.mxu0 %v5903_v40  ;;  %v3089_v40 = vrot.slane %v7257_v33, %v3051_v31  ;;  %v5950_v33 = vld [vmem:[%s7800_s4 + $0x218] ss:$12 sps:$4 sm:$0xff]  }
 0x1fd   :  { %v5986_v31 = vld [vmem:[%s7803_s7 + $0x80] sm:$0xff]  }
 0x1ff   :  { %5144 = vmatpush3.bf16.msra.mxu0 %v5904_v42 }
 0x200   :  { %5145 = vmatprep.subr.bf16.mxu0 %v5905_v3 }
 0x202   :  { %v5058_v55 = vpop.f32.mrf.mxu0 }
 0x203   :  { %5146 = vmatpush3.bf16.msra.mxu0 %v5906_v50  ;;  %v5080_v62 = vpop.f32.mrf.mxu1 }
 0x204   :  { %5147 = vmatprep.subr.bf16.mxu0 %v5907_v35  ;;  %v5059_v0 = vpop.f32.mrf.mxu0 }
 0x205   :  { %v5081_v46 = vpop.f32.mrf.mxu1  ;;  %v5060_v18 = vadd.f32 %v5059_v0, %v5058_v55  ;;  %v5957_v55 = vld [vmem:[%s7800_s4 + $0x278] ss:$12 sps:$4 sm:$0xff]   ;;  %v5960_v0 = vld [vmem:[%s7800_s4 + $0x1a0] ss:$12 sps:$4 sm:$0xff]  }
 0x206   :  { %v5061_v5 = vpop.f32.mrf.mxu0  ;;  %v5082_v20 = vadd.f32 %v5081_v46, %v5080_v62  ;;  %v5959_v62 = vld [vmem:[%s7800_s4 + $0x260] ss:$12 sps:$4 sm:$0xff]   ;;  %v5962_v46 = vld [vmem:[%s7800_s4 + $0x188] ss:$12 sps:$4 sm:$0xff]  }
 0x207   :  { %5148 = vmatpush3.bf16.msra.mxu0 %v5908_v61  ;;  %v5083_v7 = vpop.f32.mrf.mxu1 }
 0x208   :  { %5149 = vmatprep.subr.bf16.mxu0 %v5909_v43  ;;  %v5062_v8 = vpop.f32.mrf.mxu0  ;;  %v2902_v27 = vadd.f32 %v5082_v20, %v5060_v18  ;;  %v5975_v18 = vld [vmem:[%s7803_s7 + $0x48] sm:$0xff]  }
 0x209   :  { %v5084_v12 = vpop.f32.mrf.mxu1  ;;  %v5063_v28 = vadd.f32 %v5062_v8, %v5061_v5  ;;  %v5963_v5 = vld [vmem:[%s7803_s7 + $0x78] sm:$0xff]   ;;  %v5966_v8 = vld [vmem:[%s7803_s7 + $0x30] sm:$0xff]   ;;  %v5976_v20 = vld [vmem:[%s7803_s7 + $0x8] sm:$0xff]  }
 0x20a   :  { %v5085_v34 = vadd.f32 %v5084_v12, %v5083_v7  ;;  %v5965_v7 = vld [vmem:[%s7803_s7 + $0x70] sm:$0xff]   ;;  %v5970_v12 = vld [vmem:[%s7803_s7 + $0x20] sm:$0xff]  }
 0x20b   :  { %5150 = vmatpush3.bf16.msra.mxu0 %v5910_v4 }
 0x20c   :  { %5151 = vmatprep.subr.bf16.mxu0 %v5911_v44  ;;  %v2905_v58 = vadd.f32 %v5085_v34, %v5063_v28  ;;  %v5981_v28 = vld [vmem:[%s7803_s7 + $0xa8] sm:$0xff]   ;;  %v5982_v34 = vld [vmem:[%s7803_s7 + $0xa0] sm:$0xff]  }
 0x20f   :  { %5152 = vmatpush3.bf16.msra.mxu0 %v5912_v45  ;;  %v5948_v45 = vld [vmem:[%s7800_s4 + $0x230] ss:$12 sps:$4 sm:$0xff]  }
 0x210   :  { %5153 = vmatprep.subr.bf16.mxu0 %v5913_v47  ;;  %v5949_v47 = vld [vmem:[%s7800_s4 + $0x2d8] ss:$12 sps:$4 sm:$0xff]  }
 0x213   :  { %5154 = vmatpush3.bf16.msra.mxu0 %v5914_v49  ;;  %v5951_v49 = vld [vmem:[%s7800_s4 + $0x2c0] ss:$12 sps:$4 sm:$0xff]  }
 0x214   :  { %5243 = vmatprep.subr.bf16.mxu0 %v5997_v23 }
 0x216   :  { %4082 = vmatmul.mubr.bf16.vlgmr.msra.gmra.mxu0 %v7445_v2  ;;  %v5930_v2 = vld [vmem:[%s7800_s4 + $0x368] ss:$12 sps:$4 sm:$0xff]  }
 0x217   :  { %5244 = vmatpush3.bf16.msra.mxu0 %v5918_v51  ;;  %5259 = vmatprep.mubr.msk.bf16.mxu0 %vm5998_vm0, %v5997_v23  ;;  %v5952_v51 = vld [vmem:[%s7800_s4 + $0x200] ss:$12 sps:$4 sm:$0xff]  }
 0x218   :  { %5245 = vmatprep.subr.bf16.mxu0 %v5997_v23 }
 0x21b   :  { %5246 = vmatpush3.bf16.msra.mxu0 %v5922_v53  ;;  %v5954_v53 = vld [vmem:[%s7800_s4 + $0x1e8] ss:$12 sps:$4 sm:$0xff]  }
 0x21c   :  { %5247 = vmatprep.subr.bf16.mxu0 %v5997_v23 }
 0x21f   :  { %5248 = vmatpush3.bf16.msra.mxu0 %v5926_v54  ;;  %v5955_v54 = vld [vmem:[%s7800_s4 + $0x290] ss:$12 sps:$4 sm:$0xff]  }
 0x220   :  { %5249 = vmatprep.subr.bf16.mxu0 %v5997_v23 }
 0x222   :  { %v5102_v9 = vpop.f32.mrf.mxu0 }
 0x223   :  { %5250 = vmatpush3.bf16.msra.mxu0 %v5930_v2  ;;  %v5124_v14 = vpop.f32.mrf.mxu1  ;;  %v5956_v2 = vld [vmem:[%s7800_s4 + $0x1d0] ss:$12 sps:$4 sm:$0xff]  }
 0x224   :  { %5251 = vmatprep.subr.bf16.mxu0 %v5997_v23  ;;  %v5103_v13 = vpop.f32.mrf.mxu0 }
 0x225   :  { %v5125_v17 = vpop.f32.mrf.mxu1  ;;  %v5104_v24 = vadd.f32 %v5103_v13, %v5102_v9  ;;  %v5967_v9 = vld [vmem:[%s7803_s7 + $0x68] sm:$0xff]   ;;  %v5971_v13 = vld [vmem:[%s7803_s7 + $0x58] sm:$0xff]  }
 0x226   :  { %v5105_v16 = vpop.f32.mrf.mxu0  ;;  %v5126_v29 = vadd.f32 %v5125_v17, %v5124_v14  ;;  %v5972_v14 = vld [vmem:[%s7803_s7 + $0x18] sm:$0xff]   ;;  %v5974_v17 = vld [vmem:[%s7803_s7 + $0x10] sm:$0xff]  }
 0x227   :  { %5252 = vmatpush3.bf16.msra.mxu0 %v5934_v59  ;;  %v5127_v26 = vpop.f32.mrf.mxu1  ;;  %v2943_v11 = vadd.f32 %v5104_v24, %v2902_v27  ;;  %v5958_v59 = vld [vmem:[%s7800_s4 + $0x1b8] ss:$12 sps:$4 sm:$0xff]   ;;  %v5980_v27 = vld [vmem:[%s7803_s7 + $0xb0] sm:$0xff]  }
 0x228   :  { %5253 = vmatprep.subr.bf16.mxu0 %v5997_v23  ;;  %v5106_v48 = vpop.f32.mrf.mxu0  ;;  %v5977_v24 = vld [vmem:[%s7803_s7 + $0x40] sm:$0xff]  }
 0x229   :  { %v5107_v30 = vadd.f32 %v5106_v48, %v5105_v16  ;;  %v5128_v52 = vpop.f32.mrf.mxu1  ;;  %v2984_v38 = vadd.f32 %v5126_v29, %v2943_v11  ;;  %v5973_v16 = vld [vmem:[%s7803_s7 + $0x50] sm:$0xff]   ;;  %v5978_v48 = vld [vmem:[%s7803_s7] sm:$0xff]   ;;  %v5983_v11 = vld [vmem:[%s7803_s7 + $0x98] sm:$0xff]  }
 0x22a   :  { %v5129_v32 = vadd.f32 %v5128_v52, %v5127_v26  ;;  %v5979_v26 = vld [vmem:[%s7803_s7 + $0xb8] sm:$0xff]   ;;  %v5984_v29 = vld [vmem:[%s7803_s7 + $0x90] sm:$0xff]  }
 0x22b   :  { %5254 = vmatpush3.bf16.msra.mxu0 %v5938_v1  ;;  %v2946_v60 = vadd.f32 %v5107_v30, %v2905_v58  ;;  %v5961_v1 = vld [vmem:[%s7800_s4 + $0x248] ss:$12 sps:$4 sm:$0xff]  }
 0x22c   :  { %5255 = vmatprep.subr.bf16.mxu0 %v5997_v23  ;;  %v5985_v30 = vld [vmem:[%s7803_s7 + $0x88] sm:$0xff]  }
 0x22d   :  { %v2987_v42 = vadd.f32 %v5129_v32, %v2946_v60 }
 0x22f   :  { %5256 = vmatpush3.bf16.msra.mxu0 %v5942_v6  ;;  %v5964_v6 = vld [vmem:[%s7803_s7 + $0x38] sm:$0xff]  }
 0x230   :  { %5257 = vmatprep.subr.bf16.mxu0 %v5997_v23 }
 0x233   :  { %5258 = vmatpush3.bf16.msra.mxu0 %v5946_v21  ;;  %v5968_v21 = vld [vmem:[%s7803_s7 + $0x28] sm:$0xff]  }
 0x234   :  { %5263 = vmatprep.subr.bf16.mxu0 %v5997_v23 }
 0x242   :  { %v3024_v63 = vpop.f32.mrf.mxu0 }
 0x243   :  { %v3025_v57 = vadd.f32 %v3024_v63, %v2984_v38 }
 0x244   :  { %v5241_v22 = vpop.f32.mrf.mxu0 }
 0x245   :  { %v3062_v39 = vmul.f32 %v3052_v41, %v3025_v57 }
 0x246   :  { %v3027_v3 = vpop.f32.mrf.mxu0 }
 0x247   :  { %v3028_v50 = vadd.f32 %v3027_v3, %v2987_v42  ;;  %v3099_v61 = vadd.f32 %v3089_v40, %v3062_v39 }
 0x248   :  { %v5242_v35 = vpop.f32.mrf.mxu0 }
 0x249   :  { %v3067_v43 = vmul.f32 %v3052_v41, %v3028_v50  ;;  %v3109_v4 = vmax.f32 %v3099_v61, 0.0 }
 0x24b   :  { %v3104_v15 = vadd.f32 %v3089_v40, %v3067_v43 }
 0x24d   :  { %v3114_v44 = vmax.f32 %v3104_v15, 0.0 }
 0x24f   :  { %v3119_v25 = vpack.c.bf16 %v3114_v44, %v3109_v4 }
 0x251   :  { %4039 = vmatmul.mubr.bf16.vlgmr.msra.gmra.mxu1 %v3119_v25  ;;  %5260 = vmatmul.mubr.bf16.vlgmr.msra.gmra.mxu0 %v3119_v25 }
 0x252   :  { %5162 = vmatpush3.bf16.msra.mxu1 %v5948_v45  ;;  %4122 = vmatprep.mubr.bf16.mxu1 %v7555_v36  ;;  %v5953_v36 = vld [vmem:[%s7800_s4 + $0x2a8] ss:$12 sps:$4 sm:$0xff]  }
 0x253   :  { %5163 = vmatprep.subr.bf16.mxu1 %v5949_v47  ;;  %5279 = vmatprep.mubr.msk.bf16.mxu0 %vm5998_vm0, %v5997_v23  ;;  %v4195_v47 = vld [vmem:[%s7805_s6] sm:$0x7] }
 0x254   :  { %5264 = vmatpush3.bf16.msra.mxu0 %v5979_v26 }
 0x255   :  { %5265 = vmatprep.subr.bf16.mxu0 %v5997_v23 }
 0x256   :  { %5164 = vmatpush3.bf16.msra.mxu1 %v5950_v33 }
 0x257   :  { %5165 = vmatprep.subr.bf16.mxu1 %v5951_v49 }
 0x258   :  { %5266 = vmatpush3.bf16.msra.mxu0 %v5980_v27 }
 0x259   :  { %5267 = vmatprep.subr.bf16.mxu0 %v5997_v23 }
 0x25a   :  { %5166 = vmatpush3.bf16.msra.mxu1 %v5952_v51 }
 0x25b   :  { %5167 = vmatprep.subr.bf16.mxu1 %v5953_v36 }
 0x25c   :  { %5268 = vmatpush3.bf16.msra.mxu0 %v5981_v28 }
 0x25d   :  { %5269 = vmatprep.subr.bf16.mxu0 %v5997_v23 }
 0x25e   :  { %5168 = vmatpush3.bf16.msra.mxu1 %v5954_v53 }
 0x25f   :  { %5169 = vmatprep.subr.bf16.mxu1 %v5955_v54  ;;  %v4204_v54 = vrot.slane %v4195_v47, %v7221_v19 }
 0x260   :  { %5270 = vmatpush3.bf16.msra.mxu0 %v5982_v34 }
 0x261   :  { %5271 = vmatprep.subr.bf16.mxu0 %v5997_v23 }
 0x262   :  { %5170 = vmatpush3.bf16.msra.mxu1 %v5956_v2 }
 0x263   :  { %5171 = vmatprep.subr.bf16.mxu1 %v5957_v55  ;;  %v3954_v38 = vpop.f32.mrf.mxu1 }
 0x264   :  { %5272 = vmatpush3.bf16.msra.mxu0 %v5983_v11 }
 0x265   :  { %5273 = vmatprep.subr.bf16.mxu0 %v5997_v23  ;;  %v3956_v63 = vpop.f32.mrf.mxu1 }
 0x266   :  { %5172 = vmatpush3.bf16.msra.mxu1 %v5958_v59  ;;  %v4200_v59 = vrot.slane %v4195_v47, %v7388_v10 }
 0x267   :  { %5173 = vmatprep.subr.bf16.mxu1 %v5959_v62  ;;  %v3958_v22 = vpop.f32.mrf.mxu1 }
 0x268   :  { %5274 = vmatpush3.bf16.msra.mxu0 %v5984_v29  ;;  %v4208_v29 = vrot.slane %v4195_v47, %v7547_v56 }
 0x269   :  { %5275 = vmatprep.subr.bf16.mxu0 %v5997_v23  ;;  %v3960_v40 = vpop.f32.mrf.mxu1 }
 0x26a   :  { %5174 = vmatpush3.bf16.msra.mxu1 %v5960_v0 }
 0x26b   :  { %5175 = vmatprep.subr.bf16.mxu1 %v5961_v1 }
 0x26c   :  { %5276 = vmatpush3.bf16.msra.mxu0 %v5985_v30 }
 0x26d   :  { %5277 = vmatprep.subr.bf16.mxu0 %v5997_v23  ;;  %v4172_v23 = vld [vmem:[%s7804_s5] sm:$0x7] }
 0x26e   :  { %5176 = vmatpush3.bf16.msra.mxu1 %v5962_v46  ;;  %v4181_v43 = vrot.slane %v4172_v23, %v7221_v19  ;;  %v4177_v4 = vrot.slane %v4172_v23, %v7388_v10 }
 0x26f   :  { %5192 = vmatprep.subr.bf16.mxu1 %v5963_v5 }
 0x270   :  { %5278 = vmatpush3.bf16.msra.mxu0 %v5986_v31 }
 0x271   :  { %4123 = vmatmul.mubr.bf16.vlgmr.msra.gmra.mxu1 %v7560_v37  ;;  %v5969_v37 = vld [vmem:[%s7803_s7 + $0x60] sm:$0xff]  }
 0x272   :  { %5193 = vmatpush3.bf16.msra.mxu1 %v5964_v6 }
 0x273   :  { %5194 = vmatprep.subr.bf16.mxu1 %v5965_v7 }
 0x276   :  { %5195 = vmatpush3.bf16.msra.mxu1 %v5966_v8 }
 0x277   :  { %5196 = vmatprep.subr.bf16.mxu1 %v5967_v9 }
 0x27a   :  { %5197 = vmatpush3.bf16.msra.mxu1 %v5968_v21 }
 0x27b   :  { %5198 = vmatprep.subr.bf16.mxu1 %v5969_v37 }
 0x27e   :  { %5199 = vmatpush3.bf16.msra.mxu1 %v5970_v12 }
 0x27f   :  { %5200 = vmatprep.subr.bf16.mxu1 %v5971_v13 }
 0x282   :  { %5201 = vmatpush3.bf16.msra.mxu1 %v5972_v14 }
 0x283   :  { %5202 = vmatprep.subr.bf16.mxu1 %v5973_v16 }
 0x286   :  { %5203 = vmatpush3.bf16.msra.mxu1 %v5974_v17 }
 0x287   :  { %5204 = vmatprep.subr.bf16.mxu1 %v5975_v18 }
 0x28a   :  { %5205 = vmatpush3.bf16.msra.mxu1 %v5976_v20 }
 0x28b   :  { %5206 = vmatprep.subr.bf16.mxu1 %v5977_v24 }
 0x28e   :  { %5207 = vmatpush3.bf16.msra.mxu1 %v5978_v48  ;;  %v4185_v48 = vrot.slane %v4172_v23, %v7547_v56 }
 0x2b6   :  { %v3997_v52 = vpop.f32.mrf.mxu0 }
 0x2b7   :  { %v3998_v3 = vadd.f32 %v3997_v52, %v3954_v38 }
 0x2b8   :  { %v3999_v58 = vpop.f32.mrf.mxu0 }
 0x2b9   :  { %v4000_v61 = vadd.f32 %v3999_v58, %v3956_v63 }
 0x2ba   :  { %v4001_v60 = vpop.f32.mrf.mxu0 }
 0x2bb   :  { %v4002_v25 = vadd.f32 %v4001_v60, %v3958_v22 }
 0x2bc   :  { %v4003_v32 = vpop.f32.mrf.mxu0 }
 0x2bd   :  { %v4004_v36 = vadd.f32 %v4003_v32, %v3960_v40 }
 0x2d6   :  { %v5155_v41 = vpop.f32.mrf.mxu0 }
 0x2d8   :  { %v5156_v57 = vpop.f32.mrf.mxu0 }
 0x2d9   :  { %v5157_v10 = vadd.f32 %v5156_v57, %v5155_v41 }
 0x2da   :  { %v5158_v39 = vpop.f32.mrf.mxu0 }
 0x2dc   :  { %v5159_v42 = vpop.f32.mrf.mxu0 }
 0x2dd   :  { %v5160_v27 = vadd.f32 %v5159_v42, %v5158_v39  ;;  %v5040_v42 = vld [vmem:[%s7806_s8] ss:$0 sm:$0xff] }
 0x311   :  { %v4040_v50 = vpop.f32.mrf.mxu1  ;;  %v4165_v35 = vpop.f32.mrf.mxu0 }
 0x312   :  { %v4041_v15 = vadd.f32 %v4040_v50, %v3998_v3  ;;  %v5041_v3 = vld [vmem:[%s7807_s9] ss:$0 sm:$0xff] }
 0x313   :  { %v4042_v44 = vpop.f32.mrf.mxu1  ;;  %v5261_v45 = vpop.f32.mrf.mxu0 }
 0x314   :  { %v4043_v33 = vadd.f32 %v4042_v44, %v4000_v61  ;;  %v4189_v55 = vmul.f32 %v4177_v4, %v4041_v15 }
 0x315   :  { %v4044_v49 = vpop.f32.mrf.mxu1  ;;  %v4168_v51 = vpop.f32.mrf.mxu0 }
 0x316   :  { %v4190_v53 = vmul.f32 %v4181_v43, %v4043_v33  ;;  %v4045_v2 = vadd.f32 %v4044_v49, %v4002_v25  ;;  %v4212_v8 = vadd.f32 %v4200_v59, %v4189_v55 }
 0x317   :  { %v4046_v62 = vpop.f32.mrf.mxu1  ;;  %v5262_v0 = vpop.f32.mrf.mxu0 }
 0x318   :  { %v4192_v1 = vmul.f32 %v4177_v4, %v4045_v2  ;;  %v4047_v46 = vadd.f32 %v4046_v62, %v4004_v36  ;;  %v4213_v5 = vadd.f32 %v4204_v54, %v4190_v53  ;;  %v4218_v13 = vmax.f32 %v4212_v8, 0.0 }
 0x31a   :  { %v4215_v6 = vadd.f32 %v4200_v59, %v4192_v1  ;;  %v4193_v7 = vmul.f32 %v4181_v43, %v4047_v46  ;;  %v4219_v37 = vmax.f32 %v4213_v5, 0.0 }
 0x31c   :  { %v4216_v9 = vadd.f32 %v4204_v54, %v4193_v7  ;;  %v4221_v21 = vmax.f32 %v4215_v6, 0.0 }
 0x31e   :  { %v4222_v12 = vmax.f32 %v4216_v9, 0.0  ;;  %v4224_v16 = vpack.c.bf16 %v4221_v21, %v4218_v13 }
 0x320   :  { %v4225_v14 = vpack.c.bf16 %v4222_v12, %v4219_v37 }
 0x322   :  { %4451 = vmatprep.mubr.bf16.mxu1 %v4225_v14 }
 0x323   :  { %4452 = vmatmul.mubr.bf16.vlgmr.msra.gmra.mxu1 %v4224_v16 }
 0x331   :  { %v5177_v19 = vpop.f32.mrf.mxu1 }
 0x333   :  { %v5178_v17 = vpop.f32.mrf.mxu1 }
 0x334   :  { %v5179_v18 = vadd.f32 %v5178_v17, %v5177_v19 }
 0x335   :  { %v5180_v20 = vpop.f32.mrf.mxu1 }
 0x336   :  { %v4125_v24 = vadd.f32 %v5179_v18, %v5157_v10 }
 0x337   :  { %v5181_v26 = vpop.f32.mrf.mxu1 }
 0x338   :  { %v4166_v28 = vadd.f32 %v4165_v35, %v4125_v24  ;;  %v5182_v34 = vadd.f32 %v5181_v26, %v5180_v20 }
 0x33a   :  { %v4191_v11 = vmul.f32 %v4185_v48, %v4166_v28  ;;  %v4128_v30 = vadd.f32 %v5182_v34, %v5160_v27 }
 0x33c   :  { %v4169_v31 = vadd.f32 %v4168_v51, %v4128_v30  ;;  %v4214_v52 = vadd.f32 %v4208_v29, %v4191_v11 }
 0x33e   :  { %v4194_v58 = vmul.f32 %v4185_v48, %v4169_v31  ;;  %v4220_v32 = vmax.f32 %v4214_v52, 0.0 }
 0x340   :  { %v4217_v60 = vadd.f32 %v4208_v29, %v4194_v58 }
 0x342   :  { %v4223_v38 = vmax.f32 %v4217_v60, 0.0 }
 0x344   :  { %v4226_v41 = vpack.c.bf16 %v4223_v38, %v4220_v32 }
 0x346   :  { %5280 = vmatmul.mubr.bf16.vlgmr.msra.gmra.mxu0 %v4226_v41 }
 0x3e3   :  { %v5208_v63 = vpop.f32.mrf.mxu1 }
 0x3e5   :  { %v5209_v57 = vpop.f32.mrf.mxu1 }
 0x3e6   :  { %v5210_v40 = vadd.f32 %v5209_v57, %v5208_v63 }
 0x3e7   :  { %v5211_v22 = vpop.f32.mrf.mxu1 }
 0x3e9   :  { %v5212_v23 = vpop.f32.mrf.mxu1 }
 0x3ea   :  { %v5213_v35 = vadd.f32 %v5212_v23, %v5211_v22 }
 0x406   :  { %v4494_v39 = vpop.f32.mrf.mxu0 }
 0x407   :  { %v4495_v56 = vadd.f32 %v5210_v40, %v4494_v39 }
 0x408   :  { %v5281_v50 = vpop.f32.mrf.mxu0 }
 0x409   :  { %v4508_v61 = vmul.f32 %v5040_v42, %v4495_v56 }
 0x40a   :  { %v4497_v43 = vpop.f32.mrf.mxu0 }
 0x40b   :  { %v4517_v15 = vadd.f32 %v5041_v3, %v4508_v61  ;;  %v4498_v4 = vadd.f32 %v5213_v35, %v4497_v43 }
 0x40c   :  { %v5282_v44 = vpop.f32.mrf.mxu0 }
 0x40d   :  { %v4519_v45 = vmax.f32 %v4517_v15, 0.0  ;;  %v4509_v25 = vmul.f32 %v5040_v42, %v4498_v4 }
 0x40f   :  { %4521 = vst [vmem:[%s7808_s10] sm:$0xff] %v4519_v45  ;;  %v4518_v47 = vadd.f32 %v5041_v3, %v4509_v25 }
 0x411   :  { %v4520_v33 = vmax.f32 %v4518_v47, 0.0 }
 0x413   :  { %4522 = vst [vmem:[%s7808_s10 + $0x8] sm:$0xff] %v4520_v33 }

</bundles_post_ra>
